<compile_context>
chip_gen: v7x
topology: tpu7x:2x2x1
jax: 0.10.0
libtpu: 0.0.40
codegen_flags: <defaults>
</compile_context>

<pallas_src>
import functools

import jax
import jax.numpy as jnp
import numpy as np
from jax import lax
from jax.experimental import pallas as pl
from jax.experimental.pallas import tpu as pltpu


_LRELU_SLOPE = 0.01            # F.leaky_relu default slope (assumed for `lrelu`)

# (KH, KW, Cin, Cout, pad_h) for conv1..conv4 — mirrors CNN2d.__init__
_CONV_DEFS = (
    (3, 1, 1, 10, 1),
    (3, 5, 10, 20, 0),
    (3, 5, 20, 20, 0),
    (3, 5, 20, 40, 0),
)


def _lrelu(v):
    return jnp.where(v >= 0, v, _LRELU_SLOPE * v)


# ------------------------------ static shape plan -------------------------------

def _stage_plan(max_t, n_feature):
    """Per-stage shape bookkeeping (mirrors CNN2d.__get_features arithmetic)."""
    h, w = max_t, n_feature
    plan = []
    for (kh, kw, cin, cout, pad_h) in _CONV_DEFS:
        hin = h + 2 * pad_h
        oh, ow = hin - kh + 1, w - kw + 1
        ohp, owp = oh // 2, ow // 2
        assert oh >= 1 and ow >= 1 and ohp >= 1 and owp >= 1, (
            "max_T / n_feature too small for this architecture")
        plan.append(dict(kh=kh, kw=kw, cin=cin, cout=cout, pad_h=pad_h,
                         h=h, w=w, hin=hin, oh=oh, ow=ow, ohp=ohp, owp=owp,
                         k=w * cin))
        h, w = ohp, owp
    return plan


# --------------------------- host-side weight transforms ------------------------

def _toeplitz_pooled(w_conv, w_in, owp):
    """Banded conv weight with the width half of the 2x2 max-pool folded in.

    T[p, i, w*Cin + ci, o*Cout + co] = w_conv[i, j, ci, co]  with w = 2*o + p + j,
    so  X2 @ T[p, i]  (X2 rows = image rows, lanes = (w, ci)) gives the conv
    response at the even (p=0) / odd (p=1) pooling columns directly.
    """
    kh, kw, cin, cout = w_conv.shape
    t = np.zeros((2, kh, w_in * cin, owp * cout), np.float32)
    for p in range(2):
        for i in range(kh):
            for o in range(owp):
                for j in range(kw):
                    r0 = (2 * o + p + j) * cin
                    t[p, i, r0:r0 + cin, o * cout:(o + 1) * cout] = w_conv[i, j]
    return t


def _hpool_select(oh, ohp):
    """0/1 selection matrices for the height half of the 2x2 max-pool."""
    s = np.zeros((2, ohp, oh), np.float32)
    idx = np.arange(ohp)
    s[0, idx, 2 * idx] = 1.0
    s[1, idx, 2 * idx + 1] = 1.0
    return s


def prepare_operands(params, n_feature, max_t, n_label):
    """One-time (outside jit) numpy weight transforms -> kernel operands."""
    plan = _stage_plan(max_t, n_feature)
    stage_ops = []
    for s_idx, st in enumerate(plan, start=1):
        assert s_idx == 1 or st["pad_h"] == 0, "in-kernel padding only on stage 1"
        w = np.asarray(params[f"conv{s_idx}_w"], np.float32)   # (KH, KW, Cin, Cout)
        b = np.asarray(params[f"conv{s_idx}_b"], np.float32)   # (Cout,)
        stage_ops.append((
            jnp.asarray(_toeplitz_pooled(w, st["w"], st["owp"])),   # (2,KH,K,OWp*Cout)
            jnp.asarray(_hpool_select(st["oh"], st["ohp"])),        # (2,OHp,OH)
            jnp.asarray(np.tile(b, st["owp"]).reshape(1, -1)),      # (1,OWp*Cout)
        ))

    last = plan[-1]
    hf, wf, cf = last["ohp"], last["owp"], last["cout"]
    # fc1 rows are ordered for PyTorch's NCHW flatten (c, h, w); permute them to
    # this kernel's lane-dense (h, w, c) feature layout.
    w1 = np.asarray(params["fc1_w"], np.float32)
    w1 = w1.reshape(cf, hf, wf, -1).transpose(1, 2, 0, 3).reshape(hf, wf * cf, -1)
    fc_ops = (
        jnp.asarray(w1),                                        # (Hf, Wf*Cf, 500)
        jnp.asarray(params["fc1_b"]).reshape(1, -1),
        jnp.asarray(params["fc2_w"]),
        jnp.asarray(params["fc2_b"]).reshape(1, -1),
        jnp.asarray(params["fc3_w"]),
        jnp.asarray(params["fc3_b"]).reshape(1, -1),
    )
    return dict(plan=plan, stage_ops=stage_ops, fc_ops=fc_ops,
                n_label=n_label, hf=hf)


# ------------------------------- fused forward kernel ---------------------------

def _make_fused_kernel(plan, hf):
    p1 = plan[0]
    PAD1, H1, W1, HIN1 = p1["pad_h"], p1["h"], p1["w"], p1["hin"]

    def conv_pool_lrelu(a, t_ref, s_ref, b_ref, kh, oh):
        # a: (Hin, W*Cin) lane-dense activation for this stage.
        def half(par):          # width-pooled conv response, parity `par`
            acc = jnp.dot(a[0:oh, :], t_ref[par, 0],
                          preferred_element_type=jnp.float32)
            for i in range(1, kh):
                acc = acc + jnp.dot(a[i:i + oh, :], t_ref[par, i],
                                    preferred_element_type=jnp.float32)
            return acc
        wmax = jnp.maximum(half(0), half(1))                    # (OH, OWp*Cout)
        pooled = jnp.maximum(                                    # height pool
            jnp.dot(s_ref[0], wmax, preferred_element_type=jnp.float32),
            jnp.dot(s_ref[1], wmax, preferred_element_type=jnp.float32))
        # per-channel bias commutes with max-pool; lrelu(pool(conv) + b)
        return _lrelu(pooled + b_ref[...])                       # (OHp, OWp*Cout)

    def kernel(x_ref,
               t1_ref, s1_ref, c1_ref,
               t2_ref, s2_ref, c2_ref,
               t3_ref, s3_ref, c3_ref,
               t4_ref, s4_ref, c4_ref,
               w1_ref, b1_ref, w2_ref, b2_ref, w3_ref, b3_ref,
               o_ref, xpad_ref):
        # conv1 padding=(1, 0): build the H-padded image in VMEM scratch
        # (written every grid step — do NOT gate on program_id, scratch is
        #  per-core and "parallel" iterations may never see step 0).
        if PAD1:
            xpad_ref[0:PAD1, :] = jnp.zeros((PAD1, W1), jnp.float32)
            xpad_ref[PAD1 + H1:HIN1, :] = jnp.zeros((HIN1 - PAD1 - H1, W1),
                                                    jnp.float32)
            xpad_ref[PAD1:PAD1 + H1, :] = x_ref[0]
            a = xpad_ref[...]                                    # (Hin, W)
        else:
            a = x_ref[0]

        stage_refs = ((t1_ref, s1_ref, c1_ref), (t2_ref, s2_ref, c2_ref),
                      (t3_ref, s3_ref, c3_ref), (t4_ref, s4_ref, c4_ref))
        for st, (t_ref, s_ref, b_ref) in zip(plan, stage_refs):
            a = conv_pool_lrelu(a, t_ref, s_ref, b_ref, st["kh"], st["oh"])

        # MLP head: fc1 -> lrelu -> fc2 -> lrelu -> fc3 -> lrelu -> log_softmax
        # (dropout layers are identity in eval mode)
        acc = jnp.dot(a[0:1, :], w1_ref[0], preferred_element_type=jnp.float32)
        for r in range(1, hf):
            acc = acc + jnp.dot(a[r:r + 1, :], w1_ref[r],
                                preferred_element_type=jnp.float32)
        h = _lrelu(acc + b1_ref[...])
        h = _lrelu(jnp.dot(h, w2_ref[...],
                           preferred_element_type=jnp.float32) + b2_ref[...])
        h = _lrelu(jnp.dot(h, w3_ref[...],
                           preferred_element_type=jnp.float32) + b3_ref[...])
        m = jnp.max(h, axis=-1, keepdims=True)
        lse = m + jnp.log(jnp.sum(jnp.exp(h - m), axis=-1, keepdims=True))
        o_ref[0] = (h - lse).astype(o_ref.dtype)

    return kernel


def cnn2d_forward(ops, x_nchw):
    """x_nchw: (N, 1, max_T, n_feature) — PyTorch NCHW convention."""
    plan = ops["plan"]
    n_label = ops["n_label"]
    p1 = plan[0]
    n = x_nchw.shape[0]
    x = x_nchw.astype(jnp.float32).reshape(n, p1["h"], p1["w"])  # Cin=1 -> (N,H,W)

    def resident(arr):
        nd = arr.ndim
        return pl.BlockSpec(tuple(arr.shape), lambda i, _nd=nd: (0,) * _nd)

    inputs = [x]
    in_specs = [pl.BlockSpec((1, p1["h"], p1["w"]), lambda i: (i, 0, 0))]
    for trip in ops["stage_ops"]:
        for arr in trip:
            inputs.append(arr)
            in_specs.append(resident(arr))
    for arr in ops["fc_ops"]:
        inputs.append(arr)
        in_specs.append(resident(arr))

    kernel = _make_fused_kernel(plan, ops["hf"])
    out = pl.pallas_call(
        kernel,
        out_shape=jax.ShapeDtypeStruct((n, 1, n_label), jnp.float32),
        grid=(n,),
        in_specs=in_specs,
        out_specs=pl.BlockSpec((1, 1, n_label), lambda i: (i, 0, 0)),
        scratch_shapes=[pltpu.VMEM((p1["hin"], p1["w"]), jnp.float32)],
        compiler_params=pltpu.CompilerParams(
            dimension_semantics=("parallel",),
            vmem_limit_bytes=48 * 1024 * 1024),
    )(*inputs)
    return out.reshape(n, n_label)


# ----------------------------------- params -------------------------------------

def init_params(key, n_feature, max_t, n_label):
    plan = _stage_plan(max_t, n_feature)
    last = plan[-1]
    nfeature = last["cout"] * last["ohp"] * last["owp"]
    fc_shapes = [(nfeature, 500), (500, 50), (50, n_label)]
    keys = jax.random.split(key, 2 * (len(_CONV_DEFS) + len(fc_shapes)))
    params = {}
    for i, (kh, kw, cin, cout, _) in enumerate(_CONV_DEFS, start=1):
        kw_, kb_ = keys[2 * (i - 1)], keys[2 * (i - 1) + 1]
        fan_in = kh * kw * cin
        params[f"conv{i}_w"] = (jax.random.normal(kw_, (kh, kw, cin, cout),
                                                  jnp.float32) / jnp.sqrt(fan_in))
        params[f"conv{i}_b"] = 0.1 * jax.random.normal(kb_, (cout,), jnp.float32)
    for i, (fin, fout) in enumerate(fc_shapes, start=1):
        j = 2 * (len(_CONV_DEFS) + i - 1)
        params[f"fc{i}_w"] = (jax.random.normal(keys[j], (fin, fout),
                                                jnp.float32) / jnp.sqrt(fin))
        params[f"fc{i}_b"] = 0.1 * jax.random.normal(keys[j + 1], (fout,),
                                                     jnp.float32)
    return params, nfeature


# ---------------------- plain-XLA reference (for validation) --------------------

def _reference_forward(params, x_nchw):
    x = jnp.transpose(x_nchw, (0, 2, 3, 1)).astype(jnp.float32)  # NHWC
    for s_idx, (_, _, _, _, pad_h) in enumerate(_CONV_DEFS, start=1):
        w, b = params[f"conv{s_idx}_w"], params[f"conv{s_idx}_b"]
        y = lax.conv_general_dilated(
            x, w, window_strides=(1, 1), padding=((pad_h, pad_h), (0, 0)),
            dimension_numbers=("NHWC", "HWIO", "NHWC")) + b
        y = lax.reduce_window(y, -jnp.inf, lax.max,
                              (1, 2, 2, 1), (1, 2, 2, 1), "VALID")
        x = _lrelu(y)
    x = jnp.transpose(x, (0, 3, 1, 2)).reshape(x.shape[0], -1)   # NCHW flatten
    x = _lrelu(x @ params["fc1_w"] + params["fc1_b"])
    x = _lrelu(x @ params["fc2_w"] + params["fc2_b"])
    x = _lrelu(x @ params["fc3_w"] + params["fc3_b"])
    return jax.nn.log_softmax(x, axis=-1)


if __name__ == "__main__":
    batch, max_T, n_feature, n_label = 2, 48, 80, 5

    key = jax.random.PRNGKey(0)
    kx, kp = jax.random.split(key)
    params, _nfeature = init_params(kp, n_feature, max_T, n_label)
    x = jax.random.normal(kx, (batch, 1, max_T, n_feature), jnp.float32)

    ops = prepare_operands(params, n_feature, max_T, n_label)
    fwd = jax.jit(functools.partial(cnn2d_forward, ops))
    out = jax.block_until_ready(fwd(x))

    assert out.shape == (batch, n_label), out.shape
    # log-softmax rows must exponentiate to probability simplices
    assert bool(jnp.allclose(jnp.sum(jnp.exp(out), axis=-1), 1.0, atol=1e-4))

    # cross-check the fused Pallas path against a plain-XLA reference forward
    ref = jax.block_until_ready(
        jax.jit(functools.partial(_reference_forward, params))(x))
    assert bool(jnp.allclose(out, ref, rtol=1e-3, atol=1e-3)), (
        "max |pallas - ref| = %g" % float(jnp.max(jnp.abs(out - ref))))

    print("KERNEL_OK")
</pallas_src>

<mosaic_0001>
module attributes {stable_mosaic.version = 11 : i64} {
  func.func @kernel(%arg0: i32, %arg1: memref<1x48x80xf32, #tpu.memory_space<vmem>>, %arg2: memref<2x3x80x400xf32, #tpu.memory_space<vmem>>, %arg3: memref<2x24x48xf32, #tpu.memory_space<vmem>>, %arg4: memref<1x400xf32, #tpu.memory_space<vmem>>, %arg5: memref<2x3x400x360xf32, #tpu.memory_space<vmem>>, %arg6: memref<2x11x22xf32, #tpu.memory_space<vmem>>, %arg7: memref<1x360xf32, #tpu.memory_space<vmem>>, %arg8: memref<2x3x360x140xf32, #tpu.memory_space<vmem>>, %arg9: memref<2x4x9xf32, #tpu.memory_space<vmem>>, %arg10: memref<1x140xf32, #tpu.memory_space<vmem>>, %arg11: memref<2x3x140x40xf32, #tpu.memory_space<vmem>>, %arg12: memref<2x1x2xf32, #tpu.memory_space<vmem>>, %arg13: memref<1x40xf32, #tpu.memory_space<vmem>>, %arg14: memref<1x40x500xf32, #tpu.memory_space<vmem>>, %arg15: memref<1x500xf32, #tpu.memory_space<vmem>>, %arg16: memref<500x50xf32, #tpu.memory_space<vmem>>, %arg17: memref<1x50xf32, #tpu.memory_space<vmem>>, %arg18: memref<50x5xf32, #tpu.memory_space<vmem>>, %arg19: memref<1x5xf32, #tpu.memory_space<vmem>>, %arg20: memref<1x1x5xf32, #tpu.memory_space<vmem>>, %arg21: memref<50x80xf32, #tpu.memory_space<vmem>>) attributes {dimension_semantics = [#tpu.dimension_semantics<parallel>], iteration_bounds = array<i64: 2>, scalar_prefetch = 0 : i64, scratch_operands = 1 : i64, tpu.core_type = #tpu.core_type<tc>, window_params = [{transform_indices = @transform_0, window_bounds = array<i64: 1, 48, 80>}, {pipeline_mode = #tpu.pipeline_mode<synchronous>, transform_indices = @transform_1, window_bounds = array<i64: 2, 3, 80, 400>}, {pipeline_mode = #tpu.pipeline_mode<synchronous>, transform_indices = @transform_2, window_bounds = array<i64: 2, 24, 48>}, {pipeline_mode = #tpu.pipeline_mode<synchronous>, transform_indices = @transform_3, window_bounds = array<i64: 1, 400>}, {pipeline_mode = #tpu.pipeline_mode<synchronous>, transform_indices = @transform_4, window_bounds = array<i64: 2, 3, 400, 360>}, {pipeline_mode = #tpu.pipeline_mode<synchronous>, transform_indices = @transform_5, window_bounds = array<i64: 2, 11, 22>}, {pipeline_mode = #tpu.pipeline_mode<synchronous>, transform_indices = @transform_6, window_bounds = array<i64: 1, 360>}, {pipeline_mode = #tpu.pipeline_mode<synchronous>, transform_indices = @transform_7, window_bounds = array<i64: 2, 3, 360, 140>}, {pipeline_mode = #tpu.pipeline_mode<synchronous>, transform_indices = @transform_8, window_bounds = array<i64: 2, 4, 9>}, {pipeline_mode = #tpu.pipeline_mode<synchronous>, transform_indices = @transform_9, window_bounds = array<i64: 1, 140>}, {pipeline_mode = #tpu.pipeline_mode<synchronous>, transform_indices = @transform_10, window_bounds = array<i64: 2, 3, 140, 40>}, {pipeline_mode = #tpu.pipeline_mode<synchronous>, transform_indices = @transform_11, window_bounds = array<i64: 2, 1, 2>}, {pipeline_mode = #tpu.pipeline_mode<synchronous>, transform_indices = @transform_12, window_bounds = array<i64: 1, 40>}, {pipeline_mode = #tpu.pipeline_mode<synchronous>, transform_indices = @transform_13, window_bounds = array<i64: 1, 40, 500>}, {pipeline_mode = #tpu.pipeline_mode<synchronous>, transform_indices = @transform_14, window_bounds = array<i64: 1, 500>}, {pipeline_mode = #tpu.pipeline_mode<synchronous>, transform_indices = @transform_15, window_bounds = array<i64: 500, 50>}, {pipeline_mode = #tpu.pipeline_mode<synchronous>, transform_indices = @transform_16, window_bounds = array<i64: 1, 50>}, {pipeline_mode = #tpu.pipeline_mode<synchronous>, transform_indices = @transform_17, window_bounds = array<i64: 50, 5>}, {pipeline_mode = #tpu.pipeline_mode<synchronous>, transform_indices = @transform_18, window_bounds = array<i64: 1, 5>}, {transform_indices = @transform_19, window_bounds = array<i64: 1, 1, 5>}]} {
    %cst = arith.constant 0.000000e+00 : f32
    %0 = vector.broadcast %cst : f32 to vector<1x80xf32>
    %c0 = arith.constant 0 : index
    %c0_0 = arith.constant 0 : index
    %1 = vector.load %arg21[%c0, %c0_0] : memref<50x80xf32, #tpu.memory_space<vmem>>, vector<1x80xf32>
    tpu.vector_store %arg21[%c0, %c0_0], %0 {strides = array<i32>} : memref<50x80xf32, #tpu.memory_space<vmem>>, vector<1x80xf32>,
    %cst_1 = arith.constant 0.000000e+00 : f32
    %2 = vector.broadcast %cst_1 : f32 to vector<1x80xf32>
    %c49 = arith.constant 49 : index
    %c0_2 = arith.constant 0 : index
    %3 = vector.load %arg21[%c49, %c0_2] : memref<50x80xf32, #tpu.memory_space<vmem>>, vector<1x80xf32>
    tpu.vector_store %arg21[%c49, %c0_2], %2 {strides = array<i32>} : memref<50x80xf32, #tpu.memory_space<vmem>>, vector<1x80xf32>,
    %c0_3 = arith.constant 0 : index
    %c0_4 = arith.constant 0 : index
    %c0_5 = arith.constant 0 : index
    %4 = vector.load %arg1[%c0_3, %c0_4, %c0_5] : memref<1x48x80xf32, #tpu.memory_space<vmem>>, vector<1x48x80xf32>
    %5 = vector.shape_cast %4 : vector<1x48x80xf32> to vector<48x80xf32>
    %c1 = arith.constant 1 : index
    %c0_6 = arith.constant 0 : index
    %6 = vector.load %arg21[%c1, %c0_6] : memref<50x80xf32, #tpu.memory_space<vmem>>, vector<48x80xf32>
    tpu.vector_store %arg21[%c1, %c0_6], %5 {strides = array<i32>} : memref<50x80xf32, #tpu.memory_space<vmem>>, vector<48x80xf32>,
    %c0_7 = arith.constant 0 : index
    %c0_8 = arith.constant 0 : index
    %7 = vector.load %arg21[%c0_7, %c0_8] : memref<50x80xf32, #tpu.memory_space<vmem>>, vector<50x80xf32>
    %8 = vector.extract_strided_slice %7 {offsets = [0, 0], sizes = [48, 80], strides = [1, 1]} : vector<50x80xf32> to vector<48x80xf32>
    %c0_9 = arith.constant 0 : index
    %c0_10 = arith.constant 0 : index
    %c0_11 = arith.constant 0 : index
    %c0_12 = arith.constant 0 : index
    %9 = vector.load %arg2[%c0_9, %c0_10, %c0_11, %c0_12] : memref<2x3x80x400xf32, #tpu.memory_space<vmem>>, vector<1x1x80x400xf32>
    %10 = vector.shape_cast %9 : vector<1x1x80x400xf32> to vector<80x400xf32>
    %cst_13 = arith.constant dense<0.000000e+00> : vector<48x400xf32>
    %11 = tpu.matmul %8, %10, %cst_13 {dimension_numbers = #tpu.dot_dimension_numbers<[1], [0], [0], [1], [0, 0, 1, 1], [], []>} : vector<48x80xf32>, vector<80x400xf32>, vector<48x400xf32> -> vector<48x400xf32>
    %12 = vector.extract_strided_slice %7 {offsets = [1, 0], sizes = [48, 80], strides = [1, 1]} : vector<50x80xf32> to vector<48x80xf32>
    %c0_14 = arith.constant 0 : index
    %c1_15 = arith.constant 1 : index
    %c0_16 = arith.constant 0 : index
    %c0_17 = arith.constant 0 : index
    %13 = vector.load %arg2[%c0_14, %c1_15, %c0_16, %c0_17] : memref<2x3x80x400xf32, #tpu.memory_space<vmem>>, vector<1x1x80x400xf32>
    %14 = vector.shape_cast %13 : vector<1x1x80x400xf32> to vector<80x400xf32>
    %cst_18 = arith.constant dense<0.000000e+00> : vector<48x400xf32>
    %15 = tpu.matmul %12, %14, %cst_18 {dimension_numbers = #tpu.dot_dimension_numbers<[1], [0], [0], [1], [0, 0, 1, 1], [], []>} : vector<48x80xf32>, vector<80x400xf32>, vector<48x400xf32> -> vector<48x400xf32>
    %16 = arith.addf %11, %15 : vector<48x400xf32>
    %17 = vector.extract_strided_slice %7 {offsets = [2, 0], sizes = [48, 80], strides = [1, 1]} : vector<50x80xf32> to vector<48x80xf32>
    %c0_19 = arith.constant 0 : index
    %c2 = arith.constant 2 : index
    %c0_20 = arith.constant 0 : index
    %c0_21 = arith.constant 0 : index
    %18 = vector.load %arg2[%c0_19, %c2, %c0_20, %c0_21] : memref<2x3x80x400xf32, #tpu.memory_space<vmem>>, vector<1x1x80x400xf32>
    %19 = vector.shape_cast %18 : vector<1x1x80x400xf32> to vector<80x400xf32>
    %cst_22 = arith.constant dense<0.000000e+00> : vector<48x400xf32>
    %20 = tpu.matmul %17, %19, %cst_22 {dimension_numbers = #tpu.dot_dimension_numbers<[1], [0], [0], [1], [0, 0, 1, 1], [], []>} : vector<48x80xf32>, vector<80x400xf32>, vector<48x400xf32> -> vector<48x400xf32>
    %21 = arith.addf %16, %20 : vector<48x400xf32>
    %22 = vector.extract_strided_slice %7 {offsets = [0, 0], sizes = [48, 80], strides = [1, 1]} : vector<50x80xf32> to vector<48x80xf32>
    %c1_23 = arith.constant 1 : index
    %c0_24 = arith.constant 0 : index
    %c0_25 = arith.constant 0 : index
    %c0_26 = arith.constant 0 : index
    %23 = vector.load %arg2[%c1_23, %c0_24, %c0_25, %c0_26] : memref<2x3x80x400xf32, #tpu.memory_space<vmem>>, vector<1x1x80x400xf32>
    %24 = vector.shape_cast %23 : vector<1x1x80x400xf32> to vector<80x400xf32>
    %cst_27 = arith.constant dense<0.000000e+00> : vector<48x400xf32>
    %25 = tpu.matmul %22, %24, %cst_27 {dimension_numbers = #tpu.dot_dimension_numbers<[1], [0], [0], [1], [0, 0, 1, 1], [], []>} : vector<48x80xf32>, vector<80x400xf32>, vector<48x400xf32> -> vector<48x400xf32>
    %26 = vector.extract_strided_slice %7 {offsets = [1, 0], sizes = [48, 80], strides = [1, 1]} : vector<50x80xf32> to vector<48x80xf32>
    %c1_28 = arith.constant 1 : index
    %c1_29 = arith.constant 1 : index
    %c0_30 = arith.constant 0 : index
    %c0_31 = arith.constant 0 : index
    %27 = vector.load %arg2[%c1_28, %c1_29, %c0_30, %c0_31] : memref<2x3x80x400xf32, #tpu.memory_space<vmem>>, vector<1x1x80x400xf32>
    %28 = vector.shape_cast %27 : vector<1x1x80x400xf32> to vector<80x400xf32>
    %cst_32 = arith.constant dense<0.000000e+00> : vector<48x400xf32>
    %29 = tpu.matmul %26, %28, %cst_32 {dimension_numbers = #tpu.dot_dimension_numbers<[1], [0], [0], [1], [0, 0, 1, 1], [], []>} : vector<48x80xf32>, vector<80x400xf32>, vector<48x400xf32> -> vector<48x400xf32>
    %30 = arith.addf %25, %29 : vector<48x400xf32>
    %31 = vector.extract_strided_slice %7 {offsets = [2, 0], sizes = [48, 80], strides = [1, 1]} : vector<50x80xf32> to vector<48x80xf32>
    %c1_33 = arith.constant 1 : index
    %c2_34 = arith.constant 2 : index
    %c0_35 = arith.constant 0 : index
    %c0_36 = arith.constant 0 : index
    %32 = vector.load %arg2[%c1_33, %c2_34, %c0_35, %c0_36] : memref<2x3x80x400xf32, #tpu.memory_space<vmem>>, vector<1x1x80x400xf32>
    %33 = vector.shape_cast %32 : vector<1x1x80x400xf32> to vector<80x400xf32>
    %cst_37 = arith.constant dense<0.000000e+00> : vector<48x400xf32>
    %34 = tpu.matmul %31, %33, %cst_37 {dimension_numbers = #tpu.dot_dimension_numbers<[1], [0], [0], [1], [0, 0, 1, 1], [], []>} : vector<48x80xf32>, vector<80x400xf32>, vector<48x400xf32> -> vector<48x400xf32>
    %35 = arith.addf %30, %34 : vector<48x400xf32>
    %36 = arith.maximumf %21, %35 : vector<48x400xf32>
    %c0_38 = arith.constant 0 : index
    %c0_39 = arith.constant 0 : index
    %c0_40 = arith.constant 0 : index
    %37 = vector.load %arg3[%c0_38, %c0_39, %c0_40] : memref<2x24x48xf32, #tpu.memory_space<vmem>>, vector<1x24x48xf32>
    %38 = vector.shape_cast %37 : vector<1x24x48xf32> to vector<24x48xf32>
    %cst_41 = arith.constant dense<0.000000e+00> : vector<24x400xf32>
    %39 = tpu.matmul %38, %36, %cst_41 {dimension_numbers = #tpu.dot_dimension_numbers<[1], [0], [0], [1], [0, 0, 1, 1], [], []>} : vector<24x48xf32>, vector<48x400xf32>, vector<24x400xf32> -> vector<24x400xf32>
    %c1_42 = arith.constant 1 : index
    %c0_43 = arith.constant 0 : index
    %c0_44 = arith.constant 0 : index
    %40 = vector.load %arg3[%c1_42, %c0_43, %c0_44] : memref<2x24x48xf32, #tpu.memory_space<vmem>>, vector<1x24x48xf32>
    %41 = vector.shape_cast %40 : vector<1x24x48xf32> to vector<24x48xf32>
    %cst_45 = arith.constant dense<0.000000e+00> : vector<24x400xf32>
    %42 = tpu.matmul %41, %36, %cst_45 {dimension_numbers = #tpu.dot_dimension_numbers<[1], [0], [0], [1], [0, 0, 1, 1], [], []>} : vector<24x48xf32>, vector<48x400xf32>, vector<24x400xf32> -> vector<24x400xf32>
    %43 = arith.maximumf %39, %42 : vector<24x400xf32>
    %c0_46 = arith.constant 0 : index
    %c0_47 = arith.constant 0 : index
    %44 = vector.load %arg4[%c0_46, %c0_47] : memref<1x400xf32, #tpu.memory_space<vmem>>, vector<1x400xf32>
    %45 = vector.broadcast %44 : vector<1x400xf32> to vector<24x400xf32>
    %46 = arith.addf %43, %45 : vector<24x400xf32>
    %cst_48 = arith.constant 0.000000e+00 : f32
    %47 = vector.broadcast %cst_48 : f32 to vector<24x400xf32>
    %48 = arith.cmpf oge, %46, %47 : vector<24x400xf32>
    %cst_49 = arith.constant 0.00999999977 : f32
    %49 = vector.broadcast %cst_49 : f32 to vector<24x400xf32>
    %50 = arith.mulf %49, %46 : vector<24x400xf32>
    %51 = arith.select %48, %46, %50 : vector<24x400xi1>, vector<24x400xf32>
    %52 = vector.extract_strided_slice %51 {offsets = [0, 0], sizes = [22, 400], strides = [1, 1]} : vector<24x400xf32> to vector<22x400xf32>
    %c0_50 = arith.constant 0 : index
    %c0_51 = arith.constant 0 : index
    %c0_52 = arith.constant 0 : index
    %c0_53 = arith.constant 0 : index
    %53 = vector.load %arg5[%c0_50, %c0_51, %c0_52, %c0_53] : memref<2x3x400x360xf32, #tpu.memory_space<vmem>>, vector<1x1x400x360xf32>
    %54 = vector.shape_cast %53 : vector<1x1x400x360xf32> to vector<400x360xf32>
    %cst_54 = arith.constant dense<0.000000e+00> : vector<22x360xf32>
    %55 = tpu.matmul %52, %54, %cst_54 {dimension_numbers = #tpu.dot_dimension_numbers<[1], [0], [0], [1], [0, 0, 1, 1], [], []>} : vector<22x400xf32>, vector<400x360xf32>, vector<22x360xf32> -> vector<22x360xf32>
    %56 = vector.extract_strided_slice %51 {offsets = [1, 0], sizes = [22, 400], strides = [1, 1]} : vector<24x400xf32> to vector<22x400xf32>
    %c0_55 = arith.constant 0 : index
    %c1_56 = arith.constant 1 : index
    %c0_57 = arith.constant 0 : index
    %c0_58 = arith.constant 0 : index
    %57 = vector.load %arg5[%c0_55, %c1_56, %c0_57, %c0_58] : memref<2x3x400x360xf32, #tpu.memory_space<vmem>>, vector<1x1x400x360xf32>
    %58 = vector.shape_cast %57 : vector<1x1x400x360xf32> to vector<400x360xf32>
    %cst_59 = arith.constant dense<0.000000e+00> : vector<22x360xf32>
    %59 = tpu.matmul %56, %58, %cst_59 {dimension_numbers = #tpu.dot_dimension_numbers<[1], [0], [0], [1], [0, 0, 1, 1], [], []>} : vector<22x400xf32>, vector<400x360xf32>, vector<22x360xf32> -> vector<22x360xf32>
    %60 = arith.addf %55, %59 : vector<22x360xf32>
    %61 = vector.extract_strided_slice %51 {offsets = [2, 0], sizes = [22, 400], strides = [1, 1]} : vector<24x400xf32> to vector<22x400xf32>
    %c0_60 = arith.constant 0 : index
    %c2_61 = arith.constant 2 : index
    %c0_62 = arith.constant 0 : index
    %c0_63 = arith.constant 0 : index
    %62 = vector.load %arg5[%c0_60, %c2_61, %c0_62, %c0_63] : memref<2x3x400x360xf32, #tpu.memory_space<vmem>>, vector<1x1x400x360xf32>
    %63 = vector.shape_cast %62 : vector<1x1x400x360xf32> to vector<400x360xf32>
    %cst_64 = arith.constant dense<0.000000e+00> : vector<22x360xf32>
    %64 = tpu.matmul %61, %63, %cst_64 {dimension_numbers = #tpu.dot_dimension_numbers<[1], [0], [0], [1], [0, 0, 1, 1], [], []>} : vector<22x400xf32>, vector<400x360xf32>, vector<22x360xf32> -> vector<22x360xf32>
    %65 = arith.addf %60, %64 : vector<22x360xf32>
    %66 = vector.extract_strided_slice %51 {offsets = [0, 0], sizes = [22, 400], strides = [1, 1]} : vector<24x400xf32> to vector<22x400xf32>
    %c1_65 = arith.constant 1 : index
    %c0_66 = arith.constant 0 : index
    %c0_67 = arith.constant 0 : index
    %c0_68 = arith.constant 0 : index
    %67 = vector.load %arg5[%c1_65, %c0_66, %c0_67, %c0_68] : memref<2x3x400x360xf32, #tpu.memory_space<vmem>>, vector<1x1x400x360xf32>
    %68 = vector.shape_cast %67 : vector<1x1x400x360xf32> to vector<400x360xf32>
    %cst_69 = arith.constant dense<0.000000e+00> : vector<22x360xf32>
    %69 = tpu.matmul %66, %68, %cst_69 {dimension_numbers = #tpu.dot_dimension_numbers<[1], [0], [0], [1], [0, 0, 1, 1], [], []>} : vector<22x400xf32>, vector<400x360xf32>, vector<22x360xf32> -> vector<22x360xf32>
    %70 = vector.extract_strided_slice %51 {offsets = [1, 0], sizes = [22, 400], strides = [1, 1]} : vector<24x400xf32> to vector<22x400xf32>
    %c1_70 = arith.constant 1 : index
    %c1_71 = arith.constant 1 : index
    %c0_72 = arith.constant 0 : index
    %c0_73 = arith.constant 0 : index
    %71 = vector.load %arg5[%c1_70, %c1_71, %c0_72, %c0_73] : memref<2x3x400x360xf32, #tpu.memory_space<vmem>>, vector<1x1x400x360xf32>
    %72 = vector.shape_cast %71 : vector<1x1x400x360xf32> to vector<400x360xf32>
    %cst_74 = arith.constant dense<0.000000e+00> : vector<22x360xf32>
    %73 = tpu.matmul %70, %72, %cst_74 {dimension_numbers = #tpu.dot_dimension_numbers<[1], [0], [0], [1], [0, 0, 1, 1], [], []>} : vector<22x400xf32>, vector<400x360xf32>, vector<22x360xf32> -> vector<22x360xf32>
    %74 = arith.addf %69, %73 : vector<22x360xf32>
    %75 = vector.extract_strided_slice %51 {offsets = [2, 0], sizes = [22, 400], strides = [1, 1]} : vector<24x400xf32> to vector<22x400xf32>
    %c1_75 = arith.constant 1 : index
    %c2_76 = arith.constant 2 : index
    %c0_77 = arith.constant 0 : index
    %c0_78 = arith.constant 0 : index
    %76 = vector.load %arg5[%c1_75, %c2_76, %c0_77, %c0_78] : memref<2x3x400x360xf32, #tpu.memory_space<vmem>>, vector<1x1x400x360xf32>
    %77 = vector.shape_cast %76 : vector<1x1x400x360xf32> to vector<400x360xf32>
    %cst_79 = arith.constant dense<0.000000e+00> : vector<22x360xf32>
    %78 = tpu.matmul %75, %77, %cst_79 {dimension_numbers = #tpu.dot_dimension_numbers<[1], [0], [0], [1], [0, 0, 1, 1], [], []>} : vector<22x400xf32>, vector<400x360xf32>, vector<22x360xf32> -> vector<22x360xf32>
    %79 = arith.addf %74, %78 : vector<22x360xf32>
    %80 = arith.maximumf %65, %79 : vector<22x360xf32>
    %c0_80 = arith.constant 0 : index
    %c0_81 = arith.constant 0 : index
    %c0_82 = arith.constant 0 : index
    %81 = vector.load %arg6[%c0_80, %c0_81, %c0_82] : memref<2x11x22xf32, #tpu.memory_space<vmem>>, vector<1x11x22xf32>
    %82 = vector.shape_cast %81 : vector<1x11x22xf32> to vector<11x22xf32>
    %cst_83 = arith.constant dense<0.000000e+00> : vector<11x360xf32>
    %83 = tpu.matmul %82, %80, %cst_83 {dimension_numbers = #tpu.dot_dimension_numbers<[1], [0], [0], [1], [0, 0, 1, 1], [], []>} : vector<11x22xf32>, vector<22x360xf32>, vector<11x360xf32> -> vector<11x360xf32>
    %c1_84 = arith.constant 1 : index
    %c0_85 = arith.constant 0 : index
    %c0_86 = arith.constant 0 : index
    %84 = vector.load %arg6[%c1_84, %c0_85, %c0_86] : memref<2x11x22xf32, #tpu.memory_space<vmem>>, vector<1x11x22xf32>
    %85 = vector.shape_cast %84 : vector<1x11x22xf32> to vector<11x22xf32>
    %cst_87 = arith.constant dense<0.000000e+00> : vector<11x360xf32>
    %86 = tpu.matmul %85, %80, %cst_87 {dimension_numbers = #tpu.dot_dimension_numbers<[1], [0], [0], [1], [0, 0, 1, 1], [], []>} : vector<11x22xf32>, vector<22x360xf32>, vector<11x360xf32> -> vector<11x360xf32>
    %87 = arith.maximumf %83, %86 : vector<11x360xf32>
    %c0_88 = arith.constant 0 : index
    %c0_89 = arith.constant 0 : index
    %88 = vector.load %arg7[%c0_88, %c0_89] : memref<1x360xf32, #tpu.memory_space<vmem>>, vector<1x360xf32>
    %89 = vector.broadcast %88 : vector<1x360xf32> to vector<11x360xf32>
    %90 = arith.addf %87, %89 : vector<11x360xf32>
    %cst_90 = arith.constant 0.000000e+00 : f32
    %91 = vector.broadcast %cst_90 : f32 to vector<11x360xf32>
    %92 = arith.cmpf oge, %90, %91 : vector<11x360xf32>
    %cst_91 = arith.constant 0.00999999977 : f32
    %93 = vector.broadcast %cst_91 : f32 to vector<11x360xf32>
    %94 = arith.mulf %93, %90 : vector<11x360xf32>
    %95 = arith.select %92, %90, %94 : vector<11x360xi1>, vector<11x360xf32>
    %96 = vector.extract_strided_slice %95 {offsets = [0, 0], sizes = [9, 360], strides = [1, 1]} : vector<11x360xf32> to vector<9x360xf32>
    %c0_92 = arith.constant 0 : index
    %c0_93 = arith.constant 0 : index
    %c0_94 = arith.constant 0 : index
    %c0_95 = arith.constant 0 : index
    %97 = vector.load %arg8[%c0_92, %c0_93, %c0_94, %c0_95] : memref<2x3x360x140xf32, #tpu.memory_space<vmem>>, vector<1x1x360x140xf32>
    %98 = vector.shape_cast %97 : vector<1x1x360x140xf32> to vector<360x140xf32>
    %cst_96 = arith.constant dense<0.000000e+00> : vector<9x140xf32>
    %99 = tpu.matmul %96, %98, %cst_96 {dimension_numbers = #tpu.dot_dimension_numbers<[1], [0], [0], [1], [0, 0, 1, 1], [], []>} : vector<9x360xf32>, vector<360x140xf32>, vector<9x140xf32> -> vector<9x140xf32>
    %100 = vector.extract_strided_slice %95 {offsets = [1, 0], sizes = [9, 360], strides = [1, 1]} : vector<11x360xf32> to vector<9x360xf32>
    %c0_97 = arith.constant 0 : index
    %c1_98 = arith.constant 1 : index
    %c0_99 = arith.constant 0 : index
    %c0_100 = arith.constant 0 : index
    %101 = vector.load %arg8[%c0_97, %c1_98, %c0_99, %c0_100] : memref<2x3x360x140xf32, #tpu.memory_space<vmem>>, vector<1x1x360x140xf32>
    %102 = vector.shape_cast %101 : vector<1x1x360x140xf32> to vector<360x140xf32>
    %cst_101 = arith.constant dense<0.000000e+00> : vector<9x140xf32>
    %103 = tpu.matmul %100, %102, %cst_101 {dimension_numbers = #tpu.dot_dimension_numbers<[1], [0], [0], [1], [0, 0, 1, 1], [], []>} : vector<9x360xf32>, vector<360x140xf32>, vector<9x140xf32> -> vector<9x140xf32>
    %104 = arith.addf %99, %103 : vector<9x140xf32>
    %105 = vector.extract_strided_slice %95 {offsets = [2, 0], sizes = [9, 360], strides = [1, 1]} : vector<11x360xf32> to vector<9x360xf32>
    %c0_102 = arith.constant 0 : index
    %c2_103 = arith.constant 2 : index
    %c0_104 = arith.constant 0 : index
    %c0_105 = arith.constant 0 : index
    %106 = vector.load %arg8[%c0_102, %c2_103, %c0_104, %c0_105] : memref<2x3x360x140xf32, #tpu.memory_space<vmem>>, vector<1x1x360x140xf32>
    %107 = vector.shape_cast %106 : vector<1x1x360x140xf32> to vector<360x140xf32>
    %cst_106 = arith.constant dense<0.000000e+00> : vector<9x140xf32>
    %108 = tpu.matmul %105, %107, %cst_106 {dimension_numbers = #tpu.dot_dimension_numbers<[1], [0], [0], [1], [0, 0, 1, 1], [], []>} : vector<9x360xf32>, vector<360x140xf32>, vector<9x140xf32> -> vector<9x140xf32>
    %109 = arith.addf %104, %108 : vector<9x140xf32>
    %110 = vector.extract_strided_slice %95 {offsets = [0, 0], sizes = [9, 360], strides = [1, 1]} : vector<11x360xf32> to vector<9x360xf32>
    %c1_107 = arith.constant 1 : index
    %c0_108 = arith.constant 0 : index
    %c0_109 = arith.constant 0 : index
    %c0_110 = arith.constant 0 : index
    %111 = vector.load %arg8[%c1_107, %c0_108, %c0_109, %c0_110] : memref<2x3x360x140xf32, #tpu.memory_space<vmem>>, vector<1x1x360x140xf32>
    %112 = vector.shape_cast %111 : vector<1x1x360x140xf32> to vector<360x140xf32>
    %cst_111 = arith.constant dense<0.000000e+00> : vector<9x140xf32>
    %113 = tpu.matmul %110, %112, %cst_111 {dimension_numbers = #tpu.dot_dimension_numbers<[1], [0], [0], [1], [0, 0, 1, 1], [], []>} : vector<9x360xf32>, vector<360x140xf32>, vector<9x140xf32> -> vector<9x140xf32>
    %114 = vector.extract_strided_slice %95 {offsets = [1, 0], sizes = [9, 360], strides = [1, 1]} : vector<11x360xf32> to vector<9x360xf32>
    %c1_112 = arith.constant 1 : index
    %c1_113 = arith.constant 1 : index
    %c0_114 = arith.constant 0 : index
    %c0_115 = arith.constant 0 : index
    %115 = vector.load %arg8[%c1_112, %c1_113, %c0_114, %c0_115] : memref<2x3x360x140xf32, #tpu.memory_space<vmem>>, vector<1x1x360x140xf32>
    %116 = vector.shape_cast %115 : vector<1x1x360x140xf32> to vector<360x140xf32>
    %cst_116 = arith.constant dense<0.000000e+00> : vector<9x140xf32>
    %117 = tpu.matmul %114, %116, %cst_116 {dimension_numbers = #tpu.dot_dimension_numbers<[1], [0], [0], [1], [0, 0, 1, 1], [], []>} : vector<9x360xf32>, vector<360x140xf32>, vector<9x140xf32> -> vector<9x140xf32>
    %118 = arith.addf %113, %117 : vector<9x140xf32>
    %119 = vector.extract_strided_slice %95 {offsets = [2, 0], sizes = [9, 360], strides = [1, 1]} : vector<11x360xf32> to vector<9x360xf32>
    %c1_117 = arith.constant 1 : index
    %c2_118 = arith.constant 2 : index
    %c0_119 = arith.constant 0 : index
    %c0_120 = arith.constant 0 : index
    %120 = vector.load %arg8[%c1_117, %c2_118, %c0_119, %c0_120] : memref<2x3x360x140xf32, #tpu.memory_space<vmem>>, vector<1x1x360x140xf32>
    %121 = vector.shape_cast %120 : vector<1x1x360x140xf32> to vector<360x140xf32>
    %cst_121 = arith.constant dense<0.000000e+00> : vector<9x140xf32>
    %122 = tpu.matmul %119, %121, %cst_121 {dimension_numbers = #tpu.dot_dimension_numbers<[1], [0], [0], [1], [0, 0, 1, 1], [], []>} : vector<9x360xf32>, vector<360x140xf32>, vector<9x140xf32> -> vector<9x140xf32>
    %123 = arith.addf %118, %122 : vector<9x140xf32>
    %124 = arith.maximumf %109, %123 : vector<9x140xf32>
    %c0_122 = arith.constant 0 : index
    %c0_123 = arith.constant 0 : index
    %c0_124 = arith.constant 0 : index
    %125 = vector.load %arg9[%c0_122, %c0_123, %c0_124] : memref<2x4x9xf32, #tpu.memory_space<vmem>>, vector<1x4x9xf32>
    %126 = vector.shape_cast %125 : vector<1x4x9xf32> to vector<4x9xf32>
    %cst_125 = arith.constant dense<0.000000e+00> : vector<4x140xf32>
    %127 = tpu.matmul %126, %124, %cst_125 {dimension_numbers = #tpu.dot_dimension_numbers<[1], [0], [0], [1], [0, 0, 1, 1], [], []>} : vector<4x9xf32>, vector<9x140xf32>, vector<4x140xf32> -> vector<4x140xf32>
    %c1_126 = arith.constant 1 : index
    %c0_127 = arith.constant 0 : index
    %c0_128 = arith.constant 0 : index
    %128 = vector.load %arg9[%c1_126, %c0_127, %c0_128] : memref<2x4x9xf32, #tpu.memory_space<vmem>>, vector<1x4x9xf32>
    %129 = vector.shape_cast %128 : vector<1x4x9xf32> to vector<4x9xf32>
    %cst_129 = arith.constant dense<0.000000e+00> : vector<4x140xf32>
    %130 = tpu.matmul %129, %124, %cst_129 {dimension_numbers = #tpu.dot_dimension_numbers<[1], [0], [0], [1], [0, 0, 1, 1], [], []>} : vector<4x9xf32>, vector<9x140xf32>, vector<4x140xf32> -> vector<4x140xf32>
    %131 = arith.maximumf %127, %130 : vector<4x140xf32>
    %c0_130 = arith.constant 0 : index
    %c0_131 = arith.constant 0 : index
    %132 = vector.load %arg10[%c0_130, %c0_131] : memref<1x140xf32, #tpu.memory_space<vmem>>, vector<1x140xf32>
    %133 = vector.broadcast %132 : vector<1x140xf32> to vector<4x140xf32>
    %134 = arith.addf %131, %133 : vector<4x140xf32>
    %cst_132 = arith.constant 0.000000e+00 : f32
    %135 = vector.broadcast %cst_132 : f32 to vector<4x140xf32>
    %136 = arith.cmpf oge, %134, %135 : vector<4x140xf32>
    %cst_133 = arith.constant 0.00999999977 : f32
    %137 = vector.broadcast %cst_133 : f32 to vector<4x140xf32>
    %138 = arith.mulf %137, %134 : vector<4x140xf32>
    %139 = arith.select %136, %134, %138 : vector<4x140xi1>, vector<4x140xf32>
    %140 = vector.extract_strided_slice %139 {offsets = [0, 0], sizes = [2, 140], strides = [1, 1]} : vector<4x140xf32> to vector<2x140xf32>
    %c0_134 = arith.constant 0 : index
    %c0_135 = arith.constant 0 : index
    %c0_136 = arith.constant 0 : index
    %c0_137 = arith.constant 0 : index
    %141 = vector.load %arg11[%c0_134, %c0_135, %c0_136, %c0_137] : memref<2x3x140x40xf32, #tpu.memory_space<vmem>>, vector<1x1x140x40xf32>
    %142 = vector.shape_cast %141 : vector<1x1x140x40xf32> to vector<140x40xf32>
    %cst_138 = arith.constant dense<0.000000e+00> : vector<2x40xf32>
    %143 = tpu.matmul %140, %142, %cst_138 {dimension_numbers = #tpu.dot_dimension_numbers<[1], [0], [0], [1], [0, 0, 1, 1], [], []>} : vector<2x140xf32>, vector<140x40xf32>, vector<2x40xf32> -> vector<2x40xf32>
    %144 = vector.extract_strided_slice %139 {offsets = [1, 0], sizes = [2, 140], strides = [1, 1]} : vector<4x140xf32> to vector<2x140xf32>
    %c0_139 = arith.constant 0 : index
    %c1_140 = arith.constant 1 : index
    %c0_141 = arith.constant 0 : index
    %c0_142 = arith.constant 0 : index
    %145 = vector.load %arg11[%c0_139, %c1_140, %c0_141, %c0_142] : memref<2x3x140x40xf32, #tpu.memory_space<vmem>>, vector<1x1x140x40xf32>
    %146 = vector.shape_cast %145 : vector<1x1x140x40xf32> to vector<140x40xf32>
    %cst_143 = arith.constant dense<0.000000e+00> : vector<2x40xf32>
    %147 = tpu.matmul %144, %146, %cst_143 {dimension_numbers = #tpu.dot_dimension_numbers<[1], [0], [0], [1], [0, 0, 1, 1], [], []>} : vector<2x140xf32>, vector<140x40xf32>, vector<2x40xf32> -> vector<2x40xf32>
    %148 = arith.addf %143, %147 : vector<2x40xf32>
    %149 = vector.extract_strided_slice %139 {offsets = [2, 0], sizes = [2, 140], strides = [1, 1]} : vector<4x140xf32> to vector<2x140xf32>
    %c0_144 = arith.constant 0 : index
    %c2_145 = arith.constant 2 : index
    %c0_146 = arith.constant 0 : index
    %c0_147 = arith.constant 0 : index
    %150 = vector.load %arg11[%c0_144, %c2_145, %c0_146, %c0_147] : memref<2x3x140x40xf32, #tpu.memory_space<vmem>>, vector<1x1x140x40xf32>
    %151 = vector.shape_cast %150 : vector<1x1x140x40xf32> to vector<140x40xf32>
    %cst_148 = arith.constant dense<0.000000e+00> : vector<2x40xf32>
    %152 = tpu.matmul %149, %151, %cst_148 {dimension_numbers = #tpu.dot_dimension_numbers<[1], [0], [0], [1], [0, 0, 1, 1], [], []>} : vector<2x140xf32>, vector<140x40xf32>, vector<2x40xf32> -> vector<2x40xf32>
    %153 = arith.addf %148, %152 : vector<2x40xf32>
    %154 = vector.extract_strided_slice %139 {offsets = [0, 0], sizes = [2, 140], strides = [1, 1]} : vector<4x140xf32> to vector<2x140xf32>
    %c1_149 = arith.constant 1 : index
    %c0_150 = arith.constant 0 : index
    %c0_151 = arith.constant 0 : index
    %c0_152 = arith.constant 0 : index
    %155 = vector.load %arg11[%c1_149, %c0_150, %c0_151, %c0_152] : memref<2x3x140x40xf32, #tpu.memory_space<vmem>>, vector<1x1x140x40xf32>
    %156 = vector.shape_cast %155 : vector<1x1x140x40xf32> to vector<140x40xf32>
    %cst_153 = arith.constant dense<0.000000e+00> : vector<2x40xf32>
    %157 = tpu.matmul %154, %156, %cst_153 {dimension_numbers = #tpu.dot_dimension_numbers<[1], [0], [0], [1], [0, 0, 1, 1], [], []>} : vector<2x140xf32>, vector<140x40xf32>, vector<2x40xf32> -> vector<2x40xf32>
    %158 = vector.extract_strided_slice %139 {offsets = [1, 0], sizes = [2, 140], strides = [1, 1]} : vector<4x140xf32> to vector<2x140xf32>
    %c1_154 = arith.constant 1 : index
    %c1_155 = arith.constant 1 : index
    %c0_156 = arith.constant 0 : index
    %c0_157 = arith.constant 0 : index
    %159 = vector.load %arg11[%c1_154, %c1_155, %c0_156, %c0_157] : memref<2x3x140x40xf32, #tpu.memory_space<vmem>>, vector<1x1x140x40xf32>
    %160 = vector.shape_cast %159 : vector<1x1x140x40xf32> to vector<140x40xf32>
    %cst_158 = arith.constant dense<0.000000e+00> : vector<2x40xf32>
    %161 = tpu.matmul %158, %160, %cst_158 {dimension_numbers = #tpu.dot_dimension_numbers<[1], [0], [0], [1], [0, 0, 1, 1], [], []>} : vector<2x140xf32>, vector<140x40xf32>, vector<2x40xf32> -> vector<2x40xf32>
    %162 = arith.addf %157, %161 : vector<2x40xf32>
    %163 = vector.extract_strided_slice %139 {offsets = [2, 0], sizes = [2, 140], strides = [1, 1]} : vector<4x140xf32> to vector<2x140xf32>
    %c1_159 = arith.constant 1 : index
    %c2_160 = arith.constant 2 : index
    %c0_161 = arith.constant 0 : index
    %c0_162 = arith.constant 0 : index
    %164 = vector.load %arg11[%c1_159, %c2_160, %c0_161, %c0_162] : memref<2x3x140x40xf32, #tpu.memory_space<vmem>>, vector<1x1x140x40xf32>
    %165 = vector.shape_cast %164 : vector<1x1x140x40xf32> to vector<140x40xf32>
    %cst_163 = arith.constant dense<0.000000e+00> : vector<2x40xf32>
    %166 = tpu.matmul %163, %165, %cst_163 {dimension_numbers = #tpu.dot_dimension_numbers<[1], [0], [0], [1], [0, 0, 1, 1], [], []>} : vector<2x140xf32>, vector<140x40xf32>, vector<2x40xf32> -> vector<2x40xf32>
    %167 = arith.addf %162, %166 : vector<2x40xf32>
    %168 = arith.maximumf %153, %167 : vector<2x40xf32>
    %c0_164 = arith.constant 0 : index
    %c0_165 = arith.constant 0 : index
    %c0_166 = arith.constant 0 : index
    %169 = vector.load %arg12[%c0_164, %c0_165, %c0_166] : memref<2x1x2xf32, #tpu.memory_space<vmem>>, vector<1x1x2xf32>
    %170 = vector.shape_cast %169 : vector<1x1x2xf32> to vector<1x2xf32>
    %cst_167 = arith.constant dense<0.000000e+00> : vector<1x40xf32>
    %171 = tpu.matmul %170, %168, %cst_167 {dimension_numbers = #tpu.dot_dimension_numbers<[1], [0], [0], [1], [0, 0, 1, 1], [], []>} : vector<1x2xf32>, vector<2x40xf32>, vector<1x40xf32> -> vector<1x40xf32>
    %c1_168 = arith.constant 1 : index
    %c0_169 = arith.constant 0 : index
    %c0_170 = arith.constant 0 : index
    %172 = vector.load %arg12[%c1_168, %c0_169, %c0_170] : memref<2x1x2xf32, #tpu.memory_space<vmem>>, vector<1x1x2xf32>
    %173 = vector.shape_cast %172 : vector<1x1x2xf32> to vector<1x2xf32>
    %cst_171 = arith.constant dense<0.000000e+00> : vector<1x40xf32>
    %174 = tpu.matmul %173, %168, %cst_171 {dimension_numbers = #tpu.dot_dimension_numbers<[1], [0], [0], [1], [0, 0, 1, 1], [], []>} : vector<1x2xf32>, vector<2x40xf32>, vector<1x40xf32> -> vector<1x40xf32>
    %175 = arith.maximumf %171, %174 : vector<1x40xf32>
    %c0_172 = arith.constant 0 : index
    %c0_173 = arith.constant 0 : index
    %176 = vector.load %arg13[%c0_172, %c0_173] : memref<1x40xf32, #tpu.memory_space<vmem>>, vector<1x40xf32>
    %177 = arith.addf %175, %176 : vector<1x40xf32>
    %cst_174 = arith.constant 0.000000e+00 : f32
    %178 = vector.broadcast %cst_174 : f32 to vector<1x40xf32>
    %179 = arith.cmpf oge, %177, %178 : vector<1x40xf32>
    %cst_175 = arith.constant 0.00999999977 : f32
    %180 = vector.broadcast %cst_175 : f32 to vector<1x40xf32>
    %181 = arith.mulf %180, %177 : vector<1x40xf32>
    %182 = arith.select %179, %177, %181 : vector<1x40xi1>, vector<1x40xf32>
    %c0_176 = arith.constant 0 : index
    %c0_177 = arith.constant 0 : index
    %c0_178 = arith.constant 0 : index
    %183 = vector.load %arg14[%c0_176, %c0_177, %c0_178] : memref<1x40x500xf32, #tpu.memory_space<vmem>>, vector<1x40x500xf32>
    %184 = vector.shape_cast %183 : vector<1x40x500xf32> to vector<40x500xf32>
    %cst_179 = arith.constant dense<0.000000e+00> : vector<1x500xf32>
    %185 = tpu.matmul %182, %184, %cst_179 {dimension_numbers = #tpu.dot_dimension_numbers<[1], [0], [0], [1], [0, 0, 1, 1], [], []>} : vector<1x40xf32>, vector<40x500xf32>, vector<1x500xf32> -> vector<1x500xf32>
    %c0_180 = arith.constant 0 : index
    %c0_181 = arith.constant 0 : index
    %186 = vector.load %arg15[%c0_180, %c0_181] : memref<1x500xf32, #tpu.memory_space<vmem>>, vector<1x500xf32>
    %187 = arith.addf %185, %186 : vector<1x500xf32>
    %cst_182 = arith.constant 0.000000e+00 : f32
    %188 = vector.broadcast %cst_182 : f32 to vector<1x500xf32>
    %189 = arith.cmpf oge, %187, %188 : vector<1x500xf32>
    %cst_183 = arith.constant 0.00999999977 : f32
    %190 = vector.broadcast %cst_183 : f32 to vector<1x500xf32>
    %191 = arith.mulf %190, %187 : vector<1x500xf32>
    %192 = arith.select %189, %187, %191 : vector<1x500xi1>, vector<1x500xf32>
    %c0_184 = arith.constant 0 : index
    %c0_185 = arith.constant 0 : index
    %193 = vector.load %arg16[%c0_184, %c0_185] : memref<500x50xf32, #tpu.memory_space<vmem>>, vector<500x50xf32>
    %cst_186 = arith.constant dense<0.000000e+00> : vector<1x50xf32>
    %194 = tpu.matmul %192, %193, %cst_186 {dimension_numbers = #tpu.dot_dimension_numbers<[1], [0], [0], [1], [0, 0, 1, 1], [], []>} : vector<1x500xf32>, vector<500x50xf32>, vector<1x50xf32> -> vector<1x50xf32>
    %c0_187 = arith.constant 0 : index
    %c0_188 = arith.constant 0 : index
    %195 = vector.load %arg17[%c0_187, %c0_188] : memref<1x50xf32, #tpu.memory_space<vmem>>, vector<1x50xf32>
    %196 = arith.addf %194, %195 : vector<1x50xf32>
    %cst_189 = arith.constant 0.000000e+00 : f32
    %197 = vector.broadcast %cst_189 : f32 to vector<1x50xf32>
    %198 = arith.cmpf oge, %196, %197 : vector<1x50xf32>
    %cst_190 = arith.constant 0.00999999977 : f32
    %199 = vector.broadcast %cst_190 : f32 to vector<1x50xf32>
    %200 = arith.mulf %199, %196 : vector<1x50xf32>
    %201 = arith.select %198, %196, %200 : vector<1x50xi1>, vector<1x50xf32>
    %c0_191 = arith.constant 0 : index
    %c0_192 = arith.constant 0 : index
    %202 = vector.load %arg18[%c0_191, %c0_192] : memref<50x5xf32, #tpu.memory_space<vmem>>, vector<50x5xf32>
    %cst_193 = arith.constant dense<0.000000e+00> : vector<1x5xf32>
    %203 = tpu.matmul %201, %202, %cst_193 {dimension_numbers = #tpu.dot_dimension_numbers<[1], [0], [0], [1], [0, 0, 1, 1], [], []>} : vector<1x50xf32>, vector<50x5xf32>, vector<1x5xf32> -> vector<1x5xf32>
    %c0_194 = arith.constant 0 : index
    %c0_195 = arith.constant 0 : index
    %204 = vector.load %arg19[%c0_194, %c0_195] : memref<1x5xf32, #tpu.memory_space<vmem>>, vector<1x5xf32>
    %205 = arith.addf %203, %204 : vector<1x5xf32>
    %cst_196 = arith.constant 0.000000e+00 : f32
    %206 = vector.broadcast %cst_196 : f32 to vector<1x5xf32>
    %207 = arith.cmpf oge, %205, %206 : vector<1x5xf32>
    %cst_197 = arith.constant 0.00999999977 : f32
    %208 = vector.broadcast %cst_197 : f32 to vector<1x5xf32>
    %209 = arith.mulf %208, %205 : vector<1x5xf32>
    %210 = arith.select %207, %205, %209 : vector<1x5xi1>, vector<1x5xf32>
    %cst_198 = arith.constant dense<0xFF800000> : vector<1xf32>
    %211 = vector.multi_reduction <maximumf>, %210, %cst_198 [1] : vector<1x5xf32> to vector<1xf32>
    %212 = vector.shape_cast %211 : vector<1xf32> to vector<1x1xf32>
    %213 = vector.broadcast %212 : vector<1x1xf32> to vector<1x5xf32>
    %214 = arith.subf %210, %213 : vector<1x5xf32>
    %215 = math.exp %214 : vector<1x5xf32>
    %cst_199 = arith.constant dense<0.000000e+00> : vector<1xf32>
    %216 = vector.multi_reduction <add>, %215, %cst_199 [1] : vector<1x5xf32> to vector<1xf32>
    %217 = vector.shape_cast %216 : vector<1xf32> to vector<1x1xf32>
    %218 = math.log %217 : vector<1x1xf32>
    %219 = arith.addf %212, %218 : vector<1x1xf32>
    %220 = vector.broadcast %219 : vector<1x1xf32> to vector<1x5xf32>
    %221 = arith.subf %210, %220 : vector<1x5xf32>
    %c0_200 = arith.constant 0 : index
    %c0_201 = arith.constant 0 : index
    %c0_202 = arith.constant 0 : index
    %222 = vector.load %arg20[%c0_200, %c0_201, %c0_202] : memref<1x1x5xf32, #tpu.memory_space<vmem>>, vector<1x1x5xf32>
    %223 = vector.shape_cast %222 : vector<1x1x5xf32> to vector<1x5xf32>
    %224 = vector.shape_cast %221 : vector<1x5xf32> to vector<1x1x5xf32>
    tpu.vector_store %arg20[%c0_200, %c0_201, %c0_202], %224 {strides = array<i32>} : memref<1x1x5xf32, #tpu.memory_space<vmem>>, vector<1x1x5xf32>,
    return
  }
  func.func @transform_0(%arg0: i32) -> (i32, i32, i32) {
    %c0_i32 = arith.constant 0 : i32
    %c0_i32_0 = arith.constant 0 : i32
    %c0_i32_1 = arith.constant 0 : i32
    return %arg0, %c0_i32, %c0_i32_0 : i32, i32, i32
  }
  func.func @transform_1(%arg0: i32) -> (i32, i32, i32, i32) {
    %c0_i32 = arith.constant 0 : i32
    %c0_i32_0 = arith.constant 0 : i32
    %c0_i32_1 = arith.constant 0 : i32
    %c0_i32_2 = arith.constant 0 : i32
    %c0_i32_3 = arith.constant 0 : i32
    return %c0_i32, %c0_i32_0, %c0_i32_1, %c0_i32_2 : i32, i32, i32, i32
  }
  func.func @transform_2(%arg0: i32) -> (i32, i32, i32) {
    %c0_i32 = arith.constant 0 : i32
    %c0_i32_0 = arith.constant 0 : i32
    %c0_i32_1 = arith.constant 0 : i32
    %c0_i32_2 = arith.constant 0 : i32
    return %c0_i32, %c0_i32_0, %c0_i32_1 : i32, i32, i32
  }
  func.func @transform_3(%arg0: i32) -> (i32, i32) {
    %c0_i32 = arith.constant 0 : i32
    %c0_i32_0 = arith.constant 0 : i32
    %c0_i32_1 = arith.constant 0 : i32
    return %c0_i32, %c0_i32_0 : i32, i32
  }
  func.func @transform_4(%arg0: i32) -> (i32, i32, i32, i32) {
    %c0_i32 = arith.constant 0 : i32
    %c0_i32_0 = arith.constant 0 : i32
    %c0_i32_1 = arith.constant 0 : i32
    %c0_i32_2 = arith.constant 0 : i32
    %c0_i32_3 = arith.constant 0 : i32
    return %c0_i32, %c0_i32_0, %c0_i32_1, %c0_i32_2 : i32, i32, i32, i32
  }
  func.func @transform_5(%arg0: i32) -> (i32, i32, i32) {
    %c0_i32 = arith.constant 0 : i32
    %c0_i32_0 = arith.constant 0 : i32
    %c0_i32_1 = arith.constant 0 : i32
    %c0_i32_2 = arith.constant 0 : i32
    return %c0_i32, %c0_i32_0, %c0_i32_1 : i32, i32, i32
  }
  func.func @transform_6(%arg0: i32) -> (i32, i32) {
    %c0_i32 = arith.constant 0 : i32
    %c0_i32_0 = arith.constant 0 : i32
    %c0_i32_1 = arith.constant 0 : i32
    return %c0_i32, %c0_i32_0 : i32, i32
  }
  func.func @transform_7(%arg0: i32) -> (i32, i32, i32, i32) {
    %c0_i32 = arith.constant 0 : i32
    %c0_i32_0 = arith.constant 0 : i32
    %c0_i32_1 = arith.constant 0 : i32
    %c0_i32_2 = arith.constant 0 : i32
    %c0_i32_3 = arith.constant 0 : i32
    return %c0_i32, %c0_i32_0, %c0_i32_1, %c0_i32_2 : i32, i32, i32, i32
  }
  func.func @transform_8(%arg0: i32) -> (i32, i32, i32) {
    %c0_i32 = arith.constant 0 : i32
    %c0_i32_0 = arith.constant 0 : i32
    %c0_i32_1 = arith.constant 0 : i32
    %c0_i32_2 = arith.constant 0 : i32
    return %c0_i32, %c0_i32_0, %c0_i32_1 : i32, i32, i32
  }
  func.func @transform_9(%arg0: i32) -> (i32, i32) {
    %c0_i32 = arith.constant 0 : i32
    %c0_i32_0 = arith.constant 0 : i32
    %c0_i32_1 = arith.constant 0 : i32
    return %c0_i32, %c0_i32_0 : i32, i32
  }
  func.func @transform_10(%arg0: i32) -> (i32, i32, i32, i32) {
    %c0_i32 = arith.constant 0 : i32
    %c0_i32_0 = arith.constant 0 : i32
    %c0_i32_1 = arith.constant 0 : i32
    %c0_i32_2 = arith.constant 0 : i32
    %c0_i32_3 = arith.constant 0 : i32
    return %c0_i32, %c0_i32_0, %c0_i32_1, %c0_i32_2 : i32, i32, i32, i32
  }
  func.func @transform_11(%arg0: i32) -> (i32, i32, i32) {
    %c0_i32 = arith.constant 0 : i32
    %c0_i32_0 = arith.constant 0 : i32
    %c0_i32_1 = arith.constant 0 : i32
    %c0_i32_2 = arith.constant 0 : i32
    return %c0_i32, %c0_i32_0, %c0_i32_1 : i32, i32, i32
  }
  func.func @transform_12(%arg0: i32) -> (i32, i32) {
    %c0_i32 = arith.constant 0 : i32
    %c0_i32_0 = arith.constant 0 : i32
    %c0_i32_1 = arith.constant 0 : i32
    return %c0_i32, %c0_i32_0 : i32, i32
  }
  func.func @transform_13(%arg0: i32) -> (i32, i32, i32) {
    %c0_i32 = arith.constant 0 : i32
    %c0_i32_0 = arith.constant 0 : i32
    %c0_i32_1 = arith.constant 0 : i32
    %c0_i32_2 = arith.constant 0 : i32
    return %c0_i32, %c0_i32_0, %c0_i32_1 : i32, i32, i32
  }
  func.func @transform_14(%arg0: i32) -> (i32, i32) {
    %c0_i32 = arith.constant 0 : i32
    %c0_i32_0 = arith.constant 0 : i32
    %c0_i32_1 = arith.constant 0 : i32
    return %c0_i32, %c0_i32_0 : i32, i32
  }
  func.func @transform_15(%arg0: i32) -> (i32, i32) {
    %c0_i32 = arith.constant 0 : i32
    %c0_i32_0 = arith.constant 0 : i32
    %c0_i32_1 = arith.constant 0 : i32
    return %c0_i32, %c0_i32_0 : i32, i32
  }
  func.func @transform_16(%arg0: i32) -> (i32, i32) {
    %c0_i32 = arith.constant 0 : i32
    %c0_i32_0 = arith.constant 0 : i32
    %c0_i32_1 = arith.constant 0 : i32
    return %c0_i32, %c0_i32_0 : i32, i32
  }
  func.func @transform_17(%arg0: i32) -> (i32, i32) {
    %c0_i32 = arith.constant 0 : i32
    %c0_i32_0 = arith.constant 0 : i32
    %c0_i32_1 = arith.constant 0 : i32
    return %c0_i32, %c0_i32_0 : i32, i32
  }
  func.func @transform_18(%arg0: i32) -> (i32, i32) {
    %c0_i32 = arith.constant 0 : i32
    %c0_i32_0 = arith.constant 0 : i32
    %c0_i32_1 = arith.constant 0 : i32
    return %c0_i32, %c0_i32_0 : i32, i32
  }
  func.func @transform_19(%arg0: i32) -> (i32, i32, i32) {
    %c0_i32 = arith.constant 0 : i32
    %c0_i32_0 = arith.constant 0 : i32
    %c0_i32_1 = arith.constant 0 : i32
    return %arg0, %c0_i32, %c0_i32_0 : i32, i32, i32
  }
}

</mosaic_0001>

<bundles_post_ra>
// kernel: cnn2d_forward.1
= control target key start
LH: loop header
LB: loop body
LE: loop exit
PB: predicated region body
PF: predicated region fallthrough
CT: control target
= control target key end

     0   :  { %s15155_s0 = inlined_call_operand.hbm [shape: f32[2,48,80], index: 0, kind: input, shape index: {}]   ;;  %s15156_s1 = inlined_call_operand.hbm [shape: f32[2,3,80,400], index: 1, kind: input, shape index: {}]   ;;  %s15157_s2 = inlined_call_operand.hbm [shape: f32[2,24,48], index: 2, kind: input, shape index: {}]   ;;  %s15158_s3 = inlined_call_operand.hbm [shape: f32[1,400], index: 3, kind: input, shape index: {}]   ;;  %s15159_s4 = inlined_call_operand.hbm [shape: f32[2,3,400,360], index: 4, kind: input, shape index: {}]   ;;  %s15160_s5 = inlined_call_operand.hbm [shape: f32[2,11,22], index: 5, kind: input, shape index: {}]   ;;  %s15161_s6 = inlined_call_operand.hbm [shape: f32[1,360], index: 6, kind: input, shape index: {}]   ;;  %s15162_s7 = inlined_call_operand.hbm [shape: f32[2,3,360,140], index: 7, kind: input, shape index: {}]   ;;  %s15163_s8 = inlined_call_operand.hbm [shape: f32[2,4,9], index: 8, kind: input, shape index: {}]   ;;  %s15164_s9 = inlined_call_operand.hbm [shape: f32[1,140], index: 9, kind: input, shape index: {}]   ;;  %s15165_s10 = inlined_call_operand.hbm [shape: f32[2,3,140,40], index: 10, kind: input, shape index: {}]   ;;  %s15166_s11 = inlined_call_operand.hbm [shape: f32[2,1,2], index: 11, kind: input, shape index: {}]   ;;  %s15167_s12 = inlined_call_operand.hbm [shape: f32[1,40], index: 12, kind: input, shape index: {}]   ;;  %s15168_s13 = inlined_call_operand.hbm [shape: f32[1,40,500], index: 13, kind: input, shape index: {}]   ;;  %s15169_s14 = inlined_call_operand.hbm [shape: f32[1,500], index: 14, kind: input, shape index: {}]   ;;  %s15170_s15 = inlined_call_operand.hbm [shape: f32[500,50], index: 15, kind: input, shape index: {}]   ;;  %s15171_s16 = inlined_call_operand.hbm [shape: f32[1,50], index: 16, kind: input, shape index: {}]   ;;  %s15172_s17 = inlined_call_operand.hbm [shape: f32[50,5], index: 17, kind: input, shape index: {}]   ;;  %s15173_s18 = inlined_call_operand.hbm [shape: f32[1,5], index: 18, kind: input, shape index: {}]   ;;  %s15174_s19 = inlined_call_operand.hbm [shape: f32[2,1,5], index: 19, kind: output, shape index: {}]  }
   0x1   :  { %15216 = sst [smem:[#allocation56_spill]] %s15155_s0 }
   0x2   :  { %15217 = sst [smem:[#allocation57_spill]] %s15156_s1 }
   0x3   :  { %15218 = sst [smem:[#allocation58_spill]] %s15157_s2 }
   0x4   :  { %15219 = sst [smem:[#allocation59_spill]] %s15158_s3 }
   0x5   :  { %15220 = sst [smem:[#allocation60_spill]] %s15159_s4 }
   0x6   :  { %15221 = sst [smem:[#allocation61_spill]] %s15160_s5 }
   0x7   :  { %15222 = sst [smem:[#allocation62_spill]] %s15161_s6 }
   0x8   :  { %15223 = sst [smem:[#allocation63_spill]] %s15162_s7 }
   0x9   :  { %15224 = sst [smem:[#allocation64_spill]] %s15163_s8 }
   0xa   :  { %15225 = sst [smem:[#allocation65_spill]] %s15164_s9 }
   0xb   :  { %15226 = sst [smem:[#allocation66_spill]] %s15169_s14 }
   0xc   :  { %15227 = sst [smem:[#allocation67_spill]] %s15171_s16 }
   0xd   :  { %15228 = sst [smem:[#allocation68_spill]] %s15173_s18 }
   0xe   :  { %15229 = sst [smem:[#allocation69_spill]] %s15174_s19 }
   0xf   :  { %24 = vsyncpa [#allocation4], 0 }
  0x10   :  { %26 = vsyncpa [#allocation4 + $0x1], 0 }
  0x11   :  { %27 = vsyncpa [#allocation7], 0 }
  0x12   :  { %28 = vsyncpa [#allocation10], 0 }
  0x13   :  { %29 = vsyncpa [#allocation13], 0 }
  0x14   :  { %30 = vsyncpa [#allocation16], 0 }
  0x15   :  { %31 = vsyncpa [#allocation19], 0 }
  0x16   :  { %32 = vsyncpa [#allocation22], 0 }
  0x17   :  { %33 = vsyncpa [#allocation25], 0 }
  0x18   :  { %34 = vsyncpa [#allocation28], 0 }
  0x19   :  { %35 = vsyncpa [#allocation31], 0 }
  0x1a   :  { %36 = vsyncpa [#allocation5], 0 }
  0x1b   :  { %38 = vsyncpa [#allocation5 + $0x1], 0  ;;  %s13391_s0 = smov 0   ;;  %s13393_s30 = smov 0  }
  0x1c   :  { %s13395_s20 = smov 0   ;;  %s13397_s21 = smov 0  }
  0x1d LB: > { %15230 = sst [smem:[#allocation45_spill]] %s13242_s0  ;;  %s13256_s1 = smov [#allocation6]   ;;  %s13254_s21 = sphi %s13397_s21, %s13833_s21   ;;  %s13250_s20 = sphi %s13395_s20, %s15315_s20   ;;  %s13246_s30 = sphi %s13393_s30, %s15314_s30   ;;  %s13242_s0 = sphi %s13391_s0, %s15313_s0  }
  0x1e   : > { %15231 = sst [smem:[#allocation46_spill]] %s13246_s30  ;;  %s491_s22 = sshll.u32 %s13256_s1, 4  ;;  %s13417_s22 = int_to_ptr.vmem [resolvable:$true] %s491_s22 }
  0x1f   : > { %15232 = sst [smem:[#allocation47_spill]] %s13250_s20  ;;  %s13412_s2 = sadd.s32 4294967295, %s13254_s21  }
  0x20   : > { %15233 = sst [smem:[#allocation48_spill]] %s13254_s21  ;;  %p9490_p0 = scmp.ge.s32.totalorder %s13254_s21, 1 }
  0x21   : > { %15234 = sst [smem:[#allocation49_spill]] %s13412_s2  ;;  %p15191_p1 = scmp.eq.s32.totalorder %s13412_s2, 0 }
  0x22   : > { %p479_p2 = scmp.lt.s32.totalorder %s13254_s21, 3  ;;  %s13257_s24 = smov [#allocation9]  }
  0x23   : > { %s518_s25 = sshll.u32 %s13257_s24, 4  ;;  %s13258_s26 = smov [#allocation12]   ;;  %s13432_s25 = int_to_ptr.vmem [resolvable:$true] %s518_s25 }
  0x24   : > { %p13419_p3 = pnand %p9490_p0, %p479_p2  ;;  %s13434_s27 = sshll.u32 %s13258_s26, 4  ;;  %s542_s27 = int_to_ptr.vmem [resolvable:$true] %s13434_s27 }
  0x25   : > { %s15238_s1 = sld [smem:[#allocation57_spill]] }
  0x26   : > { %s15235_s23 = scalar_select %p13419_p3, 1, 0 }
  0x27   : > { %p12448_p5 = pneg %p13419_p3 }
  0x28   : > { %15236 = sst [smem:[#allocation50_spill]] %s15235_s23 }
  0x29   : > { %p13428_p6 = pnand %p12448_p5, %p15191_p1 }
  0x2b   : > { %s12618_s19 = scalar_lea.hbm %s15238_s1, 30720  ;;  %p13444_p8 = pneg %p13428_p6 }
  0x2c   : > { %p12619_p7 = scmp.ne.s32.totalorder %s15238_s1, %s12618_s19  ;;  %p12625_p11 = scmp.lt.u32.totalorder %s12618_s19, %s15238_s1 }
  0x2e   : > { %p12621_p9 = pnand %p13444_p8, %p12619_p7 }
  0x30   : > { %p12622_p10 = pneg %p12621_p9 }
  0x32   : > { %p12627_p12 = pnand %p12625_p11, %p12622_p10 }
  0x34   : > { %12630 = shalt.err (!%p12627_p12)
}
  0x35   : > { %s12631_s0 = scalar_lea.vmem %s13417_s22, 30720  ;;  %p12639_p5 = scmp.lt.s32.totalorder %s13417_s22, %s13417_s22 }
  0x36   : > { %p12632_p13 = scmp.ne.s32.totalorder %s13417_s22, %s12631_s0  ;;  %p12640_p4 = scmp.lt.s32.totalorder %s12631_s0, %s12631_s0 }
  0x38   : > { %p12634_p0 = pnand %p12632_p13, %p13444_p8  ;;  %p12641_p7 = por %p12640_p4, %p12639_p5 }
  0x3a   : > { %p12635_p2 = pneg %p12634_p0 }
  0x3c   : > { %p12642_p9 = pnand %p12641_p7, %p12635_p2 }
  0x3e   : > { %12645 = shalt.err (!%p12642_p9)
}
  0x3f   : > { %s15193_s23 = smov 512   ;;  %s15198_s19 = smov 32  }
  0x40   : > { %12451 = dma.hbm_to_vmem [thread:$0]  (!%p13428_p6), %s15238_s1, 30720, %s13417_s22, [#allocation7], %s15193_s23, %s15193_s23, %s15198_s19  }
  0x41   : > { %s15240_s30 = sld [smem:[#allocation59_spill]] }
  0x47   : > { %s15241_s18 = smov %s15240_s30  ;;  %s12646_s0 = scalar_lea.hbm %s15240_s30, 64 }
  0x48   : > { %p12647_p4 = scmp.ne.s32.totalorder %s15241_s18, %s12646_s0  ;;  %p12653_p12 = scmp.lt.u32.totalorder %s12646_s0, %s15241_s18 }
  0x4a   : > { %p12649_p10 = pnand %p12647_p4, %p13444_p8 }
  0x4c   : > { %p12650_p11 = pneg %p12649_p10 }
  0x4e   : > { %p12655_p13 = pnand %p12653_p12, %p12650_p11 }
  0x50   : > { %12658 = shalt.err (!%p12655_p13)
}
  0x51   : > { %s12659_s22 = scalar_lea.vmem %s13432_s25, 64  ;;  %p12667_p7 = scmp.lt.s32.totalorder %s13432_s25, %s13432_s25 }
  0x52   : > { %p12660_p0 = scmp.ne.s32.totalorder %s13432_s25, %s12659_s22  ;;  %p12668_p9 = scmp.lt.s32.totalorder %s12659_s22, %s12659_s22 }
  0x54   : > { %p12662_p2 = pnand %p12660_p0, %p13444_p8  ;;  %p12669_p4 = por %p12668_p9, %p12667_p7 }
  0x56   : > { %p12663_p5 = pneg %p12662_p2 }
  0x58   : > { %p12670_p10 = pnand %p12669_p4, %p12663_p5 }
  0x5a   : > { %12673 = shalt.err (!%p12670_p10)
}
  0x5b   : > { %12457 = dma.hbm_to_vmem [thread:$0]  (!%p13428_p6), %s15241_s18, 64, %s13432_s25, [#allocation10]  }
  0x5c   : > { %s15242_s5 = sld [smem:[#allocation61_spill]] }
  0x62   : > { %s12674_s21 = scalar_lea.hbm %s15242_s5, 512 }
  0x63   : > { %p12675_p11 = scmp.ne.s32.totalorder %s15242_s5, %s12674_s21  ;;  %p12681_p0 = scmp.lt.u32.totalorder %s12674_s21, %s15242_s5 }
  0x65   : > { %p12677_p12 = pnand %p12675_p11, %p13444_p8 }
  0x67   : > { %p12678_p13 = pneg %p12677_p12 }
  0x69   : > { %p12683_p2 = pnand %p12681_p0, %p12678_p13 }
  0x6b   : > { %12686 = shalt.err (!%p12683_p2)
}
  0x6c   : > { %s12687_s0 = scalar_lea.vmem %s542_s27, 512  ;;  %p12695_p4 = scmp.lt.s32.totalorder %s542_s27, %s542_s27 }
  0x6d   : > { %p12688_p5 = scmp.ne.s32.totalorder %s542_s27, %s12687_s0  ;;  %p12696_p10 = scmp.lt.s32.totalorder %s12687_s0, %s12687_s0 }
  0x6f   : > { %p12690_p7 = pnand %p12688_p5, %p13444_p8  ;;  %p12697_p1 = por %p12696_p10, %p12695_p4 }
  0x71   : > { %p12691_p9 = pneg %p12690_p7 }
  0x73   : > { %p12698_p3 = pnand %p12697_p1, %p12691_p9 }
  0x75   : > { %12701 = shalt.err (!%p12698_p3)
}
  0x76   : > { %s15194_s25 = smov 128   ;;  %s15196_s22 = smov 8  }
  0x77   : > { %12463 = dma.hbm_to_vmem [thread:$0]  (!%p13428_p6), %s15242_s5, 512, %s542_s27, [#allocation13], %s15194_s25, %s15194_s25, %s15196_s22  }
  0x78   : > { %s13263_s30 = smov [#allocation15]   ;;  %s15243_s7 = sld [smem:[#allocation63_spill]] }
  0x79   : > { %s565_s20 = sshll.u32 %s13263_s30, 4  ;;  %s566_s20 = int_to_ptr.vmem [resolvable:$true] %s565_s20 }
  0x7e   : > { %s12702_s28 = scalar_lea.hbm %s15243_s7, 69120 }
  0x7f   : > { %p12703_p1 = scmp.ne.s32.totalorder %s15243_s7, %s12702_s28  ;;  %p12709_p12 = scmp.lt.u32.totalorder %s12702_s28, %s15243_s7 }
  0x81   : > { %p12705_p3 = pnand %p12703_p1, %p13444_p8 }
  0x83   : > { %p12706_p11 = pneg %p12705_p3 }
  0x85   : > { %p12711_p13 = pnand %p12709_p12, %p12706_p11 }
  0x87   : > { %12714 = shalt.err (!%p12711_p13)
}
  0x88   : > { %s12715_s27 = scalar_lea.vmem %s566_s20, 69120  ;;  %p12723_p7 = scmp.lt.s32.totalorder %s566_s20, %s566_s20 }
  0x89   : > { %p12716_p0 = scmp.ne.s32.totalorder %s566_s20, %s12715_s27  ;;  %p12724_p9 = scmp.lt.s32.totalorder %s12715_s27, %s12715_s27 }
  0x8b   : > { %p12718_p2 = pnand %p12716_p0, %p13444_p8  ;;  %p12725_p4 = por %p12724_p9, %p12723_p7 }
  0x8d   : > { %p12719_p5 = pneg %p12718_p2 }
  0x8f   : > { %p12726_p10 = pnand %p12725_p4, %p12719_p5 }
  0x91   : > { %12729 = shalt.err (!%p12726_p10)
}
  0x92   : > { %s13264_s14 = smov 256   ;;  %s13265_s16 = smov 16  }
  0x93   : > { %12469 = dma.hbm_to_vmem [thread:$0]  (!%p13428_p6), %s15243_s7, 69120, %s566_s20, [#allocation16], %s13264_s14, %s13264_s14, %s13265_s16  }
  0x94   : > { %s13266_s21 = smov [#allocation18]   ;;  %s13267_s28 = smov [#allocation21]  }
  0x95   : > { %s592_s2 = sshll.u32 %s13266_s21, 4  ;;  %s615_s29 = sshll.u32 %s13267_s28, 4  ;;  %s593_s2 = int_to_ptr.vmem [resolvable:$true] %s592_s2  ;;  %s13532_s29 = int_to_ptr.vmem [resolvable:$true] %s615_s29 }
  0x96   : > { %s15244_s9 = sld [smem:[#allocation65_spill]] }
  0x9c   : > { %s12730_s27 = scalar_lea.hbm %s15244_s9, 32 }
  0x9d   : > { %p12731_p1 = scmp.ne.s32.totalorder %s15244_s9, %s12730_s27  ;;  %p12737_p12 = scmp.lt.u32.totalorder %s12730_s27, %s15244_s9 }
  0x9f   : > { %p12733_p3 = pnand %p12731_p1, %p13444_p8 }
  0xa1   : > { %p12734_p11 = pneg %p12733_p3 }
  0xa3   : > { %p12739_p13 = pnand %p12737_p12, %p12734_p11 }
  0xa5   : > { %12742 = shalt.err (!%p12739_p13)
}
  0xa6   : > { %s12743_s14 = scalar_lea.vmem %s593_s2, 32  ;;  %p12751_p7 = scmp.lt.s32.totalorder %s593_s2, %s593_s2 }
  0xa7   : > { %p12744_p0 = scmp.ne.s32.totalorder %s593_s2, %s12743_s14  ;;  %p12752_p9 = scmp.lt.s32.totalorder %s12743_s14, %s12743_s14 }
  0xa9   : > { %p12746_p2 = pnand %p12744_p0, %p13444_p8  ;;  %p12753_p4 = por %p12752_p9, %p12751_p7 }
  0xab   : > { %p12747_p5 = pneg %p12746_p2 }
  0xad   : > { %p12754_p10 = pnand %p12753_p4, %p12747_p5 }
  0xaf   : > { %12757 = shalt.err (!%p12754_p10)
}
  0xb0   : > { %12475 = dma.hbm_to_vmem [thread:$0]  (!%p13428_p6), %s15244_s9, 32, %s593_s2, [#allocation19]  }
  0xb1   : > { %s12758_s28 = scalar_lea.hbm %s15166_s11, 32 }
  0xb2   : > { %p12759_p1 = scmp.ne.s32.totalorder %s15166_s11, %s12758_s28  ;;  %p12765_p12 = scmp.lt.u32.totalorder %s12758_s28, %s15166_s11 }
  0xb4   : > { %p12761_p3 = pnand %p12759_p1, %p13444_p8 }
  0xb6   : > { %p12762_p11 = pneg %p12761_p3 }
  0xb8   : > { %p12767_p13 = pnand %p12765_p12, %p12762_p11 }
  0xba   : > { %12770 = shalt.err (!%p12767_p13)
}
  0xbb   : > { %s12771_s2 = scalar_lea.vmem %s13532_s29, 32  ;;  %p12779_p7 = scmp.lt.s32.totalorder %s13532_s29, %s13532_s29 }
  0xbc   : > { %p12772_p0 = scmp.ne.s32.totalorder %s13532_s29, %s12771_s2  ;;  %p12780_p9 = scmp.lt.s32.totalorder %s12771_s2, %s12771_s2 }
  0xbe   : > { %p12774_p2 = pnand %p12772_p0, %p13444_p8  ;;  %p12781_p4 = por %p12780_p9, %p12779_p7 }
  0xc0   : > { %p12775_p5 = pneg %p12774_p2 }
  0xc2   : > { %p12782_p10 = pnand %p12781_p4, %p12775_p5 }
  0xc4   : > { %12785 = shalt.err (!%p12782_p10)
}
  0xc5   : > { %s13268_s20 = smov 1   ;;  %s13269_s22 = smov [#allocation24]  }
  0xc6   : > { %12481 = dma.hbm_to_vmem [thread:$0]  (!%p13428_p6), %s15166_s11, 32, %s13532_s29, [#allocation22], %s13265_s16, %s13265_s16, %s13268_s20  }
  0xc7   : > { %s639_s30 = sshll.u32 %s13269_s22, 4  ;;  %s13270_s21 = smov [#allocation27]   ;;  %s640_s30 = int_to_ptr.vmem [resolvable:$true] %s639_s30 }
  0xc8   : > { %s663_s28 = sshll.u32 %s13270_s21, 4  ;;  %s12786_s27 = scalar_lea.hbm %s15168_s13, 2560  ;;  %s664_s28 = int_to_ptr.vmem [resolvable:$true] %s663_s28 }
  0xc9   : > { %p12787_p1 = scmp.ne.s32.totalorder %s15168_s13, %s12786_s27  ;;  %p12793_p12 = scmp.lt.u32.totalorder %s12786_s27, %s15168_s13 }
  0xcb   : > { %p12789_p3 = pnand %p12787_p1, %p13444_p8 }
  0xcd   : > { %p12790_p11 = pneg %p12789_p3 }
  0xcf   : > { %p12795_p13 = pnand %p12793_p12, %p12790_p11 }
  0xd1   : > { %12798 = shalt.err (!%p12795_p13)
}
  0xd2   : > { %s12799_s16 = scalar_lea.vmem %s640_s30, 2560  ;;  %p12807_p7 = scmp.lt.s32.totalorder %s640_s30, %s640_s30 }
  0xd3   : > { %p12800_p0 = scmp.ne.s32.totalorder %s640_s30, %s12799_s16  ;;  %p12808_p9 = scmp.lt.s32.totalorder %s12799_s16, %s12799_s16 }
  0xd5   : > { %p12802_p2 = pnand %p12800_p0, %p13444_p8  ;;  %p12809_p4 = por %p12808_p9, %p12807_p7 }
  0xd7   : > { %p12803_p5 = pneg %p12802_p2 }
  0xd9   : > { %p12810_p10 = pnand %p12809_p4, %p12803_p5 }
  0xdb   : > { %12813 = shalt.err (!%p12810_p10)
}
  0xdc   : > { %s15245_s29 = smov 32   ;;  %s15246_s20 = smov 512  }
  0xdd   : > { %12487 = dma.hbm_to_vmem [thread:$0]  (!%p13428_p6), %s15168_s13, 2560, %s640_s30, [#allocation25], %s15246_s20, %s15246_s20, %s15245_s29  }
  0xde   : > { %s12814_s26 = scalar_lea.hbm %s15170_s15, 8064 }
  0xdf   : > { %p12815_p1 = scmp.ne.s32.totalorder %s15170_s15, %s12814_s26  ;;  %p12821_p12 = scmp.lt.u32.totalorder %s12814_s26, %s15170_s15 }
  0xe1   : > { %p12817_p3 = pnand %p12815_p1, %p13444_p8 }
  0xe3   : > { %p12818_p11 = pneg %p12817_p3 }
  0xe5   : > { %p12823_p13 = pnand %p12821_p12, %p12818_p11 }
  0xe7   : > { %12826 = shalt.err (!%p12823_p13)
}
  0xe8   : > { %s12827_s14 = scalar_lea.vmem %s664_s28, 8064  ;;  %p12835_p7 = scmp.lt.s32.totalorder %s664_s28, %s664_s28 }
  0xe9   : > { %p12828_p0 = scmp.ne.s32.totalorder %s664_s28, %s12827_s14  ;;  %p12836_p9 = scmp.lt.s32.totalorder %s12827_s14, %s12827_s14 }
  0xeb   : > { %p12830_p2 = pnand %p12828_p0, %p13444_p8  ;;  %p12837_p4 = por %p12836_p9, %p12835_p7 }
  0xed   : > { %p12831_p5 = pneg %p12830_p2 }
  0xef   : > { %p12838_p10 = pnand %p12837_p4, %p12831_p5 }
  0xf1   : > { %12841 = shalt.err (!%p12838_p10)
}
  0xf2   : > { %s15247_s30 = smov 8   ;;  %s15248_s16 = smov 128  }
  0xf3   : > { %12493 = dma.hbm_to_vmem [thread:$0]  (!%p13428_p6), %s15170_s15, 8064, %s664_s28, [#allocation28], %s15248_s16, %s15248_s16, %s15247_s30  }
  0xf4   : > { %s13271_s19 = smov [#allocation30]   ;;  %s13272_s22 = smov [#allocation8]  }
  0xf5   : > { %s687_s25 = sshll.u32 %s13271_s19, 4  ;;  %s504_s21 = sshll.u32 %s13272_s22, 4  ;;  %s688_s25 = int_to_ptr.vmem [resolvable:$true] %s687_s25  ;;  %s505_s21 = int_to_ptr.vmem [resolvable:$true] %s504_s21 }
  0xf6   : > { %s12842_s27 = scalar_lea.hbm %s15172_s17, 896 }
  0xf7   : > { %p12843_p1 = scmp.ne.s32.totalorder %s15172_s17, %s12842_s27  ;;  %p12849_p12 = scmp.lt.u32.totalorder %s12842_s27, %s15172_s17 }
  0xf9   : > { %p12845_p3 = pnand %p12843_p1, %p13444_p8 }
  0xfb   : > { %p12846_p11 = pneg %p12845_p3 }
  0xfd   : > { %p12851_p13 = pnand %p12849_p12, %p12846_p11 }
  0xff   : > { %12854 = shalt.err (!%p12851_p13)
}
 0x100   : > { %s12855_s28 = scalar_lea.vmem %s688_s25, 896  ;;  %p12863_p7 = scmp.lt.s32.totalorder %s688_s25, %s688_s25 }
 0x101   : > { %p12856_p0 = scmp.ne.s32.totalorder %s688_s25, %s12855_s28  ;;  %p12864_p9 = scmp.lt.s32.totalorder %s12855_s28, %s12855_s28 }
 0x103   : > { %p12858_p2 = pnand %p12856_p0, %p13444_p8  ;;  %p12865_p4 = por %p12864_p9, %p12863_p7 }
 0x105   : > { %p12859_p5 = pneg %p12858_p2 }
 0x107   : > { %p12866_p10 = pnand %p12865_p4, %p12859_p5 }
 0x109   : > { %12869 = shalt.err (!%p12866_p10)
}
 0x10a   : > { %12499 = dma.hbm_to_vmem [thread:$0]  (!%p13428_p6), %s15172_s17, 896, %s688_s25, [#allocation31], %s15248_s16, %s15248_s16, %s15247_s30  }
 0x10b   : > { %s15249_s0 = sld [smem:[#allocation58_spill]] }
 0x111   : > { %s15250_s27 = smov %s15249_s0  ;;  %s12870_s23 = scalar_lea.hbm %s15249_s0, 768 }
 0x112   : > { %p12871_p1 = scmp.ne.s32.totalorder %s15250_s27, %s12870_s23  ;;  %p12877_p12 = scmp.lt.u32.totalorder %s12870_s23, %s15250_s27 }
 0x114   : > { %p12873_p3 = pnand %p12871_p1, %p13444_p8 }
 0x116   : > { %p12874_p11 = pneg %p12873_p3 }
 0x118   : > { %p12879_p13 = pnand %p12877_p12, %p12874_p11 }
 0x11a   : > { %12882 = shalt.err (!%p12879_p13)
}
 0x11b   : > { %s12883_s20 = scalar_lea.vmem %s505_s21, 768  ;;  %p12891_p7 = scmp.lt.s32.totalorder %s505_s21, %s505_s21 }
 0x11c   : > { %p12884_p0 = scmp.ne.s32.totalorder %s505_s21, %s12883_s20  ;;  %p12892_p9 = scmp.lt.s32.totalorder %s12883_s20, %s12883_s20 }
 0x11e   : > { %p12886_p2 = pnand %p12884_p0, %p13444_p8  ;;  %p12893_p4 = por %p12892_p9, %p12891_p7 }
 0x120   : > { %p12887_p5 = pneg %p12886_p2 }
 0x122   : > { %p12894_p10 = pnand %p12893_p4, %p12887_p5 }
 0x124   : > { %12897 = shalt.err (!%p12894_p10)
}
 0x125   : > { %12454 = dma.hbm_to_vmem [thread:$0]  (!%p13428_p6), %s15250_s27, 768, %s505_s21, [#allocation7], %s15248_s16, %s15248_s16, %s15247_s30  }
 0x126   : > { %s13273_s22 = smov [#allocation11]   ;;  %s15251_s4 = sld [smem:[#allocation60_spill]] }
 0x127   : > { %s528_s26 = sshll.u32 %s13273_s22, 4  ;;  %s529_s26 = int_to_ptr.vmem [resolvable:$true] %s528_s26 }
 0x12c   : > { %s12898_s2 = scalar_lea.hbm %s15251_s4, 115200 }
 0x12d   : > { %p12899_p1 = scmp.ne.s32.totalorder %s15251_s4, %s12898_s2  ;;  %p12905_p12 = scmp.lt.u32.totalorder %s12898_s2, %s15251_s4 }
 0x12f   : > { %p12901_p3 = pnand %p12899_p1, %p13444_p8 }
 0x131   : > { %p12902_p11 = pneg %p12901_p3 }
 0x133   : > { %p12907_p13 = pnand %p12905_p12, %p12902_p11 }
 0x135   : > { %12910 = shalt.err (!%p12907_p13)
}
 0x136   : > { %s12911_s21 = scalar_lea.vmem %s529_s26, 115200  ;;  %p12919_p7 = scmp.lt.s32.totalorder %s529_s26, %s529_s26 }
 0x137   : > { %p12912_p0 = scmp.ne.s32.totalorder %s529_s26, %s12911_s21  ;;  %p12920_p9 = scmp.lt.s32.totalorder %s12911_s21, %s12911_s21 }
 0x139   : > { %p12914_p2 = pnand %p12912_p0, %p13444_p8  ;;  %p12921_p4 = por %p12920_p9, %p12919_p7 }
 0x13b   : > { %p12915_p5 = pneg %p12914_p2 }
 0x13d   : > { %p12922_p10 = pnand %p12921_p4, %p12915_p5 }
 0x13f   : > { %12925 = shalt.err (!%p12922_p10)
}
 0x140   : > { %s13274_s25 = smov 384   ;;  %s13275_s19 = smov 24  }
 0x141   : > { %12460 = dma.hbm_to_vmem [thread:$0]  (!%p13428_p6), %s15251_s4, 115200, %s529_s26, [#allocation10], %s13274_s25, %s13274_s25, %s13275_s19  }
 0x142   : > { %s13276_s23 = smov [#allocation14]   ;;  %s13277_s14 = smov [#allocation17]  }
 0x143   : > { %s555_s2 = sshll.u32 %s13276_s23, 4  ;;  %s578_s29 = sshll.u32 %s13277_s14, 4  ;;  %s556_s2 = int_to_ptr.vmem [resolvable:$true] %s555_s2  ;;  %s13679_s29 = int_to_ptr.vmem [resolvable:$true] %s578_s29 }
 0x144   : > { %s15252_s6 = sld [smem:[#allocation62_spill]] }
 0x14a   : > { %s12926_s21 = scalar_lea.hbm %s15252_s6, 48 }
 0x14b   : > { %p12927_p1 = scmp.ne.s32.totalorder %s15252_s6, %s12926_s21  ;;  %p12933_p12 = scmp.lt.u32.totalorder %s12926_s21, %s15252_s6 }
 0x14d   : > { %p12929_p3 = pnand %p12927_p1, %p13444_p8 }
 0x14f   : > { %p12930_p11 = pneg %p12929_p3 }
 0x151   : > { %p12935_p13 = pnand %p12933_p12, %p12930_p11 }
 0x153   : > { %12938 = shalt.err (!%p12935_p13)
}
 0x154   : > { %s12939_s25 = scalar_lea.vmem %s556_s2, 48  ;;  %s12946_s19 = scalar_lea.vmem %s556_s2, 64 }
 0x155   : > { %p12940_p0 = scmp.ne.s32.totalorder %s556_s2, %s12939_s25  ;;  %p12947_p7 = scmp.lt.s32.totalorder %s556_s2, %s556_s2 }
 0x156   : > { %p12948_p9 = scmp.lt.s32.totalorder %s12946_s19, %s12939_s25 }
 0x157   : > { %p12942_p2 = pnand %p12940_p0, %p13444_p8 }
 0x158   : > { %p12949_p4 = por %p12948_p9, %p12947_p7 }
 0x159   : > { %p12943_p5 = pneg %p12942_p2 }
 0x15b   : > { %p12950_p10 = pnand %p12949_p4, %p12943_p5 }
 0x15d   : > { %12953 = shalt.err (!%p12950_p10)
}
 0x15e   : > { %12466 = dma.hbm_to_vmem [thread:$0]  (!%p13428_p6), %s15252_s6, 48, %s556_s2, [#allocation13]  }
 0x15f   : > { %s15253_s8 = sld [smem:[#allocation64_spill]] }
 0x165   : > { %s12954_s14 = scalar_lea.hbm %s15253_s8, 128 }
 0x166   : > { %p12955_p1 = scmp.ne.s32.totalorder %s15253_s8, %s12954_s14  ;;  %p12961_p12 = scmp.lt.u32.totalorder %s12954_s14, %s15253_s8 }
 0x168   : > { %p12957_p3 = pnand %p12955_p1, %p13444_p8 }
 0x16a   : > { %p12958_p11 = pneg %p12957_p3 }
 0x16c   : > { %p12963_p13 = pnand %p12961_p12, %p12958_p11 }
 0x16e   : > { %12966 = shalt.err (!%p12963_p13)
}
 0x16f   : > { %s12967_s2 = scalar_lea.vmem %s13679_s29, 128  ;;  %p12975_p7 = scmp.lt.s32.totalorder %s13679_s29, %s13679_s29 }
 0x170   : > { %p12968_p0 = scmp.ne.s32.totalorder %s13679_s29, %s12967_s2  ;;  %p12976_p9 = scmp.lt.s32.totalorder %s12967_s2, %s12967_s2 }
 0x172   : > { %p12970_p2 = pnand %p12968_p0, %p13444_p8  ;;  %p12977_p4 = por %p12976_p9, %p12975_p7 }
 0x174   : > { %p12971_p5 = pneg %p12970_p2 }
 0x176   : > { %p12978_p10 = pnand %p12977_p4, %p12971_p5 }
 0x178   : > { %12981 = shalt.err (!%p12978_p10)
}
 0x179   : > { %s13278_s26 = smov 64   ;;  %s13279_s25 = smov 4  }
 0x17a   : > { %12472 = dma.hbm_to_vmem [thread:$0]  (!%p13428_p6), %s15253_s8, 128, %s13679_s29, [#allocation16], %s13278_s26, %s13278_s26, %s13279_s25  }
 0x17b   : > { %s13280_s1 = smov [#allocation20]   ;;  %s13281_s23 = smov [#allocation23]  }
 0x17c   : > { %s602_s0 = sshll.u32 %s13280_s1, 4  ;;  %s629_s14 = sshll.u32 %s13281_s23, 4  ;;  %s603_s0 = int_to_ptr.vmem [resolvable:$true] %s602_s0  ;;  %s13722_s14 = int_to_ptr.vmem [resolvable:$true] %s629_s14 }
 0x17d   : > { %s12982_s21 = scalar_lea.hbm %s15165_s10, 13824 }
 0x17e   : > { %p12983_p1 = scmp.ne.s32.totalorder %s15165_s10, %s12982_s21  ;;  %p12989_p12 = scmp.lt.u32.totalorder %s12982_s21, %s15165_s10 }
 0x180   : > { %p12985_p3 = pnand %p12983_p1, %p13444_p8 }
 0x182   : > { %p12986_p11 = pneg %p12985_p3 }
 0x184   : > { %p12991_p13 = pnand %p12989_p12, %p12986_p11 }
 0x186   : > { %12994 = shalt.err (!%p12991_p13)
}
 0x187   : > { %s12995_s26 = scalar_lea.vmem %s603_s0, 13824  ;;  %p13003_p7 = scmp.lt.s32.totalorder %s603_s0, %s603_s0 }
 0x188   : > { %p12996_p0 = scmp.ne.s32.totalorder %s603_s0, %s12995_s26  ;;  %p13004_p9 = scmp.lt.s32.totalorder %s12995_s26, %s12995_s26 }
 0x18a   : > { %p12998_p2 = pnand %p12996_p0, %p13444_p8  ;;  %p13005_p4 = por %p13004_p9, %p13003_p7 }
 0x18c   : > { %p12999_p5 = pneg %p12998_p2 }
 0x18e   : > { %p13006_p10 = pnand %p13005_p4, %p12999_p5 }
 0x190   : > { %13009 = shalt.err (!%p13006_p10)
}
 0x191   : > { %12478 = dma.hbm_to_vmem [thread:$0]  (!%p13428_p6), %s15165_s10, 13824, %s603_s0, [#allocation19], %s15248_s16, %s15248_s16, %s15247_s30  }
 0x192   : > { %s13010_s28 = scalar_lea.hbm %s15167_s12, 16 }
 0x193   : > { %p13011_p1 = scmp.ne.s32.totalorder %s15167_s12, %s13010_s28  ;;  %p13017_p12 = scmp.lt.u32.totalorder %s13010_s28, %s15167_s12 }
 0x195   : > { %p13013_p3 = pnand %p13011_p1, %p13444_p8 }
 0x197   : > { %p13014_p11 = pneg %p13013_p3 }
 0x199   : > { %p13019_p13 = pnand %p13017_p12, %p13014_p11 }
 0x19b   : > { %13022 = shalt.err (!%p13019_p13)
}
 0x19c   : > { %s13023_s0 = scalar_lea.vmem %s13722_s14, 16  ;;  %s13030_s19 = scalar_lea.vmem %s13722_s14, 32 }
 0x19d   : > { %p13024_p0 = scmp.ne.s32.totalorder %s13722_s14, %s13023_s0  ;;  %p13031_p7 = scmp.lt.s32.totalorder %s13722_s14, %s13722_s14 }
 0x19e   : > { %p13032_p9 = scmp.lt.s32.totalorder %s13030_s19, %s13023_s0 }
 0x19f   : > { %p13026_p2 = pnand %p13024_p0, %p13444_p8 }
 0x1a0   : > { %p13033_p4 = por %p13032_p9, %p13031_p7 }
 0x1a1   : > { %p13027_p5 = pneg %p13026_p2 }
 0x1a3   : > { %p13034_p10 = pnand %p13033_p4, %p13027_p5 }
 0x1a5   : > { %13037 = shalt.err (!%p13034_p10)
}
 0x1a6   : > { %12484 = dma.hbm_to_vmem [thread:$0]  (!%p13428_p6), %s15167_s12, 16, %s13722_s14, [#allocation22]  }
 0x1a7   : > { %s13282_s25 = smov [#allocation26]   ;;  %s13283_s1 = smov [#allocation29]  }
 0x1a8   : > { %s653_s5 = sshll.u32 %s13282_s25, 4  ;;  %s677_s23 = sshll.u32 %s13283_s1, 4  ;;  %s654_s5 = int_to_ptr.vmem [resolvable:$true] %s653_s5  ;;  %s13769_s23 = int_to_ptr.vmem [resolvable:$true] %s677_s23 }
 0x1a9   : > { %s15254_s21 = sld [smem:[#allocation66_spill]] }
 0x1af   : > { %s15255_s22 = smov %s15254_s21  ;;  %s13038_s2 = scalar_lea.hbm %s15254_s21, 64 }
 0x1b0   : > { %p13039_p1 = scmp.ne.s32.totalorder %s15255_s22, %s13038_s2  ;;  %p13045_p12 = scmp.lt.u32.totalorder %s13038_s2, %s15255_s22 }
 0x1b2   : > { %p13041_p3 = pnand %p13039_p1, %p13444_p8 }
 0x1b4   : > { %p13042_p11 = pneg %p13041_p3 }
 0x1b6   : > { %p13047_p13 = pnand %p13045_p12, %p13042_p11 }
 0x1b8   : > { %13050 = shalt.err (!%p13047_p13)
}
 0x1b9   : > { %s13051_s26 = scalar_lea.vmem %s654_s5, 64  ;;  %p13059_p7 = scmp.lt.s32.totalorder %s654_s5, %s654_s5 }
 0x1ba   : > { %p13052_p0 = scmp.ne.s32.totalorder %s654_s5, %s13051_s26  ;;  %p13060_p9 = scmp.lt.s32.totalorder %s13051_s26, %s13051_s26 }
 0x1bc   : > { %p13054_p2 = pnand %p13052_p0, %p13444_p8  ;;  %p13061_p4 = por %p13060_p9, %p13059_p7 }
 0x1be   : > { %p13055_p5 = pneg %p13054_p2 }
 0x1c0   : > { %p13062_p10 = pnand %p13061_p4, %p13055_p5 }
 0x1c2   : > { %13065 = shalt.err (!%p13062_p10)
}
 0x1c3   : > { %12490 = dma.hbm_to_vmem [thread:$0]  (!%p13428_p6), %s15255_s22, 64, %s654_s5, [#allocation25]  }
 0x1c4   : > { %s15256_s21 = sld [smem:[#allocation67_spill]] }
 0x1ca   : > { %s15257_s2 = smov %s15256_s21  ;;  %s13066_s0 = scalar_lea.hbm %s15256_s21, 16 }
 0x1cb   : > { %p13067_p1 = scmp.ne.s32.totalorder %s15257_s2, %s13066_s0  ;;  %p13073_p12 = scmp.lt.u32.totalorder %s13066_s0, %s15257_s2 }
 0x1cd   : > { %p13069_p3 = pnand %p13067_p1, %p13444_p8 }
 0x1cf   : > { %p13070_p11 = pneg %p13069_p3 }
 0x1d1   : > { %p13075_p13 = pnand %p13073_p12, %p13070_p11 }
 0x1d3   : > { %13078 = shalt.err (!%p13075_p13)
}
 0x1d4   : > { %s13079_s5 = scalar_lea.vmem %s13769_s23, 16  ;;  %s13086_s25 = scalar_lea.vmem %s13769_s23, 32 }
 0x1d5   : > { %p13080_p0 = scmp.ne.s32.totalorder %s13769_s23, %s13079_s5  ;;  %p13087_p7 = scmp.lt.s32.totalorder %s13769_s23, %s13769_s23 }
 0x1d6   : > { %p13088_p9 = scmp.lt.s32.totalorder %s13086_s25, %s13079_s5 }
 0x1d7   : > { %p13082_p2 = pnand %p13080_p0, %p13444_p8 }
 0x1d8   : > { %p13089_p4 = por %p13088_p9, %p13087_p7 }
 0x1d9   : > { %p13083_p5 = pneg %p13082_p2 }
 0x1db   : > { %p13090_p10 = pnand %p13089_p4, %p13083_p5 }
 0x1dd   : > { %13093 = shalt.err (!%p13090_p10)
}
 0x1de   : > { %12496 = dma.hbm_to_vmem [thread:$0]  (!%p13428_p6), %s15257_s2, 16, %s13769_s23, [#allocation28]  }
 0x1df   : > { %s13284_s20 = smov [#allocation32]   ;;  %s15258_s29 = sld [smem:[#allocation68_spill]] }
 0x1e0   : > { %s701_s21 = sshll.u32 %s13284_s20, 4  ;;  %s702_s21 = int_to_ptr.vmem [resolvable:$true] %s701_s21 }
 0x1e5   : > { %s13094_s14 = scalar_lea.hbm %s15258_s29, 16 }
 0x1e6   : > { %p13095_p1 = scmp.ne.s32.totalorder %s15258_s29, %s13094_s14  ;;  %p13101_p12 = scmp.lt.u32.totalorder %s13094_s14, %s15258_s29 }
 0x1e8   : > { %p13097_p3 = pnand %p13095_p1, %p13444_p8 }
 0x1ea   : > { %p13098_p11 = pneg %p13097_p3 }
 0x1ec   : > { %p13103_p13 = pnand %p13101_p12, %p13098_p11 }
 0x1ee   : > { %13106 = shalt.err (!%p13103_p13)
}
 0x1ef   : > { %s13107_s23 = scalar_lea.vmem %s702_s21, 16  ;;  %s13114_s1 = scalar_lea.vmem %s702_s21, 32 }
 0x1f0   : > { %p13108_p0 = scmp.ne.s32.totalorder %s702_s21, %s13107_s23  ;;  %p13115_p7 = scmp.lt.s32.totalorder %s702_s21, %s702_s21 }
 0x1f1   : > { %p13116_p9 = scmp.lt.s32.totalorder %s13114_s1, %s13107_s23 }
 0x1f2   : > { %p13110_p2 = pnand %p13108_p0, %p13444_p8 }
 0x1f3   : > { %p13117_p4 = por %p13116_p9, %p13115_p7 }
 0x1f4   : > { %p13111_p5 = pneg %p13110_p2 }
 0x1f6   : > { %p13118_p10 = pnand %p13117_p4, %p13111_p5 }
 0x1f8   : > { %13121 = shalt.err (!%p13118_p10)
}
 0x1f9   : > { %s15259_s4 = sld [smem:[#allocation48_spill]]  ;;  %s15260_s0 = sld [smem:[#allocation47_spill]] }
 0x1fa   : > { %s15261_s19 = sld [smem:[#allocation46_spill]]  ;;  %s15262_s24 = sld [smem:[#allocation45_spill]] }
 0x1fb   : > { %s15263_s14 = sld [smem:[#allocation49_spill]]  ;;  %s15269_s2 = sld [smem:[#allocation56_spill]] }
 0x1fc   : > { %12502 = dma.hbm_to_vmem [thread:$0]  (!%p13428_p6), %s15258_s29, 16, %s702_s21, [#allocation31]  }
 0x1ff   : > { %s9489_s26 = sadd.s32 4294967294, %s15259_s4   ;;  %s13833_s21 = sadd.s32 1, %s15259_s4  }
 0x200   : > { %s51_s3 = sadd.s32 1, %s15260_s0  ;;  %s48_s5 = ssub.s32 %s15259_s4, %s13833_s21 }
 0x201   : > { %p58_p8 = scmp.ne.s32.totalorder %s15260_s0, %s15261_s19  ;;  %p49_p1 = scmp.eq.s32.totalorder %s48_s5, 0 }
 0x202   : > { %p59_p3 = scmp.eq.s32.totalorder %s15259_s4, 0  ;;  %p64_p11 = scmp.ne.s32.totalorder %s15261_s19, %s15262_s24 }
 0x203   : > { %p466_p12 = scmp.eq.s32.totalorder %s15263_s14, 1  ;;  %p15264_p0 = scmp.eq.s32.totalorder %s15263_s14, 0 }
 0x204   : > { %s13845_s25 = scalar_select %p49_p1, %s15260_s0, %s51_s3  }
 0x205   : > { %p60_p13 = por %p59_p3, %p58_p8  ;;  %p13849_p2 = por %p15264_p0, %p64_p11 }
 0x206   : > { %p13853_p6 = por %p466_p12, %p58_p8  ;;  %p472_p5 = scmp.eq.s32.totalorder %s9489_s26, 1 }
 0x207   : > { %p12529_p7 = scmp.lt.s32.totalorder %s15259_s4, 2  ;;  %s712_s28 = sand.u32 1, %s15260_s0  }
 0x208   : > { %s15266_s1 = scalar_select %p13853_p6, 1, 0 }
 0x209   : > { %p13859_p9 = por %p472_p5, %p64_p11  ;;  %s12369_s19 = smul.u32 48, %s712_s28 }
 0x20a   : > { %p13863_p4 = pnand %p12529_p7, %p60_p13  ;;  %s12370_s14 = smul.u32 768, %s15259_s4 }
 0x20b   : > { %s15267_s20 = scalar_select %p13859_p9, 1, 0 }
 0x20c   : > { %s13871_s6 = scalar_lea.hbm %s15269_s2, %s12370_s14  ;;  %s716_s0 = scalar_lea.vmem [#allocation3], %s12369_s19 }
 0x20d   : > { %s723_s26 = sshll.u32 %s716_s0, 4  ;;  %s13875_s7 = scalar_lea.sflag [#allocation4], %s712_s28  ;;  %s13873_s26 = int_to_ptr.vmem [resolvable:$true] %s723_s26 }
 0x20e   : > { %s13122_s8 = scalar_lea.hbm %s13871_s6, 768  ;;  %p13124_p8 = pneg %p13863_p4 }
 0x20f   : > { %p13123_p10 = scmp.ne.s32.totalorder %s13871_s6, %s13122_s8  ;;  %s13127_s3 = scalar_lea.hbm %s15269_s2, 1536 }
 0x210   : > { %p13128_p11 = scmp.lt.u32.totalorder %s13871_s6, %s15269_s2  ;;  %p13129_p12 = scmp.lt.u32.totalorder %s13127_s3, %s13122_s8 }
 0x211   : > { %p13125_p1 = pnand %p13124_p8, %p13123_p10  ;;  %p13131_p0 = scmp.lt.u32.totalorder %s13122_s8, %s13871_s6 }
 0x212   : > { %p13130_p13 = por %p13129_p12, %p13128_p11 }
 0x213   : > { %p13126_p3 = pneg %p13125_p1 }
 0x214   : > { %p13132_p5 = por %p13131_p0, %p13130_p13 }
 0x216   : > { %p13133_p7 = pnand %p13132_p5, %p13126_p3 }
 0x218   : > { %13136 = shalt.err (!%p13133_p7)
}
 0x219   : > { %s13137_s28 = scalar_lea.vmem %s13873_s26, 768  ;;  %s13285_s19 = smov [#allocation3]  }
 0x21a   : > { %p13138_p10 = scmp.ne.s32.totalorder %s13873_s26, %s13137_s28  ;;  %s13142_s0 = sshll.u32 %s13285_s19, 4  ;;  %s13143_s0 = int_to_ptr.vmem [resolvable:$false] %s13142_s0 }
 0x21b   : > { %s13144_s9 = scalar_lea.vmem %s13143_s0, 1536  ;;  %p13145_p6 = scmp.lt.s32.totalorder %s13873_s26, %s13143_s0 }
 0x21c   : > { %p13140_p1 = pnand %p13138_p10, %p13124_p8  ;;  %p13146_p11 = scmp.lt.s32.totalorder %s13144_s9, %s13137_s28 }
 0x21e   : > { %p13141_p9 = pneg %p13140_p1  ;;  %p13147_p12 = por %p13146_p11, %p13145_p6 }
 0x220   : > { %p13148_p13 = pnand %p13147_p12, %p13141_p9 }
 0x222   : > { %13151 = shalt.err (!%p13148_p13)
}
 0x223   : > { %12506 = dma.hbm_to_vmem [thread:$0]  (!%p13863_p4), %s13871_s6, 768, %s13873_s26, %s13875_s7, %s15248_s16, %s15248_s16, %s15247_s30  }
 0x224   : > { %s15270_s8 = sld [smem:[#allocation50_spill]] }
 0x22a   : > { %p15271_p8 = scmp.ne.s32.totalorder %s15270_s8, 0 }
 0x22c   : > { %735 = sbr.rel (%p15271_p8) target bundleno = 4543 (0x11bf), region = 96 }
 0x233   : > { %s15272_s4 = sld [smem:[#allocation46_spill]] }
 0x239   : > { %s13909_s14 = sand.u32 1, %s15272_s4  }
 0x23a   : > { %s12371_s3 = smul.u32 48, %s13909_s14  ;;  %s738_s5 = scalar_lea.sflag [#allocation4], %s13909_s14 }
 0x23c   : > { %s13913_s28 = scalar_lea.vmem [#allocation3], %s12371_s3 }
 0x23d   : > { %13197 = dma.done.wait (%p13849_p2), %s738_s5, 768  }
 0x23e   : > { %13199 = vsyncadd (%p13849_p2), %s738_s5, 4294966528  ;;  %s15273_s24 = sld [smem:[#allocation49_spill]] }
 0x244   : > { %p15274_p6 = scmp.eq.s32.totalorder %s15273_s24, 0 }
 0x246   : > { %13201 = dma.done.wait (%p15274_p6), [#allocation7], 31488   ;;  %p15275_p9 = pmov %p15274_p6 }
 0x247   : > { %p15276_p4 = pmov %p15274_p6 }
 0x248   : > { %13203 = vsyncadd (%p15275_p9), [#allocation7], 4294935808 }
 0x249   : > { %13205 = dma.done.wait (%p15276_p4), [#allocation10], 115264   ;;  %p15277_p3 = pmov %p15276_p4 }
 0x24b   : > { %13207 = vsyncadd (%p15277_p3), [#allocation10], 4294852032  ;;  %p15278_p0 = pmov %p15277_p3 }
 0x24d   : > { %13209 = dma.done.wait (%p15278_p0), [#allocation13], 560   ;;  %p15279_p5 = pmov %p15278_p0 }
 0x24e   : > { %p15280_p2 = pmov %p15278_p0 }
 0x24f   : > { %13211 = vsyncadd (%p15279_p5), [#allocation13], 4294966736 }
 0x250   : > { %13213 = dma.done.wait (%p15280_p2), [#allocation16], 69248   ;;  %p15281_p7 = pmov %p15278_p0 }
 0x251   : > { %p15282_p10 = pmov %p15278_p0 }
 0x252   : > { %13215 = vsyncadd (%p15281_p7), [#allocation16], 4294898048 }
 0x253   : > { %13217 = dma.done.wait (%p15282_p10), [#allocation19], 13856   ;;  %p15283_p1 = pmov %p15278_p0 }
 0x254   : > { %p15284_p11 = pmov %p15278_p0 }
 0x255   : > { %13219 = vsyncadd (%p15283_p1), [#allocation19], 4294953440 }
 0x256   : > { %13221 = dma.done.wait (%p15284_p11), [#allocation22], 48   ;;  %p15285_p12 = pmov %p15278_p0 }
 0x257   : > { %p15286_p13 = pmov %p15278_p0 }
 0x258   : > { %13223 = vsyncadd (%p15285_p12), [#allocation22], 4294967248 }
 0x259   : > { %13225 = dma.done.wait (%p15286_p13), [#allocation25], 2624   ;;  %p15287_p8 = pmov %p15278_p0 }
 0x25a   : > { %p15288_p6 = pmov %p15278_p0 }
 0x25b   : > { %13227 = vsyncadd (%p15287_p8), [#allocation25], 4294964672 }
 0x25c   : > { %13229 = dma.done.wait (%p15288_p6), [#allocation28], 8080   ;;  %p15289_p9 = pmov %p15278_p0 }
 0x25d   : > { %p15290_p4 = pmov %p15278_p0 }
 0x25e   : > { %13231 = vsyncadd (%p15289_p9), [#allocation28], 4294959216 }
 0x25f   : > { %13233 = dma.done.wait (%p15290_p4), [#allocation31], 912   ;;  %p15291_p3 = pmov %p15278_p0 }
 0x260   : > { %vm867_vm0 = vcmask 647168   ;;  %v15203_v0 = vmov 0.0   ;;  %v932_v1 = vld [vmem:[#allocation6 + $0x148] sm:$0xff]  ;;  %v934_v3 = vld [vmem:[#allocation6 + $0x158] sm:$0xff]  ;;  %v931_v6 = vld [vmem:[#allocation6 + $0x140] sm:$0xff]  ;;  %vm876_vm1 = vcmask 654336  }
 0x261   : > { %13235 = vsyncadd (%p15291_p3), [#allocation31], 4294966384  ;;  %1068 = vmatprep.mubr.f32.mxu0 %v15203_v0  ;;  %1169 = vmatprep.mubr.f32.mxu1 %v15203_v0  ;;  %868 = vst.msk [vmem:[#allocation2] sm:$0x1] %vm867_vm0, %v15203_v0  ;;  %v936_v2 = vld [vmem:[#allocation6 + $0x168] sm:$0xff]  ;;  %v938_v5 = vld [vmem:[#allocation6 + $0x178] sm:$0xff] }
 0x262   : > { %869 = vst.msk [vmem:[#allocation2 + $0x31] sm:$0x1] %vm867_vm0, %v15203_v0  ;;  %v10055_v4 = vpack.c.bf16 %v936_v2, %v932_v1  ;;  %v935_v7 = vld [vmem:[#allocation6 + $0x160] sm:$0xff]  ;;  %v10075_v8 = vpack.c.bf16 %v938_v5, %v934_v3  ;;  %v933_v10 = vld [vmem:[#allocation6 + $0x150] sm:$0xff]  ;;  %v940_v12 = vld [vmem:[#allocation6 + $0x188] sm:$0xff]  ;;  %vm978_vm2 = vcmask 1046528  }
 0x263   : > { %v10057_v9 = vpack.c.bf16 %v935_v7, %v931_v6  ;;  %v937_v11 = vld [vmem:[#allocation6 + $0x170] sm:$0xff]  ;;  %v944_v14 = vld [vmem:[#allocation6 + $0x1a8] sm:$0xff]  ;;  %v942_v15 = vld [vmem:[#allocation6 + $0x198] sm:$0xff]  ;;  %vm1461_vm3 = vcmask 1045504   ;;  %vm2493_vm4 = vcmask 392192   ;;  %vm3272_vm13 = vcmask 130048  }
 0x264   : > { %10056 = vmatprep.subr.bf16.mxu0 %v10055_v4  ;;  %v10077_v13 = vpack.c.bf16 %v937_v11, %v933_v10  ;;  %v946_v16 = vld [vmem:[#allocation6 + $0x1b8] sm:$0xff]  ;;  %10076 = vmatprep.subr.bf16.mxu1 %v10075_v8  ;;  %v10059_v17 = vpack.c.bf16 %v944_v14, %v940_v12  ;;  %v939_v19 = vld [vmem:[#allocation6 + $0x180] sm:$0xff]  ;;  %v941_v21 = vld [vmem:[#allocation6 + $0x190] sm:$0xff]  ;;  %s9704_s6 = sshll.u32 %s15273_s24, 4  ;;  %s866_s7 = scalar_lea.vmem [#allocation33], %s13909_s14 }
 0x265   : > { %10058 = vmatpush1.bf16.msra.mxu0 %v10057_v9  ;;  %v10079_v18 = vpack.c.bf16 %v946_v16, %v942_v15  ;;  %v943_v20 = vld [vmem:[#allocation6 + $0x1a0] sm:$0xff]  ;;  %v945_v23 = vld [vmem:[#allocation6 + $0x1b0] sm:$0xff]  ;;  %v948_v24 = vld [vmem:[#allocation6 + $0x1c8] sm:$0xff]  ;;  %s9252_s30 = sshll.u32 %s866_s7, 4  ;;  %s15307_s26 = sld [smem:[#allocation69_spill]]  ;;  %s15112_s30 = int_to_ptr.vmem [resolvable:$true] %s9252_s30 }
 0x266   : > { %10078 = vmatpush1.bf16.msra.mxu1 %v10077_v13  ;;  %v10061_v22 = vpack.c.bf16 %v943_v20, %v939_v19  ;;  %v952_v25 = vld [vmem:[#allocation6 + $0x1e8] sm:$0xff]  ;;  %10060 = vmatprep.subr.bf16.mxu0 %v10059_v17  ;;  %v10081_v26 = vpack.c.bf16 %v945_v23, %v941_v21  ;;  %v950_v28 = vld [vmem:[#allocation6 + $0x1d8] sm:$0xff]  ;;  %v947_v30 = vld [vmem:[#allocation6 + $0x1c0] sm:$0xff]  ;;  %s9240_s0 = scalar_lea.sflag [#allocation5], %s13909_s14  ;;  %s13152_s9 = scalar_lea.vmem %s15112_s30, 16 }
 0x267   : > { %10080 = vmatprep.subr.bf16.mxu1 %v10079_v18  ;;  %v10063_v27 = vpack.c.bf16 %v952_v25, %v948_v24  ;;  %v954_v29 = vld [vmem:[#allocation6 + $0x1f8] sm:$0xff]  ;;  %v951_v32 = vld [vmem:[#allocation6 + $0x1e0] sm:$0xff]  ;;  %v949_v33 = vld [vmem:[#allocation6 + $0x1d0] sm:$0xff]  ;;  %p13153_p0 = scmp.ne.s32.totalorder %s15112_s30, %s13152_s9  ;;  %p15308_p5 = scmp.ne.s32.totalorder %s15266_s1, 0 }
 0x268   : > { %v10083_v31 = vpack.c.bf16 %v954_v29, %v950_v28  ;;  %v953_v34 = vld [vmem:[#allocation6 + $0x1f0] sm:$0xff]  ;;  %v10065_v35 = vpack.c.bf16 %v951_v32, %v947_v30  ;;  %v956_v36 = vld [vmem:[#allocation6 + $0x208] sm:$0xff]  ;;  %v958_v38 = vld [vmem:[#allocation6 + $0x218] sm:$0xff]  ;;  %s13290_s8 = smov [#allocation33]  }
 0x269   : > { %10062 = vmatpush1.bf16.msra.mxu0 %v10061_v22  ;;  %v960_v37 = vld [vmem:[#allocation6 + $0x228] sm:$0xff]  ;;  %v10085_v39 = vpack.c.bf16 %v953_v34, %v949_v33  ;;  %v962_v41 = vld [vmem:[#allocation6 + $0x238] sm:$0xff]  ;;  %v955_v42 = vld [vmem:[#allocation6 + $0x200] sm:$0xff]  ;;  %p13154_p2 = pnand %p13153_p0, %p15308_p5  ;;  %s13156_s4 = sshll.u32 %s13290_s8, 4  ;;  %s13157_s4 = int_to_ptr.vmem [resolvable:$false] %s13156_s4 }
 0x26a   : > { %10082 = vmatpush1.bf16.msra.mxu1 %v10081_v26  ;;  %10064 = vmatprep.subr.bf16.mxu0 %v10063_v27  ;;  %v10067_v40 = vpack.c.bf16 %v960_v37, %v956_v36  ;;  %v959_v43 = vld [vmem:[#allocation6 + $0x220] sm:$0xff]  ;;  %v10087_v44 = vpack.c.bf16 %v962_v41, %v958_v38  ;;  %v957_v45 = vld [vmem:[#allocation6 + $0x210] sm:$0xff]  ;;  %v964_v47 = vld [vmem:[#allocation6 + $0x248] sm:$0xff]  ;;  %s13158_s3 = scalar_lea.vmem %s13157_s4, 32  ;;  %p13159_p10 = scmp.lt.s32.totalorder %s15112_s30, %s13157_s4 }
 0x26b   : > { %10084 = vmatprep.subr.bf16.mxu1 %v10083_v31  ;;  %v961_v46 = vld [vmem:[#allocation6 + $0x230] sm:$0xff]  ;;  %v968_v48 = vld [vmem:[#allocation6 + $0x268] sm:$0xff]  ;;  %v966_v49 = vld [vmem:[#allocation6 + $0x258] sm:$0xff]  ;;  %v10069_v51 = vpack.c.bf16 %v959_v43, %v955_v42  ;;  %s15110_s19 = scalar_lea.hbm %s15307_s26, %s9704_s6  ;;  %p13155_p7 = pneg %p13154_p2 }
 0x26c   : > { %v970_v50 = vld [vmem:[#allocation6 + $0x278] sm:$0xff]  ;;  %v963_v52 = vld [vmem:[#allocation6 + $0x240] sm:$0xff]  ;;  %v965_v54 = vld [vmem:[#allocation6 + $0x250] sm:$0xff]  ;;  %v10089_v55 = vpack.c.bf16 %v961_v46, %v957_v45  ;;  %v10071_v56 = vpack.c.bf16 %v968_v48, %v964_v47  ;;  %p13160_p1 = scmp.lt.s32.totalorder %s13158_s3, %s13152_s9 }
 0x26d   : > { %10066 = vmatpush1.bf16.msra.mxu0 %v10065_v35  ;;  %v967_v53 = vld [vmem:[#allocation6 + $0x260] sm:$0xff]  ;;  %v969_v57 = vld [vmem:[#allocation6 + $0x270] sm:$0xff]  ;;  %v871_v59 = vld [vmem:[%s13913_s28 + $0x8] sm:$0xff]  ;;  %v10091_v60 = vpack.c.bf16 %v970_v50, %v966_v49 }
 0x26e   : > { %10086 = vmatpush1.bf16.msra.mxu1 %v10085_v39  ;;  %10068 = vmatprep.subr.bf16.mxu0 %v10067_v40  ;;  %v870_v58 = vld [vmem:[%s13913_s28] sm:$0xff]  ;;  %878 = vst.msk [vmem:[#allocation2 + $0x9] sm:$0xff] %vm876_vm1, %v871_v59  ;;  %v872_v61 = vld [vmem:[%s13913_s28 + $0x10] sm:$0xff]  ;;  %v891_v62 = vld [vmem:[#allocation6 + $0x8] sm:$0xff]  ;;  %v10073_v3 = vpack.c.bf16 %v967_v53, %v963_v52  ;;  %v10093_v4 = vpack.c.bf16 %v969_v57, %v965_v54  ;;  %p13161_p11 = por %p13160_p1, %p13159_p10 }
 0x26f   : > { %10088 = vmatprep.subr.bf16.mxu1 %v10087_v44  ;;  %877 = vst.msk [vmem:[#allocation2 + $0x1] sm:$0xff] %vm876_vm1, %v870_v58  ;;  %v895_v63 = vld [vmem:[#allocation6 + $0x28] sm:$0xff]  ;;  %879 = vst.msk [vmem:[#allocation2 + $0x11] sm:$0xff] %vm876_vm1, %v872_v61  ;;  %v893_v1 = vld [vmem:[#allocation6 + $0x18] sm:$0xff] }
 0x270   : > { %v897_v2 = vld [vmem:[#allocation6 + $0x38] sm:$0xff]  ;;  %v10095_v5 = vpack.c.bf16 %v895_v63, %v891_v62  ;;  %v890_v8 = vld [vmem:[#allocation6] sm:$0xff]  ;;  %v892_v10 = vld [vmem:[#allocation6 + $0x10] sm:$0xff]  ;;  %p13162_p12 = pnand %p13161_p11, %p13155_p7 }
 0x271   : > { %10070 = vmatpush1.bf16.msra.mxu0 %v10069_v51  ;;  %v873_v6 = vld [vmem:[%s13913_s28 + $0x18] sm:$0xff]  ;;  %v10115_v7 = vpack.c.bf16 %v897_v2, %v893_v1  ;;  %v894_v9 = vld [vmem:[#allocation6 + $0x20] sm:$0xff]  ;;  %v896_v11 = vld [vmem:[#allocation6 + $0x30] sm:$0xff] }
 0x272   : > { %10090 = vmatpush1.bf16.msra.mxu1 %v10089_v55  ;;  %10072 = vmatprep.subr.bf16.mxu0 %v10071_v56  ;;  %880 = vst.msk [vmem:[#allocation2 + $0x19] sm:$0xff] %vm876_vm1, %v873_v6  ;;  %v899_v12 = vld [vmem:[#allocation6 + $0x48] sm:$0xff]  ;;  %v901_v14 = vld [vmem:[#allocation6 + $0x58] sm:$0xff]  ;;  %v874_v15 = vld [vmem:[%s13913_s28 + $0x20] sm:$0xff]  ;;  %v10097_v24 = vpack.c.bf16 %v894_v9, %v890_v8  ;;  %v10117_v25 = vpack.c.bf16 %v896_v11, %v892_v10 }
 0x273   : > { %10092 = vmatprep.subr.bf16.mxu1 %v10091_v60  ;;  %v903_v13 = vld [vmem:[#allocation6 + $0x68] sm:$0xff]  ;;  %v905_v18 = vld [vmem:[#allocation6 + $0x78] sm:$0xff]  ;;  %881 = vst.msk [vmem:[#allocation2 + $0x21] sm:$0xff] %vm876_vm1, %v874_v15  ;;  %v898_v22 = vld [vmem:[#allocation6 + $0x40] sm:$0xff] }
 0x274   : > { %v902_v26 = vld [vmem:[#allocation6 + $0x60] sm:$0xff]  ;;  %v900_v27 = vld [vmem:[#allocation6 + $0x50] sm:$0xff]  ;;  %v10099_v30 = vpack.c.bf16 %v903_v13, %v899_v12  ;;  %v10119_v31 = vpack.c.bf16 %v905_v18, %v901_v14  ;;  %v907_v32 = vld [vmem:[#allocation6 + $0x88] sm:$0xff] }
 0x275   : > { %10074 = vmatpush1.bf16.msra.mxu0 %v10073_v3  ;;  %v904_v28 = vld [vmem:[#allocation6 + $0x70] sm:$0xff]  ;;  %v911_v33 = vld [vmem:[#allocation6 + $0xa8] sm:$0xff]  ;;  %v909_v36 = vld [vmem:[#allocation6 + $0x98] sm:$0xff]  ;;  %v10101_v40 = vpack.c.bf16 %v902_v26, %v898_v22 }
 0x276   : > { %10094 = vmatpush1.bf16.msra.mxu1 %v10093_v4  ;;  %v13968_v16 = vld [vmem:[#allocation2] sm:$0xff]  ;;  %v13970_v17 = vld [vmem:[#allocation2 + $0x8] sm:$0xff]  ;;  %10096 = vmatprep.subr.bf16.mxu0 %v10095_v5  ;;  %v13975_v21 = vld [vmem:[#allocation2 + $0x10] sm:$0xff]  ;;  %v10121_v41 = vpack.c.bf16 %v904_v28, %v900_v27  ;;  %v10103_v46 = vpack.c.bf16 %v911_v33, %v907_v32 }
 0x277   : > { %v979_v19 = vrot.slane %v13968_v16, 1  ;;  %v980_v20 = vrot.slane %v13970_v17, 1  ;;  %10116 = vmatprep.subr.bf16.mxu1 %v10115_v7  ;;  %v982_v23 = vrot.slane %v13975_v21, 1  ;;  %v875_v34 = vld [vmem:[%s13913_s28 + $0x28] sm:$0xff]  ;;  %v906_v42 = vld [vmem:[#allocation6 + $0x80] sm:$0xff]  ;;  %v908_v44 = vld [vmem:[#allocation6 + $0x90] sm:$0xff] }
 0x278   : > { %v913_v37 = vld [vmem:[#allocation6 + $0xb8] sm:$0xff]  ;;  %882 = vst.msk [vmem:[#allocation2 + $0x29] sm:$0xff] %vm876_vm1, %v875_v34  ;;  %v910_v43 = vld [vmem:[#allocation6 + $0xa0] sm:$0xff]  ;;  %v912_v48 = vld [vmem:[#allocation6 + $0xb0] sm:$0xff] }
 0x279   : > { %v13979_v29 = vsel %vm978_vm2, %v979_v19, %v980_v20  ;;  %v13986_v35 = vld [vmem:[#allocation2 + $0x18] sm:$0xff]  ;;  %v13992_v38 = vsel %vm978_vm2, %v980_v20, %v982_v23  ;;  %v10123_v47 = vpack.c.bf16 %v913_v37, %v909_v36  ;;  %v915_v49 = vld [vmem:[#allocation6 + $0xc8] sm:$0xff]  ;;  %v917_v51 = vld [vmem:[#allocation6 + $0xd8] sm:$0xff]  ;;  %v10105_v55 = vpack.c.bf16 %v910_v43, %v906_v42 }
 0x27a   : > { %9530 = vmatmul.mubr.msk.f32.vlgmr.msra.gmra.mrb[0].mxu0 %vm876_vm1, %v13979_v29  ;;  %9536 = vmatmul.mubr.msk.f32.vlgmr.msra.gmra.mrb[0].mxu1 %vm876_vm1, %v13979_v29  ;;  %v984_v39 = vrot.slane %v13986_v35, 1  ;;  %v13995_v45 = vld [vmem:[#allocation2 + $0x20] sm:$0xff]  ;;  %v921_v52 = vld [vmem:[#allocation6 + $0xf8] sm:$0xff]  ;;  %v10125_v56 = vpack.c.bf16 %v912_v48, %v908_v44  ;;  %v914_v57 = vld [vmem:[#allocation6 + $0xc0] sm:$0xff] }
 0x27b   : > { %1074 = vmatprep.mubr.f32.mxu0 %v15203_v0  ;;  %1175 = vmatprep.mubr.f32.mxu1 %v15203_v0  ;;  %v919_v50 = vld [vmem:[#allocation6 + $0xe8] sm:$0xff]  ;;  %v986_v54 = vrot.slane %v13995_v45, 1  ;;  %v918_v58 = vld [vmem:[#allocation6 + $0xe0] sm:$0xff]  ;;  %v916_v59 = vld [vmem:[#allocation6 + $0xd0] sm:$0xff]  ;;  %v10127_v62 = vpack.c.bf16 %v921_v52, %v917_v51 }
 0x27c   : > { %10098 = vmatpush1.bf16.msra.mxu0 %v10097_v24  ;;  %10118 = vmatpush1.bf16.msra.mxu1 %v10117_v25  ;;  %v14004_v53 = vsel %vm978_vm2, %v982_v23, %v984_v39  ;;  %v10107_v61 = vpack.c.bf16 %v919_v50, %v915_v49  ;;  %v920_v63 = vld [vmem:[#allocation6 + $0xf0] sm:$0xff]  ;;  %v923_v1 = vld [vmem:[#allocation6 + $0x108] sm:$0xff]  ;;  %v925_v3 = vld [vmem:[#allocation6 + $0x118] sm:$0xff]  ;;  %v10109_v7 = vpack.c.bf16 %v918_v58, %v914_v57 }
 0x27d   : > { %10100 = vmatprep.subr.bf16.mxu0 %v10099_v30  ;;  %10120 = vmatprep.subr.bf16.mxu1 %v10119_v31  ;;  %v927_v2 = vld [vmem:[#allocation6 + $0x128] sm:$0xff]  ;;  %v929_v4 = vld [vmem:[#allocation6 + $0x138] sm:$0xff]  ;;  %v14016_v5 = vsel %vm978_vm2, %v984_v39, %v986_v54  ;;  %v10129_v8 = vpack.c.bf16 %v920_v63, %v916_v59  ;;  %v922_v10 = vld [vmem:[#allocation6 + $0x100] sm:$0xff] }
 0x27e   : > { %9531 = vmatmul.mubr.msk.f32.gmra.mrb[2].mxu0 %vm876_vm1, %v13992_v38  ;;  %9537 = vmatmul.mubr.msk.f32.gmra.mrb[2].mxu1 %vm876_vm1, %v13992_v38  ;;  %v926_v11 = vld [vmem:[#allocation6 + $0x120] sm:$0xff]  ;;  %v10111_v12 = vpack.c.bf16 %v927_v2, %v923_v1  ;;  %v10131_v13 = vpack.c.bf16 %v929_v4, %v925_v3  ;;  %v924_v14 = vld [vmem:[#allocation6 + $0x110] sm:$0xff]  ;;  %v1422_v18 = vld [vmem:[#allocation6 + $0x288] sm:$0xff] }
 0x27f   : > { %1080 = vmatprep.mubr.f32.mxu0 %v15203_v0  ;;  %1181 = vmatprep.mubr.f32.mxu1 %v15203_v0  ;;  %v14007_v60 = vld [vmem:[#allocation2 + $0x28] sm:$0xff]  ;;  %v14019_v9 = vld [vmem:[#allocation2 + $0x30] sm:$0x3]  ;;  %v1426_v19 = vld [vmem:[#allocation6 + $0x2a8] sm:$0xff]  ;;  %v10113_v25 = vpack.c.bf16 %v926_v11, %v922_v10 }
 0x280   : > { %10102 = vmatpush1.bf16.msra.mxu0 %v10101_v40  ;;  %10122 = vmatpush1.bf16.msra.mxu1 %v10121_v41  ;;  %v988_v6 = vrot.slane %v14007_v60, 1  ;;  %v928_v15 = vld [vmem:[#allocation6 + $0x130] sm:$0xff]  ;;  %v1424_v20 = vld [vmem:[#allocation6 + $0x298] sm:$0xff]  ;;  %v990_v24 = vrot.slane %v14019_v9, 1  ;;  %v10135_v27 = vpack.c.bf16 %v1426_v19, %v1422_v18  ;;  %v1421_v31 = vld [vmem:[#allocation6 + $0x280] sm:$0xff] }
 0x281   : > { %10104 = vmatprep.subr.bf16.mxu0 %v10103_v46  ;;  %10124 = vmatprep.subr.bf16.mxu1 %v10123_v47  ;;  %v1428_v22 = vld [vmem:[#allocation6 + $0x2b8] sm:$0xff]  ;;  %v10133_v26 = vpack.c.bf16 %v928_v15, %v924_v14  ;;  %v1425_v32 = vld [vmem:[#allocation6 + $0x2a0] sm:$0xff]  ;;  %v1423_v33 = vld [vmem:[#allocation6 + $0x290] sm:$0xff] }
 0x282   : > { %9532 = vmatmul.mubr.msk.f32.gmra.mrb[4].mxu0 %vm876_vm1, %v14004_v53  ;;  %9538 = vmatmul.mubr.msk.f32.gmra.mrb[4].mxu1 %vm876_vm1, %v14004_v53  ;;  %v14028_v23 = vsel %vm978_vm2, %v986_v54, %v988_v6  ;;  %v10155_v28 = vpack.c.bf16 %v1428_v22, %v1424_v20  ;;  %v14038_v30 = vsel %vm978_vm2, %v988_v6, %v990_v24  ;;  %v1427_v34 = vld [vmem:[#allocation6 + $0x2b0] sm:$0xff]  ;;  %v1430_v36 = vld [vmem:[#allocation6 + $0x2c8] sm:$0xff]  ;;  %v1432_v39 = vld [vmem:[#allocation6 + $0x2d8] sm:$0xff] }
 0x283   : > { %1086 = vmatprep.mubr.f32.mxu0 %v15203_v0  ;;  %1187 = vmatprep.mubr.f32.mxu1 %v15203_v0  ;;  %v1434_v37 = vld [vmem:[#allocation6 + $0x2e8] sm:$0xff]  ;;  %v1436_v40 = vld [vmem:[#allocation6 + $0x2f8] sm:$0xff]  ;;  %v10137_v41 = vpack.c.bf16 %v1425_v32, %v1421_v31  ;;  %v10157_v42 = vpack.c.bf16 %v1427_v34, %v1423_v33  ;;  %v1429_v43 = vld [vmem:[#allocation6 + $0x2c0] sm:$0xff] }
 0x284   : > { %10106 = vmatpush1.bf16.msra.mxu0 %v10105_v55  ;;  %10126 = vmatpush1.bf16.msra.mxu1 %v10125_v56  ;;  %v1433_v44 = vld [vmem:[#allocation6 + $0x2e0] sm:$0xff]  ;;  %v10139_v46 = vpack.c.bf16 %v1434_v37, %v1430_v36  ;;  %v10159_v47 = vpack.c.bf16 %v1436_v40, %v1432_v39  ;;  %v1431_v48 = vld [vmem:[#allocation6 + $0x2d0] sm:$0xff]  ;;  %v1438_v50 = vld [vmem:[#allocation6 + $0x308] sm:$0xff] }
 0x285   : > { %10108 = vmatprep.subr.bf16.mxu0 %v10107_v61  ;;  %10128 = vmatprep.subr.bf16.mxu1 %v10127_v62  ;;  %v1435_v49 = vld [vmem:[#allocation6 + $0x2f0] sm:$0xff]  ;;  %v1442_v51 = vld [vmem:[#allocation6 + $0x328] sm:$0xff]  ;;  %v1440_v52 = vld [vmem:[#allocation6 + $0x318] sm:$0xff]  ;;  %v10141_v55 = vpack.c.bf16 %v1433_v44, %v1429_v43  ;;  %v1462_v43 = vrot.slane %v13968_v16, 2  ;;  %v1463_v44 = vrot.slane %v13970_v17, 2 }
 0x286   : > { %9533 = vmatmul.mubr.msk.f32.gmra.mrb[6].mxu0 %vm876_vm1, %v14016_v5  ;;  %9539 = vmatmul.mubr.msk.f32.gmra.mrb[6].mxu1 %vm876_vm1, %v14016_v5  ;;  %v1444_v54 = vld [vmem:[#allocation6 + $0x338] sm:$0xff]  ;;  %v10161_v56 = vpack.c.bf16 %v1435_v49, %v1431_v48  ;;  %v1437_v57 = vld [vmem:[#allocation6 + $0x300] sm:$0xff]  ;;  %v10143_v59 = vpack.c.bf16 %v1442_v51, %v1438_v50  ;;  %v1439_v62 = vld [vmem:[#allocation6 + $0x310] sm:$0xff] }
 0x287   : > { %1092 = vmatprep.mubr.f32.mxu0 %v15203_v0  ;;  %1193 = vmatprep.mubr.f32.mxu1 %v15203_v0  ;;  %v1441_v58 = vld [vmem:[#allocation6 + $0x320] sm:$0xff]  ;;  %v10163_v61 = vpack.c.bf16 %v1444_v54, %v1440_v52  ;;  %v1443_v63 = vld [vmem:[#allocation6 + $0x330] sm:$0xff]  ;;  %v1446_v1 = vld [vmem:[#allocation6 + $0x348] sm:$0xff] }
 0x288   : > { %10110 = vmatpush1.bf16.msra.mxu0 %v10109_v7  ;;  %10130 = vmatpush1.bf16.msra.mxu1 %v10129_v8  ;;  %v1450_v2 = vld [vmem:[#allocation6 + $0x368] sm:$0xff]  ;;  %v1448_v3 = vld [vmem:[#allocation6 + $0x358] sm:$0xff]  ;;  %v10145_v6 = vpack.c.bf16 %v1441_v58, %v1437_v57  ;;  %v10165_v7 = vpack.c.bf16 %v1443_v63, %v1439_v62  ;;  %v1445_v8 = vld [vmem:[#allocation6 + $0x340] sm:$0xff] }
 0x289   : > { %10112 = vmatprep.subr.bf16.mxu0 %v10111_v12  ;;  %10132 = vmatprep.subr.bf16.mxu1 %v10131_v13  ;;  %v1452_v4 = vld [vmem:[#allocation6 + $0x378] sm:$0xff]  ;;  %v1449_v10 = vld [vmem:[#allocation6 + $0x360] sm:$0xff]  ;;  %v10147_v11 = vpack.c.bf16 %v1450_v2, %v1446_v1  ;;  %v1447_v13 = vld [vmem:[#allocation6 + $0x350] sm:$0xff] }
 0x28a   : > { %9534 = vmatmul.mubr.msk.f32.gmra.mrb[8].mxu0 %vm876_vm1, %v14028_v23  ;;  %9540 = vmatmul.mubr.msk.f32.gmra.mrb[8].mxu1 %vm876_vm1, %v14028_v23  ;;  %v10167_v12 = vpack.c.bf16 %v1452_v4, %v1448_v3  ;;  %v1451_v14 = vld [vmem:[#allocation6 + $0x370] sm:$0xff]  ;;  %v1454_v15 = vld [vmem:[#allocation6 + $0x388] sm:$0xff]  ;;  %v1456_v19 = vld [vmem:[#allocation6 + $0x398] sm:$0xff]  ;;  %v10149_v22 = vpack.c.bf16 %v1449_v10, %v1445_v8  ;;  %v1467_v10 = vrot.slane %v13986_v35, 2 }
 0x28b   : > { %1098 = vmatprep.mubr.f32.mxu0 %v15203_v0  ;;  %1199 = vmatprep.mubr.f32.mxu1 %v15203_v0  ;;  %v1458_v18 = vld [vmem:[#allocation6 + $0x3a8] sm:$0xff]  ;;  %v1460_v20 = vld [vmem:[#allocation6 + $0x3b8] sm:$0xff]  ;;  %v10169_v24 = vpack.c.bf16 %v1451_v14, %v1447_v13  ;;  %v1455_v31 = vld [vmem:[#allocation6 + $0x390] sm:$0xff] }
 0x28c   : > { %10114 = vmatpush1.bf16.msra.mxu0 %v10113_v25  ;;  %10134 = vmatpush1.bf16.msra.mxu1 %v10133_v26  ;;  %v1453_v25 = vld [vmem:[#allocation6 + $0x380] sm:$0xff]  ;;  %v1459_v32 = vld [vmem:[#allocation6 + $0x3b0] sm:$0xff]  ;;  %v1756_v33 = vld [vmem:[#allocation6 + $0x508] sm:$0xff] }
 0x28d   : > { %10136 = vmatprep.subr.bf16.mxu0 %v10135_v27  ;;  %10156 = vmatprep.subr.bf16.mxu1 %v10155_v28  ;;  %v1457_v26 = vld [vmem:[#allocation6 + $0x3a0] sm:$0xff]  ;;  %v10151_v27 = vpack.c.bf16 %v1458_v18, %v1454_v15  ;;  %v10171_v28 = vpack.c.bf16 %v1460_v20, %v1456_v19  ;;  %v1760_v34 = vld [vmem:[#allocation6 + $0x528] sm:$0xff]  ;;  %v1758_v36 = vld [vmem:[#allocation6 + $0x518] sm:$0xff]  ;;  %v10173_v40 = vpack.c.bf16 %v1459_v32, %v1455_v31 }
 0x28e   : > { %9535 = vmatmul.mubr.msk.f32.gmra.mrb[10].mxu0 %vm876_vm1, %v14038_v30  ;;  %9541 = vmatmul.mubr.msk.f32.gmra.mrb[10].mxu1 %vm876_vm1, %v14038_v30  ;;  %v1762_v37 = vld [vmem:[#allocation6 + $0x538] sm:$0xff]  ;;  %v10153_v39 = vpack.c.bf16 %v1457_v26, %v1453_v25  ;;  %v1757_v48 = vld [vmem:[#allocation6 + $0x510] sm:$0xff]  ;;  %v1764_v50 = vld [vmem:[#allocation6 + $0x548] sm:$0xff] }
 0x28f   : > { %1282 = vmatprep.mubr.f32.mxu0 %v15203_v0  ;;  %1383 = vmatprep.mubr.f32.mxu1 %v15203_v0  ;;  %v1761_v49 = vld [vmem:[#allocation6 + $0x530] sm:$0xff]  ;;  %v1768_v51 = vld [vmem:[#allocation6 + $0x568] sm:$0xff]  ;;  %v1766_v52 = vld [vmem:[#allocation6 + $0x558] sm:$0xff] }
 0x290   : > { %v1770_v54 = vld [vmem:[#allocation6 + $0x578] sm:$0xff]  ;;  %v10197_v58 = vpack.c.bf16 %v1761_v49, %v1757_v48  ;;  %v10179_v62 = vpack.c.bf16 %v1768_v51, %v1764_v50  ;;  %v1765_v1 = vld [vmem:[#allocation6 + $0x550] sm:$0xff]  ;;  %v1772_v3 = vld [vmem:[#allocation6 + $0x588] sm:$0xff] }
 0x291   : > { %v10199_v63 = vpack.c.bf16 %v1770_v54, %v1766_v52  ;;  %v1769_v2 = vld [vmem:[#allocation6 + $0x570] sm:$0xff]  ;;  %v1776_v4 = vld [vmem:[#allocation6 + $0x5a8] sm:$0xff]  ;;  %v1771_v13 = vld [vmem:[#allocation6 + $0x580] sm:$0xff] }
 0x292   : > { %9542 = vmatmul.mubr.msk.f32.vlgmr.msra.gmra.mrb[0].mxu0 %vm876_vm1, %v13968_v16  ;;  %9548 = vmatmul.mubr.msk.f32.vlgmr.msra.gmra.mrb[0].mxu1 %vm876_vm1, %v13968_v16  ;;  %v1775_v14 = vld [vmem:[#allocation6 + $0x5a0] sm:$0xff]  ;;  %v10183_v15 = vpack.c.bf16 %v1776_v4, %v1772_v3  ;;  %v1773_v19 = vld [vmem:[#allocation6 + $0x590] sm:$0xff]  ;;  %v1782_v25 = vld [vmem:[#allocation6 + $0x5d8] sm:$0xff] }
 0x293   : > { %1288 = vmatprep.mubr.f32.mxu0 %v15203_v0  ;;  %1389 = vmatprep.mubr.f32.mxu1 %v15203_v0  ;;  %v1777_v20 = vld [vmem:[#allocation6 + $0x5b0] sm:$0xff]  ;;  %v1786_v26 = vld [vmem:[#allocation6 + $0x5f8] sm:$0xff]  ;;  %v10185_v31 = vpack.c.bf16 %v1775_v14, %v1771_v13  ;;  %v1787_v50 = vld [vmem:[#allocation6 + $0x600] sm:$0xff] }
 0x294   : > { %10138 = vmatpush1.bf16.msra.mxu0 %v10137_v41  ;;  %10158 = vmatpush1.bf16.msra.mxu1 %v10157_v42  ;;  %v10175_v41 = vpack.c.bf16 %v1760_v34, %v1756_v33  ;;  %v10195_v42 = vpack.c.bf16 %v1762_v37, %v1758_v36  ;;  %v10205_v32 = vpack.c.bf16 %v1777_v20, %v1773_v19  ;;  %v1779_v33 = vld [vmem:[#allocation6 + $0x5c0] sm:$0xff]  ;;  %v1723_v13 = vld [vmem:[#allocation6 + $0x408] sm:$0xff] }
 0x295   : > { %10140 = vmatprep.subr.bf16.mxu0 %v10139_v46  ;;  %10160 = vmatprep.subr.bf16.mxu1 %v10159_v47  ;;  %v1755_v46 = vld [vmem:[#allocation6 + $0x500] sm:$0xff]  ;;  %v10207_v37 = vpack.c.bf16 %v1786_v26, %v1782_v25  ;;  %v1727_v14 = vld [vmem:[#allocation6 + $0x428] sm:$0xff] }
 0x296   : > { %9543 = vmatmul.mubr.msk.f32.gmra.mrb[2].mxu0 %vm876_vm1, %v13970_v17  ;;  %9549 = vmatmul.mubr.msk.f32.gmra.mrb[2].mxu1 %vm876_vm1, %v13970_v17  ;;  %v1759_v47 = vld [vmem:[#allocation6 + $0x520] sm:$0xff]  ;;  %v10219_v25 = vpack.c.bf16 %v1727_v14, %v1723_v13  ;;  %v1752_v13 = vld [vmem:[#allocation6 + $0x4f0] sm:$0xff]  ;;  %v2205_v14 = vld [vmem:[#allocation6 + $0x668] sm:$0xff] }
 0x297   : > { %1294 = vmatprep.mubr.f32.mxu0 %v15203_v0  ;;  %1395 = vmatprep.mubr.f32.mxu1 %v15203_v0  ;;  %v10177_v57 = vpack.c.bf16 %v1759_v47, %v1755_v46  ;;  %v1783_v34 = vld [vmem:[#allocation6 + $0x5e0] sm:$0xff]  ;;  %v1471_v47 = vrot.slane %v14007_v60, 2 }
 0x298   : > { %10142 = vmatpush1.bf16.msra.mxu0 %v10141_v55  ;;  %10162 = vmatpush1.bf16.msra.mxu1 %v10161_v56  ;;  %v14085_v55 = vsel %vm1461_vm3, %v1462_v43, %v1463_v44  ;;  %v1465_v56 = vrot.slane %v13975_v21, 2  ;;  %v1790_v43 = vld [vmem:[#allocation6 + $0x618] sm:$0xff]  ;;  %v10189_v48 = vpack.c.bf16 %v1783_v34, %v1779_v33  ;;  %v1791_v51 = vld [vmem:[#allocation6 + $0x620] sm:$0xff]  ;;  %v1735_v33 = vld [vmem:[#allocation6 + $0x468] sm:$0xff] }
 0x299   : > { %10144 = vmatprep.subr.bf16.mxu0 %v10143_v59  ;;  %10164 = vmatprep.subr.bf16.mxu1 %v10163_v61  ;;  %v1763_v59 = vld [vmem:[#allocation6 + $0x540] sm:$0xff]  ;;  %v1733_v34 = vld [vmem:[#allocation6 + $0x458] sm:$0xff] }
 0x29a   : > { %9544 = vmatmul.mubr.msk.f32.gmra.mrb[4].mxu0 %vm876_vm1, %v13975_v21  ;;  %9550 = vmatmul.mubr.msk.f32.gmra.mrb[4].mxu1 %vm876_vm1, %v13975_v21  ;;  %v1767_v61 = vld [vmem:[#allocation6 + $0x560] sm:$0xff]  ;;  %v14095_v8 = vsel %vm1461_vm3, %v1463_v44, %v1465_v56  ;;  %v1794_v44 = vld [vmem:[#allocation6 + $0x638] sm:$0xff] }
 0x29b   : > { %1300 = vmatprep.mubr.f32.mxu0 %v15203_v0  ;;  %1401 = vmatprep.mubr.f32.mxu1 %v15203_v0  ;;  %v10211_v54 = vpack.c.bf16 %v1794_v44, %v1790_v43  ;;  %v1732_v44 = vld [vmem:[#allocation6 + $0x450] sm:$0xff] }
 0x29c   : > { %10146 = vmatpush1.bf16.msra.mxu0 %v10145_v6  ;;  %10166 = vmatpush1.bf16.msra.mxu1 %v10165_v7  ;;  %v1774_v6 = vld [vmem:[#allocation6 + $0x598] sm:$0xff] }
 0x29d   : > { %10148 = vmatprep.subr.bf16.mxu0 %v10147_v11  ;;  %10168 = vmatprep.subr.bf16.mxu1 %v10167_v12  ;;  %v1778_v7 = vld [vmem:[#allocation6 + $0x5b8] sm:$0xff]  ;;  %v10181_v11 = vpack.c.bf16 %v1767_v61, %v1763_v59  ;;  %v10201_v12 = vpack.c.bf16 %v1769_v2, %v1765_v1  ;;  %v1719_v59 = vld [vmem:[#allocation6 + $0x3e8] sm:$0xff]  ;;  %v1473_v1 = vrot.slane %v14019_v9, 2  ;;  %v10193_v2 = vpack.c.bf16 %v1791_v51, %v1787_v50 }
 0x29e   : > { %9545 = vmatmul.mubr.msk.f32.gmra.mrb[6].mxu0 %vm876_vm1, %v13986_v35  ;;  %9551 = vmatmul.mubr.msk.f32.gmra.mrb[6].mxu1 %vm876_vm1, %v13986_v35  ;;  %v10203_v18 = vpack.c.bf16 %v1778_v7, %v1774_v6  ;;  %v1717_v61 = vld [vmem:[#allocation6 + $0x3d8] sm:$0xff]  ;;  %v1714_v7 = vld [vmem:[#allocation6 + $0x3c0] sm:$0xff] }
 0x29f   : > { %1306 = vmatprep.mubr.f32.mxu0 %v15203_v0  ;;  %1407 = vmatprep.mubr.f32.mxu1 %v15203_v0  ;;  %v14135_v9 = vsel %vm1461_vm3, %v1471_v47, %v1473_v1  ;;  %v1745_v50 = vld [vmem:[#allocation6 + $0x4b8] sm:$0xff] }
 0x2a0   : > { %10150 = vmatpush1.bf16.msra.mxu0 %v10149_v22  ;;  %10170 = vmatpush1.bf16.msra.mxu1 %v10169_v24  ;;  %v1780_v22 = vld [vmem:[#allocation6 + $0x5c8] sm:$0xff]  ;;  %v1749_v1 = vld [vmem:[#allocation6 + $0x4d8] sm:$0xff] }
 0x2a1   : > { %10152 = vmatprep.subr.bf16.mxu0 %v10151_v27  ;;  %10172 = vmatprep.subr.bf16.mxu1 %v10171_v28  ;;  %v1784_v24 = vld [vmem:[#allocation6 + $0x5e8] sm:$0xff]  ;;  %v14105_v27 = vsel %vm1461_vm3, %v1465_v56, %v1467_v10  ;;  %v1469_v28 = vrot.slane %v13995_v45, 2  ;;  %v1789_v56 = vld [vmem:[#allocation6 + $0x610] sm:$0xff] }
 0x2a2   : > { %9546 = vmatmul.mubr.msk.f32.gmra.mrb[8].mxu0 %vm876_vm1, %v13995_v45  ;;  %9552 = vmatmul.mubr.msk.f32.gmra.mrb[8].mxu1 %vm876_vm1, %v13995_v45  ;;  %v10187_v36 = vpack.c.bf16 %v1784_v24, %v1780_v22  ;;  %v1722_v22 = vld [vmem:[#allocation6 + $0x400] sm:$0xff] }
 0x2a3   : > { %1312 = vmatprep.mubr.f32.mxu0 %v15203_v0  ;;  %1413 = vmatprep.mubr.f32.mxu1 %v15203_v0  ;;  %v14115_v46 = vsel %vm1461_vm3, %v1467_v10, %v1469_v28  ;;  %v1718_v10 = vld [vmem:[#allocation6 + $0x3e0] sm:$0xff] }
 0x2a4   : > { %10154 = vmatpush1.bf16.msra.mxu0 %v10153_v39  ;;  %10174 = vmatpush1.bf16.msra.mxu1 %v10173_v40  ;;  %v1781_v39 = vld [vmem:[#allocation6 + $0x5d0] sm:$0xff]  ;;  %v10217_v19 = vpack.c.bf16 %v1718_v10, %v1714_v7  ;;  %v1726_v24 = vld [vmem:[#allocation6 + $0x420] sm:$0xff] }
 0x2a5   : > { %10176 = vmatprep.subr.bf16.mxu0 %v10175_v41  ;;  %10196 = vmatprep.subr.bf16.mxu1 %v10195_v42  ;;  %v1785_v40 = vld [vmem:[#allocation6 + $0x5f0] sm:$0xff]  ;;  %v1788_v41 = vld [vmem:[#allocation6 + $0x608] sm:$0xff]  ;;  %v1750_v7 = vld [vmem:[#allocation6 + $0x4e0] sm:$0xff] }
 0x2a6   : > { %9547 = vmatmul.mubr.msk.f32.gmra.mrb[10].mxu0 %vm876_vm1, %v14007_v60  ;;  %9553 = vmatmul.mubr.msk.f32.gmra.mrb[10].mxu1 %vm876_vm1, %v14007_v60  ;;  %v1792_v42 = vld [vmem:[#allocation6 + $0x628] sm:$0xff]  ;;  %v10209_v49 = vpack.c.bf16 %v1785_v40, %v1781_v39  ;;  %v1730_v40 = vld [vmem:[#allocation6 + $0x440] sm:$0xff] }
 0x2a7   : > { %1551 = vmatprep.mubr.f32.mxu0 %v15203_v0  ;;  %1652 = vmatprep.mubr.f32.mxu1 %v15203_v0  ;;  %v10191_v52 = vpack.c.bf16 %v1792_v42, %v1788_v41  ;;  %v1734_v41 = vld [vmem:[#allocation6 + $0x460] sm:$0xff] }
 0x2a8   : > { %v10225_v51 = vpack.c.bf16 %v1734_v41, %v1730_v40 }
 0x2aa   : > { %9554 = vmatmul.mubr.msk.f32.vlgmr.msra.gmra.mrb[0].mxu0 %vm876_vm1, %v14085_v55  ;;  %9560 = vmatmul.mubr.msk.f32.vlgmr.msra.gmra.mrb[0].mxu1 %vm876_vm1, %v14085_v55 }
 0x2ab   : > { %1557 = vmatprep.mubr.f32.mxu0 %v15203_v0  ;;  %1658 = vmatprep.mubr.f32.mxu1 %v15203_v0 }
 0x2ac   : > { %10178 = vmatpush1.bf16.msra.mxu0 %v10177_v57  ;;  %10198 = vmatpush1.bf16.msra.mxu1 %v10197_v58  ;;  %v1793_v57 = vld [vmem:[#allocation6 + $0x630] sm:$0xff]  ;;  %v1715_v58 = vld [vmem:[#allocation6 + $0x3c8] sm:$0xff] }
 0x2ad   : > { %10180 = vmatprep.subr.bf16.mxu0 %v10179_v62  ;;  %10200 = vmatprep.subr.bf16.mxu1 %v10199_v63  ;;  %v1721_v62 = vld [vmem:[#allocation6 + $0x3f8] sm:$0xff]  ;;  %v14125_v63 = vsel %vm1461_vm3, %v1469_v28, %v1471_v47  ;;  %v10213_v3 = vpack.c.bf16 %v1793_v57, %v1789_v56  ;;  %v10215_v4 = vpack.c.bf16 %v1719_v59, %v1715_v58  ;;  %v1724_v28 = vld [vmem:[#allocation6 + $0x410] sm:$0xff]  ;;  %v1742_v56 = vld [vmem:[#allocation6 + $0x4a0] sm:$0xff] }
 0x2ae   : > { %9555 = vmatmul.mubr.msk.f32.gmra.mrb[2].mxu0 %vm876_vm1, %v14095_v8  ;;  %9561 = vmatmul.mubr.msk.f32.gmra.mrb[2].mxu1 %vm876_vm1, %v14095_v8  ;;  %v10235_v6 = vpack.c.bf16 %v1721_v62, %v1717_v61  ;;  %v1736_v47 = vld [vmem:[#allocation6 + $0x470] sm:$0xff]  ;;  %v1751_v62 = vld [vmem:[#allocation6 + $0x4e8] sm:$0xff] }
 0x2af   : > { %1563 = vmatprep.mubr.f32.mxu0 %v15203_v0  ;;  %1664 = vmatprep.mubr.f32.mxu1 %v15203_v0  ;;  %v1740_v59 = vld [vmem:[#allocation6 + $0x490] sm:$0xff] }
 0x2b0   : > { %10182 = vmatpush1.bf16.msra.mxu0 %v10181_v11  ;;  %10202 = vmatpush1.bf16.msra.mxu1 %v10201_v12  ;;  %v1716_v11 = vld [vmem:[#allocation6 + $0x3d0] sm:$0xff] }
 0x2b1   : > { %10184 = vmatprep.subr.bf16.mxu0 %v10183_v15  ;;  %10204 = vmatprep.subr.bf16.mxu1 %v10203_v18  ;;  %v1720_v12 = vld [vmem:[#allocation6 + $0x3f0] sm:$0xff]  ;;  %v1725_v15 = vld [vmem:[#allocation6 + $0x418] sm:$0xff] }
 0x2b2   : > { %9556 = vmatmul.mubr.msk.f32.gmra.mrb[4].mxu0 %vm876_vm1, %v14105_v27  ;;  %9562 = vmatmul.mubr.msk.f32.gmra.mrb[4].mxu1 %vm876_vm1, %v14105_v27  ;;  %v1729_v18 = vld [vmem:[#allocation6 + $0x438] sm:$0xff]  ;;  %v10237_v20 = vpack.c.bf16 %v1720_v12, %v1716_v11  ;;  %v1744_v61 = vld [vmem:[#allocation6 + $0x4b0] sm:$0xff] }
 0x2b3   : > { %1569 = vmatprep.mubr.f32.mxu0 %v15203_v0  ;;  %1670 = vmatprep.mubr.f32.mxu1 %v15203_v0  ;;  %v10239_v26 = vpack.c.bf16 %v1729_v18, %v1725_v15  ;;  %v1748_v12 = vld [vmem:[#allocation6 + $0x4d0] sm:$0xff]  ;;  %v2203_v15 = vld [vmem:[#allocation6 + $0x658] sm:$0xff] }
 0x2b4   : > { %10186 = vmatpush1.bf16.msra.mxu0 %v10185_v31  ;;  %10206 = vmatpush1.bf16.msra.mxu1 %v10205_v32  ;;  %v1728_v31 = vld [vmem:[#allocation6 + $0x430] sm:$0xff]  ;;  %v1731_v32 = vld [vmem:[#allocation6 + $0x448] sm:$0xff]  ;;  %v2207_v18 = vld [vmem:[#allocation6 + $0x678] sm:$0xff] }
 0x2b5   : > { %10188 = vmatprep.subr.bf16.mxu0 %v10187_v36  ;;  %10208 = vmatprep.subr.bf16.mxu1 %v10207_v37  ;;  %v1737_v36 = vld [vmem:[#allocation6 + $0x478] sm:$0xff]  ;;  %v10221_v37 = vpack.c.bf16 %v1726_v24, %v1722_v22  ;;  %v10241_v39 = vpack.c.bf16 %v1728_v31, %v1724_v28  ;;  %v10223_v42 = vpack.c.bf16 %v1735_v33, %v1731_v32  ;;  %v2206_v28 = vld [vmem:[#allocation6 + $0x670] sm:$0xff]  ;;  %v2209_v31 = vld [vmem:[#allocation6 + $0x688] sm:$0xff] }
 0x2b6   : > { %9557 = vmatmul.mubr.msk.f32.gmra.mrb[6].mxu0 %vm876_vm1, %v14115_v46  ;;  %9563 = vmatmul.mubr.msk.f32.gmra.mrb[6].mxu1 %vm876_vm1, %v14115_v46  ;;  %v10243_v43 = vpack.c.bf16 %v1737_v36, %v1733_v34  ;;  %v10275_v24 = vpack.c.bf16 %v2207_v18, %v2203_v15  ;;  %v2211_v32 = vld [vmem:[#allocation6 + $0x698] sm:$0xff] }
 0x2b7   : > { %1575 = vmatprep.mubr.f32.mxu0 %v15203_v0  ;;  %1676 = vmatprep.mubr.f32.mxu1 %v15203_v0  ;;  %v2215_v33 = vld [vmem:[#allocation6 + $0x6b8] sm:$0xff] }
 0x2b8   : > { %10190 = vmatpush1.bf16.msra.mxu0 %v10189_v48  ;;  %10210 = vmatpush1.bf16.msra.mxu1 %v10209_v49  ;;  %v1743_v48 = vld [vmem:[#allocation6 + $0x4a8] sm:$0xff]  ;;  %v1741_v49 = vld [vmem:[#allocation6 + $0x498] sm:$0xff]  ;;  %v10279_v41 = vpack.c.bf16 %v2215_v33, %v2211_v32 }
 0x2b9   : > { %10192 = vmatprep.subr.bf16.mxu0 %v10191_v52  ;;  %10212 = vmatprep.subr.bf16.mxu1 %v10211_v54  ;;  %v10245_v52 = vpack.c.bf16 %v1736_v47, %v1732_v44  ;;  %v1738_v54 = vld [vmem:[#allocation6 + $0x480] sm:$0xff]  ;;  %v10247_v58 = vpack.c.bf16 %v1745_v50, %v1741_v49  ;;  %v2217_v44 = vld [vmem:[#allocation6 + $0x6c8] sm:$0xff]  ;;  %v2219_v47 = vld [vmem:[#allocation6 + $0x6d8] sm:$0xff] }
 0x2ba   : > { %9558 = vmatmul.mubr.msk.f32.gmra.mrb[8].mxu0 %vm876_vm1, %v14125_v63  ;;  %9564 = vmatmul.mubr.msk.f32.gmra.mrb[8].mxu1 %vm876_vm1, %v14125_v63  ;;  %v2216_v50 = vld [vmem:[#allocation6 + $0x6c0] sm:$0xff] }
 0x2bb   : > { %1581 = vmatprep.mubr.f32.mxu0 %v15203_v0  ;;  %1682 = vmatprep.mubr.f32.mxu1 %v15203_v0 }
 0x2bc   : > { %10194 = vmatpush1.bf16.msra.mxu0 %v10193_v2  ;;  %10214 = vmatpush1.bf16.msra.mxu1 %v10213_v3  ;;  %v1753_v2 = vld [vmem:[#allocation6 + $0x4f8] sm:$0xff]  ;;  %v10229_v3 = vpack.c.bf16 %v1742_v56, %v1738_v54  ;;  %v2218_v56 = vld [vmem:[#allocation6 + $0x6d0] sm:$0xff] }
 0x2bd   : > { %10216 = vmatprep.subr.bf16.mxu0 %v10215_v4  ;;  %10236 = vmatprep.subr.bf16.mxu1 %v10235_v6  ;;  %v10249_v4 = vpack.c.bf16 %v1744_v61, %v1740_v59  ;;  %v1746_v6 = vld [vmem:[#allocation6 + $0x4c0] sm:$0xff]  ;;  %v10251_v11 = vpack.c.bf16 %v1753_v2, %v1749_v1  ;;  %v2227_v59 = vld [vmem:[#allocation6 + $0x718] sm:$0xff] }
 0x2be   : > { %9559 = vmatmul.mubr.msk.f32.gmra.mrb[10].mxu0 %vm876_vm1, %v14135_v9  ;;  %9565 = vmatmul.mubr.msk.f32.gmra.mrb[10].mxu1 %vm876_vm1, %v14135_v9  ;;  %v2231_v61 = vld [vmem:[#allocation6 + $0x738] sm:$0xff]  ;;  %v2224_v1 = vld [vmem:[#allocation6 + $0x700] sm:$0xff] }
 0x2bf   : > { %1859 = vmatprep.mubr.f32.mxu0 %v15203_v0  ;;  %1960 = vmatprep.mubr.f32.mxu1 %v15203_v0  ;;  %v2228_v2 = vld [vmem:[#allocation6 + $0x720] sm:$0xff] }
 0x2c2   : > { %9566 = vmatmul.mubr.msk.f32.vlgmr.msra.gmra.mrb[12].mxu0 %vm876_vm1, %v13979_v29  ;;  %9572 = vmatmul.mubr.msk.f32.vlgmr.msra.gmra.mrb[12].mxu1 %vm876_vm1, %v13979_v29  ;;  %v1739_v29 = vld [vmem:[#allocation6 + $0x488] sm:$0xff] }
 0x2c3   : > { %1865 = vmatprep.mubr.f32.mxu0 %v15203_v0  ;;  %1966 = vmatprep.mubr.f32.mxu1 %v15203_v0  ;;  %v10227_v57 = vpack.c.bf16 %v1743_v48, %v1739_v29  ;;  %v2223_v29 = vld [vmem:[#allocation6 + $0x6f8] sm:$0xff] }
 0x2c4   : > { %10218 = vmatpush1.bf16.msra.mxu0 %v10217_v19  ;;  %10238 = vmatpush1.bf16.msra.mxu1 %v10237_v20  ;;  %v10233_v19 = vpack.c.bf16 %v1750_v7, %v1746_v6  ;;  %v10253_v20 = vpack.c.bf16 %v1752_v13, %v1748_v12  ;;  %v10283_v54 = vpack.c.bf16 %v2223_v29, %v2219_v47  ;;  %v2226_v6 = vld [vmem:[#allocation6 + $0x710] sm:$0xff]  ;;  %v2239_v12 = vld [vmem:[#allocation6 + $0x778] sm:$0xff] }
 0x2c5   : > { %10220 = vmatprep.subr.bf16.mxu0 %v10219_v25  ;;  %10240 = vmatprep.subr.bf16.mxu1 %v10239_v26  ;;  %v2204_v25 = vld [vmem:[#allocation6 + $0x660] sm:$0xff]  ;;  %v2202_v26 = vld [vmem:[#allocation6 + $0x650] sm:$0xff]  ;;  %v10269_v13 = vpack.c.bf16 %v2228_v2, %v2224_v1 }
 0x2c6   : > { %9567 = vmatmul.mubr.msk.f32.gmra.mrb[14].mxu0 %vm876_vm1, %v13992_v38  ;;  %9573 = vmatmul.mubr.msk.f32.gmra.mrb[14].mxu1 %vm876_vm1, %v13992_v38  ;;  %v1747_v38 = vld [vmem:[#allocation6 + $0x4c8] sm:$0xff]  ;;  %v10277_v36 = vpack.c.bf16 %v2206_v28, %v2202_v26  ;;  %v2230_v7 = vld [vmem:[#allocation6 + $0x730] sm:$0xff] }
 0x2c7   : > { %1871 = vmatprep.mubr.f32.mxu0 %v15203_v0  ;;  %1972 = vmatprep.mubr.f32.mxu1 %v15203_v0  ;;  %v10231_v10 = vpack.c.bf16 %v1751_v62, %v1747_v38 }
 0x2c8   : > { %10222 = vmatpush1.bf16.msra.mxu0 %v10221_v37  ;;  %10242 = vmatpush1.bf16.msra.mxu1 %v10241_v39  ;;  %v2208_v37 = vld [vmem:[#allocation6 + $0x680] sm:$0xff] }
 0x2c9   : > { %10224 = vmatprep.subr.bf16.mxu0 %v10223_v42  ;;  %10244 = vmatprep.subr.bf16.mxu1 %v10243_v43  ;;  %v2212_v39 = vld [vmem:[#allocation6 + $0x6a0] sm:$0xff]  ;;  %v2210_v42 = vld [vmem:[#allocation6 + $0x690] sm:$0xff] }
 0x2ca   : > { %9568 = vmatmul.mubr.msk.f32.gmra.mrb[16].mxu0 %vm876_vm1, %v14004_v53  ;;  %9574 = vmatmul.mubr.msk.f32.gmra.mrb[16].mxu1 %vm876_vm1, %v14004_v53  ;;  %v2201_v53 = vld [vmem:[#allocation6 + $0x648] sm:$0xff]  ;;  %v2214_v43 = vld [vmem:[#allocation6 + $0x6b0] sm:$0xff]  ;;  %v10261_v48 = vpack.c.bf16 %v2212_v39, %v2208_v37 }
 0x2cb   : > { %1877 = vmatprep.mubr.f32.mxu0 %v15203_v0  ;;  %1978 = vmatprep.mubr.f32.mxu1 %v15203_v0  ;;  %v10255_v22 = vpack.c.bf16 %v2205_v14, %v2201_v53  ;;  %v10281_v49 = vpack.c.bf16 %v2214_v43, %v2210_v42  ;;  %v10289_v53 = vpack.c.bf16 %v2230_v7, %v2226_v6  ;;  %v2232_v14 = vld [vmem:[#allocation6 + $0x740] sm:$0xff] }
 0x2cc   : > { %10226 = vmatpush1.bf16.msra.mxu0 %v10225_v51  ;;  %10246 = vmatpush1.bf16.msra.mxu1 %v10245_v52  ;;  %v2220_v51 = vld [vmem:[#allocation6 + $0x6e0] sm:$0xff] }
 0x2cd   : > { %10228 = vmatprep.subr.bf16.mxu0 %v10227_v57  ;;  %10248 = vmatprep.subr.bf16.mxu1 %v10247_v58  ;;  %v2222_v57 = vld [vmem:[#allocation6 + $0x6f0] sm:$0xff]  ;;  %v2229_v58 = vld [vmem:[#allocation6 + $0x728] sm:$0xff]  ;;  %v10265_v38 = vpack.c.bf16 %v2220_v51, %v2216_v50 }
 0x2ce   : > { %9569 = vmatmul.mubr.msk.f32.gmra.mrb[18].mxu0 %vm876_vm1, %v14016_v5  ;;  %9575 = vmatmul.mubr.msk.f32.gmra.mrb[18].mxu1 %vm876_vm1, %v14016_v5  ;;  %v2200_v5 = vld [vmem:[#allocation6 + $0x640] sm:$0xff]  ;;  %v10285_v62 = vpack.c.bf16 %v2222_v57, %v2218_v56 }
 0x2cf   : > { %1883 = vmatprep.mubr.f32.mxu0 %v15203_v0  ;;  %1984 = vmatprep.mubr.f32.mxu1 %v15203_v0  ;;  %v10257_v34 = vpack.c.bf16 %v2204_v25, %v2200_v5 }
 0x2d0   : > { %10230 = vmatpush1.bf16.msra.mxu0 %v10229_v3  ;;  %10250 = vmatpush1.bf16.msra.mxu1 %v10249_v4  ;;  %v10287_v4 = vpack.c.bf16 %v2231_v61, %v2227_v59 }
 0x2d1   : > { %10232 = vmatprep.subr.bf16.mxu0 %v10231_v10  ;;  %10252 = vmatprep.subr.bf16.mxu1 %v10251_v11  ;;  %v2237_v10 = vld [vmem:[#allocation6 + $0x768] sm:$0xff]  ;;  %v2235_v11 = vld [vmem:[#allocation6 + $0x758] sm:$0xff] }
 0x2d2   : > { %9570 = vmatmul.mubr.msk.f32.gmra.mrb[20].mxu0 %vm876_vm1, %v14028_v23  ;;  %9576 = vmatmul.mubr.msk.f32.gmra.mrb[20].mxu1 %vm876_vm1, %v14028_v23  ;;  %v2213_v23 = vld [vmem:[#allocation6 + $0x6a8] sm:$0xff]  ;;  %v10291_v18 = vpack.c.bf16 %v2239_v12, %v2235_v11 }
 0x2d3   : > { %1889 = vmatprep.mubr.f32.mxu0 %v15203_v0  ;;  %1990 = vmatprep.mubr.f32.mxu1 %v15203_v0  ;;  %v10259_v40 = vpack.c.bf16 %v2213_v23, %v2209_v31 }
 0x2d4   : > { %10234 = vmatpush1.bf16.msra.mxu0 %v10233_v19  ;;  %10254 = vmatpush1.bf16.msra.mxu1 %v10253_v20  ;;  %v2236_v19 = vld [vmem:[#allocation6 + $0x760] sm:$0xff]  ;;  %v2234_v20 = vld [vmem:[#allocation6 + $0x750] sm:$0xff] }
 0x2d5   : > { %10256 = vmatprep.subr.bf16.mxu0 %v10255_v22  ;;  %10276 = vmatprep.subr.bf16.mxu1 %v10275_v24  ;;  %v2238_v22 = vld [vmem:[#allocation6 + $0x770] sm:$0xff] }
 0x2d6   : > { %9571 = vmatmul.mubr.msk.f32.gmra.mrb[22].mxu0 %vm876_vm1, %v14038_v30  ;;  %9577 = vmatmul.mubr.msk.f32.gmra.mrb[22].mxu1 %vm876_vm1, %v14038_v30  ;;  %v2221_v30 = vld [vmem:[#allocation6 + $0x6e8] sm:$0xff]  ;;  %v10293_v24 = vpack.c.bf16 %v2238_v22, %v2234_v20 }
 0x2d7   : > { %2061 = vmatprep.mubr.f32.mxu0 %v15203_v0  ;;  %2162 = vmatprep.mubr.f32.mxu1 %v15203_v0  ;;  %v10263_v52 = vpack.c.bf16 %v2221_v30, %v2217_v44 }
 0x2da   : > { %9578 = vmatmul.mubr.msk.f32.vlgmr.msra.gmra.mrb[12].mxu0 %vm876_vm1, %v13968_v16  ;;  %9584 = vmatmul.mubr.msk.f32.vlgmr.msra.gmra.mrb[12].mxu1 %vm876_vm1, %v13968_v16  ;;  %v2225_v16 = vld [vmem:[#allocation6 + $0x708] sm:$0xff] }
 0x2db   : > { %2067 = vmatprep.mubr.f32.mxu0 %v15203_v0  ;;  %2168 = vmatprep.mubr.f32.mxu1 %v15203_v0  ;;  %v10267_v3 = vpack.c.bf16 %v2229_v58, %v2225_v16 }
 0x2dc   : > { %10258 = vmatpush1.bf16.msra.mxu0 %v10257_v34  ;;  %10278 = vmatpush1.bf16.msra.mxu1 %v10277_v36 }
 0x2dd   : > { %10260 = vmatprep.subr.bf16.mxu0 %v10259_v40  ;;  %10280 = vmatprep.subr.bf16.mxu1 %v10279_v41 }
 0x2de   : > { %9579 = vmatmul.mubr.msk.f32.gmra.mrb[14].mxu0 %vm876_vm1, %v13970_v17  ;;  %9585 = vmatmul.mubr.msk.f32.gmra.mrb[14].mxu1 %vm876_vm1, %v13970_v17  ;;  %v2233_v17 = vld [vmem:[#allocation6 + $0x748] sm:$0xff] }
 0x2df   : > { %2073 = vmatprep.mubr.f32.mxu0 %v15203_v0  ;;  %2174 = vmatprep.mubr.f32.mxu1 %v15203_v0  ;;  %v10271_v15 = vpack.c.bf16 %v2237_v10, %v2233_v17 }
 0x2e0   : > { %10262 = vmatpush1.bf16.msra.mxu0 %v10261_v48  ;;  %10282 = vmatpush1.bf16.msra.mxu1 %v10281_v49 }
 0x2e1   : > { %10264 = vmatprep.subr.bf16.mxu0 %v10263_v52  ;;  %10284 = vmatprep.subr.bf16.mxu1 %v10283_v54 }
 0x2e2   : > { %9580 = vmatmul.mubr.msk.f32.gmra.mrb[16].mxu0 %vm876_vm1, %v13975_v21  ;;  %9586 = vmatmul.mubr.msk.f32.gmra.mrb[16].mxu1 %vm876_vm1, %v13975_v21  ;;  %v10273_v21 = vpack.c.bf16 %v2236_v19, %v2232_v14 }
 0x2e3   : > { %2079 = vmatprep.mubr.f32.mxu0 %v15203_v0  ;;  %2180 = vmatprep.mubr.f32.mxu1 %v15203_v0 }
 0x2e4   : > { %10266 = vmatpush1.bf16.msra.mxu0 %v10265_v38  ;;  %10286 = vmatpush1.bf16.msra.mxu1 %v10285_v62 }
 0x2e5   : > { %10268 = vmatprep.subr.bf16.mxu0 %v10267_v3  ;;  %10288 = vmatprep.subr.bf16.mxu1 %v10287_v4 }
 0x2e6   : > { %9581 = vmatmul.mubr.msk.f32.gmra.mrb[18].mxu0 %vm876_vm1, %v13986_v35  ;;  %9587 = vmatmul.mubr.msk.f32.gmra.mrb[18].mxu1 %vm876_vm1, %v13986_v35 }
 0x2e7   : > { %2085 = vmatprep.mubr.f32.mxu0 %v15203_v0  ;;  %2186 = vmatprep.mubr.f32.mxu1 %v15203_v0 }
 0x2e8   : > { %10270 = vmatpush1.bf16.msra.mxu0 %v10269_v13  ;;  %10290 = vmatpush1.bf16.msra.mxu1 %v10289_v53 }
 0x2e9   : > { %10272 = vmatprep.subr.bf16.mxu0 %v10271_v15  ;;  %10292 = vmatprep.subr.bf16.mxu1 %v10291_v18 }
 0x2ea   : > { %9582 = vmatmul.mubr.msk.f32.gmra.mrb[20].mxu0 %vm876_vm1, %v13995_v45  ;;  %9588 = vmatmul.mubr.msk.f32.gmra.mrb[20].mxu1 %vm876_vm1, %v13995_v45 }
 0x2eb   : > { %2091 = vmatprep.mubr.f32.mxu0 %v15203_v0  ;;  %2192 = vmatprep.mubr.f32.mxu1 %v15203_v0 }
 0x2ec   : > { %10274 = vmatpush1.bf16.msra.mxu0 %v10273_v21  ;;  %10294 = vmatpush1.bf16.msra.mxu1 %v10293_v24 }
 0x2ee   : > { %9583 = vmatmul.mubr.msk.f32.gmra.mrb[22].mxu0 %vm876_vm1, %v14007_v60  ;;  %9589 = vmatmul.mubr.msk.f32.gmra.mrb[22].mxu1 %vm876_vm1, %v14007_v60 }
 0x2ef   : > { %2304 = vmatprep.mubr.f32.mxu0 %v15203_v0  ;;  %2405 = vmatprep.mubr.f32.mxu1 %v15203_v0 }
 0x2f2   : > { %9590 = vmatmul.mubr.msk.f32.vlgmr.msra.gmra.mrb[12].mxu0 %vm876_vm1, %v14085_v55  ;;  %9596 = vmatmul.mubr.msk.f32.vlgmr.msra.gmra.mrb[12].mxu1 %vm876_vm1, %v14085_v55 }
 0x2f3   : > { %2310 = vmatprep.mubr.f32.mxu0 %v15203_v0  ;;  %2411 = vmatprep.mubr.f32.mxu1 %v15203_v0 }
 0x2f6   : > { %9591 = vmatmul.mubr.msk.f32.gmra.mrb[14].mxu0 %vm876_vm1, %v14095_v8  ;;  %9597 = vmatmul.mubr.msk.f32.gmra.mrb[14].mxu1 %vm876_vm1, %v14095_v8 }
 0x2f7   : > { %2316 = vmatprep.mubr.f32.mxu0 %v15203_v0  ;;  %2417 = vmatprep.mubr.f32.mxu1 %v15203_v0 }
 0x2fa   : > { %9592 = vmatmul.mubr.msk.f32.gmra.mrb[16].mxu0 %vm876_vm1, %v14105_v27  ;;  %9598 = vmatmul.mubr.msk.f32.gmra.mrb[16].mxu1 %vm876_vm1, %v14105_v27 }
 0x2fb   : > { %2322 = vmatprep.mubr.f32.mxu0 %v15203_v0  ;;  %2423 = vmatprep.mubr.f32.mxu1 %v15203_v0 }
 0x2fe   : > { %9593 = vmatmul.mubr.msk.f32.gmra.mrb[18].mxu0 %vm876_vm1, %v14115_v46  ;;  %9599 = vmatmul.mubr.msk.f32.gmra.mrb[18].mxu1 %vm876_vm1, %v14115_v46 }
 0x2ff   : > { %2328 = vmatprep.mubr.f32.mxu0 %v15203_v0  ;;  %2429 = vmatprep.mubr.f32.mxu1 %v15203_v0 }
 0x302   : > { %9594 = vmatmul.mubr.msk.f32.gmra.mrb[20].mxu0 %vm876_vm1, %v14125_v63  ;;  %9600 = vmatmul.mubr.msk.f32.gmra.mrb[20].mxu1 %vm876_vm1, %v14125_v63 }
 0x303   : > { %2334 = vmatprep.mubr.f32.mxu0 %v15203_v0  ;;  %2435 = vmatprep.mubr.f32.mxu1 %v15203_v0 }
 0x306   : > { %9595 = vmatmul.mubr.msk.f32.gmra.mrb[22].mxu0 %vm876_vm1, %v14135_v9  ;;  %9601 = vmatmul.mubr.msk.f32.gmra.mrb[22].mxu1 %vm876_vm1, %v14135_v9 }
 0x307   : > { %2567 = vmatprep.mubr.f32.mxu1 %v15203_v0  ;;  %2746 = vmatprep.mubr.f32.mxu0 %v15203_v0 }
 0x37d   : > { %v1553_v35 = vpop.f32.mrb[0].mxu0  ;;  %v1654_v45 = vpop.f32.mrb[0].mxu1 }
 0x37e   : > { %v1555_v60 = vpop.f32.mrb[1].mxu0  ;;  %v1656_v55 = vpop.f32.mrb[1].mxu1 }
 0x381   : > { %v1559_v8 = vpop.f32.mrb[2].mxu0  ;;  %v1660_v27 = vpop.f32.mrb[2].mxu1 }
 0x382   : > { %v1561_v46 = vpop.f32.mrb[3].mxu0  ;;  %v1662_v63 = vpop.f32.mrb[3].mxu1 }
 0x385   : > { %v1565_v5 = vpop.f32.mrb[4].mxu0  ;;  %v1666_v25 = vpop.f32.mrb[4].mxu1 }
 0x386   : > { %v1567_v26 = vpop.f32.mrb[5].mxu0  ;;  %v1668_v28 = vpop.f32.mrb[5].mxu1 }
 0x389   : > { %v1571_v31 = vpop.f32.mrb[6].mxu0  ;;  %v1672_v23 = vpop.f32.mrb[6].mxu1 }
 0x38a   : > { %v1573_v32 = vpop.f32.mrb[7].mxu0  ;;  %v1674_v9 = vpop.f32.mrb[7].mxu1 }
 0x38d   : > { %v14251_v33 = vpop.f32.mrb[8].mxu0  ;;  %v14253_v34 = vpop.f32.mrb[8].mxu1 }
 0x38e   : > { %v14255_v36 = vpop.f32.mrb[9].mxu0  ;;  %v14257_v37 = vpop.f32.mrb[9].mxu1 }
 0x391   : > { %v14259_v39 = vpop.f32.mrb[10].mxu0  ;;  %v14261_v40 = vpop.f32.mrb[10].mxu1 }
 0x392   : > { %v14263_v41 = vpop.f32.mrb[11].mxu0  ;;  %v14265_v42 = vpop.f32.mrb[11].mxu1 }
 0x3c5   : > { %v2306_v43 = vpop.f32.mrb[12].mxu0  ;;  %v2407_v44 = vpop.f32.mrb[12].mxu1 }
 0x3c6   : > { %v2466_v30 = vmax.f32 %v1553_v35, %v2306_v43  ;;  %v2468_v47 = vmax.f32 %v1654_v45, %v2407_v44  ;;  %v2308_v29 = vpop.f32.mrb[13].mxu0  ;;  %v2409_v48 = vpop.f32.mrb[13].mxu1 }
 0x3c7   : > { %v2467_v49 = vmax.f32 %v1555_v60, %v2308_v29  ;;  %v2469_v50 = vmax.f32 %v1656_v55, %v2409_v48  ;;  %v3084_v29 = vld [vmem:[#allocation11 + $0x4c8] sm:$0xff] }
 0x3c8   : > { %v14287_v48 = vld [vmem:[#allocation8 + $0x18] sm:$0xff] }
 0x3c9   : > { %v2312_v51 = vpop.f32.mrb[14].mxu0  ;;  %v2413_v52 = vpop.f32.mrb[14].mxu1 }
 0x3ca   : > { %v2470_v54 = vmax.f32 %v1559_v8, %v2312_v51  ;;  %v2472_v56 = vmax.f32 %v1660_v27, %v2413_v52  ;;  %v2314_v57 = vpop.f32.mrb[15].mxu0  ;;  %v2415_v16 = vpop.f32.mrb[15].mxu1  ;;  %v14295_v51 = vld [vmem:[#allocation8 + $0x20] sm:$0xff] }
 0x3cb   : > { %v2471_v58 = vmax.f32 %v1561_v46, %v2314_v57  ;;  %v2473_v59 = vmax.f32 %v1662_v63, %v2415_v16  ;;  %v3094_v57 = vld [vmem:[#allocation11 + $0x518] sm:$0xff]  ;;  %v3097_v16 = vld [vmem:[#allocation11 + $0x530] sm:$0xff] }
 0x3cc   : > { %v10297_v61 = vpack.c.bf16 %v2470_v54, %v2466_v30  ;;  %v14267_v38 = vpack.c.bf16 %v2472_v56, %v2468_v47  ;;  %v3087_v54 = vld [vmem:[#allocation11 + $0x4e0] sm:$0xff]  ;;  %v3090_v56 = vld [vmem:[#allocation11 + $0x4f8] sm:$0xff] }
 0x3cd   : > { %v10295_v62 = vpack.c.bf16 %v2471_v58, %v2467_v49  ;;  %v14269_v1 = vpack.c.bf16 %v2473_v59, %v2469_v50  ;;  %v2318_v2 = vpop.f32.mrb[16].mxu0  ;;  %v2419_v3 = vpop.f32.mrb[16].mxu1  ;;  %v3091_v49 = vld [vmem:[#allocation11 + $0x500] sm:$0xff]  ;;  %v2491_v50 = vld [vmem:[#allocation8 + $0x8] sm:$0xff] }
 0x3ce   : > { %v2474_v4 = vmax.f32 %v1565_v5, %v2318_v2  ;;  %v2476_v6 = vmax.f32 %v1666_v25, %v2419_v3  ;;  %v2320_v7 = vpop.f32.mrb[17].mxu0  ;;  %v2421_v17 = vpop.f32.mrb[17].mxu1  ;;  %v2492_v58 = vld [vmem:[#allocation8 + $0x10] sm:$0xff]  ;;  %v14304_v59 = vld [vmem:[#allocation8 + $0x28] sm:$0xff]  ;;  %v3096_v3 = vld [vmem:[#allocation11 + $0x528] sm:$0xff] }
 0x3cf   : > { %v2475_v10 = vmax.f32 %v1567_v26, %v2320_v7  ;;  %v2477_v11 = vmax.f32 %v1668_v28, %v2421_v17  ;;  %10296 = vmatprep.subr.bf16.mxu1 %v10295_v62  ;;  %10320 = vmatprep.subr.bf16.mxu0 %v10295_v62  ;;  %v10351_v62 = vpack.c.bf16 %v3097_v16, %v3094_v57  ;;  %v3093_v2 = vld [vmem:[#allocation11 + $0x510] sm:$0xff]  ;;  %v3104_v16 = vld [vmem:[#allocation11 + $0x568] sm:$0xff] }
 0x3d0   : > { %10298 = vmatpush1.bf16.msra.mxu1 %v10297_v61  ;;  %10322 = vmatpush1.bf16.msra.mxu0 %v10297_v61  ;;  %v10349_v61 = vpack.c.bf16 %v3090_v56, %v3087_v54  ;;  %v10353_v7 = vpack.c.bf16 %v3096_v3, %v3093_v2  ;;  %v3101_v57 = vld [vmem:[#allocation11 + $0x550] sm:$0xff]  ;;  %v3139_v2 = vld [vmem:[#allocation11 + $0x680] sm:$0xff] }
 0x3d1   : > { %v2324_v12 = vpop.f32.mrb[18].mxu0  ;;  %v2425_v13 = vpop.f32.mrb[18].mxu1  ;;  %v10457_v3 = vpack.c.bf16 %v3104_v16, %v3101_v57  ;;  %v3173_v57 = vld [vmem:[#allocation11 + $0x790] sm:$0xff] }
 0x3d2   : > { %v2478_v53 = vmax.f32 %v1571_v31, %v2324_v12  ;;  %v2480_v14 = vmax.f32 %v1672_v23, %v2425_v13  ;;  %v2326_v15 = vpop.f32.mrb[19].mxu0  ;;  %v2427_v18 = vpop.f32.mrb[19].mxu1  ;;  %v3106_v12 = vld [vmem:[#allocation11 + $0x578] sm:$0xff]  ;;  %v3109_v13 = vld [vmem:[#allocation11 + $0x590] sm:$0xff] }
 0x3d3   : > { %v2479_v19 = vmax.f32 %v1573_v32, %v2326_v15  ;;  %v2481_v20 = vmax.f32 %v1674_v9, %v2427_v18  ;;  %v3082_v9 = vld [vmem:[#allocation11 + $0x4b8] sm:$0xff]  ;;  %v3108_v15 = vld [vmem:[#allocation11 + $0x588] sm:$0xff]  ;;  %v3131_v18 = vld [vmem:[#allocation11 + $0x640] sm:$0xff] }
 0x3d4   : > { %v10301_v22 = vpack.c.bf16 %v2478_v53, %v2474_v4  ;;  %v14271_v21 = vpack.c.bf16 %v2480_v14, %v2476_v6  ;;  %v3100_v4 = vld [vmem:[#allocation11 + $0x548] sm:$0xff]  ;;  %v3103_v6 = vld [vmem:[#allocation11 + $0x560] sm:$0xff]  ;;  %v3105_v14 = vld [vmem:[#allocation11 + $0x570] sm:$0xff] }
 0x3d5   : > { %v10299_v24 = vpack.c.bf16 %v2479_v19, %v2475_v10  ;;  %v14273_v35 = vpack.c.bf16 %v2481_v20, %v2477_v11  ;;  %v2330_v45 = vpop.f32.mrb[20].mxu0  ;;  %v2431_v60 = vpop.f32.mrb[20].mxu1  ;;  %v10355_v17 = vpack.c.bf16 %v3103_v6, %v3100_v4  ;;  %v3099_v10 = vld [vmem:[#allocation11 + $0x540] sm:$0xff]  ;;  %v3102_v11 = vld [vmem:[#allocation11 + $0x558] sm:$0xff]  ;;  %v3112_v20 = vld [vmem:[#allocation11 + $0x5a8] sm:$0xff] }
 0x3d6   : > { %v2482_v55 = vmax.f32 %v14251_v33, %v2330_v45  ;;  %v2484_v8 = vmax.f32 %v14253_v34, %v2431_v60  ;;  %v2332_v27 = vpop.f32.mrb[21].mxu0  ;;  %v2433_v46 = vpop.f32.mrb[21].mxu1  ;;  %v3085_v33 = vld [vmem:[#allocation11 + $0x4d0] sm:$0xff]  ;;  %v10357_v53 = vpack.c.bf16 %v3102_v11, %v3099_v10  ;;  %v3134_v19 = vld [vmem:[#allocation11 + $0x658] sm:$0xff]  ;;  %v3083_v45 = vld [vmem:[#allocation11 + $0x4c0] sm:$0xff] }
 0x3d7   : > { %v2483_v63 = vmax.f32 %v14255_v36, %v2332_v27  ;;  %v2485_v5 = vmax.f32 %v14257_v37, %v2433_v46  ;;  %10300 = vmatprep.subr.bf16.mxu1 %v10299_v24  ;;  %10324 = vmatprep.subr.bf16.mxu0 %v10299_v24  ;;  %v10343_v47 = vpack.c.bf16 %v3085_v33, %v3082_v9  ;;  %v3111_v24 = vld [vmem:[#allocation11 + $0x5a0] sm:$0xff]  ;;  %v3086_v60 = vld [vmem:[#allocation11 + $0x4d8] sm:$0xff]  ;;  %v3137_v27 = vld [vmem:[#allocation11 + $0x670] sm:$0xff] }
 0x3d8   : > { %10302 = vmatpush1.bf16.msra.mxu1 %v10301_v22  ;;  %10326 = vmatpush1.bf16.msra.mxu0 %v10301_v22  ;;  %v3115_v22 = vld [vmem:[#allocation11 + $0x5c0] sm:$0xff]  ;;  %v3140_v46 = vld [vmem:[#allocation11 + $0x688] sm:$0xff]  ;;  %v3142_v10 = vld [vmem:[#allocation11 + $0x698] sm:$0xff] }
 0x3d9   : > { %v2336_v25 = vpop.f32.mrb[22].mxu0  ;;  %v2437_v26 = vpop.f32.mrb[22].mxu1  ;;  %v3120_v9 = vld [vmem:[#allocation11 + $0x5e8] sm:$0xff]  ;;  %v3143_v33 = vld [vmem:[#allocation11 + $0x6a0] sm:$0xff]  ;;  %v3145_v11 = vld [vmem:[#allocation11 + $0x6b0] sm:$0xff] }
 0x3da   : > { %v2486_v28 = vmax.f32 %v14259_v39, %v2336_v25  ;;  %v2488_v31 = vmax.f32 %v14261_v40, %v2437_v26  ;;  %v2338_v23 = vpop.f32.mrb[23].mxu0  ;;  %v2439_v32 = vpop.f32.mrb[23].mxu1  ;;  %v3081_v39 = vld [vmem:[#allocation11 + $0x4b0] sm:$0xff] }
 0x3db   : > { %v2487_v34 = vmax.f32 %v14263_v41, %v2338_v23  ;;  %v2489_v36 = vmax.f32 %v14265_v42, %v2439_v32  ;;  %v2490_v40 = vld [vmem:[#allocation8] sm:$0xff]  ;;  %v10345_v41 = vpack.c.bf16 %v3084_v29, %v3081_v39  ;;  %v3095_v39 = vld [vmem:[#allocation11 + $0x520] sm:$0xff]  ;;  %v3098_v29 = vld [vmem:[#allocation11 + $0x538] sm:$0xff] }
 0x3dc   : > { %v10305_v43 = vpack.c.bf16 %v2486_v28, %v2482_v55  ;;  %v14283_v37 = vpack.c.bf16 %v2488_v31, %v2484_v8  ;;  %v3088_v42 = vld [vmem:[#allocation11 + $0x4e8] sm:$0xff]  ;;  %v10363_v55 = vpack.c.bf16 %v3115_v22, %v3112_v20  ;;  %v3114_v8 = vld [vmem:[#allocation11 + $0x5b8] sm:$0xff]  ;;  %v3117_v26 = vld [vmem:[#allocation11 + $0x5d0] sm:$0xff]  ;;  %v10447_v28 = vpack.c.bf16 %v3140_v46, %v3137_v27 }
 0x3dd   : > { %v10303_v44 = vpack.c.bf16 %v2487_v34, %v2483_v63  ;;  %v14285_v30 = vpack.c.bf16 %v2489_v36, %v2485_v5  ;;  %v10347_v52 = vpack.c.bf16 %v3091_v49, %v3088_v42  ;;  %v3118_v63 = vld [vmem:[#allocation11 + $0x5d8] sm:$0xff]  ;;  %v3121_v5 = vld [vmem:[#allocation11 + $0x5f0] sm:$0xff]  ;;  %v10365_v25 = vpack.c.bf16 %v3114_v8, %v3111_v24  ;;  %v3092_v23 = vld [vmem:[#allocation11 + $0x508] sm:$0xff] }
 0x3de   : > { %v3089_v31 = vld [vmem:[#allocation11 + $0x4f0] sm:$0xff]  ;;  %v10367_v32 = vpack.c.bf16 %v3121_v5, %v3118_v63  ;;  %v3146_v34 = vld [vmem:[#allocation11 + $0x6b8] sm:$0xff]  ;;  %v3124_v36 = vld [vmem:[#allocation11 + $0x608] sm:$0xff] }
 0x3df   : > { %10304 = vmatprep.subr.bf16.mxu1 %v10303_v44  ;;  %10328 = vmatprep.subr.bf16.mxu0 %v10303_v44  ;;  %v10369_v44 = vpack.c.bf16 %v3120_v9, %v3117_v26  ;;  %v3149_v42 = vld [vmem:[#allocation11 + $0x6d0] sm:$0xff]  ;;  %v3152_v49 = vld [vmem:[#allocation11 + $0x6e8] sm:$0xff]  ;;  %v3150_v20 = vld [vmem:[#allocation11 + $0x6d8] sm:$0xff] }
 0x3e0   : > { %10306 = vmatpush1.bf16.msra.mxu1 %v10305_v43  ;;  %10330 = vmatpush1.bf16.msra.mxu0 %v10305_v43  ;;  %v3127_v43 = vld [vmem:[#allocation11 + $0x620] sm:$0xff]  ;;  %v10455_v56 = vpack.c.bf16 %v3152_v49, %v3149_v42  ;;  %v3157_v24 = vld [vmem:[#allocation11 + $0x710] sm:$0xff]  ;;  %v3156_v8 = vld [vmem:[#allocation11 + $0x708] sm:$0xff] }
 0x3e1   : > { %10308 = vmatprep.subr.bf16.mxu1 %v14269_v1  ;;  %10344 = vmatprep.subr.bf16.mxu0 %v10343_v47  ;;  %v10451_v47 = vpack.c.bf16 %v3146_v34, %v3143_v33  ;;  %v3107_v63 = vld [vmem:[#allocation11 + $0x580] sm:$0xff]  ;;  %v3110_v5 = vld [vmem:[#allocation11 + $0x598] sm:$0xff] }
 0x3e2   : > { %v3163_v26 = vld [vmem:[#allocation11 + $0x740] sm:$0xff]  ;;  %v3162_v9 = vld [vmem:[#allocation11 + $0x738] sm:$0xff] }
 0x3e3   : > { %9602 = vmatmul.mubr.msk.f32.vlgmr.msra.gmra.mrb[24].mxu1 %vm2493_vm4, %v2490_v40  ;;  %9608 = vmatmul.mubr.msk.f32.vlgmr.msra.gmra.mrb[24].mxu0 %vm2493_vm4, %v14287_v48 }
 0x3e4   : > { %10310 = vmatpush1.bf16.msra.mxu1 %v14267_v38  ;;  %2573 = vmatprep.mubr.f32.mxu1 %v15203_v0 }
 0x3e5   : > { %10312 = vmatprep.subr.bf16.mxu1 %v14273_v35  ;;  %2752 = vmatprep.mubr.f32.mxu0 %v15203_v0 }
 0x3e6   : > { %10346 = vmatpush1.bf16.msra.mxu0 %v10345_v41  ;;  %v3126_v41 = vld [vmem:[#allocation11 + $0x618] sm:$0xff] }
 0x3e7   : > { %9603 = vmatmul.mubr.msk.f32.gmra.mrb[26].mxu1 %vm2493_vm4, %v2491_v50  ;;  %9609 = vmatmul.mubr.msk.f32.gmra.mrb[26].mxu0 %vm2493_vm4, %v14295_v51 }
 0x3e8   : > { %10314 = vmatpush1.bf16.msra.mxu1 %v14271_v21  ;;  %2579 = vmatprep.mubr.f32.mxu1 %v15203_v0 }
 0x3e9   : > { %10316 = vmatprep.subr.bf16.mxu1 %v14285_v30  ;;  %2758 = vmatprep.mubr.f32.mxu0 %v15203_v0 }
 0x3ea   : > { %10348 = vmatprep.subr.bf16.mxu0 %v10347_v52  ;;  %v10453_v52 = vpack.c.bf16 %v3098_v29, %v3095_v39  ;;  %v3170_v29 = vld [vmem:[#allocation11 + $0x778] sm:$0xff] }
 0x3eb   : > { %9604 = vmatmul.mubr.msk.f32.gmra.mrb[28].mxu1 %vm2493_vm4, %v2492_v58  ;;  %9610 = vmatmul.mubr.msk.f32.gmra.mrb[28].mxu0 %vm2493_vm4, %v14304_v59 }
 0x3ec   : > { %10318 = vmatpush1.bf16.msra.mxu1 %v14283_v37  ;;  %2650 = vmatprep.mubr.f32.mxu1 %v15203_v0 }
 0x3ed   : > { %10332 = vmatprep.subr.bf16.mxu1 %v14269_v1  ;;  %10350 = vmatpush1.bf16.msra.mxu0 %v10349_v61  ;;  %v10359_v1 = vpack.c.bf16 %v3109_v13, %v3106_v12  ;;  %v3129_v61 = vld [vmem:[#allocation11 + $0x630] sm:$0xff]  ;;  %v10383_v13 = vpack.c.bf16 %v3145_v11, %v3142_v10  ;;  %v15205_v11 = vmov 0.0|0.0  }
 0x3ee   : > { %10352 = vmatprep.subr.bf16.mxu0 %v10351_v62  ;;  %v3132_v62 = vld [vmem:[#allocation11 + $0x648] sm:$0xff] }
 0x3ef   : > { %9605 = vmatmul.mubr.msk.f32.vlgmr.msra.gmra.mrb[30].mxu1 %vm2493_vm4, %v2490_v40  ;;  %v10371_v40 = vpack.c.bf16 %v3127_v43, %v3124_v36  ;;  %v10377_v4 = vpack.c.bf16 %v3132_v62, %v3129_v61  ;;  %v3113_v36 = vld [vmem:[#allocation11 + $0x5b0] sm:$0xff]  ;;  %v3116_v43 = vld [vmem:[#allocation11 + $0x5c8] sm:$0xff]  ;;  %v3171_v61 = vld [vmem:[#allocation11 + $0x780] sm:$0xff] }
 0x3f0   : > { %10334 = vmatpush1.bf16.msra.mxu1 %v14267_v38  ;;  %2656 = vmatprep.mubr.f32.mxu1 %v15203_v0  ;;  %v10361_v38 = vpack.c.bf16 %v3108_v15, %v3105_v14  ;;  %v3148_v14 = vld [vmem:[#allocation11 + $0x6c8] sm:$0xff]  ;;  %v3174_v62 = vld [vmem:[#allocation11 + $0x798] sm:$0xff] }
 0x3f1   : > { %10336 = vmatprep.subr.bf16.mxu1 %v14273_v35  ;;  %10354 = vmatpush1.bf16.msra.mxu0 %v10353_v7  ;;  %v10443_v35 = vpack.c.bf16 %v3134_v19, %v3131_v18  ;;  %v3135_v7 = vld [vmem:[#allocation11 + $0x660] sm:$0xff] }
 0x3f2   : > { %10356 = vmatprep.subr.bf16.mxu0 %v10355_v17  ;;  %v3138_v17 = vld [vmem:[#allocation11 + $0x678] sm:$0xff]  ;;  %v3147_v19 = vld [vmem:[#allocation11 + $0x6c0] sm:$0xff] }
 0x3f3   : > { %9606 = vmatmul.mubr.msk.f32.gmra.mrb[32].mxu1 %vm2493_vm4, %v2491_v50  ;;  %v3133_v50 = vld [vmem:[#allocation11 + $0x650] sm:$0xff]  ;;  %v10381_v12 = vpack.c.bf16 %v3138_v17, %v3135_v7  ;;  %v10389_v22 = vpack.c.bf16 %v3150_v20, %v3147_v19  ;;  %v3178_v7 = vld [vmem:[#allocation11 + $0x7b8] sm:$0xff] }
 0x3f4   : > { %10338 = vmatpush1.bf16.msra.mxu1 %v14271_v21  ;;  %2662 = vmatprep.mubr.f32.mxu1 %v15203_v0  ;;  %v10445_v21 = vpack.c.bf16 %v3086_v60, %v3083_v45  ;;  %v3158_v60 = vld [vmem:[#allocation11 + $0x718] sm:$0xff]  ;;  %v3181_v17 = vld [vmem:[#allocation11 + $0x7d0] sm:$0xff] }
 0x3f5   : > { %10340 = vmatprep.subr.bf16.mxu1 %v14285_v30  ;;  %10358 = vmatpush1.bf16.msra.mxu0 %v10357_v53  ;;  %v3123_v30 = vld [vmem:[#allocation11 + $0x600] sm:$0xff]  ;;  %v3141_v53 = vld [vmem:[#allocation11 + $0x690] sm:$0xff]  ;;  %v10407_v10 = vpack.c.bf16 %v3181_v17, %v3178_v7  ;;  %v3186_v7 = vld [vmem:[#allocation11 + $0x7f8] sm:$0xff] }
 0x3f6   : > { %10360 = vmatprep.subr.bf16.mxu0 %v10359_v1  ;;  %v10373_v54 = vpack.c.bf16 %v3126_v41, %v3123_v30  ;;  %v3151_v1 = vld [vmem:[#allocation11 + $0x6e0] sm:$0xff]  ;;  %v3169_v30 = vld [vmem:[#allocation11 + $0x770] sm:$0xff]  ;;  %v3168_v41 = vld [vmem:[#allocation11 + $0x768] sm:$0xff] }
 0x3f7   : > { %9607 = vmatmul.mubr.msk.f32.gmra.mrb[34].mxu1 %vm2493_vm4, %v2492_v58  ;;  %v10387_v18 = vpack.c.bf16 %v3151_v1, %v3148_v14  ;;  %v3185_v17 = vld [vmem:[#allocation11 + $0x7f0] sm:$0xff] }
 0x3f8   : > { %10342 = vmatpush1.bf16.msra.mxu1 %v14283_v37  ;;  %2829 = vmatprep.mubr.f32.mxu1 %v15203_v0  ;;  %v10449_v37 = vpack.c.bf16 %v3092_v23, %v3089_v31  ;;  %v3164_v23 = vld [vmem:[#allocation11 + $0x748] sm:$0xff] }
 0x3f9   : > { %10362 = vmatpush1.bf16.msra.mxu0 %v10361_v38  ;;  %10444 = vmatprep.subr.bf16.mxu1 %v10443_v35  ;;  %v3154_v38 = vld [vmem:[#allocation11 + $0x6f8] sm:$0xff]  ;;  %v3155_v35 = vld [vmem:[#allocation11 + $0x700] sm:$0xff] }
 0x3fa   : > { %10364 = vmatprep.subr.bf16.mxu0 %v10363_v55  ;;  %v10391_v45 = vpack.c.bf16 %v3157_v24, %v3154_v38  ;;  %v3153_v55 = vld [vmem:[#allocation11 + $0x6f0] sm:$0xff]  ;;  %v10459_v27 = vpack.c.bf16 %v3158_v60, %v3155_v35 }
 0x3fb   : > { %9611 = vmatmul.mubr.msk.f32.vlgmr.msra.gmra.mrb[36].mxu1 %vm2493_vm4, %v14287_v48  ;;  %v3130_v48 = vld [vmem:[#allocation11 + $0x638] sm:$0xff]  ;;  %v10393_v46 = vpack.c.bf16 %v3156_v8, %v3153_v55 }
 0x3fc   : > { %2835 = vmatprep.mubr.f32.mxu1 %v15203_v0  ;;  %10446 = vmatpush3.bf16.msra.mxu1 %v10445_v21  ;;  %v10375_v58 = vpack.c.bf16 %v3133_v50, %v3130_v48  ;;  %v10461_v21 = vpack.c.bf16 %v3110_v5, %v3107_v63  ;;  %v3119_v48 = vld [vmem:[#allocation11 + $0x5e0] sm:$0xff]  ;;  %v3122_v50 = vld [vmem:[#allocation11 + $0x5f8] sm:$0xff] }
 0x3fd   : > { %10366 = vmatpush1.bf16.msra.mxu0 %v10365_v25  ;;  %10448 = vmatprep.subr.bf16.mxu1 %v10447_v28  ;;  %v3160_v25 = vld [vmem:[#allocation11 + $0x728] sm:$0xff]  ;;  %v3161_v28 = vld [vmem:[#allocation11 + $0x730] sm:$0xff] }
 0x3fe   : > { %10368 = vmatprep.subr.bf16.mxu0 %v10367_v32  ;;  %v10395_v31 = vpack.c.bf16 %v3163_v26, %v3160_v25  ;;  %v3159_v32 = vld [vmem:[#allocation11 + $0x720] sm:$0xff]  ;;  %v10463_v33 = vpack.c.bf16 %v3164_v23, %v3161_v28  ;;  %v3177_v23 = vld [vmem:[#allocation11 + $0x7b0] sm:$0xff] }
 0x3ff   : > { %9612 = vmatmul.mubr.msk.f32.gmra.mrb[38].mxu1 %vm2493_vm4, %v14295_v51  ;;  %v3136_v51 = vld [vmem:[#allocation11 + $0x668] sm:$0xff]  ;;  %v10397_v34 = vpack.c.bf16 %v3162_v9, %v3159_v32 }
 0x400   : > { %2841 = vmatprep.mubr.f32.mxu1 %v15203_v0  ;;  %10450 = vmatpush3.bf16.msra.mxu1 %v10449_v37  ;;  %v10379_v6 = vpack.c.bf16 %v3139_v2, %v3136_v51  ;;  %v10465_v37 = vpack.c.bf16 %v3116_v43, %v3113_v36  ;;  %v10405_v2 = vpack.c.bf16 %v3174_v62, %v3171_v61  ;;  %v3180_v36 = vld [vmem:[#allocation11 + $0x7c8] sm:$0xff] }
 0x401   : > { %10370 = vmatpush1.bf16.msra.mxu0 %v10369_v44  ;;  %10452 = vmatprep.subr.bf16.mxu1 %v10451_v47  ;;  %v3166_v44 = vld [vmem:[#allocation11 + $0x758] sm:$0xff]  ;;  %v3167_v47 = vld [vmem:[#allocation11 + $0x760] sm:$0xff]  ;;  %v4635_v0 = vld [vmem:[#allocation11 + $0x1388] sm:$0xff] }
 0x402   : > { %10372 = vmatprep.subr.bf16.mxu0 %v10371_v40  ;;  %v10399_v39 = vpack.c.bf16 %v3169_v30, %v3166_v44  ;;  %v3165_v40 = vld [vmem:[#allocation11 + $0x750] sm:$0xff]  ;;  %v10467_v42 = vpack.c.bf16 %v3170_v29, %v3167_v47  ;;  %v3179_v29 = vld [vmem:[#allocation11 + $0x7c0] sm:$0xff] }
 0x403   : > { %9613 = vmatmul.mubr.msk.f32.gmra.mrb[40].mxu1 %vm2493_vm4, %v14304_v59  ;;  %v3144_v59 = vld [vmem:[#allocation11 + $0x6a8] sm:$0xff]  ;;  %v10401_v49 = vpack.c.bf16 %v3168_v41, %v3165_v40  ;;  %v3182_v40 = vld [vmem:[#allocation11 + $0x7d8] sm:$0xff]  ;;  %vm5909_vm4 = vcmask 179200  }
 0x404   : > { %10454 = vmatpush3.bf16.msra.mxu1 %v10453_v52  ;;  %v10385_v15 = vpack.c.bf16 %v3144_v59, %v3141_v53  ;;  %v10469_v52 = vpack.c.bf16 %v3122_v50, %v3119_v48  ;;  %v14339_v59 = vld [vmem:[#allocation9] sm:$0xf]  ;;  %v10409_v48 = vpack.c.bf16 %v3180_v36, %v3177_v23  ;;  %v3200_v36 = vld [vmem:[#allocation11 + $0x868] sm:$0xff] }
 0x405   : > { %10374 = vmatpush1.bf16.msra.mxu0 %v10373_v54  ;;  %10456 = vmatprep.subr.bf16.mxu1 %v10455_v56  ;;  %v3172_v54 = vld [vmem:[#allocation11 + $0x788] sm:$0xff]  ;;  %v3175_v56 = vld [vmem:[#allocation11 + $0x7a0] sm:$0xff] }
 0x406   : > { %10376 = vmatprep.subr.bf16.mxu0 %v10375_v58  ;;  %v10403_v16 = vpack.c.bf16 %v3175_v56, %v3172_v54  ;;  %v3176_v58 = vld [vmem:[#allocation11 + $0x7a8] sm:$0xff]  ;;  %v3187_v54 = vld [vmem:[#allocation11 + $0x800] sm:$0xff] }
 0x407   : > { %v10471_v51 = vpack.c.bf16 %v3176_v58, %v3173_v57 }
 0x408   : > { %10458 = vmatpush3.bf16.msra.mxu1 %v10457_v3  ;;  %v3125_v3 = vld [vmem:[#allocation11 + $0x610] sm:$0xff] }
 0x409   : > { %10378 = vmatpush1.bf16.msra.mxu0 %v10377_v4  ;;  %10460 = vmatprep.subr.bf16.mxu1 %v10459_v27  ;;  %v3128_v4 = vld [vmem:[#allocation11 + $0x628] sm:$0xff] }
 0x40a   : > { %10380 = vmatprep.subr.bf16.mxu0 %v10379_v6  ;;  %v10473_v6 = vpack.c.bf16 %v3128_v4, %v3125_v3 }
 0x40c   : > { %10462 = vmatpush3.bf16.msra.mxu1 %v10461_v21 }
 0x40d   : > { %10382 = vmatpush1.bf16.msra.mxu0 %v10381_v12  ;;  %10464 = vmatprep.subr.bf16.mxu1 %v10463_v33  ;;  %v2862_v12 = vlaneseq }
 0x40e   : > { %10384 = vmatprep.subr.bf16.mxu0 %v10383_v13 }
 0x40f   : > { %v14334_v13 = vshrl.u32 %v2862_v12, 7 }
 0x410   : > { %10466 = vmatpush3.bf16.msra.mxu1 %v10465_v37 }
 0x411   : > { %10386 = vmatpush1.bf16.msra.mxu0 %v10385_v15  ;;  %10468 = vmatprep.subr.bf16.mxu1 %v10467_v42  ;;  %15292 = vst [vmem:[#allocation51_spill] sm:$0xff] %v14334_v13  ;;  %v14337_v53 = vsub.s32 0, %v14334_v13  ;;  %v14342_v14 = vsub.s32 1, %v14334_v13 }
 0x412   : > { %10388 = vmatprep.subr.bf16.mxu0 %v10387_v18 }
 0x413   : > { %15293 = vst [vmem:[#allocation52_spill] sm:$0xff] %v14337_v53  ;;  %15294 = vst [vmem:[#allocation53_spill] sm:$0xff] %v14342_v14  ;;  %v2865_v1 = vrot.slane %v14339_v59, %v14337_v53  ;;  %v2869_v19 = vrot.slane %v14339_v59, %v14342_v14  ;;  %v4686_v14 = vld [vmem:[#allocation11 + $0x1520] sm:$0xff] }
 0x414   : > { %10470 = vmatpush3.bf16.msra.mxu1 %v10469_v52  ;;  %v3184_v52 = vld [vmem:[#allocation11 + $0x7e8] sm:$0xff] }
 0x415   : > { %10390 = vmatpush1.bf16.msra.mxu0 %v10389_v22  ;;  %10472 = vmatprep.subr.bf16.mxu1 %v10471_v51  ;;  %v10476_v51 = vpack.c.bf16 %v3182_v40, %v3179_v29  ;;  %v3205_v29 = vld [vmem:[#allocation11 + $0x890] sm:$0xff] }
 0x416   : > { %10392 = vmatprep.subr.bf16.mxu0 %v10391_v45 }
 0x418   : > { %10474 = vmatpush3.bf16.msra.mxu1 %v10473_v6  ;;  %v10411_v6 = vpack.c.bf16 %v3187_v54, %v3184_v52  ;;  %v3201_v54 = vld [vmem:[#allocation11 + $0x870] sm:$0xff] }
 0x419   : > { %10394 = vmatpush1.bf16.msra.mxu0 %v10393_v46  ;;  %10475 = vmatprep.subr.bf16.mxu1 %v15205_v11 }
 0x41a   : > { %10396 = vmatprep.subr.bf16.mxu0 %v10395_v31 }
 0x41d   : > { %10398 = vmatpush1.bf16.msra.mxu0 %v10397_v34 }
 0x41e   : > { %10400 = vmatprep.subr.bf16.mxu0 %v10399_v39 }
 0x421   : > { %10402 = vmatpush1.bf16.msra.mxu0 %v10401_v49 }
 0x422   : > { %10404 = vmatprep.subr.bf16.mxu0 %v10403_v16 }
 0x425   : > { %10406 = vmatpush1.bf16.msra.mxu0 %v10405_v2  ;;  %v3183_v2 = vld [vmem:[#allocation11 + $0x7e0] sm:$0xff] }
 0x426   : > { %10408 = vmatprep.subr.bf16.mxu0 %v10407_v10  ;;  %v3188_v10 = vld [vmem:[#allocation11 + $0x808] sm:$0xff] }
 0x4b6   : > { %v2569_v15 = vpop.f32.mrb[24].mxu1  ;;  %v2748_v18 = vpop.f32.mrb[24].mxu0 }
 0x4b7   : > { %v2848_v20 = vmax.f32 %v2569_v15, %v2748_v18  ;;  %v2571_v22 = vpop.f32.mrb[25].mxu1  ;;  %v2750_v38 = vpop.f32.mrb[25].mxu0 }
 0x4b8   : > { %v2849_v24 = vmax.f32 %v2571_v22, %v2750_v38 }
 0x4b9   : > { %v2882_v35 = vadd.f32 %v2865_v1, %v2848_v20  ;;  %v3193_v20 = vld [vmem:[#allocation11 + $0x830] sm:$0xff] }
 0x4ba   : > { %v2883_v45 = vadd.f32 %v2869_v19, %v2849_v24  ;;  %v2575_v60 = vpop.f32.mrb[26].mxu1  ;;  %v2754_v55 = vpop.f32.mrb[26].mxu0  ;;  %v10413_v24 = vpack.c.bf16 %v3186_v7, %v3183_v2  ;;  %v3208_v2 = vld [vmem:[#allocation11 + $0x8a8] sm:$0xff] }
 0x4bb   : > { %v2852_v8 = vmax.f32 %v2575_v60, %v2754_v55  ;;  %v2577_v27 = vpop.f32.mrb[27].mxu1  ;;  %v2756_v46 = vpop.f32.mrb[27].mxu0  ;;  %v2906_v21 = vmul.f32 0.01, %v2882_v35  ;;  %vm2894_vm6 = vcmp.ge.f32.partialorder %v2882_v35, 0.0 }
 0x4bc   : > { %v2907_v63 = vmul.f32 0.01, %v2883_v45  ;;  %v2853_v5 = vmax.f32 %v2577_v27, %v2756_v46  ;;  %vm2895_vm5 = vcmp.ge.f32.partialorder %v2883_v45, 0.0  ;;  %v3191_v27 = vld [vmem:[#allocation11 + $0x820] sm:$0xff]  ;;  %v3194_v46 = vld [vmem:[#allocation11 + $0x838] sm:$0xff] }
 0x4bd   : > { %v2886_v25 = vadd.f32 %v2865_v1, %v2852_v8  ;;  %v14350_v30 = vsel %vm2894_vm6, %v2882_v35, %v2906_v21  ;;  %v10479_v35 = vpack.c.bf16 %v3188_v10, %v3185_v17  ;;  %v3192_v8 = vld [vmem:[#allocation11 + $0x828] sm:$0xff]  ;;  %v15202_v21 = vsub.s32 3, %v14334_v13  ;;  %v3207_v17 = vld [vmem:[#allocation11 + $0x8a0] sm:$0xff] }
 0x4be   : > { %v2887_v26 = vadd.f32 %v2869_v19, %v2853_v5  ;;  %v2581_v28 = vpop.f32.mrb[28].mxu1  ;;  %v2760_v31 = vpop.f32.mrb[28].mxu0  ;;  %v14348_v43 = vsel %vm2895_vm5, %v2883_v45, %v2907_v63  ;;  %v3243_v62 = vrot.slane %v14350_v30, 1  ;;  %v3189_v45 = vld [vmem:[#allocation11 + $0x810] sm:$0xff]  ;;  %v10482_v23 = vpack.c.bf16 %v3194_v46, %v3191_v27 }
 0x4bf   : > { %vm2898_vm7 = vcmp.ge.f32.partialorder %v2886_v25, 0.0  ;;  %v2910_v32 = vmul.f32 0.01, %v2886_v25  ;;  %v2856_v9 = vmax.f32 %v2581_v28, %v2760_v31  ;;  %v2583_v33 = vpop.f32.mrb[29].mxu1  ;;  %v2762_v34 = vpop.f32.mrb[29].mxu0  ;;  %v3246_v57 = vrot.slane %v14348_v43, 1 }
 0x4c0   : > { %vm2899_vm8 = vcmp.ge.f32.partialorder %v2887_v26, 0.0  ;;  %v2911_v37 = vmul.f32 0.01, %v2887_v26  ;;  %v2857_v44 = vmax.f32 %v2583_v33, %v2762_v34  ;;  %v10417_v31 = vpack.c.bf16 %v3192_v8, %v3189_v45  ;;  %v3198_v33 = vld [vmem:[#allocation11 + $0x858] sm:$0xff]  ;;  %v3197_v34 = vld [vmem:[#allocation11 + $0x850] sm:$0xff] }
 0x4c1   : > { %v14352_v47 = vsel %vm2898_vm7, %v2886_v25, %v2910_v32  ;;  %v2890_v39 = vadd.f32 %v2865_v1, %v2856_v9  ;;  %v3196_v25 = vld [vmem:[#allocation11 + $0x848] sm:$0xff]  ;;  %v3195_v32 = vld [vmem:[#allocation11 + $0x840] sm:$0xff]  ;;  %v10485_v52 = vpack.c.bf16 %v3200_v36, %v3197_v34  ;;  %v3209_v45 = vld [vmem:[#allocation11 + $0x8b0] sm:$0xff]  ;;  %v14426_v8 = vsub.s32 2, %v14334_v13 }
 0x4c2   : > { %v14354_v41 = vsel %vm2899_vm8, %v2887_v26, %v2911_v37  ;;  %v2891_v42 = vadd.f32 %v2869_v19, %v2857_v44  ;;  %v3244_v49 = vrot.slane %v14352_v47, 1  ;;  %v14357_v50 = vpop.f32.mrb[30].mxu1  ;;  %v3190_v19 = vld [vmem:[#allocation11 + $0x818] sm:$0xff]  ;;  %v3199_v26 = vld [vmem:[#allocation11 + $0x860] sm:$0xff]  ;;  %v14412_v44 = vrot.slane %v14339_v59, %v15202_v21  ;;  %v3213_v36 = vld [vmem:[#allocation11 + $0x8d0] sm:$0xff] }
 0x4c3   : > { %vm2902_vm9 = vcmp.ge.f32.partialorder %v2890_v39, 0.0  ;;  %v2914_v56 = vmul.f32 0.01, %v2890_v39  ;;  %v3247_v16 = vrot.slane %v14354_v41, 1  ;;  %v14361_v58 = vpop.f32.mrb[31].mxu1  ;;  %v10415_v55 = vpack.c.bf16 %v3193_v20, %v3190_v19  ;;  %15295 = vst [vmem:[#allocation54_spill] sm:$0xff] %v14426_v8 }
 0x4c4   : > { %vm2903_vm10 = vcmp.ge.f32.partialorder %v2891_v42, 0.0  ;;  %v2915_v61 = vmul.f32 0.01, %v2891_v42  ;;  %v14374_v1 = vsel %vm978_vm2, %v3243_v62, %v3244_v49  ;;  %v10419_v9 = vpack.c.bf16 %v3199_v26, %v3196_v25  ;;  %v3214_v25 = vld [vmem:[#allocation11 + $0x8d8] sm:$0xff] }
 0x4c5   : > { %v14364_v3 = vsel %vm2902_vm9, %v2890_v39, %v2914_v56  ;;  %v14367_v4 = vsel %vm978_vm2, %v3246_v57, %v3247_v16  ;;  %v3202_v39 = vld [vmem:[#allocation11 + $0x878] sm:$0xff]  ;;  %v3204_v57 = vld [vmem:[#allocation11 + $0x888] sm:$0xff] }
 0x4c6   : > { %v14369_v12 = vsel %vm2903_vm10, %v2891_v42, %v2915_v61  ;;  %3343 = vmatprep.mubr.f32.mxu0 %v14367_v4  ;;  %3509 = vmatprep.mubr.f32.mxu1 %v14367_v4  ;;  %v14376_v15 = vpop.f32.mrb[32].mxu1  ;;  %v14379_v18 = vrot.slane %v14364_v3, 1  ;;  %v10423_v56 = vpack.c.bf16 %v3205_v29, %v3202_v39  ;;  %v3206_v61 = vld [vmem:[#allocation11 + $0x898] sm:$0xff]  ;;  %v10425_v20 = vpack.c.bf16 %v3204_v57, %v3201_v54  ;;  %v3223_v54 = vld [vmem:[#allocation11 + $0x920] sm:$0xff] }
 0x4c7   : > { %3344 = vmatmul.mubr.f32.vlgmr.msra.gmra.mrb[30].mxu0 %v14374_v1  ;;  %3510 = vmatmul.mubr.f32.vlgmr.msra.gmra.mrb[42].mxu1 %v14374_v1  ;;  %v14384_v22 = vrot.slane %v14369_v12, 1  ;;  %v14386_v38 = vpop.f32.mrb[33].mxu1  ;;  %v2873_v39 = vrot.slane %v14339_v59, %v14426_v8  ;;  %v4683_v8 = vld [vmem:[#allocation11 + $0x1508] sm:$0xff] }
 0x4c8   : > { %10410 = vmatpush1.bf16.msra.mxu0 %v10409_v48  ;;  %10477 = vmatpush1.bf16.msra.mxu1 %v10476_v51  ;;  %v14397_v63 = vsel %vm978_vm2, %v3244_v49, %v14379_v18  ;;  %v10421_v48 = vpack.c.bf16 %v3198_v33, %v3195_v32 }
 0x4c9   : > { %v14390_v60 = vsel %vm978_vm2, %v3247_v16, %v14384_v22  ;;  %10412 = vmatprep.subr.bf16.mxu0 %v10411_v6  ;;  %10478 = vmatprep.subr.bf16.mxu1 %v15205_v11  ;;  %v3203_v16 = vld [vmem:[#allocation11 + $0x880] sm:$0xff] }
 0x4ca   : > { %3349 = vmatprep.mubr.f32.mxu0 %v14390_v60  ;;  %3514 = vmatprep.mubr.f32.mxu1 %v14390_v60  ;;  %v14399_v5 = vpop.f32.mrb[34].mxu1  ;;  %v3211_v6 = vld [vmem:[#allocation11 + $0x8c0] sm:$0xff] }
 0x4cb   : > { %3350 = vmatmul.mubr.f32.gmra.mrb[32].mxu0 %v14397_v63  ;;  %3515 = vmatmul.mubr.f32.gmra.mrb[44].mxu1 %v14397_v63  ;;  %v14404_v28 = vpop.f32.mrb[35].mxu1 }
 0x4cc   : > { %10414 = vmatpush1.bf16.msra.mxu0 %v10413_v24  ;;  %10480 = vmatpush1.bf16.msra.mxu1 %v10479_v35  ;;  %v10488_v24 = vpack.c.bf16 %v3206_v61, %v3203_v16  ;;  %v3210_v35 = vld [vmem:[#allocation11 + $0x8b8] sm:$0xff] }
 0x4cd   : > { %10416 = vmatprep.subr.bf16.mxu0 %v10415_v55  ;;  %10481 = vmatprep.subr.bf16.mxu1 %v15205_v11  ;;  %v3212_v55 = vld [vmem:[#allocation11 + $0x8c8] sm:$0xff] }
 0x4ce   : > { %v14407_v37 = vpop.f32.mrb[36].mxu1  ;;  %3519 = vmatprep.mubr.f32.mxu1 %v14384_v22  ;;  %3355 = vmatprep.mubr.f32.mxu0 %v14384_v22  ;;  %v10491_v32 = vpack.c.bf16 %v3212_v55, %v3209_v45 }
 0x4cf   : > { %v2850_v40 = vmax.f32 %v14357_v50, %v14407_v37  ;;  %v2833_v42 = vpop.f32.mrb[37].mxu1  ;;  %3520 = vmatmul.mubr.f32.gmra.mrb[46].mxu1 %v14379_v18  ;;  %3356 = vmatmul.mubr.f32.gmra.mrb[34].mxu0 %v14379_v18  ;;  %v3226_v50 = vld [vmem:[#allocation11 + $0x938] sm:$0xff]  ;;  %v3229_v37 = vld [vmem:[#allocation11 + $0x950] sm:$0xff] }
 0x4d0   : > { %v2851_v49 = vmax.f32 %v14361_v58, %v2833_v42  ;;  %10418 = vmatpush1.bf16.msra.mxu0 %v10417_v31  ;;  %10483 = vmatpush1.bf16.msra.mxu1 %v10482_v23  ;;  %v10429_v23 = vpack.c.bf16 %v3210_v35, %v3207_v17  ;;  %v3215_v42 = vld [vmem:[#allocation11 + $0x8e0] sm:$0xff]  ;;  %v3228_v35 = vld [vmem:[#allocation11 + $0x948] sm:$0xff]  ;;  %v10439_v55 = vpack.c.bf16 %v3229_v37, %v3226_v50 }
 0x4d1   : > { %10420 = vmatprep.subr.bf16.mxu0 %v10419_v9  ;;  %10484 = vmatprep.subr.bf16.mxu1 %v15205_v11 }
 0x4d2   : > { %v2885_v62 = vadd.f32 %v14412_v44, %v2851_v49  ;;  %v2837_v51 = vpop.f32.mrb[38].mxu1  ;;  %v3218_v49 = vld [vmem:[#allocation11 + $0x8f8] sm:$0xff] }
 0x4d3   : > { %v2854_v7 = vmax.f32 %v14376_v15, %v2837_v51  ;;  %v2839_v58 = vpop.f32.mrb[39].mxu1  ;;  %v10427_v15 = vpack.c.bf16 %v3211_v6, %v3208_v2  ;;  %v10494_v61 = vpack.c.bf16 %v3218_v49, %v3215_v42  ;;  %v2884_v51 = vadd.f32 %v2873_v39, %v2850_v40  ;;  %v2933_v42 = vld [vmem:[#allocation11 + $0x18] sm:$0xff] }
 0x4d4   : > { %v2909_v10 = vmul.f32 0.01, %v2885_v62  ;;  %v2855_v19 = vmax.f32 %v14386_v38, %v2839_v58  ;;  %10422 = vmatpush1.bf16.msra.mxu0 %v10421_v48  ;;  %10486 = vmatpush1.bf16.msra.mxu1 %v10485_v52  ;;  %vm2897_vm11 = vcmp.ge.f32.partialorder %v2885_v62, 0.0  ;;  %v3217_v38 = vld [vmem:[#allocation11 + $0x8f0] sm:$0xff]  ;;  %v3220_v52 = vld [vmem:[#allocation11 + $0x908] sm:$0xff] }
 0x4d5   : > { %10424 = vmatprep.subr.bf16.mxu0 %v10423_v56  ;;  %10487 = vmatprep.subr.bf16.mxu1 %v15205_v11  ;;  %v10431_v29 = vpack.c.bf16 %v3217_v38, %v3214_v25  ;;  %v2888_v56 = vadd.f32 %v2873_v39, %v2854_v7  ;;  %v10435_v6 = vpack.c.bf16 %v3223_v54, %v3220_v52  ;;  %v3222_v7 = vld [vmem:[#allocation11 + $0x918] sm:$0xff]  ;;  %v3224_v58 = vld [vmem:[#allocation11 + $0x928] sm:$0xff]  ;;  %v2908_v45 = vmul.f32 0.01, %v2884_v51  ;;  %v2934_v25 = vld [vmem:[#allocation11 + $0x20] sm:$0xff] }
 0x4d6   : > { %v2889_v27 = vadd.f32 %v14412_v44, %v2855_v19  ;;  %v2843_v46 = vpop.f32.mrb[40].mxu1  ;;  %v14431_v9 = vsel %vm2897_vm11, %v2885_v62, %v2909_v10  ;;  %v3219_v62 = vld [vmem:[#allocation11 + $0x900] sm:$0xff]  ;;  %vm2896_vm0 = vcmp.ge.f32.partialorder %v2884_v51, 0.0  ;;  %v2980_v38 = vld [vmem:[#allocation11 + $0x190] sm:$0xff]  ;;  %v2935_v54 = vld [vmem:[#allocation11 + $0x28] sm:$0xff]  ;;  %vm6485_vm11 = vcmask 850944  }
 0x4d7   : > { %v2858_v26 = vmax.f32 %v14399_v5, %v2843_v46  ;;  %v2845_v31 = vpop.f32.mrb[41].mxu1  ;;  %v3216_v5 = vld [vmem:[#allocation11 + $0x8e8] sm:$0xff]  ;;  %v2912_v40 = vmul.f32 0.01, %v2888_v56  ;;  %vm2900_vm14 = vcmp.ge.f32.partialorder %v2888_v56, 0.0  ;;  %v10437_v19 = vpack.c.bf16 %v3222_v7, %v3219_v62  ;;  %v2932_v52 = vld [vmem:[#allocation11 + $0x10] sm:$0xff] }
 0x4d8   : > { %vm2901_vm12 = vcmp.ge.f32.partialorder %v2889_v27, 0.0  ;;  %v2913_v33 = vmul.f32 0.01, %v2889_v27  ;;  %v2859_v34 = vmax.f32 %v14404_v28, %v2845_v31  ;;  %10426 = vmatpush1.bf16.msra.mxu0 %v10425_v20  ;;  %10489 = vmatpush1.bf16.msra.mxu1 %v10488_v24  ;;  %v3252_v28 = vrot.slane %v14431_v9, 1  ;;  %v3225_v24 = vld [vmem:[#allocation11 + $0x930] sm:$0xff]  ;;  %v2931_v46 = vld [vmem:[#allocation11 + $0x8] sm:$0xff] }
 0x4d9   : > { %10428 = vmatprep.subr.bf16.mxu0 %v10427_v15  ;;  %10490 = vmatprep.subr.bf16.mxu1 %v15205_v11  ;;  %v10433_v59 = vpack.c.bf16 %v3216_v5, %v3213_v36  ;;  %v2892_v17 = vadd.f32 %v2873_v39, %v2858_v26  ;;  %v3227_v15 = vld [vmem:[#allocation11 + $0x940] sm:$0xff]  ;;  %v2983_v26 = vld [vmem:[#allocation11 + $0x1a8] sm:$0xff]  ;;  %v14457_v31 = vsel %vm2900_vm14, %v2888_v56, %v2912_v40  ;;  %v2937_v56 = vld [vmem:[#allocation11 + $0x38] sm:$0xff]  ;;  %vm8037_vm14 = vcmask 1043456  }
 0x4da   : > { %v14437_v48 = vsel %vm2901_vm12, %v2889_v27, %v2913_v33  ;;  %v2893_v16 = vadd.f32 %v14412_v44, %v2859_v34  ;;  %v3221_v44 = vld [vmem:[#allocation11 + $0x910] sm:$0xff]  ;;  %v3230_v27 = vld [vmem:[#allocation11 + $0x958] sm:$0xff]  ;;  %v10441_v33 = vpack.c.bf16 %v3228_v35, %v3225_v24  ;;  %v14461_v36 = vsel %vm2896_vm0, %v2884_v51, %v2908_v45  ;;  %v2930_v5 = vld [vmem:[#allocation11] sm:$0xff] }
 0x4db   : > { %v3253_v57 = vrot.slane %v14437_v48, 1  ;;  %v10497_v20 = vpack.c.bf16 %v3224_v58, %v3221_v44  ;;  %vm2904_vm1 = vcmp.ge.f32.partialorder %v2892_v17, 0.0  ;;  %v10500_v34 = vpack.c.bf16 %v3230_v27, %v3227_v15  ;;  %v2989_v62 = vld [vmem:[#allocation11 + $0x1d8] sm:$0xff]  ;;  %v2936_v44 = vld [vmem:[#allocation11 + $0x30] sm:$0xff]  ;;  %v2939_v58 = vld [vmem:[#allocation11 + $0x48] sm:$0xff] }
 0x4dc   : > { %10430 = vmatpush1.bf16.msra.mxu0 %v10429_v23  ;;  %10492 = vmatpush1.bf16.msra.mxu1 %v10491_v32  ;;  %v2917_v10 = vmul.f32 0.01, %v2893_v16  ;;  %vm2905_vm15 = vcmp.ge.f32.partialorder %v2893_v16, 0.0  ;;  %v2916_v23 = vmul.f32 0.01, %v2892_v17  ;;  %v10502_v39 = vpack.c.bf16 %v2934_v25, %v2931_v46  ;;  %v2946_v35 = vld [vmem:[#allocation11 + $0x80] sm:$0xff] }
 0x4dd   : > { %10432 = vmatprep.subr.bf16.mxu0 %v10431_v29  ;;  %v14448_v2 = vsel %vm978_vm2, %v3252_v28, %v3253_v57  ;;  %10493 = vmatprep.subr.bf16.mxu1 %v15205_v11  ;;  %v10602_v29 = vpack.c.bf16 %v2983_v26, %v2980_v38  ;;  %v3250_v49 = vrot.slane %v14457_v31, 1  ;;  %v3249_v51 = vrot.slane %v14461_v36, 1  ;;  %v2992_v45 = vld [vmem:[#allocation11 + $0x1f0] sm:$0xff]  ;;  %v2942_v46 = vld [vmem:[#allocation11 + $0x60] sm:$0xff]  ;;  %v2945_v25 = vld [vmem:[#allocation11 + $0x78] sm:$0xff] }
 0x4de   : > { %9614 = vmatprep.mubr.msk.f32.mxu0 %vm3272_vm13, %v14448_v2  ;;  %9617 = vmatprep.mubr.msk.f32.mxu1 %vm3272_vm13, %v14448_v2  ;;  %v14459_v32 = vsel %vm2905_vm15, %v2893_v16, %v2917_v10  ;;  %v14466_v28 = vsel %vm2904_vm1, %v2892_v17, %v2916_v23  ;;  %v10604_v7 = vpack.c.bf16 %v2935_v54, %v2932_v52  ;;  %v2938_v10 = vld [vmem:[#allocation11 + $0x40] sm:$0xff]  ;;  %v2944_v23 = vld [vmem:[#allocation11 + $0x70] sm:$0xff]  ;;  %v2951_v54 = vld [vmem:[#allocation11 + $0xa8] sm:$0xff] }
 0x4df   : > { %v14469_v16 = vrot.slane %v14459_v32, 1  ;;  %v14473_v50 = vsel %vm978_vm2, %v3249_v51, %v3250_v49  ;;  %v14476_v37 = vrot.slane %v14466_v28, 1  ;;  %v10508_v15 = vpack.c.bf16 %v2939_v58, %v2936_v44  ;;  %v2948_v52 = vld [vmem:[#allocation11 + $0x90] sm:$0xff]  ;;  %v2955_v51 = vld [vmem:[#allocation11 + $0xc8] sm:$0xff] }
 0x4e0   : > { %10434 = vmatpush1.bf16.msra.mxu0 %v10433_v59  ;;  %10495 = vmatpush1.bf16.msra.mxu1 %v10494_v61  ;;  %v2940_v59 = vld [vmem:[#allocation11 + $0x50] sm:$0xff]  ;;  %v2986_v61 = vld [vmem:[#allocation11 + $0x1c0] sm:$0xff]  ;;  %v3007_v44 = vld [vmem:[#allocation11 + $0x268] sm:$0xff]  ;;  %v10516_v58 = vpack.c.bf16 %v2951_v54, %v2948_v52 }
 0x4e1   : > { %10436 = vmatprep.subr.bf16.mxu0 %v10435_v6  ;;  %10496 = vmatprep.subr.bf16.mxu1 %v15205_v11  ;;  %v10504_v6 = vpack.c.bf16 %v2933_v42, %v2930_v5  ;;  %v10506_v40 = vpack.c.bf16 %v2940_v59, %v2937_v56  ;;  %v10606_v17 = vpack.c.bf16 %v2989_v62, %v2986_v61  ;;  %v3001_v5 = vld [vmem:[#allocation11 + $0x238] sm:$0xff]  ;;  %v2950_v61 = vld [vmem:[#allocation11 + $0xa0] sm:$0xff]  ;;  %v3019_v52 = vld [vmem:[#allocation11 + $0x2c8] sm:$0xff] }
 0x4e2   : > { %v14484_v24 = vsel %vm978_vm2, %v3253_v57, %v14469_v16  ;;  %v14492_v38 = vsel %vm978_vm2, %v3250_v49, %v14476_v37  ;;  %v10512_v42 = vpack.c.bf16 %v2945_v25, %v2942_v46  ;;  %v2953_v62 = vld [vmem:[#allocation11 + $0xb8] sm:$0xff] }
 0x4e3   : > { %v3013_v46 = vld [vmem:[#allocation11 + $0x298] sm:$0xff] }
 0x4e4   : > { %10438 = vmatpush1.bf16.msra.mxu0 %v10437_v19  ;;  %10498 = vmatpush1.bf16.msra.mxu1 %v10497_v20  ;;  %v2941_v19 = vld [vmem:[#allocation11 + $0x58] sm:$0xff]  ;;  %v2943_v20 = vld [vmem:[#allocation11 + $0x68] sm:$0xff] }
 0x4e5   : > { %10440 = vmatprep.subr.bf16.mxu0 %v10439_v55  ;;  %10499 = vmatprep.subr.bf16.mxu1 %v15205_v11  ;;  %v2995_v55 = vld [vmem:[#allocation11 + $0x208] sm:$0xff]  ;;  %v10608_v27 = vpack.c.bf16 %v2941_v19, %v2938_v10  ;;  %v10510_v57 = vpack.c.bf16 %v2946_v35, %v2943_v20  ;;  %v2957_v10 = vld [vmem:[#allocation11 + $0xd8] sm:$0xff]  ;;  %v2956_v35 = vld [vmem:[#allocation11 + $0xd0] sm:$0xff] }
 0x4e6   : > { %v10610_v26 = vpack.c.bf16 %v2995_v55, %v2992_v45  ;;  %v2959_v45 = vld [vmem:[#allocation11 + $0xe8] sm:$0xff]  ;;  %v2961_v55 = vld [vmem:[#allocation11 + $0xf8] sm:$0xff] }
 0x4e8   : > { %10442 = vmatpush1.bf16.msra.mxu0 %v10441_v33  ;;  %10501 = vmatpush1.bf16.msra.mxu1 %v10500_v34  ;;  %v2947_v33 = vld [vmem:[#allocation11 + $0x88] sm:$0xff]  ;;  %v2949_v34 = vld [vmem:[#allocation11 + $0x98] sm:$0xff] }
 0x4e9   : > { %10503 = vmatprep.subr.bf16.mxu0 %v10502_v39  ;;  %10603 = vmatprep.subr.bf16.mxu1 %v10602_v29  ;;  %v2952_v39 = vld [vmem:[#allocation11 + $0xb0] sm:$0xff]  ;;  %v2998_v29 = vld [vmem:[#allocation11 + $0x220] sm:$0xff]  ;;  %v10612_v49 = vpack.c.bf16 %v2947_v33, %v2944_v23  ;;  %v2963_v23 = vld [vmem:[#allocation11 + $0x108] sm:$0xff] }
 0x4ea   : > { %v10514_v56 = vpack.c.bf16 %v2952_v39, %v2949_v34  ;;  %v10614_v59 = vpack.c.bf16 %v3001_v5, %v2998_v29  ;;  %v2962_v39 = vld [vmem:[#allocation11 + $0x100] sm:$0xff]  ;;  %v2965_v29 = vld [vmem:[#allocation11 + $0x118] sm:$0xff]  ;;  %v2967_v5 = vld [vmem:[#allocation11 + $0x128] sm:$0xff] }
 0x4eb   : > { %3427 = vmatmul.mubr.f32.vlgmr.msra.gmra.mrb[30].mxu0 %v14473_v50  ;;  %3590 = vmatmul.mubr.f32.vlgmr.msra.gmra.mrb[48].mxu1 %v14473_v50 }
 0x4ec   : > { %9615 = vmatprep.mubr.msk.f32.mxu0 %vm3272_vm13, %v14484_v24  ;;  %9618 = vmatprep.mubr.msk.f32.mxu1 %vm3272_vm13, %v14484_v24 }
 0x4ed   : > { %10505 = vmatpush1.bf16.msra.mxu0 %v10504_v6  ;;  %10605 = vmatpush3.bf16.msra.mxu1 %v10604_v7  ;;  %v2958_v6 = vld [vmem:[#allocation11 + $0xe0] sm:$0xff]  ;;  %v3004_v7 = vld [vmem:[#allocation11 + $0x250] sm:$0xff] }
 0x4ee   : > { %10507 = vmatprep.subr.bf16.mxu0 %v10506_v40  ;;  %10607 = vmatprep.subr.bf16.mxu1 %v10606_v17  ;;  %v10616_v40 = vpack.c.bf16 %v2953_v62, %v2950_v61  ;;  %v2954_v17 = vld [vmem:[#allocation11 + $0xc0] sm:$0xff]  ;;  %v10518_v19 = vpack.c.bf16 %v2958_v6, %v2955_v51  ;;  %v10618_v20 = vpack.c.bf16 %v3007_v44, %v3004_v7  ;;  %v2969_v61 = vld [vmem:[#allocation11 + $0x138] sm:$0xff]  ;;  %v2968_v6 = vld [vmem:[#allocation11 + $0x130] sm:$0xff] }
 0x4ef   : > { %3433 = vmatmul.mubr.f32.gmra.mrb[32].mxu0 %v14492_v38  ;;  %3595 = vmatmul.mubr.f32.gmra.mrb[50].mxu1 %v14492_v38  ;;  %v10520_v25 = vpack.c.bf16 %v2957_v10, %v2954_v17  ;;  %v2971_v7 = vld [vmem:[#allocation11 + $0x148] sm:$0xff]  ;;  %v2973_v44 = vld [vmem:[#allocation11 + $0x158] sm:$0xff] }
 0x4f0   : > { %9616 = vmatprep.mubr.msk.f32.mxu0 %vm3272_vm13, %v14469_v16  ;;  %9619 = vmatprep.mubr.msk.f32.mxu1 %vm3272_vm13, %v14469_v16  ;;  %v3025_v17 = vld [vmem:[#allocation11 + $0x2f8] sm:$0xff] }
 0x4f1   : > { %10509 = vmatpush1.bf16.msra.mxu0 %v10508_v15  ;;  %10609 = vmatpush3.bf16.msra.mxu1 %v10608_v27  ;;  %v2964_v15 = vld [vmem:[#allocation11 + $0x110] sm:$0xff]  ;;  %v3010_v27 = vld [vmem:[#allocation11 + $0x280] sm:$0xff] }
 0x4f2   : > { %10511 = vmatprep.subr.bf16.mxu0 %v10510_v57  ;;  %10611 = vmatprep.subr.bf16.mxu1 %v10610_v26  ;;  %v10620_v57 = vpack.c.bf16 %v2959_v45, %v2956_v35  ;;  %v2960_v26 = vld [vmem:[#allocation11 + $0xf0] sm:$0xff]  ;;  %v10522_v33 = vpack.c.bf16 %v2964_v15, %v2961_v55  ;;  %v10622_v34 = vpack.c.bf16 %v3013_v46, %v3010_v27  ;;  %v2975_v55 = vld [vmem:[#allocation11 + $0x168] sm:$0xff]  ;;  %v2974_v15 = vld [vmem:[#allocation11 + $0x160] sm:$0xff] }
 0x4f3   : > { %3439 = vmatmul.mubr.f32.gmra.mrb[34].mxu0 %v14476_v37  ;;  %3600 = vmatmul.mubr.f32.gmra.mrb[52].mxu1 %v14476_v37  ;;  %v10524_v54 = vpack.c.bf16 %v2963_v23, %v2960_v26  ;;  %v2977_v27 = vld [vmem:[#allocation11 + $0x178] sm:$0xff]  ;;  %v2979_v46 = vld [vmem:[#allocation11 + $0x188] sm:$0xff] }
 0x4f4   : > { %3675 = vmatprep.mubr.f32.mxu0 %v14348_v43  ;;  %3841 = vmatprep.mubr.f32.mxu1 %v14348_v43  ;;  %v10632_v26 = vpack.c.bf16 %v2977_v27, %v2974_v15  ;;  %v2996_v27 = vld [vmem:[#allocation11 + $0x210] sm:$0xff] }
 0x4f5   : > { %10513 = vmatpush1.bf16.msra.mxu0 %v10512_v42  ;;  %10613 = vmatpush3.bf16.msra.mxu1 %v10612_v49  ;;  %v2970_v42 = vld [vmem:[#allocation11 + $0x140] sm:$0xff]  ;;  %v3016_v49 = vld [vmem:[#allocation11 + $0x2b0] sm:$0xff] }
 0x4f6   : > { %10515 = vmatprep.subr.bf16.mxu0 %v10514_v56  ;;  %10615 = vmatprep.subr.bf16.mxu1 %v10614_v59  ;;  %v10624_v56 = vpack.c.bf16 %v2965_v29, %v2962_v39  ;;  %v2966_v59 = vld [vmem:[#allocation11 + $0x120] sm:$0xff]  ;;  %v10526_v62 = vpack.c.bf16 %v2970_v42, %v2967_v5  ;;  %v10626_v51 = vpack.c.bf16 %v3019_v52, %v3016_v49  ;;  %v3028_v39 = vld [vmem:[#allocation11 + $0x310] sm:$0xff]  ;;  %v3031_v29 = vld [vmem:[#allocation11 + $0x328] sm:$0xff] }
 0x4f7   : > { %v10528_v10 = vpack.c.bf16 %v2969_v61, %v2966_v59  ;;  %v2985_v5 = vld [vmem:[#allocation11 + $0x1b8] sm:$0xff]  ;;  %v2988_v42 = vld [vmem:[#allocation11 + $0x1d0] sm:$0xff]  ;;  %v10635_v52 = vpack.c.bf16 %v3031_v29, %v3028_v39  ;;  %v2987_v59 = vld [vmem:[#allocation11 + $0x1c8] sm:$0xff] }
 0x4f8   : > { %v3034_v61 = vld [vmem:[#allocation11 + $0x340] sm:$0xff] }
 0x4f9   : > { %10517 = vmatpush1.bf16.msra.mxu0 %v10516_v58  ;;  %10617 = vmatpush3.bf16.msra.mxu1 %v10616_v40  ;;  %v2976_v58 = vld [vmem:[#allocation11 + $0x170] sm:$0xff]  ;;  %v3022_v40 = vld [vmem:[#allocation11 + $0x2e0] sm:$0xff] }
 0x4fa   : > { %10519 = vmatprep.subr.bf16.mxu0 %v10518_v19  ;;  %10619 = vmatprep.subr.bf16.mxu1 %v10618_v20  ;;  %v10628_v19 = vpack.c.bf16 %v2971_v7, %v2968_v6  ;;  %v2972_v20 = vld [vmem:[#allocation11 + $0x150] sm:$0xff]  ;;  %v10530_v35 = vpack.c.bf16 %v2976_v58, %v2973_v44  ;;  %v10630_v45 = vpack.c.bf16 %v3025_v17, %v3022_v40  ;;  %v2994_v6 = vld [vmem:[#allocation11 + $0x200] sm:$0xff]  ;;  %v2993_v17 = vld [vmem:[#allocation11 + $0x1f8] sm:$0xff] }
 0x4fb   : > { %v2990_v40 = vld [vmem:[#allocation11 + $0x1e0] sm:$0xff] }
 0x4fc   : > { %v3002_v29 = vld [vmem:[#allocation11 + $0x240] sm:$0xff] }
 0x4fd   : > { %10521 = vmatpush1.bf16.msra.mxu0 %v10520_v25  ;;  %10621 = vmatpush3.bf16.msra.mxu1 %v10620_v57  ;;  %v2982_v25 = vld [vmem:[#allocation11 + $0x1a0] sm:$0xff]  ;;  %v10532_v57 = vpack.c.bf16 %v2975_v55, %v2972_v20  ;;  %v2997_v20 = vld [vmem:[#allocation11 + $0x218] sm:$0xff] }
 0x4fe   : > { %10523 = vmatprep.subr.bf16.mxu0 %v10522_v33  ;;  %10623 = vmatprep.subr.bf16.mxu1 %v10622_v34  ;;  %v10534_v23 = vpack.c.bf16 %v2982_v25, %v2979_v46  ;;  %v2978_v33 = vld [vmem:[#allocation11 + $0x180] sm:$0xff]  ;;  %v2981_v34 = vld [vmem:[#allocation11 + $0x198] sm:$0xff]  ;;  %v2999_v46 = vld [vmem:[#allocation11 + $0x228] sm:$0xff] }
 0x4ff   : > { %v10536_v49 = vpack.c.bf16 %v2981_v34, %v2978_v33  ;;  %v3046_v25 = vld [vmem:[#allocation11 + $0x3a0] sm:$0xff]  ;;  %v10548_v33 = vpack.c.bf16 %v2999_v46, %v2996_v27 }
 0x501   : > { %10525 = vmatpush1.bf16.msra.mxu0 %v10524_v54  ;;  %10625 = vmatpush3.bf16.msra.mxu1 %v10624_v56  ;;  %v10538_v54 = vpack.c.bf16 %v2988_v42, %v2985_v5  ;;  %v2984_v56 = vld [vmem:[#allocation11 + $0x1b0] sm:$0xff]  ;;  %v3005_v5 = vld [vmem:[#allocation11 + $0x258] sm:$0xff] }
 0x502   : > { %10527 = vmatprep.subr.bf16.mxu0 %v10526_v62  ;;  %10627 = vmatprep.subr.bf16.mxu1 %v10626_v51  ;;  %v3037_v62 = vld [vmem:[#allocation11 + $0x358] sm:$0xff]  ;;  %v2991_v51 = vld [vmem:[#allocation11 + $0x1e8] sm:$0xff]  ;;  %v10540_v7 = vpack.c.bf16 %v2987_v59, %v2984_v56  ;;  %v3052_v42 = vld [vmem:[#allocation11 + $0x3d0] sm:$0xff]  ;;  %v10552_v56 = vpack.c.bf16 %v3005_v5, %v3002_v29 }
 0x503   : > { %v10638_v44 = vpack.c.bf16 %v3037_v62, %v3034_v61  ;;  %v10542_v58 = vpack.c.bf16 %v2994_v6, %v2991_v51  ;;  %v3008_v62 = vld [vmem:[#allocation11 + $0x270] sm:$0xff]  ;;  %v3011_v51 = vld [vmem:[#allocation11 + $0x288] sm:$0xff]  ;;  %v3058_v6 = vld [vmem:[#allocation11 + $0x400] sm:$0xff] }
 0x505   : > { %10529 = vmatpush1.bf16.msra.mxu0 %v10528_v10  ;;  %10629 = vmatpush3.bf16.msra.mxu1 %v10628_v19  ;;  %v3040_v10 = vld [vmem:[#allocation11 + $0x370] sm:$0xff]  ;;  %v3043_v19 = vld [vmem:[#allocation11 + $0x388] sm:$0xff] }
 0x506   : > { %10531 = vmatprep.subr.bf16.mxu0 %v10530_v35  ;;  %10631 = vmatprep.subr.bf16.mxu1 %v10630_v45  ;;  %v3000_v35 = vld [vmem:[#allocation11 + $0x230] sm:$0xff]  ;;  %v10544_v45 = vpack.c.bf16 %v2993_v17, %v2990_v40  ;;  %v10641_v55 = vpack.c.bf16 %v3043_v19, %v3040_v10  ;;  %v10556_v40 = vpack.c.bf16 %v3011_v51, %v3008_v62  ;;  %v3014_v19 = vld [vmem:[#allocation11 + $0x2a0] sm:$0xff]  ;;  %v3991_v51 = vld [vmem:[#allocation11 + $0xb08] sm:$0xff] }
 0x507   : > { %v10546_v15 = vpack.c.bf16 %v3000_v35, %v2997_v20  ;;  %v3017_v20 = vld [vmem:[#allocation11 + $0x2b8] sm:$0xff]  ;;  %v3064_v35 = vld [vmem:[#allocation11 + $0x430] sm:$0xff] }
 0x508   : > { %v10560_v27 = vpack.c.bf16 %v3017_v20, %v3014_v19  ;;  %v3988_v62 = vld [vmem:[#allocation11 + $0xaf0] sm:$0xff]  ;;  %v3943_v19 = vld [vmem:[#allocation11 + $0x988] sm:$0xff] }
 0x509   : > { %10533 = vmatpush1.bf16.msra.mxu0 %v10532_v57  ;;  %10633 = vmatpush3.bf16.msra.mxu1 %v10632_v26  ;;  %v3049_v57 = vld [vmem:[#allocation11 + $0x3b8] sm:$0xff]  ;;  %v3003_v26 = vld [vmem:[#allocation11 + $0x248] sm:$0xff] }
 0x50a   : > { %10535 = vmatprep.subr.bf16.mxu0 %v10534_v23  ;;  %10634 = vmatprep.subr.bf16.mxu1 %v15205_v11  ;;  %v3006_v23 = vld [vmem:[#allocation11 + $0x260] sm:$0xff]  ;;  %v10644_v34 = vpack.c.bf16 %v3049_v57, %v3046_v25  ;;  %v3020_v57 = vld [vmem:[#allocation11 + $0x2d0] sm:$0xff]  ;;  %v3039_v20 = vld [vmem:[#allocation11 + $0x368] sm:$0xff] }
 0x50b   : > { %v10550_v39 = vpack.c.bf16 %v3006_v23, %v3003_v26  ;;  %v3023_v26 = vld [vmem:[#allocation11 + $0x2e8] sm:$0xff]  ;;  %v3070_v23 = vld [vmem:[#allocation11 + $0x460] sm:$0xff] }
 0x50c   : > { %3842 = vmatmul.mubr.f32.vlgmr.msra.gmra.mrb[54].mxu1 %v14350_v30  ;;  %v10564_v29 = vpack.c.bf16 %v3023_v26, %v3020_v57  ;;  %v3041_v57 = vld [vmem:[#allocation11 + $0x378] sm:$0xff]  ;;  %v3946_v26 = vld [vmem:[#allocation11 + $0x9a0] sm:$0xff] }
 0x50d   : > { %10537 = vmatpush1.bf16.msra.mxu0 %v10536_v49  ;;  %3846 = vmatprep.mubr.f32.mxu1 %v14354_v41  ;;  %v3055_v49 = vld [vmem:[#allocation11 + $0x3e8] sm:$0xff] }
 0x50e   : > { %10636 = vmatpush1.bf16.msra.mxu1 %v10635_v52  ;;  %10539 = vmatprep.subr.bf16.mxu0 %v10538_v54  ;;  %v3009_v52 = vld [vmem:[#allocation11 + $0x278] sm:$0xff]  ;;  %v3012_v54 = vld [vmem:[#allocation11 + $0x290] sm:$0xff]  ;;  %v10647_v59 = vpack.c.bf16 %v3055_v49, %v3052_v42  ;;  %v3026_v49 = vld [vmem:[#allocation11 + $0x300] sm:$0xff] }
 0x50f   : > { %10637 = vmatprep.subr.bf16.mxu1 %v15205_v11  ;;  %v10554_v61 = vpack.c.bf16 %v3012_v54, %v3009_v52  ;;  %v3029_v52 = vld [vmem:[#allocation11 + $0x318] sm:$0xff]  ;;  %v3076_v54 = vld [vmem:[#allocation11 + $0x490] sm:$0xff] }
 0x510   : > { %3847 = vmatmul.mubr.f32.gmra.mrb[56].mxu1 %v14352_v47 }
 0x511   : > { %10541 = vmatpush1.bf16.msra.mxu0 %v10540_v7  ;;  %3851 = vmatprep.mubr.f32.mxu1 %v14369_v12  ;;  %v3061_v7 = vld [vmem:[#allocation11 + $0x418] sm:$0xff] }
 0x512   : > { %10639 = vmatpush1.bf16.msra.mxu1 %v10638_v44  ;;  %10543 = vmatprep.subr.bf16.mxu0 %v10542_v58  ;;  %v3015_v44 = vld [vmem:[#allocation11 + $0x2a8] sm:$0xff]  ;;  %v3018_v58 = vld [vmem:[#allocation11 + $0x2c0] sm:$0xff]  ;;  %v10650_v17 = vpack.c.bf16 %v3061_v7, %v3058_v6  ;;  %v10568_v6 = vpack.c.bf16 %v3029_v52, %v3026_v49 }
 0x513   : > { %10640 = vmatprep.subr.bf16.mxu1 %v15205_v11  ;;  %v10558_v10 = vpack.c.bf16 %v3018_v58, %v3015_v44  ;;  %v10761_v58 = vpack.c.bf16 %v3991_v51, %v3988_v62  ;;  %v3955_v62 = vld [vmem:[#allocation11 + $0x9e8] sm:$0xff] }
 0x514   : > { %3852 = vmatmul.mubr.f32.gmra.mrb[58].mxu1 %v14364_v3  ;;  %v3051_v51 = vld [vmem:[#allocation11 + $0x3c8] sm:$0xff] }
 0x515   : > { %10545 = vmatpush1.bf16.msra.mxu0 %v10544_v45  ;;  %9623 = vmatprep.mubr.msk.f32.mxu1 %vm3272_vm13, %v14431_v9  ;;  %v3067_v45 = vld [vmem:[#allocation11 + $0x448] sm:$0xff] }
 0x516   : > { %10642 = vmatpush1.bf16.msra.mxu1 %v10641_v55  ;;  %10547 = vmatprep.subr.bf16.mxu0 %v10546_v15  ;;  %v3021_v55 = vld [vmem:[#allocation11 + $0x2d8] sm:$0xff]  ;;  %v3024_v15 = vld [vmem:[#allocation11 + $0x2f0] sm:$0xff]  ;;  %v10653_v46 = vpack.c.bf16 %v3067_v45, %v3064_v35  ;;  %v3042_v35 = vld [vmem:[#allocation11 + $0x380] sm:$0xff] }
 0x517   : > { %10643 = vmatprep.subr.bf16.mxu1 %v15205_v11  ;;  %v10562_v25 = vpack.c.bf16 %v3024_v15, %v3021_v55  ;;  %v3994_v45 = vld [vmem:[#allocation11 + $0xb20] sm:$0xff]  ;;  %v3997_v55 = vld [vmem:[#allocation11 + $0xb38] sm:$0xff] }
 0x519   : > { %10549 = vmatpush1.bf16.msra.mxu0 %v10548_v33  ;;  %v3073_v33 = vld [vmem:[#allocation11 + $0x478] sm:$0xff] }
 0x51a   : > { %10645 = vmatpush1.bf16.msra.mxu1 %v10644_v34  ;;  %10551 = vmatprep.subr.bf16.mxu0 %v10550_v39  ;;  %v3027_v34 = vld [vmem:[#allocation11 + $0x308] sm:$0xff]  ;;  %v3030_v39 = vld [vmem:[#allocation11 + $0x320] sm:$0xff]  ;;  %v10656_v5 = vpack.c.bf16 %v3073_v33, %v3070_v23  ;;  %v10765_v23 = vpack.c.bf16 %v3997_v55, %v3994_v45  ;;  %v3949_v33 = vld [vmem:[#allocation11 + $0x9b8] sm:$0xff] }
 0x51b   : > { %10646 = vmatprep.subr.bf16.mxu1 %v15205_v11  ;;  %v10566_v42 = vpack.c.bf16 %v3030_v39, %v3027_v34  ;;  %v3045_v34 = vld [vmem:[#allocation11 + $0x398] sm:$0xff]  ;;  %v3048_v39 = vld [vmem:[#allocation11 + $0x3b0] sm:$0xff]  ;;  %v10767_v49 = vpack.c.bf16 %v3949_v33, %v3946_v26  ;;  %v3958_v45 = vld [vmem:[#allocation11 + $0xa00] sm:$0xff] }
 0x51c   : > { %v10578_v52 = vpack.c.bf16 %v3048_v39, %v3045_v34  ;;  %v4015_v26 = vld [vmem:[#allocation11 + $0xbc8] sm:$0xff]  ;;  %v3056_v39 = vld [vmem:[#allocation11 + $0x3f0] sm:$0xff] }
 0x51d   : > { %10553 = vmatpush1.bf16.msra.mxu0 %v10552_v56  ;;  %v3079_v56 = vld [vmem:[#allocation11 + $0x4a8] sm:$0xff] }
 0x51e   : > { %10648 = vmatpush1.bf16.msra.mxu1 %v10647_v59  ;;  %10555 = vmatprep.subr.bf16.mxu0 %v10554_v61  ;;  %v3033_v59 = vld [vmem:[#allocation11 + $0x338] sm:$0xff]  ;;  %v3036_v61 = vld [vmem:[#allocation11 + $0x350] sm:$0xff]  ;;  %v10659_v7 = vpack.c.bf16 %v3079_v56, %v3076_v54  ;;  %v3047_v56 = vld [vmem:[#allocation11 + $0x3a8] sm:$0xff] }
 0x51f   : > { %10649 = vmatprep.subr.bf16.mxu1 %v15205_v11  ;;  %v10570_v44 = vpack.c.bf16 %v3036_v61, %v3033_v59  ;;  %v3044_v54 = vld [vmem:[#allocation11 + $0x390] sm:$0xff] }
 0x520   : > { %v3952_v59 = vld [vmem:[#allocation11 + $0x9d0] sm:$0xff] }
 0x521   : > { %10557 = vmatpush1.bf16.msra.mxu0 %v10556_v40  ;;  %v3032_v40 = vld [vmem:[#allocation11 + $0x330] sm:$0xff] }
 0x522   : > { %10651 = vmatpush1.bf16.msra.mxu1 %v10650_v17  ;;  %10559 = vmatprep.subr.bf16.mxu0 %v10558_v10  ;;  %v3035_v17 = vld [vmem:[#allocation11 + $0x348] sm:$0xff]  ;;  %v3940_v10 = vld [vmem:[#allocation11 + $0x970] sm:$0xff] }
 0x523   : > { %10652 = vmatprep.subr.bf16.mxu1 %v15205_v11  ;;  %v10572_v15 = vpack.c.bf16 %v3035_v17, %v3032_v40  ;;  %v10580_v40 = vpack.c.bf16 %v3047_v56, %v3044_v54  ;;  %v10771_v17 = vpack.c.bf16 %v3955_v62, %v3952_v59  ;;  %v3066_v54 = vld [vmem:[#allocation11 + $0x440] sm:$0xff]  ;;  %v4021_v59 = vld [vmem:[#allocation11 + $0xbf8] sm:$0xff] }
 0x524   : > { %v4018_v56 = vld [vmem:[#allocation11 + $0xbe0] sm:$0xff] }
 0x525   : > { %10561 = vmatpush1.bf16.msra.mxu0 %v10560_v27  ;;  %v10763_v27 = vpack.c.bf16 %v3943_v19, %v3940_v10  ;;  %v4091_v10 = vrot.slane %v14348_v43, 2 }
 0x526   : > { %10654 = vmatpush1.bf16.msra.mxu1 %v10653_v46  ;;  %10563 = vmatprep.subr.bf16.mxu0 %v10562_v25  ;;  %v10574_v46 = vpack.c.bf16 %v3042_v35, %v3039_v20  ;;  %v3038_v25 = vld [vmem:[#allocation11 + $0x360] sm:$0xff]  ;;  %v3053_v35 = vld [vmem:[#allocation11 + $0x3d8] sm:$0xff] }
 0x527   : > { %10655 = vmatprep.subr.bf16.mxu1 %v15205_v11  ;;  %v3050_v20 = vld [vmem:[#allocation11 + $0x3c0] sm:$0xff] }
 0x529   : > { %10565 = vmatpush1.bf16.msra.mxu0 %v10564_v29  ;;  %v4000_v29 = vld [vmem:[#allocation11 + $0xb50] sm:$0xff] }
 0x52a   : > { %10657 = vmatpush1.bf16.msra.mxu1 %v10656_v5  ;;  %10567 = vmatprep.subr.bf16.mxu0 %v10566_v42  ;;  %v4003_v5 = vld [vmem:[#allocation11 + $0xb68] sm:$0xff]  ;;  %v10576_v42 = vpack.c.bf16 %v3041_v57, %v3038_v25  ;;  %v4012_v57 = vld [vmem:[#allocation11 + $0xbb0] sm:$0xff] }
 0x52b   : > { %10658 = vmatprep.subr.bf16.mxu1 %v15205_v11  ;;  %v10769_v61 = vpack.c.bf16 %v4003_v5, %v4000_v29  ;;  %v3059_v29 = vld [vmem:[#allocation11 + $0x408] sm:$0xff]  ;;  %v3964_v5 = vld [vmem:[#allocation11 + $0xa30] sm:$0xff] }
 0x52c   : > { %3676 = vmatmul.mubr.f32.vlgmr.msra.gmra.mrb[30].mxu0 %v14350_v30 }
 0x52d   : > { %3681 = vmatprep.mubr.f32.mxu0 %v14354_v41  ;;  %10569 = vmatpush1.bf16.msra.mxu0 %v10568_v6  ;;  %v3054_v6 = vld [vmem:[#allocation11 + $0x3e0] sm:$0xff] }
 0x52e   : > { %10660 = vmatpush1.bf16.msra.mxu1 %v10659_v7  ;;  %10571 = vmatprep.subr.bf16.mxu0 %v10570_v44  ;;  %v4092_v7 = vrot.slane %v14354_v41, 2  ;;  %v4006_v44 = vld [vmem:[#allocation11 + $0xb80] sm:$0xff]  ;;  %v10582_v19 = vpack.c.bf16 %v3054_v6, %v3051_v51 }
 0x52f   : > { %10762 = vmatprep.subr.bf16.mxu1 %v10761_v58  ;;  %v4009_v58 = vld [vmem:[#allocation11 + $0xb98] sm:$0xff]  ;;  %v3062_v6 = vld [vmem:[#allocation11 + $0x420] sm:$0xff] }
 0x530   : > { %3682 = vmatmul.mubr.f32.gmra.mrb[32].mxu0 %v14352_v47  ;;  %v10773_v55 = vpack.c.bf16 %v4009_v58, %v4006_v44  ;;  %v14539_v25 = vsel %vm1461_vm3, %v4091_v10, %v4092_v7  ;;  %v3065_v44 = vld [vmem:[#allocation11 + $0x438] sm:$0xff]  ;;  %v3970_v58 = vld [vmem:[#allocation11 + $0xa60] sm:$0xff] }
 0x531   : > { %3922 = vmatmul.mubr.f32.vlgmr.msra.gmra.mrb[48].mxu1 %v14461_v36  ;;  %3687 = vmatprep.mubr.f32.mxu0 %v14369_v12  ;;  %v3069_v10 = vld [vmem:[#allocation11 + $0x458] sm:$0xff] }
 0x532   : > { %10573 = vmatpush1.bf16.msra.mxu0 %v10572_v15  ;;  %9624 = vmatprep.mubr.msk.f32.mxu1 %vm3272_vm13, %v14437_v48  ;;  %v3961_v15 = vld [vmem:[#allocation11 + $0xa18] sm:$0xff] }
 0x533   : > { %10764 = vmatpush3.bf16.msra.mxu1 %v10763_v27  ;;  %10575 = vmatprep.subr.bf16.mxu0 %v10574_v46  ;;  %v3057_v27 = vld [vmem:[#allocation11 + $0x3f8] sm:$0xff]  ;;  %v3060_v46 = vld [vmem:[#allocation11 + $0x410] sm:$0xff]  ;;  %v10775_v33 = vpack.c.bf16 %v3961_v15, %v3958_v45  ;;  %v10592_v45 = vpack.c.bf16 %v3065_v44, %v3062_v6 }
 0x534   : > { %3688 = vmatmul.mubr.f32.gmra.mrb[34].mxu0 %v14364_v3  ;;  %10766 = vmatprep.subr.bf16.mxu1 %v10765_v23  ;;  %v10584_v23 = vpack.c.bf16 %v3053_v35, %v3050_v20  ;;  %v10586_v34 = vpack.c.bf16 %v3060_v46, %v3057_v27  ;;  %v4024_v20 = vld [vmem:[#allocation11 + $0xc10] sm:$0xff]  ;;  %v4027_v35 = vld [vmem:[#allocation11 + $0xc28] sm:$0xff] }
 0x535   : > { %3927 = vmatmul.mubr.f32.gmra.mrb[50].mxu1 %v14457_v31  ;;  %9620 = vmatprep.mubr.msk.f32.mxu0 %vm3272_vm13, %v14431_v9  ;;  %v3068_v27 = vld [vmem:[#allocation11 + $0x450] sm:$0xff]  ;;  %v3071_v46 = vld [vmem:[#allocation11 + $0x468] sm:$0xff] }
 0x536   : > { %10577 = vmatpush1.bf16.msra.mxu0 %v10576_v42  ;;  %9625 = vmatprep.mubr.msk.f32.mxu1 %vm3272_vm13, %v14459_v32  ;;  %v10777_v42 = vpack.c.bf16 %v4015_v26, %v4012_v57  ;;  %v3976_v57 = vld [vmem:[#allocation11 + $0xa90] sm:$0xff]  ;;  %v10785_v26 = vpack.c.bf16 %v4027_v35, %v4024_v20  ;;  %v4039_v20 = vld [vmem:[#allocation11 + $0xc88] sm:$0xff]  ;;  %v3945_v35 = vld [vmem:[#allocation11 + $0x998] sm:$0xff] }
 0x537   : > { %10768 = vmatpush3.bf16.msra.mxu1 %v10767_v49  ;;  %10579 = vmatprep.subr.bf16.mxu0 %v10578_v52  ;;  %v3967_v49 = vld [vmem:[#allocation11 + $0xa48] sm:$0xff] }
 0x538   : > { %10770 = vmatprep.subr.bf16.mxu1 %v10769_v61  ;;  %v3063_v52 = vld [vmem:[#allocation11 + $0x428] sm:$0xff]  ;;  %v10588_v61 = vpack.c.bf16 %v3059_v29, %v3056_v39  ;;  %v10779_v62 = vpack.c.bf16 %v3967_v49, %v3964_v5  ;;  %v4030_v39 = vld [vmem:[#allocation11 + $0xc40] sm:$0xff]  ;;  %v4033_v29 = vld [vmem:[#allocation11 + $0xc58] sm:$0xff]  ;;  %v10596_v5 = vpack.c.bf16 %v3071_v46, %v3068_v27 }
 0x539   : > { %3932 = vmatmul.mubr.f32.gmra.mrb[52].mxu1 %v14466_v28  ;;  %v10590_v51 = vpack.c.bf16 %v3066_v54, %v3063_v52  ;;  %v3074_v52 = vld [vmem:[#allocation11 + $0x480] sm:$0xff]  ;;  %v3077_v54 = vld [vmem:[#allocation11 + $0x498] sm:$0xff] }
 0x53a   : > { %10581 = vmatpush1.bf16.msra.mxu0 %v10580_v40  ;;  %4353 = vmatprep.mubr.f32.mxu1 %v14539_v25  ;;  %v10781_v40 = vpack.c.bf16 %v4021_v59, %v4018_v56  ;;  %v3982_v56 = vld [vmem:[#allocation11 + $0xac0] sm:$0xff]  ;;  %v10789_v59 = vpack.c.bf16 %v4033_v29, %v4030_v39  ;;  %v10600_v6 = vpack.c.bf16 %v3077_v54, %v3074_v52  ;;  %v14553_v39 = vrot.slane %v14364_v3, 2  ;;  %v4045_v29 = vld [vmem:[#allocation11 + $0xcb8] sm:$0xff] }
 0x53b   : > { %10772 = vmatpush3.bf16.msra.mxu1 %v10771_v17  ;;  %10583 = vmatprep.subr.bf16.mxu0 %v10582_v19  ;;  %v3973_v17 = vld [vmem:[#allocation11 + $0xa78] sm:$0xff]  ;;  %v3072_v19 = vld [vmem:[#allocation11 + $0x470] sm:$0xff] }
 0x53c   : > { %10774 = vmatprep.subr.bf16.mxu1 %v10773_v55  ;;  %v10783_v55 = vpack.c.bf16 %v3973_v17, %v3970_v58  ;;  %v10594_v15 = vpack.c.bf16 %v3072_v19, %v3069_v10  ;;  %v3941_v17 = vld [vmem:[#allocation11 + $0x978] sm:$0xff]  ;;  %v4036_v10 = vld [vmem:[#allocation11 + $0xc70] sm:$0xff]  ;;  %v4089_v19 = vrot.slane %v14352_v47, 2 }
 0x53d   : > { %v10794_v46 = vpack.c.bf16 %v4039_v20, %v4036_v10  ;;  %v4097_v10 = vrot.slane %v14431_v9, 2  ;;  %v3956_v20 = vld [vmem:[#allocation11 + $0x9f0] sm:$0xff] }
 0x53e   : > { %10585 = vmatpush1.bf16.msra.mxu0 %v10584_v23  ;;  %v3979_v23 = vld [vmem:[#allocation11 + $0xaa8] sm:$0xff] }
 0x53f   : > { %10776 = vmatpush3.bf16.msra.mxu1 %v10775_v33  ;;  %10587 = vmatprep.subr.bf16.mxu0 %v10586_v34  ;;  %v3075_v33 = vld [vmem:[#allocation11 + $0x488] sm:$0xff]  ;;  %v3078_v34 = vld [vmem:[#allocation11 + $0x4a0] sm:$0xff] }
 0x540   : > { %10778 = vmatprep.subr.bf16.mxu1 %v10777_v42  ;;  %v10787_v42 = vpack.c.bf16 %v3979_v23, %v3976_v57  ;;  %v10598_v49 = vpack.c.bf16 %v3078_v34, %v3075_v33  ;;  %v3947_v23 = vld [vmem:[#allocation11 + $0x9a8] sm:$0xff]  ;;  %v4042_v33 = vld [vmem:[#allocation11 + $0xca0] sm:$0xff] }
 0x541   : > { %v10797_v54 = vpack.c.bf16 %v4045_v29, %v4042_v33  ;;  %v3962_v29 = vld [vmem:[#allocation11 + $0xa20] sm:$0xff] }
 0x542   : > { %10589 = vmatpush1.bf16.msra.mxu0 %v10588_v61  ;;  %v3985_v61 = vld [vmem:[#allocation11 + $0xad8] sm:$0xff] }
 0x543   : > { %10780 = vmatpush3.bf16.msra.mxu1 %v10779_v62  ;;  %10591 = vmatprep.subr.bf16.mxu0 %v10590_v51  ;;  %v3939_v62 = vld [vmem:[#allocation11 + $0x968] sm:$0xff]  ;;  %v3942_v51 = vld [vmem:[#allocation11 + $0x980] sm:$0xff]  ;;  %v10791_v44 = vpack.c.bf16 %v3985_v61, %v3982_v56  ;;  %v3953_v61 = vld [vmem:[#allocation11 + $0x9d8] sm:$0xff] }
 0x544   : > { %10782 = vmatprep.subr.bf16.mxu1 %v10781_v40  ;;  %v10661_v58 = vpack.c.bf16 %v3942_v51, %v3939_v62  ;;  %v3938_v40 = vld [vmem:[#allocation11 + $0x960] sm:$0xff]  ;;  %v4048_v62 = vld [vmem:[#allocation11 + $0xcd0] sm:$0xff]  ;;  %v14568_v51 = vsel %vm1461_vm3, %v4089_v19, %v14553_v39 }
 0x545   : > { %v10663_v27 = vpack.c.bf16 %v3941_v17, %v3938_v40 }
 0x546   : > { %10593 = vmatpush1.bf16.msra.mxu0 %v10592_v45  ;;  %v3948_v45 = vld [vmem:[#allocation11 + $0x9b0] sm:$0xff] }
 0x547   : > { %10784 = vmatpush3.bf16.msra.mxu1 %v10783_v55  ;;  %10595 = vmatprep.subr.bf16.mxu0 %v10594_v15  ;;  %v14544_v55 = vrot.slane %v14369_v12, 2  ;;  %v4088_v15 = vrot.slane %v14350_v30, 2  ;;  %v10665_v57 = vpack.c.bf16 %v3948_v45, %v3945_v35  ;;  %v3959_v35 = vld [vmem:[#allocation11 + $0xa08] sm:$0xff]  ;;  %v4054_v45 = vld [vmem:[#allocation11 + $0xd00] sm:$0xff] }
 0x548   : > { %10786 = vmatprep.subr.bf16.mxu1 %v10785_v26  ;;  %v3944_v26 = vld [vmem:[#allocation11 + $0x990] sm:$0xff] }
 0x549   : > { %v14550_v34 = vsel %vm1461_vm3, %v4088_v15, %v4089_v19  ;;  %v10667_v52 = vpack.c.bf16 %v3947_v23, %v3944_v26  ;;  %v4057_v15 = vld [vmem:[#allocation11 + $0xd18] sm:$0xff]  ;;  %v10675_v26 = vpack.c.bf16 %v3959_v35, %v3956_v20 }
 0x54a   : > { %10597 = vmatpush1.bf16.msra.mxu0 %v10596_v5  ;;  %v3951_v5 = vld [vmem:[#allocation11 + $0x9c8] sm:$0xff]  ;;  %v10803_v23 = vpack.c.bf16 %v4057_v15, %v4054_v45  ;;  %v3974_v45 = vld [vmem:[#allocation11 + $0xa80] sm:$0xff]  ;;  %v3977_v15 = vld [vmem:[#allocation11 + $0xa98] sm:$0xff] }
 0x54b   : > { %10788 = vmatpush3.bf16.msra.mxu1 %v10787_v42  ;;  %10599 = vmatprep.subr.bf16.mxu0 %v10598_v49  ;;  %v3954_v42 = vld [vmem:[#allocation11 + $0x9e0] sm:$0xff]  ;;  %v14562_v49 = vsel %vm1461_vm3, %v4092_v7, %v14544_v55  ;;  %v4051_v7 = vld [vmem:[#allocation11 + $0xce8] sm:$0xff] }
 0x54c   : > { %10790 = vmatprep.subr.bf16.mxu1 %v10789_v59  ;;  %v10669_v56 = vpack.c.bf16 %v3954_v42, %v3951_v5  ;;  %v3950_v59 = vld [vmem:[#allocation11 + $0x9c0] sm:$0xff]  ;;  %v10800_v17 = vpack.c.bf16 %v4051_v7, %v4048_v62  ;;  %v3965_v5 = vld [vmem:[#allocation11 + $0xa38] sm:$0xff]  ;;  %v4060_v42 = vld [vmem:[#allocation11 + $0xd30] sm:$0xff] }
 0x54d   : > { %v10671_v40 = vpack.c.bf16 %v3953_v61, %v3950_v59  ;;  %v10679_v59 = vpack.c.bf16 %v3965_v5, %v3962_v29  ;;  %v3968_v7 = vld [vmem:[#allocation11 + $0xa50] sm:$0xff] }
 0x54e   : > { %10601 = vmatpush1.bf16.msra.mxu0 %v10600_v6  ;;  %v3957_v6 = vld [vmem:[#allocation11 + $0x9f8] sm:$0xff] }
 0x54f   : > { %10792 = vmatpush3.bf16.msra.mxu1 %v10791_v44  ;;  %10662 = vmatprep.subr.bf16.mxu0 %v10661_v58  ;;  %v3960_v44 = vld [vmem:[#allocation11 + $0xa10] sm:$0xff]  ;;  %v4098_v58 = vrot.slane %v14437_v48, 2 }
 0x550   : > { %10793 = vmatprep.subr.bf16.mxu1 %v15205_v11  ;;  %v10673_v19 = vpack.c.bf16 %v3960_v44, %v3957_v6  ;;  %v3971_v6 = vld [vmem:[#allocation11 + $0xa68] sm:$0xff]  ;;  %v4066_v44 = vld [vmem:[#allocation11 + $0xd60] sm:$0xff] }
 0x551   : > { %3759 = vmatmul.mubr.f32.vlgmr.msra.gmra.mrb[30].mxu0 %v14461_v36 }
 0x552   : > { %4354 = vmatmul.mubr.f32.vlgmr.msra.gmra.mrb[60].mxu1 %v14550_v34  ;;  %9621 = vmatprep.mubr.msk.f32.mxu0 %vm3272_vm13, %v14437_v48 }
 0x553   : > { %10664 = vmatpush1.bf16.msra.mxu0 %v10663_v27  ;;  %4358 = vmatprep.mubr.f32.mxu1 %v14562_v49  ;;  %v3963_v27 = vld [vmem:[#allocation11 + $0xa28] sm:$0xff] }
 0x554   : > { %10795 = vmatpush1.bf16.msra.mxu1 %v10794_v46  ;;  %10666 = vmatprep.subr.bf16.mxu0 %v10665_v57  ;;  %v3966_v46 = vld [vmem:[#allocation11 + $0xa40] sm:$0xff]  ;;  %v14584_v57 = vsel %vm1461_vm3, %v4097_v10, %v4098_v58 }
 0x555   : > { %3765 = vmatmul.mubr.f32.gmra.mrb[32].mxu0 %v14457_v31  ;;  %10796 = vmatprep.subr.bf16.mxu1 %v15205_v11  ;;  %15296 = vst [vmem:[#allocation55_spill] sm:$0xff] %v14584_v57  ;;  %v10677_v33 = vpack.c.bf16 %v3966_v46, %v3963_v27  ;;  %v3978_v10 = vld [vmem:[#allocation11 + $0xaa0] sm:$0xff]  ;;  %v4072_v27 = vld [vmem:[#allocation11 + $0xd90] sm:$0xff]  ;;  %v4075_v46 = vld [vmem:[#allocation11 + $0xda8] sm:$0xff] }
 0x556   : > { %4359 = vmatmul.mubr.f32.gmra.mrb[62].mxu1 %v14568_v51  ;;  %9622 = vmatprep.mubr.msk.f32.mxu0 %vm3272_vm13, %v14459_v32  ;;  %v10812_v29 = vpack.c.bf16 %v4075_v46, %v4072_v27 }
 0x557   : > { %10668 = vmatpush1.bf16.msra.mxu0 %v10667_v52  ;;  %4363 = vmatprep.mubr.f32.mxu1 %v14544_v55  ;;  %v4063_v52 = vld [vmem:[#allocation11 + $0xd48] sm:$0xff] }
 0x558   : > { %10798 = vmatpush1.bf16.msra.mxu1 %v10797_v54  ;;  %10670 = vmatprep.subr.bf16.mxu0 %v10669_v56  ;;  %v3969_v54 = vld [vmem:[#allocation11 + $0xa58] sm:$0xff]  ;;  %v3972_v56 = vld [vmem:[#allocation11 + $0xa70] sm:$0xff]  ;;  %v10806_v61 = vpack.c.bf16 %v4063_v52, %v4060_v42  ;;  %v3983_v52 = vld [vmem:[#allocation11 + $0xac8] sm:$0xff] }
 0x559   : > { %3771 = vmatmul.mubr.f32.gmra.mrb[34].mxu0 %v14466_v28  ;;  %10799 = vmatprep.subr.bf16.mxu1 %v15205_v11  ;;  %v10681_v62 = vpack.c.bf16 %v3972_v56, %v3969_v54  ;;  %v3980_v42 = vld [vmem:[#allocation11 + $0xab0] sm:$0xff]  ;;  %v4078_v54 = vld [vmem:[#allocation11 + $0xdc0] sm:$0xff]  ;;  %v4081_v56 = vld [vmem:[#allocation11 + $0xdd8] sm:$0xff] }
 0x55a   : > { %4364 = vmatmul.mubr.f32.gmra.mrb[64].mxu1 %v14553_v39  ;;  %4187 = vmatprep.mubr.f32.mxu0 %v14539_v25 }
 0x55b   : > { %10672 = vmatpush1.bf16.msra.mxu0 %v10671_v40  ;;  %9629 = vmatprep.mubr.msk.f32.mxu1 %vm3272_vm13, %v14584_v57  ;;  %v4069_v40 = vld [vmem:[#allocation11 + $0xd78] sm:$0xff] }
 0x55c   : > { %10801 = vmatpush1.bf16.msra.mxu1 %v10800_v17  ;;  %10674 = vmatprep.subr.bf16.mxu0 %v10673_v19  ;;  %v3975_v17 = vld [vmem:[#allocation11 + $0xa88] sm:$0xff]  ;;  %v10683_v19 = vpack.c.bf16 %v3971_v6, %v3968_v7  ;;  %v10809_v20 = vpack.c.bf16 %v4069_v40, %v4066_v44  ;;  %v10815_v7 = vpack.c.bf16 %v4081_v56, %v4078_v54  ;;  %v3986_v44 = vld [vmem:[#allocation11 + $0xae0] sm:$0xff]  ;;  %v3989_v40 = vld [vmem:[#allocation11 + $0xaf8] sm:$0xff] }
 0x55d   : > { %10802 = vmatprep.subr.bf16.mxu1 %v15205_v11  ;;  %v10685_v35 = vpack.c.bf16 %v3978_v10, %v3975_v17  ;;  %v4084_v17 = vld [vmem:[#allocation11 + $0xdf0] sm:$0xff]  ;;  %v4087_v10 = vld [vmem:[#allocation11 + $0xe08] sm:$0xff]  ;;  %v4002_v54 = vld [vmem:[#allocation11 + $0xb60] sm:$0xff] }
 0x55e   : > { %v10818_v27 = vpack.c.bf16 %v4087_v10, %v4084_v17  ;;  %v4617_v56 = vld [vmem:[#allocation11 + $0x12f8] sm:$0xff] }
 0x55f   : > { %10676 = vmatpush1.bf16.msra.mxu0 %v10675_v26  ;;  %v3981_v26 = vld [vmem:[#allocation11 + $0xab8] sm:$0xff] }
 0x560   : > { %10804 = vmatpush1.bf16.msra.mxu1 %v10803_v23  ;;  %10678 = vmatprep.subr.bf16.mxu0 %v10677_v33  ;;  %v3984_v23 = vld [vmem:[#allocation11 + $0xad0] sm:$0xff]  ;;  %v10687_v33 = vpack.c.bf16 %v3977_v15, %v3974_v45  ;;  %v4614_v45 = vld [vmem:[#allocation11 + $0x12e0] sm:$0xff]  ;;  %v10695_v15 = vpack.c.bf16 %v3989_v40, %v3986_v44  ;;  %v4001_v40 = vld [vmem:[#allocation11 + $0xb58] sm:$0xff] }
 0x561   : > { %10805 = vmatprep.subr.bf16.mxu1 %v15205_v11  ;;  %v10689_v5 = vpack.c.bf16 %v3984_v23, %v3981_v26  ;;  %v3992_v26 = vld [vmem:[#allocation11 + $0xb10] sm:$0xff]  ;;  %v3995_v23 = vld [vmem:[#allocation11 + $0xb28] sm:$0xff]  ;;  %v3998_v44 = vld [vmem:[#allocation11 + $0xb40] sm:$0xff] }
 0x563   : > { %10680 = vmatpush1.bf16.msra.mxu0 %v10679_v59  ;;  %v3987_v59 = vld [vmem:[#allocation11 + $0xae8] sm:$0xff] }
 0x564   : > { %10807 = vmatpush1.bf16.msra.mxu1 %v10806_v61  ;;  %10682 = vmatprep.subr.bf16.mxu0 %v10681_v62  ;;  %v3990_v61 = vld [vmem:[#allocation11 + $0xb00] sm:$0xff]  ;;  %v10691_v62 = vpack.c.bf16 %v3983_v52, %v3980_v42  ;;  %v3999_v42 = vld [vmem:[#allocation11 + $0xb48] sm:$0xff]  ;;  %v4095_v52 = vrot.slane %v14457_v31, 2 }
 0x565   : > { %10808 = vmatprep.subr.bf16.mxu1 %v15205_v11  ;;  %v10693_v6 = vpack.c.bf16 %v3990_v61, %v3987_v59  ;;  %v4620_v59 = vld [vmem:[#allocation11 + $0x1310] sm:$0xff]  ;;  %v10699_v61 = vpack.c.bf16 %v3995_v23, %v3992_v26  ;;  %v10701_v17 = vpack.c.bf16 %v4002_v54, %v3999_v42  ;;  %v4007_v42 = vld [vmem:[#allocation11 + $0xb88] sm:$0xff] }
 0x566   : > { %v10824_v10 = vpack.c.bf16 %v4620_v59, %v4617_v56  ;;  %v4008_v26 = vld [vmem:[#allocation11 + $0xb90] sm:$0xff]  ;;  %v4622_v59 = vld [vmem:[#allocation11 + $0x1320] sm:$0xff] }
 0x567   : > { %10684 = vmatpush1.bf16.msra.mxu0 %v10683_v19  ;;  %v3993_v19 = vld [vmem:[#allocation11 + $0xb18] sm:$0xff] }
 0x568   : > { %10810 = vmatpush1.bf16.msra.mxu1 %v10809_v20  ;;  %10686 = vmatprep.subr.bf16.mxu0 %v10685_v35  ;;  %v3996_v20 = vld [vmem:[#allocation11 + $0xb30] sm:$0xff]  ;;  %v4611_v35 = vld [vmem:[#allocation11 + $0x12c8] sm:$0xff] }
 0x569   : > { %10811 = vmatprep.subr.bf16.mxu1 %v15205_v11  ;;  %v10697_v46 = vpack.c.bf16 %v3996_v20, %v3993_v19  ;;  %v4616_v19 = vld [vmem:[#allocation11 + $0x12f0] sm:$0xff]  ;;  %v4619_v20 = vld [vmem:[#allocation11 + $0x1308] sm:$0xff] }
 0x56b   : > { %10688 = vmatpush1.bf16.msra.mxu0 %v10687_v33  ;;  %v10820_v33 = vpack.c.bf16 %v4614_v45, %v4611_v35  ;;  %v4005_v35 = vld [vmem:[#allocation11 + $0xb78] sm:$0xff] }
 0x56c   : > { %10813 = vmatpush1.bf16.msra.mxu1 %v10812_v29  ;;  %10690 = vmatprep.subr.bf16.mxu0 %v10689_v5  ;;  %v4610_v29 = vld [vmem:[#allocation11 + $0x12c0] sm:$0xff]  ;;  %v4613_v5 = vld [vmem:[#allocation11 + $0x12d8] sm:$0xff]  ;;  %v10705_v54 = vpack.c.bf16 %v4008_v26, %v4005_v35  ;;  %v4631_v26 = vld [vmem:[#allocation11 + $0x1368] sm:$0xff] }
 0x56d   : > { %10814 = vmatprep.subr.bf16.mxu1 %v15205_v11 }
 0x56f   : > { %10692 = vmatpush1.bf16.msra.mxu0 %v10691_v62  ;;  %v14596_v62 = vrot.slane %v14459_v32, 2 }
 0x570   : > { %10816 = vmatpush1.bf16.msra.mxu1 %v10815_v7  ;;  %10694 = vmatprep.subr.bf16.mxu0 %v10693_v6  ;;  %v4094_v7 = vrot.slane %v14461_v36, 2  ;;  %v10822_v6 = vpack.c.bf16 %v4613_v5, %v4610_v29  ;;  %v10826_v29 = vpack.c.bf16 %v4619_v20, %v4616_v19  ;;  %v4004_v5 = vld [vmem:[#allocation11 + $0xb70] sm:$0xff]  ;;  %v4013_v19 = vld [vmem:[#allocation11 + $0xbb8] sm:$0xff] }
 0x571   : > { %10817 = vmatprep.subr.bf16.mxu1 %v15205_v11  ;;  %v14610_v23 = vsel %vm1461_vm3, %v4098_v58, %v14596_v62  ;;  %v4014_v58 = vld [vmem:[#allocation11 + $0xbc0] sm:$0xff]  ;;  %v4628_v20 = vld [vmem:[#allocation11 + $0x1350] sm:$0xff] }
 0x572   : > { %v14600_v45 = vsel %vm1461_vm3, %v4094_v7, %v4095_v52  ;;  %v4011_v7 = vld [vmem:[#allocation11 + $0xba8] sm:$0xff]  ;;  %v4638_v11 = vld [vmem:[#allocation11 + $0x13a0] sm:$0xff] }
 0x573   : > { %10696 = vmatpush1.bf16.msra.mxu0 %v10695_v15  ;;  %v14603_v15 = vrot.slane %v14466_v28, 2  ;;  %v10709_v35 = vpack.c.bf16 %v4014_v58, %v4011_v7  ;;  %v4023_v7 = vld [vmem:[#allocation11 + $0xc08] sm:$0xff]  ;;  %v4026_v58 = vld [vmem:[#allocation11 + $0xc20] sm:$0xff] }
 0x574   : > { %10819 = vmatpush1.bf16.msra.mxu1 %v10818_v27  ;;  %10698 = vmatprep.subr.bf16.mxu0 %v10697_v46  ;;  %v4623_v27 = vld [vmem:[#allocation11 + $0x1328] sm:$0xff]  ;;  %v4626_v46 = vld [vmem:[#allocation11 + $0x1340] sm:$0xff] }
 0x575   : > { %10821 = vmatprep.subr.bf16.mxu1 %v10820_v33  ;;  %v10703_v33 = vpack.c.bf16 %v4001_v40, %v3998_v44  ;;  %v10828_v56 = vpack.c.bf16 %v4626_v46, %v4623_v27  ;;  %v14616_v21 = vsel %vm1461_vm3, %v4095_v52, %v14603_v15  ;;  %v4629_v44 = vld [vmem:[#allocation11 + $0x1358] sm:$0xff]  ;;  %v4632_v40 = vld [vmem:[#allocation11 + $0x1370] sm:$0xff] }
 0x576   : > { %v10832_v52 = vpack.c.bf16 %v4632_v40, %v4629_v44  ;;  %v4017_v27 = vld [vmem:[#allocation11 + $0xbd8] sm:$0xff]  ;;  %v4020_v46 = vld [vmem:[#allocation11 + $0xbf0] sm:$0xff] }
 0x577   : > { %4434 = vmatmul.mubr.f32.vlgmr.msra.gmra.mrb[48].mxu1 %v14600_v45  ;;  %10700 = vmatpush1.bf16.msra.mxu0 %v10699_v61  ;;  %v4625_v61 = vld [vmem:[#allocation11 + $0x1338] sm:$0xff]  ;;  %v4644_v40 = vld [vmem:[#allocation11 + $0x13d0] sm:$0xff] }
 0x578   : > { %9630 = vmatprep.mubr.msk.f32.mxu1 %vm3272_vm13, %v14610_v23  ;;  %10823 = vmatpush1.bf16.msra.mxu1 %v10822_v6  ;;  %v10707_v6 = vpack.c.bf16 %v4007_v42, %v4004_v5  ;;  %v10713_v5 = vpack.c.bf16 %v4020_v46, %v4017_v27  ;;  %v4016_v42 = vld [vmem:[#allocation11 + $0xbd0] sm:$0xff]  ;;  %v4641_v44 = vld [vmem:[#allocation11 + $0x13b8] sm:$0xff]  ;;  %v4643_v27 = vld [vmem:[#allocation11 + $0x13c8] sm:$0xff] }
 0x579   : > { %10702 = vmatprep.subr.bf16.mxu0 %v10701_v17  ;;  %10825 = vmatprep.subr.bf16.mxu1 %v10824_v10  ;;  %v10830_v17 = vpack.c.bf16 %v4625_v61, %v4622_v59  ;;  %v4010_v10 = vld [vmem:[#allocation11 + $0xba0] sm:$0xff]  ;;  %v4019_v59 = vld [vmem:[#allocation11 + $0xbe8] sm:$0xff]  ;;  %v4637_v61 = vld [vmem:[#allocation11 + $0x1398] sm:$0xff] }
 0x57a   : > { %v10715_v13 = vpack.c.bf16 %v4019_v59, %v4016_v42  ;;  %v4646_v59 = vld [vmem:[#allocation11 + $0x13e0] sm:$0xff] }
 0x57b   : > { %4439 = vmatmul.mubr.f32.gmra.mrb[50].mxu1 %v14616_v21  ;;  %10704 = vmatpush1.bf16.msra.mxu0 %v10703_v33  ;;  %v10711_v33 = vpack.c.bf16 %v4013_v19, %v4010_v10  ;;  %v4022_v10 = vld [vmem:[#allocation11 + $0xc00] sm:$0xff]  ;;  %v4025_v19 = vld [vmem:[#allocation11 + $0xc18] sm:$0xff] }
 0x57c   : > { %9631 = vmatprep.mubr.msk.f32.mxu1 %vm3272_vm13, %v14596_v62  ;;  %10827 = vmatpush1.bf16.msra.mxu1 %v10826_v29  ;;  %v10834_v29 = vpack.c.bf16 %v4631_v26, %v4628_v20  ;;  %v4640_v20 = vld [vmem:[#allocation11 + $0x13b0] sm:$0xff]  ;;  %v10840_v26 = vpack.c.bf16 %v4644_v40, %v4641_v44  ;;  %v10719_v46 = vpack.c.bf16 %v4025_v19, %v4022_v10 }
 0x57d   : > { %10706 = vmatprep.subr.bf16.mxu0 %v10705_v54  ;;  %10829 = vmatprep.subr.bf16.mxu1 %v10828_v56  ;;  %v4634_v54 = vld [vmem:[#allocation11 + $0x1380] sm:$0xff]  ;;  %v10836_v56 = vpack.c.bf16 %v4638_v11, %v4635_v0  ;;  %v4647_v0 = vld [vmem:[#allocation11 + $0x13e8] sm:$0xff]  ;;  %v4656_v44 = vld [vmem:[#allocation11 + $0x1430] sm:$0xff] }
 0x57e   : > { %v4650_v11 = vld [vmem:[#allocation11 + $0x1400] sm:$0xff]  ;;  %v4652_v19 = vld [vmem:[#allocation11 + $0x1410] sm:$0xff] }
 0x57f   : > { %4444 = vmatmul.mubr.f32.gmra.mrb[52].mxu1 %v14603_v15  ;;  %10708 = vmatpush1.bf16.msra.mxu0 %v10707_v6  ;;  %v10838_v6 = vpack.c.bf16 %v4637_v61, %v4634_v54  ;;  %v10844_v54 = vpack.c.bf16 %v4650_v11, %v4647_v0  ;;  %v4649_v61 = vld [vmem:[#allocation11 + $0x13f8] sm:$0xff]  ;;  %v4662_v0 = vld [vmem:[#allocation11 + $0x1460] sm:$0xff] }
 0x580   : > { %10831 = vmatpush1.bf16.msra.mxu1 %v10830_v17  ;;  %4824 = vmatprep.mubr.f32.mxu1 %v14367_v4  ;;  %v10717_v17 = vpack.c.bf16 %v4026_v58, %v4023_v7  ;;  %v4035_v7 = vld [vmem:[#allocation11 + $0xc68] sm:$0xff]  ;;  %v4653_v58 = vld [vmem:[#allocation11 + $0x1418] sm:$0xff] }
 0x581   : > { %10710 = vmatprep.subr.bf16.mxu0 %v10709_v35  ;;  %10833 = vmatprep.subr.bf16.mxu1 %v10832_v52  ;;  %v4029_v35 = vld [vmem:[#allocation11 + $0xc38] sm:$0xff]  ;;  %v4032_v52 = vld [vmem:[#allocation11 + $0xc50] sm:$0xff] }
 0x582   : > { %v10721_v42 = vpack.c.bf16 %v4032_v52, %v4029_v35  ;;  %v4041_v35 = vld [vmem:[#allocation11 + $0xc98] sm:$0xff]  ;;  %v4659_v52 = vld [vmem:[#allocation11 + $0x1448] sm:$0xff] }
 0x583   : > { %10712 = vmatpush1.bf16.msra.mxu0 %v10711_v33  ;;  %v10842_v33 = vpack.c.bf16 %v4643_v27, %v4640_v20  ;;  %v10848_v20 = vpack.c.bf16 %v4656_v44, %v4653_v58  ;;  %v4655_v27 = vld [vmem:[#allocation11 + $0x1428] sm:$0xff]  ;;  %v4668_v58 = vld [vmem:[#allocation11 + $0x1490] sm:$0xff] }
 0x584   : > { %10835 = vmatpush1.bf16.msra.mxu1 %v10834_v29  ;;  %10714 = vmatprep.subr.bf16.mxu0 %v10713_v5  ;;  %v4028_v29 = vld [vmem:[#allocation11 + $0xc30] sm:$0xff]  ;;  %v4031_v5 = vld [vmem:[#allocation11 + $0xc48] sm:$0xff] }
 0x585   : > { %10837 = vmatprep.subr.bf16.mxu1 %v10836_v56  ;;  %v4038_v56 = vld [vmem:[#allocation11 + $0xc80] sm:$0xff]  ;;  %v10723_v40 = vpack.c.bf16 %v4031_v5, %v4028_v29 }
 0x586   : > { %v10725_v10 = vpack.c.bf16 %v4038_v56, %v4035_v7  ;;  %v4658_v5 = vld [vmem:[#allocation11 + $0x1440] sm:$0xff]  ;;  %v4047_v7 = vld [vmem:[#allocation11 + $0xcc8] sm:$0xff]  ;;  %v4665_v56 = vld [vmem:[#allocation11 + $0x1478] sm:$0xff] }
 0x587   : > { %10716 = vmatpush1.bf16.msra.mxu0 %v10715_v13  ;;  %v10846_v13 = vpack.c.bf16 %v4649_v61, %v4646_v59  ;;  %v10852_v59 = vpack.c.bf16 %v4662_v0, %v4659_v52  ;;  %v4661_v61 = vld [vmem:[#allocation11 + $0x1458] sm:$0xff]  ;;  %v4674_v52 = vld [vmem:[#allocation11 + $0x14c0] sm:$0xff] }
 0x588   : > { %10839 = vmatpush1.bf16.msra.mxu1 %v10838_v6  ;;  %10718 = vmatprep.subr.bf16.mxu0 %v10717_v17  ;;  %v4034_v6 = vld [vmem:[#allocation11 + $0xc60] sm:$0xff]  ;;  %v4037_v17 = vld [vmem:[#allocation11 + $0xc78] sm:$0xff] }
 0x589   : > { %10841 = vmatprep.subr.bf16.mxu1 %v10840_v26  ;;  %v4044_v26 = vld [vmem:[#allocation11 + $0xcb0] sm:$0xff]  ;;  %v10727_v11 = vpack.c.bf16 %v4037_v17, %v4034_v6  ;;  %v4049_v6 = vld [vmem:[#allocation11 + $0xcd8] sm:$0xff] }
 0x58a   : > { %v10729_v29 = vpack.c.bf16 %v4044_v26, %v4041_v35  ;;  %v4664_v17 = vld [vmem:[#allocation11 + $0x1470] sm:$0xff]  ;;  %v4671_v26 = vld [vmem:[#allocation11 + $0x14a8] sm:$0xff] }
 0x58b   : > { %10720 = vmatpush1.bf16.msra.mxu0 %v10719_v46  ;;  %v10850_v46 = vpack.c.bf16 %v4655_v27, %v4652_v19  ;;  %v10856_v19 = vpack.c.bf16 %v4668_v58, %v4665_v56  ;;  %v4053_v27 = vld [vmem:[#allocation11 + $0xcf8] sm:$0xff]  ;;  %v4056_v35 = vld [vmem:[#allocation11 + $0xd10] sm:$0xff] }
 0x58c   : > { %10843 = vmatpush1.bf16.msra.mxu1 %v10842_v33  ;;  %10722 = vmatprep.subr.bf16.mxu0 %v10721_v42  ;;  %v4040_v33 = vld [vmem:[#allocation11 + $0xc90] sm:$0xff]  ;;  %v4043_v42 = vld [vmem:[#allocation11 + $0xca8] sm:$0xff]  ;;  %v4677_v56 = vld [vmem:[#allocation11 + $0x14d8] sm:$0xff] }
 0x58d   : > { %10845 = vmatprep.subr.bf16.mxu1 %v10844_v54  ;;  %v4050_v54 = vld [vmem:[#allocation11 + $0xce0] sm:$0xff]  ;;  %v10731_v44 = vpack.c.bf16 %v4043_v42, %v4040_v33  ;;  %v4055_v33 = vld [vmem:[#allocation11 + $0xd08] sm:$0xff]  ;;  %v4680_v58 = vld [vmem:[#allocation11 + $0x14f0] sm:$0xff] }
 0x58e   : > { %v4670_v42 = vld [vmem:[#allocation11 + $0x14a0] sm:$0xff] }
 0x58f   : > { %10724 = vmatpush1.bf16.msra.mxu0 %v10723_v40  ;;  %v10854_v40 = vpack.c.bf16 %v4661_v61, %v4658_v5  ;;  %v10860_v5 = vpack.c.bf16 %v4674_v52, %v4671_v26  ;;  %v4059_v61 = vld [vmem:[#allocation11 + $0xd28] sm:$0xff]  ;;  %v4065_v26 = vld [vmem:[#allocation11 + $0xd58] sm:$0xff]  ;;  %v4068_v52 = vld [vmem:[#allocation11 + $0xd70] sm:$0xff] }
 0x590   : > { %10847 = vmatpush1.bf16.msra.mxu1 %v10846_v13  ;;  %10726 = vmatprep.subr.bf16.mxu0 %v10725_v10  ;;  %v10733_v13 = vpack.c.bf16 %v4050_v54, %v4047_v7  ;;  %v4046_v10 = vld [vmem:[#allocation11 + $0xcc0] sm:$0xff] }
 0x591   : > { %10849 = vmatprep.subr.bf16.mxu1 %v10848_v20  ;;  %v4667_v20 = vld [vmem:[#allocation11 + $0x1488] sm:$0xff]  ;;  %v10735_v0 = vpack.c.bf16 %v4049_v6, %v4046_v10  ;;  %v4062_v7 = vld [vmem:[#allocation11 + $0xd40] sm:$0xff] }
 0x592   : > { %4188 = vmatmul.mubr.f32.vlgmr.msra.gmra.mrb[30].mxu0 %v14550_v34  ;;  %v10741_v6 = vpack.c.bf16 %v4062_v7, %v4059_v61  ;;  %v4682_v61 = vld [vmem:[#allocation11 + $0x1500] sm:$0xff]  ;;  %v4685_v7 = vld [vmem:[#allocation11 + $0x1518] sm:$0xff] }
 0x593   : > { %4193 = vmatprep.mubr.f32.mxu0 %v14562_v49  ;;  %10728 = vmatpush1.bf16.msra.mxu0 %v10727_v11  ;;  %v10858_v11 = vpack.c.bf16 %v4667_v20, %v4664_v17  ;;  %v4058_v17 = vld [vmem:[#allocation11 + $0xd20] sm:$0xff]  ;;  %v4676_v20 = vld [vmem:[#allocation11 + $0x14d0] sm:$0xff] }
 0x594   : > { %10851 = vmatpush1.bf16.msra.mxu1 %v10850_v46  ;;  %10730 = vmatprep.subr.bf16.mxu0 %v10729_v29  ;;  %v10737_v46 = vpack.c.bf16 %v4056_v35, %v4053_v27  ;;  %v4052_v29 = vld [vmem:[#allocation11 + $0xcf0] sm:$0xff]  ;;  %v10864_v27 = vpack.c.bf16 %v4680_v58, %v4677_v56  ;;  %v4679_v35 = vld [vmem:[#allocation11 + $0x14e8] sm:$0xff]  ;;  %v4074_v56 = vld [vmem:[#allocation11 + $0xda0] sm:$0xff] }
 0x595   : > { %10853 = vmatprep.subr.bf16.mxu1 %v10852_v59  ;;  %v4673_v59 = vld [vmem:[#allocation11 + $0x14b8] sm:$0xff] }
 0x596   : > { %4194 = vmatmul.mubr.f32.gmra.mrb[32].mxu0 %v14568_v51  ;;  %v10862_v10 = vpack.c.bf16 %v4673_v59, %v4670_v42  ;;  %v4064_v42 = vld [vmem:[#allocation11 + $0xd50] sm:$0xff]  ;;  %v4067_v59 = vld [vmem:[#allocation11 + $0xd68] sm:$0xff] }
 0x597   : > { %4199 = vmatprep.mubr.f32.mxu0 %v14544_v55  ;;  %10732 = vmatpush1.bf16.msra.mxu0 %v10731_v44 }
 0x598   : > { %10855 = vmatpush1.bf16.msra.mxu1 %v10854_v40  ;;  %10734 = vmatprep.subr.bf16.mxu0 %v10733_v13  ;;  %v10739_v40 = vpack.c.bf16 %v4055_v33, %v4052_v29  ;;  %v10745_v33 = vpack.c.bf16 %v4068_v52, %v4065_v26  ;;  %v4080_v26 = vld [vmem:[#allocation11 + $0xdd0] sm:$0xff]  ;;  %v4695_v52 = vld [vmem:[#allocation11 + $0x1568] sm:$0xff] }
 0x599   : > { %10857 = vmatprep.subr.bf16.mxu1 %v10856_v19  ;;  %v4061_v19 = vld [vmem:[#allocation11 + $0xd38] sm:$0xff] }
 0x59a   : > { %4200 = vmatmul.mubr.f32.gmra.mrb[34].mxu0 %v14553_v39  ;;  %v9739_v54 = vpop.f32.mrb[42].mxu1  ;;  %v10743_v29 = vpack.c.bf16 %v4061_v19, %v4058_v17  ;;  %v4070_v19 = vld [vmem:[#allocation11 + $0xd80] sm:$0xff] }
 0x59b   : > { %10736 = vmatpush1.bf16.msra.mxu0 %v10735_v0  ;;  %9626 = vmatprep.mubr.msk.f32.mxu0 %vm3272_vm13, %v14584_v57  ;;  %v9740_v44 = vpop.f32.mrb[43].mxu1  ;;  %v4692_v57 = vld [vmem:[#allocation11 + $0x1550] sm:$0xff] }
 0x59c   : > { %10859 = vmatpush1.bf16.msra.mxu1 %v10858_v11  ;;  %10738 = vmatprep.subr.bf16.mxu0 %v10737_v46  ;;  %v14630_v13 = vadd.f32 %v9740_v44, %v9739_v54  ;;  %v10866_v46 = vpack.c.bf16 %v4679_v35, %v4676_v20  ;;  %v4071_v54 = vld [vmem:[#allocation11 + $0xd88] sm:$0xff]  ;;  %v4689_v44 = vld [vmem:[#allocation11 + $0x1538] sm:$0xff]  ;;  %v4688_v35 = vld [vmem:[#allocation11 + $0x1530] sm:$0xff] }
 0x59d   : > { %10861 = vmatprep.subr.bf16.mxu1 %v10860_v5  ;;  %v10868_v5 = vpack.c.bf16 %v4686_v14, %v4683_v8  ;;  %v4073_v20 = vld [vmem:[#allocation11 + $0xd98] sm:$0xff]  ;;  %v10872_v14 = vpack.c.bf16 %v4692_v57, %v4689_v44  ;;  %v4691_v8 = vld [vmem:[#allocation11 + $0x1548] sm:$0xff] }
 0x59e   : > { %v9742_v0 = vpop.f32.mrb[44].mxu1  ;;  %v4701_v57 = vld [vmem:[#allocation11 + $0x1598] sm:$0xff] }
 0x59f   : > { %10740 = vmatpush1.bf16.msra.mxu0 %v10739_v40  ;;  %v9743_v53 = vpop.f32.mrb[45].mxu1  ;;  %v10747_v40 = vpack.c.bf16 %v4067_v59, %v4064_v42  ;;  %v4076_v42 = vld [vmem:[#allocation11 + $0xdb0] sm:$0xff]  ;;  %v4079_v59 = vld [vmem:[#allocation11 + $0xdc8] sm:$0xff] }
 0x5a0   : > { %10863 = vmatpush1.bf16.msra.mxu1 %v10862_v10  ;;  %10742 = vmatprep.subr.bf16.mxu0 %v10741_v6  ;;  %v14632_v11 = vadd.f32 %v9743_v53, %v9742_v0  ;;  %v10870_v53 = vpack.c.bf16 %v4685_v7, %v4682_v61  ;;  %v10749_v6 = vpack.c.bf16 %v4074_v56, %v4071_v54  ;;  %v4698_v0 = vld [vmem:[#allocation11 + $0x1580] sm:$0xff]  ;;  %v4697_v54 = vld [vmem:[#allocation11 + $0x1578] sm:$0xff]  ;;  %v4083_v56 = vld [vmem:[#allocation11 + $0xde8] sm:$0xff] }
 0x5a1   : > { %10865 = vmatprep.subr.bf16.mxu1 %v10864_v27  ;;  %v4077_v27 = vld [vmem:[#allocation11 + $0xdb8] sm:$0xff]  ;;  %v4694_v61 = vld [vmem:[#allocation11 + $0x1560] sm:$0xff]  ;;  %v10876_v7 = vpack.c.bf16 %v4698_v0, %v4695_v52  ;;  %v10755_v44 = vpack.c.bf16 %v4079_v59, %v4076_v42  ;;  %v4612_v59 = vld [vmem:[#allocation11 + $0x12d0] sm:$0xff] }
 0x5a2   : > { %v9745_v58 = vpop.f32.mrb[46].mxu1  ;;  %v4709_v42 = vld [vmem:[#allocation11 + $0x15d8] sm:$0xff] }
 0x5a3   : > { %10744 = vmatpush1.bf16.msra.mxu0 %v10743_v29  ;;  %v9746_v17 = vpop.f32.mrb[47].mxu1  ;;  %v10751_v29 = vpack.c.bf16 %v4073_v20, %v4070_v19  ;;  %v4700_v19 = vld [vmem:[#allocation11 + $0x1590] sm:$0xff] }
 0x5a4   : > { %10867 = vmatpush1.bf16.msra.mxu1 %v10866_v46  ;;  %10746 = vmatprep.subr.bf16.mxu0 %v10745_v33  ;;  %v14634_v10 = vadd.f32 %v9746_v17, %v9745_v58  ;;  %v10874_v46 = vpack.c.bf16 %v4691_v8, %v4688_v35  ;;  %v10753_v33 = vpack.c.bf16 %v4080_v26, %v4077_v27  ;;  %v4704_v58 = vld [vmem:[#allocation11 + $0x15b0] sm:$0xff]  ;;  %v4703_v35 = vld [vmem:[#allocation11 + $0x15a8] sm:$0xff]  ;;  %v4710_v26 = vld [vmem:[#allocation11 + $0x15e0] sm:$0xff] }
 0x5a5   : > { %10869 = vmatprep.subr.bf16.mxu1 %v10868_v5  ;;  %v4086_v5 = vld [vmem:[#allocation11 + $0xe00] sm:$0xff]  ;;  %v10880_v20 = vpack.c.bf16 %v4704_v58, %v4701_v57  ;;  %v4660_v8 = vld [vmem:[#allocation11 + $0x1450] sm:$0xff]  ;;  %v4707_v27 = vld [vmem:[#allocation11 + $0x15c8] sm:$0xff]  ;;  %v10882_v0 = vpack.c.bf16 %v4703_v35, %v4700_v19 }
 0x5a6   : > { %v10757_v17 = vpack.c.bf16 %v4086_v5, %v4083_v56  ;;  %v4666_v56 = vld [vmem:[#allocation11 + $0x1480] sm:$0xff]  ;;  %v4669_v5 = vld [vmem:[#allocation11 + $0x1498] sm:$0xff] }
 0x5a7   : > { %10748 = vmatpush1.bf16.msra.mxu0 %v10747_v40  ;;  %v10878_v40 = vpack.c.bf16 %v4697_v54, %v4694_v61  ;;  %v4615_v61 = vld [vmem:[#allocation11 + $0x12e8] sm:$0xff]  ;;  %v4713_v54 = vld [vmem:[#allocation11 + $0x15f8] sm:$0xff]  ;;  %v4722_v35 = vld [vmem:[#allocation11 + $0x1640] sm:$0xff] }
 0x5a8   : > { %10871 = vmatpush1.bf16.msra.mxu1 %v10870_v53  ;;  %10750 = vmatprep.subr.bf16.mxu0 %v10749_v6  ;;  %v4082_v53 = vld [vmem:[#allocation11 + $0xde0] sm:$0xff]  ;;  %v4085_v6 = vld [vmem:[#allocation11 + $0xdf8] sm:$0xff]  ;;  %v10922_v58 = vpack.c.bf16 %v4615_v61, %v4612_v59  ;;  %v4728_v61 = vld [vmem:[#allocation11 + $0x1670] sm:$0xff] }
 0x5a9   : > { %10873 = vmatprep.subr.bf16.mxu1 %v10872_v14  ;;  %v4663_v14 = vld [vmem:[#allocation11 + $0x1468] sm:$0xff]  ;;  %v10759_v52 = vpack.c.bf16 %v4085_v6, %v4082_v53  ;;  %v4618_v53 = vld [vmem:[#allocation11 + $0x1300] sm:$0xff]  ;;  %v10924_v6 = vpack.c.bf16 %v4669_v5, %v4666_v56  ;;  %v4621_v19 = vld [vmem:[#allocation11 + $0x1318] sm:$0xff] }
 0x5aa   : > { %v4725_v59 = vld [vmem:[#allocation11 + $0x1658] sm:$0xff] }
 0x5ab   : > { %10752 = vmatpush1.bf16.msra.mxu0 %v10751_v29  ;;  %v10920_v29 = vpack.c.bf16 %v4663_v14, %v4660_v8  ;;  %v4672_v8 = vld [vmem:[#allocation11 + $0x14b0] sm:$0xff]  ;;  %v4675_v14 = vld [vmem:[#allocation11 + $0x14c8] sm:$0xff] }
 0x5ac   : > { %10875 = vmatpush1.bf16.msra.mxu1 %v10874_v46  ;;  %10754 = vmatprep.subr.bf16.mxu0 %v10753_v33  ;;  %v10884_v46 = vpack.c.bf16 %v4710_v26, %v4707_v27  ;;  %v4706_v33 = vld [vmem:[#allocation11 + $0x15c0] sm:$0xff]  ;;  %v10926_v26 = vpack.c.bf16 %v4621_v19, %v4618_v53  ;;  %v4633_v53 = vld [vmem:[#allocation11 + $0x1378] sm:$0xff] }
 0x5ad   : > { %10877 = vmatprep.subr.bf16.mxu1 %v10876_v7  ;;  %v4716_v7 = vld [vmem:[#allocation11 + $0x1610] sm:$0xff]  ;;  %v10886_v57 = vpack.c.bf16 %v4709_v42, %v4706_v33  ;;  %v10928_v33 = vpack.c.bf16 %v4675_v14, %v4672_v8  ;;  %v4627_v42 = vld [vmem:[#allocation11 + $0x1348] sm:$0xff]  ;;  %v4734_v19 = vld [vmem:[#allocation11 + $0x16a0] sm:$0xff] }
 0x5af   : > { %10756 = vmatpush1.bf16.msra.mxu0 %v10755_v44  ;;  %v10888_v44 = vpack.c.bf16 %v4716_v7, %v4713_v54  ;;  %v4678_v54 = vld [vmem:[#allocation11 + $0x14e0] sm:$0xff]  ;;  %v4681_v7 = vld [vmem:[#allocation11 + $0x14f8] sm:$0xff] }
 0x5b0   : > { %10879 = vmatpush1.bf16.msra.mxu1 %v10878_v40  ;;  %10758 = vmatprep.subr.bf16.mxu0 %v10757_v17  ;;  %v4712_v40 = vld [vmem:[#allocation11 + $0x15f0] sm:$0xff]  ;;  %v4715_v17 = vld [vmem:[#allocation11 + $0x1608] sm:$0xff] }
 0x5b1   : > { %10881 = vmatprep.subr.bf16.mxu1 %v10880_v20  ;;  %v4719_v20 = vld [vmem:[#allocation11 + $0x1628] sm:$0xff]  ;;  %v10890_v27 = vpack.c.bf16 %v4715_v17, %v4712_v40  ;;  %v4630_v40 = vld [vmem:[#allocation11 + $0x1360] sm:$0xff]  ;;  %v10932_v17 = vpack.c.bf16 %v4681_v7, %v4678_v54 }
 0x5b2   : > { %v10934_v14 = vpack.c.bf16 %v4633_v53, %v4630_v40  ;;  %v4743_v40 = vld [vmem:[#allocation11 + $0x16e8] sm:$0xff]  ;;  %v4696_v53 = vld [vmem:[#allocation11 + $0x1570] sm:$0xff] }
 0x5b3   : > { %10760 = vmatpush1.bf16.msra.mxu0 %v10759_v52  ;;  %v10892_v52 = vpack.c.bf16 %v4722_v35, %v4719_v20  ;;  %v4684_v20 = vld [vmem:[#allocation11 + $0x1510] sm:$0xff]  ;;  %v4687_v35 = vld [vmem:[#allocation11 + $0x1528] sm:$0xff] }
 0x5b4   : > { %10883 = vmatpush1.bf16.msra.mxu1 %v10882_v0  ;;  %10921 = vmatprep.subr.bf16.mxu0 %v10920_v29  ;;  %v4718_v0 = vld [vmem:[#allocation11 + $0x1620] sm:$0xff]  ;;  %v4721_v29 = vld [vmem:[#allocation11 + $0x1638] sm:$0xff] }
 0x5b5   : > { %10885 = vmatprep.subr.bf16.mxu1 %v10884_v46  ;;  %v4624_v46 = vld [vmem:[#allocation11 + $0x1330] sm:$0xff]  ;;  %v10894_v56 = vpack.c.bf16 %v4721_v29, %v4718_v0  ;;  %v10936_v29 = vpack.c.bf16 %v4687_v35, %v4684_v20 }
 0x5b6   : > { %4271 = vmatmul.mubr.f32.vlgmr.msra.gmra.mrb[30].mxu0 %v14600_v45  ;;  %v10930_v5 = vpack.c.bf16 %v4627_v42, %v4624_v46  ;;  %v4636_v0 = vld [vmem:[#allocation11 + $0x1390] sm:$0xff]  ;;  %v4639_v46 = vld [vmem:[#allocation11 + $0x13a8] sm:$0xff] }
 0x5b7   : > { %4825 = vmatmul.mubr.f32.vlgmr.msra.gmra.mrb[66].mxu1 %v14374_v1  ;;  %9627 = vmatprep.mubr.msk.f32.mxu0 %vm3272_vm13, %v14610_v23  ;;  %v4740_v42 = vld [vmem:[#allocation11 + $0x16d0] sm:$0xff]  ;;  %v10938_v54 = vpack.c.bf16 %v4639_v46, %v4636_v0  ;;  %v4749_v0 = vld [vmem:[#allocation11 + $0x1718] sm:$0xff]  ;;  %v4702_v46 = vld [vmem:[#allocation11 + $0x15a0] sm:$0xff] }
 0x5b8   : > { %4830 = vmatprep.mubr.f32.mxu1 %v14390_v60  ;;  %10887 = vmatpush1.bf16.msra.mxu1 %v10886_v57  ;;  %v10896_v57 = vpack.c.bf16 %v4728_v61, %v4725_v59  ;;  %v4693_v59 = vld [vmem:[#allocation11 + $0x1558] sm:$0xff] }
 0x5b9   : > { %10923 = vmatpush3.bf16.msra.mxu0 %v10922_v58  ;;  %10889 = vmatprep.subr.bf16.mxu1 %v10888_v44  ;;  %v4724_v58 = vld [vmem:[#allocation11 + $0x1650] sm:$0xff]  ;;  %v4727_v44 = vld [vmem:[#allocation11 + $0x1668] sm:$0xff] }
 0x5ba   : > { %4277 = vmatmul.mubr.f32.gmra.mrb[32].mxu0 %v14616_v21  ;;  %10925 = vmatprep.subr.bf16.mxu0 %v10924_v6  ;;  %v4731_v6 = vld [vmem:[#allocation11 + $0x1688] sm:$0xff]  ;;  %v10898_v8 = vpack.c.bf16 %v4727_v44, %v4724_v58  ;;  %v4645_v44 = vld [vmem:[#allocation11 + $0x13d8] sm:$0xff] }
 0x5bb   : > { %4831 = vmatmul.mubr.f32.gmra.mrb[68].mxu1 %v14397_v63  ;;  %9628 = vmatprep.mubr.msk.f32.mxu0 %vm3272_vm13, %v14596_v62 }
 0x5bc   : > { %4836 = vmatprep.mubr.f32.mxu1 %v14384_v22  ;;  %10891 = vmatpush1.bf16.msra.mxu1 %v10890_v27  ;;  %v10900_v27 = vpack.c.bf16 %v4734_v19, %v4731_v6  ;;  %v4699_v6 = vld [vmem:[#allocation11 + $0x1588] sm:$0xff] }
 0x5bd   : > { %10927 = vmatpush3.bf16.msra.mxu0 %v10926_v26  ;;  %10893 = vmatprep.subr.bf16.mxu1 %v10892_v52  ;;  %v4730_v26 = vld [vmem:[#allocation11 + $0x1680] sm:$0xff]  ;;  %v4733_v52 = vld [vmem:[#allocation11 + $0x1698] sm:$0xff] }
 0x5be   : > { %4283 = vmatmul.mubr.f32.gmra.mrb[34].mxu0 %v14603_v15  ;;  %10929 = vmatprep.subr.bf16.mxu0 %v10928_v33  ;;  %v4737_v33 = vld [vmem:[#allocation11 + $0x16b8] sm:$0xff]  ;;  %v10902_v61 = vpack.c.bf16 %v4733_v52, %v4730_v26  ;;  %v10944_v26 = vpack.c.bf16 %v4699_v6, %v4696_v53  ;;  %v4651_v52 = vld [vmem:[#allocation11 + $0x1408] sm:$0xff] }
 0x5bf   : > { %4837 = vmatmul.mubr.f32.gmra.mrb[70].mxu1 %v14379_v18  ;;  %4990 = vmatprep.mubr.f32.mxu0 %v14367_v4  ;;  %v4690_v4 = vld [vmem:[#allocation11 + $0x1540] sm:$0xff]  ;;  %v10904_v7 = vpack.c.bf16 %v4740_v42, %v4737_v33  ;;  %v4705_v33 = vld [vmem:[#allocation11 + $0x15b8] sm:$0xff] }
 0x5c0   : > { %10895 = vmatpush1.bf16.msra.mxu1 %v10894_v56  ;;  %9632 = vmatprep.mubr.msk.f32.mxu1 %vm3272_vm13, %v14448_v2  ;;  %v4736_v56 = vld [vmem:[#allocation11 + $0x16b0] sm:$0xff]  ;;  %v10940_v58 = vpack.c.bf16 %v4693_v59, %v4690_v4 }
 0x5c1   : > { %10931 = vmatpush3.bf16.msra.mxu0 %v10930_v5  ;;  %10897 = vmatprep.subr.bf16.mxu1 %v10896_v57  ;;  %v4739_v5 = vld [vmem:[#allocation11 + $0x16c8] sm:$0xff]  ;;  %v4642_v57 = vld [vmem:[#allocation11 + $0x13c0] sm:$0xff] }
 0x5c2   : > { %10933 = vmatprep.subr.bf16.mxu0 %v10932_v17  ;;  %v4746_v17 = vld [vmem:[#allocation11 + $0x1700] sm:$0xff]  ;;  %v10906_v19 = vpack.c.bf16 %v4739_v5, %v4736_v56  ;;  %v10942_v20 = vpack.c.bf16 %v4645_v44, %v4642_v57  ;;  %v10948_v56 = vpack.c.bf16 %v4705_v33, %v4702_v46  ;;  %v4657_v5 = vld [vmem:[#allocation11 + $0x1438] sm:$0xff]  ;;  %v4755_v57 = vld [vmem:[#allocation11 + $0x1748] sm:$0xff] }
 0x5c3   : > { %v10908_v35 = vpack.c.bf16 %v4746_v17, %v4743_v40  ;;  %v4509_v44 = vld [vmem:[#allocation11 + $0xfa0] sm:$0xff]  ;;  %v4512_v40 = vld [vmem:[#allocation11 + $0xfb8] sm:$0xff]  ;;  %v4708_v46 = vld [vmem:[#allocation11 + $0x15d0] sm:$0xff] }
 0x5c4   : > { %10899 = vmatpush1.bf16.msra.mxu1 %v10898_v8  ;;  %v4742_v8 = vld [vmem:[#allocation11 + $0x16e0] sm:$0xff]  ;;  %v4711_v33 = vld [vmem:[#allocation11 + $0x15e8] sm:$0xff] }
 0x5c5   : > { %10935 = vmatpush3.bf16.msra.mxu0 %v10934_v14  ;;  %10901 = vmatprep.subr.bf16.mxu1 %v10900_v27  ;;  %v4745_v14 = vld [vmem:[#allocation11 + $0x16f8] sm:$0xff]  ;;  %v4648_v27 = vld [vmem:[#allocation11 + $0x13f0] sm:$0xff] }
 0x5c6   : > { %10937 = vmatprep.subr.bf16.mxu0 %v10936_v29  ;;  %v4752_v29 = vld [vmem:[#allocation11 + $0x1730] sm:$0xff]  ;;  %v10910_v42 = vpack.c.bf16 %v4745_v14, %v4742_v8  ;;  %v10946_v4 = vpack.c.bf16 %v4651_v52, %v4648_v27  ;;  %v4461_v8 = vld [vmem:[#allocation11 + $0xe20] sm:$0xff]  ;;  %v4464_v14 = vld [vmem:[#allocation11 + $0xe38] sm:$0xff] }
 0x5c7   : > { %v10912_v59 = vpack.c.bf16 %v4752_v29, %v4749_v0  ;;  %v4515_v27 = vld [vmem:[#allocation11 + $0xfd0] sm:$0xff]  ;;  %v11081_v0 = vpack.c.bf16 %v4464_v14, %v4461_v8  ;;  %v4482_v8 = vld [vmem:[#allocation11 + $0xec8] sm:$0xff]  ;;  %v4533_v14 = vld [vmem:[#allocation11 + $0x1060] sm:$0xff] }
 0x5c8   : > { %10903 = vmatpush1.bf16.msra.mxu1 %v10902_v61  ;;  %v4748_v61 = vld [vmem:[#allocation11 + $0x1710] sm:$0xff] }
 0x5c9   : > { %10939 = vmatpush3.bf16.msra.mxu0 %v10938_v54  ;;  %10905 = vmatprep.subr.bf16.mxu1 %v10904_v7  ;;  %v4751_v54 = vld [vmem:[#allocation11 + $0x1728] sm:$0xff]  ;;  %v4654_v7 = vld [vmem:[#allocation11 + $0x1420] sm:$0xff] }
 0x5ca   : > { %10941 = vmatprep.subr.bf16.mxu0 %v10940_v58  ;;  %v4758_v58 = vld [vmem:[#allocation11 + $0x1760] sm:$0xff]  ;;  %v10914_v17 = vpack.c.bf16 %v4751_v54, %v4748_v61  ;;  %v10950_v53 = vpack.c.bf16 %v4657_v5, %v4654_v7  ;;  %v4524_v61 = vld [vmem:[#allocation11 + $0x1018] sm:$0xff]  ;;  %v10953_v54 = vpack.c.bf16 %v4711_v33, %v4708_v46  ;;  %v15297_v7 = vmov 0.0|0.0  }
 0x5cb   : > { %v10916_v6 = vpack.c.bf16 %v4758_v58, %v4755_v57  ;;  %v4714_v5 = vld [vmem:[#allocation11 + $0x1600] sm:$0xff]  ;;  %v4717_v57 = vld [vmem:[#allocation11 + $0x1618] sm:$0xff] }
 0x5cc   : > { %10907 = vmatpush1.bf16.msra.mxu1 %v10906_v19  ;;  %v4754_v19 = vld [vmem:[#allocation11 + $0x1740] sm:$0xff]  ;;  %v4729_v46 = vld [vmem:[#allocation11 + $0x1678] sm:$0xff] }
 0x5cd   : > { %10943 = vmatpush3.bf16.msra.mxu0 %v10942_v20  ;;  %10909 = vmatprep.subr.bf16.mxu1 %v10908_v35  ;;  %v4757_v20 = vld [vmem:[#allocation11 + $0x1758] sm:$0xff]  ;;  %v11079_v35 = vpack.c.bf16 %v4512_v40, %v4509_v44  ;;  %v4473_v44 = vld [vmem:[#allocation11 + $0xe80] sm:$0xff] }
 0x5ce   : > { %10945 = vmatprep.subr.bf16.mxu0 %v10944_v26  ;;  %v4518_v26 = vld [vmem:[#allocation11 + $0xfe8] sm:$0xff]  ;;  %v10918_v52 = vpack.c.bf16 %v4757_v20, %v4754_v19  ;;  %v4476_v40 = vld [vmem:[#allocation11 + $0xe98] sm:$0xff] }
 0x5cf   : > { %v11083_v29 = vpack.c.bf16 %v4518_v26, %v4515_v27  ;;  %v4723_v19 = vld [vmem:[#allocation11 + $0x1648] sm:$0xff]  ;;  %v4536_v27 = vld [vmem:[#allocation11 + $0x1078] sm:$0xff] }
 0x5d0   : > { %10911 = vmatpush1.bf16.msra.mxu1 %v10910_v42  ;;  %v4467_v42 = vld [vmem:[#allocation11 + $0xe50] sm:$0xff] }
 0x5d1   : > { %10947 = vmatpush3.bf16.msra.mxu0 %v10946_v4  ;;  %10913 = vmatprep.subr.bf16.mxu1 %v10912_v59  ;;  %v4470_v4 = vld [vmem:[#allocation11 + $0xe68] sm:$0xff]  ;;  %v4521_v59 = vld [vmem:[#allocation11 + $0x1000] sm:$0xff] }
 0x5d2   : > { %10949 = vmatprep.subr.bf16.mxu0 %v10948_v56  ;;  %v11085_v56 = vpack.c.bf16 %v4470_v4, %v4467_v42  ;;  %v11087_v58 = vpack.c.bf16 %v4524_v61, %v4521_v59  ;;  %v11095_v42 = vpack.c.bf16 %v4536_v27, %v4533_v14  ;;  %v4485_v4 = vld [vmem:[#allocation11 + $0xee0] sm:$0xff]  ;;  %v4488_v59 = vld [vmem:[#allocation11 + $0xef8] sm:$0xff] }
 0x5d3   : > { %v4497_v27 = vld [vmem:[#allocation11 + $0xf40] sm:$0xff] }
 0x5d4   : > { %10915 = vmatpush1.bf16.msra.mxu1 %v10914_v17  ;;  %v10956_v17 = vpack.c.bf16 %v4717_v57, %v4714_v5 }
 0x5d5   : > { %10951 = vmatpush3.bf16.msra.mxu0 %v10950_v53  ;;  %10917 = vmatprep.subr.bf16.mxu1 %v10916_v6  ;;  %v11089_v53 = vpack.c.bf16 %v4476_v40, %v4473_v44  ;;  %v4720_v6 = vld [vmem:[#allocation11 + $0x1630] sm:$0xff]  ;;  %v4735_v44 = vld [vmem:[#allocation11 + $0x16a8] sm:$0xff] }
 0x5d6   : > { %11080 = vmatprep.subr.bf16.mxu0 %v11079_v35  ;;  %v4479_v35 = vld [vmem:[#allocation11 + $0xeb0] sm:$0xff] }
 0x5d8   : > { %4991 = vmatmul.mubr.f32.vlgmr.msra.gmra.mrb[36].mxu0 %v14374_v1  ;;  %10919 = vmatpush1.bf16.msra.mxu1 %v10918_v52  ;;  %v4527_v1 = vld [vmem:[#allocation11 + $0x1030] sm:$0xff]  ;;  %v10959_v52 = vpack.c.bf16 %v4723_v19, %v4720_v6  ;;  %v4545_v6 = vld [vmem:[#allocation11 + $0x10c0] sm:$0xff]  ;;  %v4548_v19 = vld [vmem:[#allocation11 + $0x10d8] sm:$0xff] }
 0x5d9   : > { %4995 = vmatprep.mubr.f32.mxu0 %v14390_v60  ;;  %11082 = vmatpush3.bf16.msra.mxu0 %v11081_v0  ;;  %v4530_v60 = vld [vmem:[#allocation11 + $0x1048] sm:$0xff]  ;;  %v11093_v0 = vpack.c.bf16 %v4482_v8, %v4479_v35  ;;  %v4738_v8 = vld [vmem:[#allocation11 + $0x16c0] sm:$0xff]  ;;  %v11103_v14 = vpack.c.bf16 %v4548_v19, %v4545_v6  ;;  %v4756_v6 = vld [vmem:[#allocation11 + $0x1750] sm:$0xff] }
 0x5da   : > { %10952 = vmatprep.subr.bf16.mxu1 %v15297_v7  ;;  %11084 = vmatprep.subr.bf16.mxu0 %v11083_v29  ;;  %v4726_v29 = vld [vmem:[#allocation11 + $0x1660] sm:$0xff]  ;;  %v4759_v19 = vld [vmem:[#allocation11 + $0x1768] sm:$0xff] }
 0x5db   : > { %4908 = vmatmul.mubr.f32.vlgmr.msra.gmra.mrb[66].mxu1 %v14473_v50  ;;  %v10962_v57 = vpack.c.bf16 %v4729_v46, %v4726_v29 }
 0x5dc   : > { %4996 = vmatmul.mubr.f32.gmra.mrb[38].mxu0 %v14397_v63  ;;  %9633 = vmatprep.mubr.msk.f32.mxu1 %vm3272_vm13, %v14484_v24  ;;  %v11091_v63 = vpack.c.bf16 %v4530_v60, %v4527_v1 }
 0x5dd   : > { %5000 = vmatprep.mubr.f32.mxu0 %v14384_v22  ;;  %10954 = vmatpush1.bf16.msra.mxu1 %v10953_v54  ;;  %v4539_v54 = vld [vmem:[#allocation11 + $0x1090] sm:$0xff] }
 0x5de   : > { %11086 = vmatpush3.bf16.msra.mxu0 %v11085_v56  ;;  %10955 = vmatprep.subr.bf16.mxu1 %v15297_v7  ;;  %v4542_v56 = vld [vmem:[#allocation11 + $0x10a8] sm:$0xff] }
 0x5df   : > { %4914 = vmatmul.mubr.f32.gmra.mrb[68].mxu1 %v14492_v38  ;;  %11088 = vmatprep.subr.bf16.mxu0 %v11087_v58  ;;  %v9780_v20 = vpop.f32.mrb[54].mxu1  ;;  %v4732_v58 = vld [vmem:[#allocation11 + $0x1690] sm:$0xff]  ;;  %v11099_v60 = vpack.c.bf16 %v4542_v56, %v4539_v54  ;;  %v5466_v54 = vld [vmem:[#allocation11 + $0x1918] sm:$0xff] }
 0x5e0   : > { %5001 = vmatmul.mubr.f32.gmra.mrb[40].mxu0 %v14379_v18  ;;  %9634 = vmatprep.mubr.msk.f32.mxu1 %vm3272_vm13, %v14469_v16  ;;  %v9781_v22 = vpop.f32.mrb[55].mxu1 }
 0x5e1   : > { %10957 = vmatpush1.bf16.msra.mxu1 %v10956_v17  ;;  %5316 = vmatprep.mubr.f32.mxu0 %v14348_v43  ;;  %v9782_v26 = vadd.f32 %v9781_v22, %v9780_v20  ;;  %v4491_v17 = vld [vmem:[#allocation11 + $0xf10] sm:$0xff]  ;;  %v4741_v22 = vld [vmem:[#allocation11 + $0x16d8] sm:$0xff] }
 0x5e2   : > { %11090 = vmatpush3.bf16.msra.mxu0 %v11089_v53  ;;  %10958 = vmatprep.subr.bf16.mxu1 %v15297_v7  ;;  %v10968_v29 = vpack.c.bf16 %v4741_v22, %v4738_v8  ;;  %v4460_v8 = vld [vmem:[#allocation11 + $0xe18] sm:$0xff]  ;;  %v4463_v22 = vld [vmem:[#allocation11 + $0xe30] sm:$0xff] }
 0x5e3   : > { %v14667_v33 = vadd.f32 %v9782_v26, %v14630_v13  ;;  %4920 = vmatmul.mubr.f32.gmra.mrb[70].mxu1 %v14476_v37  ;;  %11092 = vmatprep.subr.bf16.mxu0 %v11091_v63  ;;  %v9783_v18 = vpop.f32.mrb[56].mxu1  ;;  %v11097_v13 = vpack.c.bf16 %v4488_v59, %v4485_v4  ;;  %v10965_v63 = vpack.c.bf16 %v4735_v44, %v4732_v58  ;;  %v4500_v26 = vld [vmem:[#allocation11 + $0xf58] sm:$0xff]  ;;  %v4503_v59 = vld [vmem:[#allocation11 + $0xf70] sm:$0xff]  ;;  %v5415_v44 = vld [vmem:[#allocation11 + $0x1780] sm:$0xff] }
 0x5e4   : > { %9635 = vmatprep.mubr.msk.f32.mxu1 %vm3272_vm13, %v14448_v2  ;;  %v9784_v61 = vpop.f32.mrb[57].mxu1  ;;  %v4494_v2 = vld [vmem:[#allocation11 + $0xf28] sm:$0xff]  ;;  %v11105_v46 = vpack.c.bf16 %v4500_v26, %v4497_v27  ;;  %v5478_v27 = vld [vmem:[#allocation11 + $0x1978] sm:$0xff]  ;;  %v10977_v26 = vpack.c.bf16 %v4759_v19, %v4756_v6 }
 0x5e5   : > { %10960 = vmatpush1.bf16.msra.mxu1 %v10959_v52  ;;  %v9785_v5 = vadd.f32 %v9784_v61, %v9783_v18  ;;  %v11101_v35 = vpack.c.bf16 %v4494_v2, %v4491_v17  ;;  %v4551_v52 = vld [vmem:[#allocation11 + $0x10f0] sm:$0xff]  ;;  %v4506_v61 = vld [vmem:[#allocation11 + $0xf88] sm:$0xff]  ;;  %v5490_v6 = vld [vmem:[#allocation11 + $0x19d8] sm:$0xff] }
 0x5e6   : > { %11094 = vmatpush3.bf16.msra.mxu0 %v11093_v0  ;;  %10961 = vmatprep.subr.bf16.mxu1 %v15297_v7  ;;  %v4554_v0 = vld [vmem:[#allocation11 + $0x1108] sm:$0xff]  ;;  %v4744_v18 = vld [vmem:[#allocation11 + $0x16f0] sm:$0xff] }
 0x5e7   : > { %v14674_v40 = vadd.f32 %v9785_v5, %v14632_v11  ;;  %11096 = vmatprep.subr.bf16.mxu0 %v11095_v42  ;;  %v9786_v1 = vpop.f32.mrb[58].mxu1  ;;  %v4747_v42 = vld [vmem:[#allocation11 + $0x1708] sm:$0xff]  ;;  %v11107_v4 = vpack.c.bf16 %v4554_v0, %v4551_v52  ;;  %v11109_v5 = vpack.c.bf16 %v4506_v61, %v4503_v59  ;;  %v4459_v0 = vld [vmem:[#allocation11 + $0xe10] sm:$0xff]  ;;  %v4469_v61 = vld [vmem:[#allocation11 + $0xe60] sm:$0xff] }
 0x5e8   : > { %v9787_v53 = vpop.f32.mrb[59].mxu1  ;;  %v10971_v56 = vpack.c.bf16 %v4747_v42, %v4744_v18  ;;  %v5472_v17 = vld [vmem:[#allocation11 + $0x1948] sm:$0xff]  ;;  %v5427_v42 = vld [vmem:[#allocation11 + $0x17e0] sm:$0xff] }
 0x5e9   : > { %10963 = vmatpush1.bf16.msra.mxu1 %v10962_v57  ;;  %v9788_v20 = vadd.f32 %v9787_v53, %v9786_v1  ;;  %v4750_v57 = vld [vmem:[#allocation11 + $0x1720] sm:$0xff]  ;;  %v5418_v1 = vld [vmem:[#allocation11 + $0x1798] sm:$0xff]  ;;  %v4462_v18 = vld [vmem:[#allocation11 + $0xe28] sm:$0xff] }
 0x5ea   : > { %11098 = vmatpush3.bf16.msra.mxu0 %v11097_v13  ;;  %10964 = vmatprep.subr.bf16.mxu1 %v15297_v7  ;;  %v4753_v13 = vld [vmem:[#allocation11 + $0x1738] sm:$0xff]  ;;  %v11240_v53 = vpack.c.bf16 %v5418_v1, %v5415_v44  ;;  %v4466_v59 = vld [vmem:[#allocation11 + $0xe48] sm:$0xff]  ;;  %v5433_v44 = vld [vmem:[#allocation11 + $0x1810] sm:$0xff] }
 0x5eb   : > { %v14678_v11 = vadd.f32 %v9788_v20, %v14634_v10  ;;  %11100 = vmatprep.subr.bf16.mxu0 %v11099_v60  ;;  %v5463_v10 = vld [vmem:[#allocation11 + $0x1900] sm:$0xff]  ;;  %v5469_v60 = vld [vmem:[#allocation11 + $0x1930] sm:$0xff]  ;;  %v10974_v2 = vpack.c.bf16 %v4753_v13, %v4750_v57  ;;  %v4468_v13 = vld [vmem:[#allocation11 + $0xe58] sm:$0xff] }
 0x5ec   : > { %v11238_v58 = vpack.c.bf16 %v5466_v54, %v5463_v10  ;;  %v11242_v20 = vpack.c.bf16 %v5472_v17, %v5469_v60  ;;  %v5481_v10 = vld [vmem:[#allocation11 + $0x1990] sm:$0xff]  ;;  %v5484_v54 = vld [vmem:[#allocation11 + $0x19a8] sm:$0xff]  ;;  %v4465_v57 = vld [vmem:[#allocation11 + $0xe40] sm:$0xff] }
 0x5ed   : > { %10966 = vmatpush1.bf16.msra.mxu1 %v10965_v63  ;;  %v5421_v63 = vld [vmem:[#allocation11 + $0x17b0] sm:$0xff]  ;;  %v5436_v1 = vld [vmem:[#allocation11 + $0x1828] sm:$0xff]  ;;  %v4472_v60 = vld [vmem:[#allocation11 + $0xe78] sm:$0xff]  ;;  %v11250_v17 = vpack.c.bf16 %v5484_v54, %v5481_v10  ;;  %v10985_v19 = vpack.c.bf16 %v4468_v13, %v4465_v57 }
 0x5ee   : > { %11102 = vmatpush3.bf16.msra.mxu0 %v11101_v35  ;;  %10967 = vmatprep.subr.bf16.mxu1 %v15297_v7  ;;  %v5424_v35 = vld [vmem:[#allocation11 + $0x17c8] sm:$0xff]  ;;  %v4487_v10 = vld [vmem:[#allocation11 + $0xef0] sm:$0xff]  ;;  %v5499_v54 = vld [vmem:[#allocation11 + $0x1a20] sm:$0xff] }
 0x5ef   : > { %11104 = vmatprep.subr.bf16.mxu0 %v11103_v14  ;;  %v5475_v14 = vld [vmem:[#allocation11 + $0x1960] sm:$0xff]  ;;  %v11244_v52 = vpack.c.bf16 %v5424_v35, %v5421_v63  ;;  %v4471_v63 = vld [vmem:[#allocation11 + $0xe70] sm:$0xff]  ;;  %v4474_v35 = vld [vmem:[#allocation11 + $0xe88] sm:$0xff] }
 0x5f0   : > { %v4483_v57 = vld [vmem:[#allocation11 + $0xed0] sm:$0xff]  ;;  %v4486_v13 = vld [vmem:[#allocation11 + $0xee8] sm:$0xff] }
 0x5f1   : > { %10969 = vmatpush1.bf16.msra.mxu1 %v10968_v29  ;;  %v10979_v29 = vpack.c.bf16 %v4463_v22, %v4460_v8  ;;  %v5439_v22 = vld [vmem:[#allocation11 + $0x1840] sm:$0xff] }
 0x5f2   : > { %11106 = vmatpush3.bf16.msra.mxu0 %v11105_v46  ;;  %10970 = vmatprep.subr.bf16.mxu1 %v15297_v7  ;;  %v11246_v46 = vpack.c.bf16 %v5478_v27, %v5475_v14  ;;  %v5442_v14 = vld [vmem:[#allocation11 + $0x1858] sm:$0xff]  ;;  %v4478_v27 = vld [vmem:[#allocation11 + $0xea8] sm:$0xff] }
 0x5f3   : > { %11108 = vmatprep.subr.bf16.mxu0 %v11107_v4  ;;  %v5430_v4 = vld [vmem:[#allocation11 + $0x17f8] sm:$0xff] }
 0x5f5   : > { %10972 = vmatpush1.bf16.msra.mxu1 %v10971_v56  ;;  %v10981_v56 = vpack.c.bf16 %v4462_v18, %v4459_v0  ;;  %v10989_v0 = vpack.c.bf16 %v4474_v35, %v4471_v63  ;;  %v4480_v18 = vld [vmem:[#allocation11 + $0xeb8] sm:$0xff] }
 0x5f6   : > { %11110 = vmatpush3.bf16.msra.mxu0 %v11109_v5  ;;  %10973 = vmatprep.subr.bf16.mxu1 %v15297_v7  ;;  %v11248_v5 = vpack.c.bf16 %v5430_v4, %v5427_v42  ;;  %v4492_v35 = vld [vmem:[#allocation11 + $0xf18] sm:$0xff] }
 0x5f7   : > { %11239 = vmatprep.subr.bf16.mxu0 %v11238_v58  ;;  %v10983_v58 = vpack.c.bf16 %v4469_v61, %v4466_v59  ;;  %v5445_v59 = vld [vmem:[#allocation11 + $0x1870] sm:$0xff]  ;;  %v5448_v61 = vld [vmem:[#allocation11 + $0x1888] sm:$0xff] }
 0x5f9   : > { %5317 = vmatmul.mubr.f32.vlgmr.msra.gmra.mrb[42].mxu0 %v14350_v30  ;;  %10975 = vmatpush1.bf16.msra.mxu1 %v10974_v2  ;;  %v4475_v2 = vld [vmem:[#allocation11 + $0xe90] sm:$0xff] }
 0x5fa   : > { %5321 = vmatprep.mubr.f32.mxu0 %v14354_v41  ;;  %11241 = vmatpush3.bf16.msra.mxu0 %v11240_v53  ;;  %v5487_v53 = vld [vmem:[#allocation11 + $0x19c0] sm:$0xff]  ;;  %v10987_v8 = vpack.c.bf16 %v4475_v2, %v4472_v60  ;;  %v5454_v60 = vld [vmem:[#allocation11 + $0x18b8] sm:$0xff] }
 0x5fb   : > { %10976 = vmatprep.subr.bf16.mxu1 %v15297_v7  ;;  %11243 = vmatprep.subr.bf16.mxu0 %v11242_v20  ;;  %v11252_v20 = vpack.c.bf16 %v5436_v1, %v5433_v44  ;;  %v5451_v1 = vld [vmem:[#allocation11 + $0x18a0] sm:$0xff] }
 0x5fc   : > { %v4493_v2 = vld [vmem:[#allocation11 + $0xf20] sm:$0xff] }
 0x5fd   : > { %5322 = vmatmul.mubr.f32.gmra.mrb[44].mxu0 %v14352_v47  ;;  %10978 = vmatpush1.bf16.msra.mxu1 %v10977_v26  ;;  %v4481_v26 = vld [vmem:[#allocation11 + $0xec0] sm:$0xff] }
 0x5fe   : > { %5326 = vmatprep.mubr.f32.mxu0 %v14369_v12  ;;  %11245 = vmatpush3.bf16.msra.mxu0 %v11244_v52  ;;  %v5493_v52 = vld [vmem:[#allocation11 + $0x19f0] sm:$0xff]  ;;  %v10991_v42 = vpack.c.bf16 %v4481_v26, %v4478_v27 }
 0x5ff   : > { %10980 = vmatprep.subr.bf16.mxu1 %v10979_v29  ;;  %11247 = vmatprep.subr.bf16.mxu0 %v11246_v46  ;;  %v11256_v29 = vpack.c.bf16 %v5442_v14, %v5439_v22  ;;  %v4477_v46 = vld [vmem:[#allocation11 + $0xea0] sm:$0xff]  ;;  %v4496_v22 = vld [vmem:[#allocation11 + $0xf38] sm:$0xff]  ;;  %v4499_v14 = vld [vmem:[#allocation11 + $0xf50] sm:$0xff] }
 0x600   : > { %5071 = vmatmul.mubr.f32.vlgmr.msra.gmra.mrb[72].mxu1 %v14473_v50  ;;  %v11254_v50 = vpack.c.bf16 %v5490_v6, %v5487_v53  ;;  %v5508_v53 = vld [vmem:[#allocation11 + $0x1a68] sm:$0xff]  ;;  %v10997_v6 = vpack.c.bf16 %v4486_v13, %v4483_v57  ;;  %v4517_v57 = vld [vmem:[#allocation11 + $0xfe0] sm:$0xff] }
 0x601   : > { %5327 = vmatmul.mubr.f32.gmra.mrb[46].mxu0 %v14364_v3  ;;  %9636 = vmatprep.mubr.msk.f32.mxu1 %vm3272_vm13, %v14484_v24  ;;  %v5496_v24 = vld [vmem:[#allocation11 + $0x1a08] sm:$0xff] }
 0x602   : > { %10982 = vmatpush1.bf16.msra.mxu1 %v10981_v56  ;;  %11249 = vmatpush3.bf16.msra.mxu0 %v11248_v5  ;;  %v11258_v4 = vpack.c.bf16 %v5496_v24, %v5493_v52  ;;  %v5502_v56 = vld [vmem:[#allocation11 + $0x1a38] sm:$0xff]  ;;  %v11260_v5 = vpack.c.bf16 %v5448_v61, %v5445_v59  ;;  %v11003_v52 = vpack.c.bf16 %v4499_v14, %v4496_v22  ;;  %v4495_v24 = vld [vmem:[#allocation11 + $0xf30] sm:$0xff]  ;;  %v4525_v14 = vld [vmem:[#allocation11 + $0x1020] sm:$0xff] }
 0x603   : > { %5793 = vmatprep.mubr.f32.mxu0 %v14539_v25  ;;  %10984 = vmatprep.subr.bf16.mxu1 %v10983_v58  ;;  %v11262_v44 = vpack.c.bf16 %v5502_v56, %v5499_v54  ;;  %v4504_v59 = vld [vmem:[#allocation11 + $0xf78] sm:$0xff]  ;;  %v4507_v56 = vld [vmem:[#allocation11 + $0xf90] sm:$0xff] }
 0x604   : > { %5076 = vmatmul.mubr.f32.gmra.mrb[74].mxu1 %v14492_v38  ;;  %11251 = vmatprep.subr.bf16.mxu0 %v11250_v17  ;;  %v4484_v38 = vld [vmem:[#allocation11 + $0xed8] sm:$0xff]  ;;  %v4490_v17 = vld [vmem:[#allocation11 + $0xf08] sm:$0xff] }
 0x605   : > { %9637 = vmatprep.mubr.msk.f32.mxu1 %vm3272_vm13, %v14469_v16  ;;  %v10993_v16 = vpack.c.bf16 %v4480_v18, %v4477_v46  ;;  %v10995_v58 = vpack.c.bf16 %v4487_v10, %v4484_v38  ;;  %v4505_v46 = vld [vmem:[#allocation11 + $0xf80] sm:$0xff]  ;;  %v4508_v61 = vld [vmem:[#allocation11 + $0xf98] sm:$0xff]  ;;  %v4511_v38 = vld [vmem:[#allocation11 + $0xfb0] sm:$0xff] }
 0x606   : > { %10986 = vmatpush1.bf16.msra.mxu1 %v10985_v19  ;;  %11253 = vmatpush3.bf16.msra.mxu0 %v11252_v20  ;;  %v4489_v19 = vld [vmem:[#allocation11 + $0xf00] sm:$0xff]  ;;  %v10999_v20 = vpack.c.bf16 %v4493_v2, %v4490_v17  ;;  %v11011_v54 = vpack.c.bf16 %v4511_v38, %v4508_v61  ;;  %v4523_v17 = vld [vmem:[#allocation11 + $0x1010] sm:$0xff]  ;;  %v4538_v61 = vld [vmem:[#allocation11 + $0x1088] sm:$0xff] }
 0x607   : > { %10988 = vmatprep.subr.bf16.mxu1 %v10987_v8  ;;  %11255 = vmatprep.subr.bf16.mxu0 %v11254_v50  ;;  %v5457_v8 = vld [vmem:[#allocation11 + $0x18d0] sm:$0xff]  ;;  %v5460_v50 = vld [vmem:[#allocation11 + $0x18e8] sm:$0xff]  ;;  %v11001_v27 = vpack.c.bf16 %v4492_v35, %v4489_v19  ;;  %v4541_v38 = vld [vmem:[#allocation11 + $0x10a0] sm:$0xff] }
 0x608   : > { %5081 = vmatmul.mubr.f32.gmra.mrb[76].mxu1 %v14476_v37  ;;  %v5505_v37 = vld [vmem:[#allocation11 + $0x1a50] sm:$0xff]  ;;  %v11268_v26 = vpack.c.bf16 %v5460_v50, %v5457_v8  ;;  %v4526_v19 = vld [vmem:[#allocation11 + $0x1028] sm:$0xff] }
 0x609   : > { %5150 = vmatprep.mubr.f32.mxu1 %v14348_v43  ;;  %v11264_v43 = vpack.c.bf16 %v5454_v60, %v5451_v1  ;;  %v11266_v63 = vpack.c.bf16 %v5508_v53, %v5505_v37  ;;  %v4516_v1 = vld [vmem:[#allocation11 + $0xfd8] sm:$0xff]  ;;  %v15298_v37 = vmov 0.0  }
 0x60a   : > { %10990 = vmatpush1.bf16.msra.mxu1 %v10989_v0  ;;  %11257 = vmatpush3.bf16.msra.mxu0 %v11256_v29  ;;  %v4498_v0 = vld [vmem:[#allocation11 + $0xf48] sm:$0xff]  ;;  %v4520_v60 = vld [vmem:[#allocation11 + $0xff8] sm:$0xff] }
 0x60b   : > { %10992 = vmatprep.subr.bf16.mxu1 %v10991_v42  ;;  %11259 = vmatprep.subr.bf16.mxu0 %v11258_v4  ;;  %v4502_v29 = vld [vmem:[#allocation11 + $0xf68] sm:$0xff]  ;;  %v11005_v18 = vpack.c.bf16 %v4498_v0, %v4495_v24  ;;  %v4501_v4 = vld [vmem:[#allocation11 + $0xf60] sm:$0xff]  ;;  %v11019_v53 = vpack.c.bf16 %v4523_v17, %v4520_v60 }
 0x60c   : > { %v11007_v42 = vpack.c.bf16 %v4505_v46, %v4502_v29  ;;  %v11009_v10 = vpack.c.bf16 %v4504_v59, %v4501_v4  ;;  %v4531_v4 = vld [vmem:[#allocation11 + $0x1050] sm:$0xff]  ;;  %v4534_v59 = vld [vmem:[#allocation11 + $0x1068] sm:$0xff] }
 0x60e   : > { %10994 = vmatpush1.bf16.msra.mxu1 %v10993_v16  ;;  %11261 = vmatpush3.bf16.msra.mxu0 %v11260_v5  ;;  %v4510_v16 = vld [vmem:[#allocation11 + $0xfa8] sm:$0xff] }
 0x60f   : > { %10996 = vmatprep.subr.bf16.mxu1 %v10995_v58  ;;  %11263 = vmatprep.subr.bf16.mxu0 %v11262_v44  ;;  %v4514_v5 = vld [vmem:[#allocation11 + $0xfc8] sm:$0xff]  ;;  %v11013_v13 = vpack.c.bf16 %v4510_v16, %v4507_v56  ;;  %v4513_v44 = vld [vmem:[#allocation11 + $0xfc0] sm:$0xff]  ;;  %v11029_v16 = vpack.c.bf16 %v4534_v59, %v4531_v4 }
 0x610   : > { %v11015_v58 = vpack.c.bf16 %v4517_v57, %v4514_v5  ;;  %v11017_v2 = vpack.c.bf16 %v4516_v1, %v4513_v44  ;;  %v4537_v57 = vld [vmem:[#allocation11 + $0x1080] sm:$0xff]  ;;  %v4547_v44 = vld [vmem:[#allocation11 + $0x10d0] sm:$0xff] }
 0x612   : > { %10998 = vmatpush1.bf16.msra.mxu1 %v10997_v6  ;;  %11265 = vmatpush3.bf16.msra.mxu0 %v11264_v43  ;;  %v4519_v6 = vld [vmem:[#allocation11 + $0xff0] sm:$0xff]  ;;  %v4522_v43 = vld [vmem:[#allocation11 + $0x1008] sm:$0xff] }
 0x613   : > { %11000 = vmatprep.subr.bf16.mxu1 %v10999_v20  ;;  %11267 = vmatprep.subr.bf16.mxu0 %v11266_v63  ;;  %v4529_v20 = vld [vmem:[#allocation11 + $0x1040] sm:$0xff]  ;;  %v11021_v8 = vpack.c.bf16 %v4522_v43, %v4519_v6 }
 0x614   : > { %v11023_v22 = vpack.c.bf16 %v4529_v20, %v4526_v19  ;;  %v4553_v6 = vld [vmem:[#allocation11 + $0x1100] sm:$0xff] }
 0x615   : > { %v4549_v20 = vld [vmem:[#allocation11 + $0x10e0] sm:$0xff] }
 0x616   : > { %11002 = vmatpush1.bf16.msra.mxu1 %v11001_v27  ;;  %11269 = vmatpush3.bf16.msra.mxu0 %v11268_v26  ;;  %v4528_v27 = vld [vmem:[#allocation11 + $0x1038] sm:$0xff] }
 0x617   : > { %11004 = vmatprep.subr.bf16.mxu1 %v11003_v52  ;;  %v4532_v26 = vld [vmem:[#allocation11 + $0x1058] sm:$0xff]  ;;  %v4535_v52 = vld [vmem:[#allocation11 + $0x1070] sm:$0xff]  ;;  %v11025_v46 = vpack.c.bf16 %v4528_v27, %v4525_v14  ;;  %v4558_v14 = vld [vmem:[#allocation11 + $0x1128] sm:$0xff] }
 0x618   : > { %v4562_v27 = vld [vmem:[#allocation11 + $0x1148] sm:$0xff] }
 0x619   : > { %5794 = vmatmul.mubr.f32.vlgmr.msra.gmra.mrb[48].mxu0 %v14550_v34 }
 0x61a   : > { %11006 = vmatpush1.bf16.msra.mxu1 %v11005_v18  ;;  %5798 = vmatprep.mubr.f32.mxu0 %v14562_v49 }
 0x61b   : > { %11008 = vmatprep.subr.bf16.mxu1 %v11007_v42  ;;  %v11027_v42 = vpack.c.bf16 %v4535_v52, %v4532_v26  ;;  %v4565_v26 = vld [vmem:[#allocation11 + $0x1160] sm:$0xff] }
 0x61d   : > { %5799 = vmatmul.mubr.f32.gmra.mrb[50].mxu0 %v14568_v51 }
 0x61e   : > { %11010 = vmatpush1.bf16.msra.mxu1 %v11009_v10  ;;  %5803 = vmatprep.mubr.f32.mxu0 %v14544_v55 }
 0x61f   : > { %11012 = vmatprep.subr.bf16.mxu1 %v11011_v54 }
 0x621   : > { %5804 = vmatmul.mubr.f32.gmra.mrb[52].mxu0 %v14553_v39 }
 0x622   : > { %11014 = vmatpush1.bf16.msra.mxu1 %v11013_v13  ;;  %5989 = vmatprep.mubr.f32.mxu0 %v15298_v37  ;;  %v4540_v13 = vld [vmem:[#allocation11 + $0x1098] sm:$0xff] }
 0x623   : > { %11016 = vmatprep.subr.bf16.mxu1 %v11015_v58  ;;  %v4544_v58 = vld [vmem:[#allocation11 + $0x10b8] sm:$0xff]  ;;  %v11033_v60 = vpack.c.bf16 %v4540_v13, %v4537_v57 }
 0x624   : > { %v11035_v17 = vpack.c.bf16 %v4547_v44, %v4544_v58  ;;  %v4580_v57 = vld [vmem:[#allocation11 + $0x11d8] sm:$0xff] }
 0x625   : > { %v9821_v63 = vpop.f32.mrb[60].mxu1 }
 0x626   : > { %11018 = vmatpush1.bf16.msra.mxu1 %v11017_v2  ;;  %v9822_v35 = vpop.f32.mrb[61].mxu1  ;;  %v4543_v2 = vld [vmem:[#allocation11 + $0x10b0] sm:$0xff] }
 0x627   : > { %v9823_v50 = vadd.f32 %v9822_v35, %v9821_v63  ;;  %11020 = vmatprep.subr.bf16.mxu1 %v11019_v53  ;;  %v4550_v53 = vld [vmem:[#allocation11 + $0x10e8] sm:$0xff]  ;;  %v4552_v63 = vld [vmem:[#allocation11 + $0x10f8] sm:$0xff] }
 0x628   : > { %v11039_v19 = vpack.c.bf16 %v4553_v6, %v4550_v53  ;;  %v4556_v35 = vld [vmem:[#allocation11 + $0x1118] sm:$0xff] }
 0x629   : > { %v9824_v24 = vpop.f32.mrb[62].mxu1  ;;  %v14705_v0 = vadd.f32 %v14667_v33, %v9823_v50  ;;  %v11031_v33 = vpack.c.bf16 %v4541_v38, %v4538_v61  ;;  %v11041_v50 = vpack.c.bf16 %v4552_v63, %v4549_v20  ;;  %v4567_v61 = vld [vmem:[#allocation11 + $0x1170] sm:$0xff]  ;;  %v4570_v38 = vld [vmem:[#allocation11 + $0x1188] sm:$0xff]  ;;  %v4585_v20 = vld [vmem:[#allocation11 + $0x1200] sm:$0xff] }
 0x62a   : > { %11022 = vmatpush1.bf16.msra.mxu1 %v11021_v8  ;;  %v9825_v29 = vpop.f32.mrb[63].mxu1  ;;  %v4559_v8 = vld [vmem:[#allocation11 + $0x1130] sm:$0xff]  ;;  %v4588_v63 = vld [vmem:[#allocation11 + $0x1218] sm:$0xff] }
 0x62b   : > { %v9826_v18 = vadd.f32 %v9825_v29, %v9824_v24  ;;  %11024 = vmatprep.subr.bf16.mxu1 %v11023_v22  ;;  %v4555_v22 = vld [vmem:[#allocation11 + $0x1110] sm:$0xff]  ;;  %v11047_v24 = vpack.c.bf16 %v4565_v26, %v4562_v27  ;;  %v4561_v29 = vld [vmem:[#allocation11 + $0x1140] sm:$0xff]  ;;  %v4594_v26 = vld [vmem:[#allocation11 + $0x1248] sm:$0xff] }
 0x62c   : > { %v11045_v52 = vpack.c.bf16 %v4558_v14, %v4555_v22  ;;  %v4591_v27 = vld [vmem:[#allocation11 + $0x1230] sm:$0xff] }
 0x62d   : > { %v9827_v10 = vpop.f32.mrb[64].mxu1  ;;  %v14708_v54 = vadd.f32 %v14674_v40, %v9826_v18  ;;  %v4546_v40 = vld [vmem:[#allocation11 + $0x10c8] sm:$0xff]  ;;  %v4568_v18 = vld [vmem:[#allocation11 + $0x1178] sm:$0xff] }
 0x62e   : > { %11026 = vmatpush1.bf16.msra.mxu1 %v11025_v46  ;;  %v9828_v56 = vpop.f32.mrb[65].mxu1  ;;  %v11037_v43 = vpack.c.bf16 %v4546_v40, %v4543_v2  ;;  %v4564_v46 = vld [vmem:[#allocation11 + $0x1158] sm:$0xff]  ;;  %v4586_v2 = vld [vmem:[#allocation11 + $0x1208] sm:$0xff]  ;;  %v4589_v40 = vld [vmem:[#allocation11 + $0x1220] sm:$0xff] }
 0x62f   : > { %v9829_v5 = vadd.f32 %v9828_v56, %v9827_v10  ;;  %11028 = vmatprep.subr.bf16.mxu1 %v11027_v42  ;;  %v4571_v42 = vld [vmem:[#allocation11 + $0x1190] sm:$0xff]  ;;  %v11049_v4 = vpack.c.bf16 %v4564_v46, %v4561_v29  ;;  %v4574_v10 = vld [vmem:[#allocation11 + $0x11a8] sm:$0xff]  ;;  %v4577_v56 = vld [vmem:[#allocation11 + $0x11c0] sm:$0xff] }
 0x630   : > { %v11051_v59 = vpack.c.bf16 %v4571_v42, %v4568_v18  ;;  %v4597_v46 = vld [vmem:[#allocation11 + $0x1260] sm:$0xff]  ;;  %v4600_v18 = vld [vmem:[#allocation11 + $0x1278] sm:$0xff] }
 0x631   : > { %v14711_v1 = vadd.f32 %v14678_v11, %v9829_v5  ;;  %v11043_v11 = vpack.c.bf16 %v4559_v8, %v4556_v35  ;;  %v11055_v5 = vpack.c.bf16 %v4577_v56, %v4574_v10  ;;  %v4595_v35 = vld [vmem:[#allocation11 + $0x1250] sm:$0xff]  ;;  %v4604_v42 = vld [vmem:[#allocation11 + $0x1298] sm:$0xff]  ;;  %v4557_v56 = vld [vmem:[#allocation11 + $0x1120] sm:$0xff] }
 0x632   : > { %11030 = vmatpush1.bf16.msra.mxu1 %v11029_v16  ;;  %v11053_v16 = vpack.c.bf16 %v4570_v38, %v4567_v61  ;;  %v4603_v61 = vld [vmem:[#allocation11 + $0x1290] sm:$0xff]  ;;  %v4606_v38 = vld [vmem:[#allocation11 + $0x12a8] sm:$0xff] }
 0x633   : > { %11032 = vmatprep.subr.bf16.mxu1 %v11031_v33  ;;  %v4573_v33 = vld [vmem:[#allocation11 + $0x11a0] sm:$0xff]  ;;  %v11077_v10 = vpack.c.bf16 %v4606_v38, %v4603_v61 }
 0x636   : > { %11034 = vmatpush1.bf16.msra.mxu1 %v11033_v60  ;;  %v4579_v60 = vld [vmem:[#allocation11 + $0x11d0] sm:$0xff] }
 0x637   : > { %11036 = vmatprep.subr.bf16.mxu1 %v11035_v17  ;;  %v4582_v17 = vld [vmem:[#allocation11 + $0x11e8] sm:$0xff] }
 0x638   : > { %v11061_v6 = vpack.c.bf16 %v4582_v17, %v4579_v60  ;;  %v4581_v17 = vld [vmem:[#allocation11 + $0x11e0] sm:$0xff] }
 0x63a   : > { %11038 = vmatpush1.bf16.msra.mxu1 %v11037_v43 }
 0x63b   : > { %11040 = vmatprep.subr.bf16.mxu1 %v11039_v19  ;;  %v11063_v19 = vpack.c.bf16 %v4589_v40, %v4586_v2  ;;  %v4584_v2 = vld [vmem:[#allocation11 + $0x11f8] sm:$0xff] }
 0x63c   : > { %v11124_v40 = vpack.c.bf16 %v4584_v2, %v4581_v17  ;;  %v5437_v2 = vld [vmem:[#allocation11 + $0x1830] sm:$0xff] }
 0x63e   : > { %11042 = vmatpush1.bf16.msra.mxu1 %v11041_v50  ;;  %v11065_v50 = vpack.c.bf16 %v4588_v63, %v4585_v20  ;;  %v4596_v20 = vld [vmem:[#allocation11 + $0x1258] sm:$0xff] }
 0x63f   : > { %11044 = vmatprep.subr.bf16.mxu1 %v11043_v11 }
 0x641   : > { %5151 = vmatmul.mubr.f32.vlgmr.msra.gmra.mrb[66].mxu1 %v14350_v30  ;;  %v4576_v30 = vld [vmem:[#allocation11 + $0x11b8] sm:$0xff] }
 0x642   : > { %5156 = vmatprep.mubr.f32.mxu1 %v14354_v41  ;;  %11046 = vmatpush1.bf16.msra.mxu1 %v11045_v52  ;;  %v4583_v41 = vld [vmem:[#allocation11 + $0x11f0] sm:$0xff]  ;;  %v11057_v58 = vpack.c.bf16 %v4576_v30, %v4573_v33  ;;  %v4601_v52 = vld [vmem:[#allocation11 + $0x1280] sm:$0xff]  ;;  %v4566_v30 = vld [vmem:[#allocation11 + $0x1168] sm:$0xff] }
 0x643   : > { %11048 = vmatprep.subr.bf16.mxu1 %v11047_v24  ;;  %v11059_v44 = vpack.c.bf16 %v4583_v41, %v4580_v57  ;;  %v11069_v24 = vpack.c.bf16 %v4594_v26, %v4591_v27  ;;  %v4563_v33 = vld [vmem:[#allocation11 + $0x1150] sm:$0xff]  ;;  %v4569_v41 = vld [vmem:[#allocation11 + $0x1180] sm:$0xff] }
 0x644   : > { %v11115_v57 = vpack.c.bf16 %v4566_v30, %v4563_v33  ;;  %v5432_v33 = vld [vmem:[#allocation11 + $0x1808] sm:$0xff]  ;;  %v5435_v30 = vld [vmem:[#allocation11 + $0x1820] sm:$0xff] }
 0x645   : > { %5157 = vmatmul.mubr.f32.gmra.mrb[68].mxu1 %v14352_v47 }
 0x646   : > { %5162 = vmatprep.mubr.f32.mxu1 %v14369_v12  ;;  %11050 = vmatpush1.bf16.msra.mxu1 %v11049_v4  ;;  %v4607_v4 = vld [vmem:[#allocation11 + $0x12b0] sm:$0xff] }
 0x647   : > { %11052 = vmatprep.subr.bf16.mxu1 %v11051_v59  ;;  %v11073_v59 = vpack.c.bf16 %v4600_v18, %v4597_v46 }
 0x649   : > { %5163 = vmatmul.mubr.f32.gmra.mrb[70].mxu1 %v14364_v3 }
 0x64a   : > { %11054 = vmatpush1.bf16.msra.mxu1 %v11053_v16  ;;  %9638 = vmatprep.mubr.msk.f32.mxu1 %vm3272_vm13, %v14431_v9  ;;  %v4435_v13 = vpop.f32.mrb[48].mxu1  ;;  %v4560_v16 = vld [vmem:[#allocation11 + $0x1138] sm:$0xff] }
 0x64b   : > { %v14721_v47 = vadd.f32 %v14705_v0, %v4435_v13  ;;  %v4437_v12 = vpop.f32.mrb[49].mxu1  ;;  %11056 = vmatprep.subr.bf16.mxu1 %v11055_v5  ;;  %v4592_v0 = vld [vmem:[#allocation11 + $0x1238] sm:$0xff]  ;;  %v11112_v5 = vpack.c.bf16 %v4560_v16, %v4557_v56  ;;  %v5425_v16 = vld [vmem:[#allocation11 + $0x17d0] sm:$0xff] }
 0x64c   : > { %v11067_v14 = vpack.c.bf16 %v4595_v35, %v4592_v0  ;;  %v4572_v13 = vld [vmem:[#allocation11 + $0x1198] sm:$0xff]  ;;  %v4575_v12 = vld [vmem:[#allocation11 + $0x11b0] sm:$0xff]  ;;  %v4602_v0 = vld [vmem:[#allocation11 + $0x1288] sm:$0xff] }
 0x64e   : > { %11058 = vmatpush1.bf16.msra.mxu1 %v11057_v58  ;;  %v4440_v53 = vpop.f32.mrb[50].mxu1  ;;  %v11118_v58 = vpack.c.bf16 %v4572_v13, %v4569_v41  ;;  %v11150_v41 = vpack.c.bf16 %v5435_v30, %v5432_v33  ;;  %v5431_v13 = vld [vmem:[#allocation11 + $0x1800] sm:$0xff]  ;;  %v5477_v33 = vld [vmem:[#allocation11 + $0x1970] sm:$0xff] }
 0x64f   : > { %v14724_v3 = vadd.f32 %v14708_v54, %v4440_v53  ;;  %v4442_v43 = vpop.f32.mrb[51].mxu1  ;;  %11060 = vmatprep.subr.bf16.mxu1 %v11059_v44  ;;  %v4598_v54 = vld [vmem:[#allocation11 + $0x1268] sm:$0xff]  ;;  %v4587_v53 = vld [vmem:[#allocation11 + $0x1210] sm:$0xff] }
 0x650   : > { %v11071_v29 = vpack.c.bf16 %v4601_v52, %v4598_v54  ;;  %v4578_v44 = vld [vmem:[#allocation11 + $0x11c8] sm:$0xff]  ;;  %v5413_v54 = vld [vmem:[#allocation11 + $0x1770] sm:$0xff] }
 0x651   : > { %v11121_v60 = vpack.c.bf16 %v4578_v44, %v4575_v12  ;;  %v5416_v52 = vld [vmem:[#allocation11 + $0x1788] sm:$0xff]  ;;  %v5438_v12 = vld [vmem:[#allocation11 + $0x1838] sm:$0xff]  ;;  %v5441_v44 = vld [vmem:[#allocation11 + $0x1850] sm:$0xff] }
 0x652   : > { %11062 = vmatpush1.bf16.msra.mxu1 %v11061_v6  ;;  %v4445_v8 = vpop.f32.mrb[52].mxu1  ;;  %v4590_v6 = vld [vmem:[#allocation11 + $0x1228] sm:$0xff]  ;;  %v11140_v46 = vpack.c.bf16 %v5416_v52, %v5413_v54  ;;  %v11154_v17 = vpack.c.bf16 %v5441_v44, %v5438_v12  ;;  %v5458_v54 = vld [vmem:[#allocation11 + $0x18d8] sm:$0xff] }
 0x653   : > { %v14727_v11 = vadd.f32 %v14711_v1, %v4445_v8  ;;  %v4447_v22 = vpop.f32.mrb[53].mxu1  ;;  %11064 = vmatprep.subr.bf16.mxu1 %v11063_v19  ;;  %v11075_v1 = vpack.c.bf16 %v4607_v4, %v4604_v42  ;;  %v11127_v43 = vpack.c.bf16 %v4590_v6, %v4587_v53  ;;  %v4593_v19 = vld [vmem:[#allocation11 + $0x1240] sm:$0xff]  ;;  %v5422_v4 = vld [vmem:[#allocation11 + $0x17b8] sm:$0xff]  ;;  %v5444_v53 = vld [vmem:[#allocation11 + $0x1868] sm:$0xff] }
 0x654   : > { %v11130_v63 = vpack.c.bf16 %v4596_v20, %v4593_v19  ;;  %v4605_v8 = vld [vmem:[#allocation11 + $0x12a0] sm:$0xff]  ;;  %v5414_v22 = vld [vmem:[#allocation11 + $0x1778] sm:$0xff]  ;;  %v5480_v44 = vld [vmem:[#allocation11 + $0x1988] sm:$0xff] }
 0x655   : > { %v5419_v42 = vld [vmem:[#allocation11 + $0x17a0] sm:$0xff]  ;;  %v5462_v52 = vld [vmem:[#allocation11 + $0x18f8] sm:$0xff] }
 0x656   : > { %11066 = vmatpush1.bf16.msra.mxu1 %v11065_v50  ;;  %v4608_v50 = vld [vmem:[#allocation11 + $0x12b8] sm:$0xff]  ;;  %v5447_v6 = vld [vmem:[#allocation11 + $0x1880] sm:$0xff] }
 0x657   : > { %11068 = vmatprep.subr.bf16.mxu1 %v11067_v14  ;;  %v5417_v14 = vld [vmem:[#allocation11 + $0x1790] sm:$0xff]  ;;  %v11136_v27 = vpack.c.bf16 %v4608_v50, %v4605_v8  ;;  %v11158_v19 = vpack.c.bf16 %v5447_v6, %v5444_v53  ;;  %v5443_v20 = vld [vmem:[#allocation11 + $0x1860] sm:$0xff]  ;;  %v5452_v8 = vld [vmem:[#allocation11 + $0x18a8] sm:$0xff] }
 0x658   : > { %v11138_v26 = vpack.c.bf16 %v5417_v14, %v5414_v22  ;;  %v5456_v50 = vld [vmem:[#allocation11 + $0x18c8] sm:$0xff]  ;;  %v5459_v22 = vld [vmem:[#allocation11 + $0x18e0] sm:$0xff] }
 0x659   : > { %v5479_v6 = vld [vmem:[#allocation11 + $0x1980] sm:$0xff] }
 0x65a   : > { %11070 = vmatpush1.bf16.msra.mxu1 %v11069_v24  ;;  %v5420_v24 = vld [vmem:[#allocation11 + $0x17a8] sm:$0xff] }
 0x65b   : > { %11072 = vmatprep.subr.bf16.mxu1 %v11071_v29  ;;  %v5423_v29 = vld [vmem:[#allocation11 + $0x17c0] sm:$0xff] }
 0x65c   : > { %v11142_v18 = vpack.c.bf16 %v5423_v29, %v5420_v24  ;;  %v5465_v24 = vld [vmem:[#allocation11 + $0x1910] sm:$0xff] }
 0x65e   : > { %11074 = vmatpush1.bf16.msra.mxu1 %v11073_v59  ;;  %v5426_v59 = vld [vmem:[#allocation11 + $0x17d8] sm:$0xff] }
 0x65f   : > { %11076 = vmatprep.subr.bf16.mxu1 %v11075_v1  ;;  %v5429_v1 = vld [vmem:[#allocation11 + $0x17f0] sm:$0xff] }
 0x660   : > { %v11146_v56 = vpack.c.bf16 %v5429_v1, %v5426_v59  ;;  %v5471_v59 = vld [vmem:[#allocation11 + $0x1940] sm:$0xff] }
 0x662   : > { %11078 = vmatpush1.bf16.msra.mxu1 %v11077_v10  ;;  %v11144_v10 = vpack.c.bf16 %v5422_v4, %v5419_v42  ;;  %v5464_v42 = vld [vmem:[#allocation11 + $0x1908] sm:$0xff] }
 0x663   : > { %11111 = vmatprep.subr.bf16.mxu1 %v15297_v7  ;;  %v5468_v4 = vld [vmem:[#allocation11 + $0x1928] sm:$0xff] }
 0x665   : > { %5234 = vmatmul.mubr.f32.vlgmr.msra.gmra.mrb[66].mxu1 %v14461_v36 }
 0x666   : > { %9639 = vmatprep.mubr.msk.f32.mxu1 %vm3272_vm13, %v14437_v48  ;;  %11113 = vmatpush1.bf16.msra.mxu1 %v11112_v5  ;;  %v5428_v5 = vld [vmem:[#allocation11 + $0x17e8] sm:$0xff] }
 0x667   : > { %11114 = vmatprep.subr.bf16.mxu1 %v15297_v7 }
 0x669   : > { %5240 = vmatmul.mubr.f32.gmra.mrb[68].mxu1 %v14457_v31 }
 0x66a   : > { %9640 = vmatprep.mubr.msk.f32.mxu1 %vm3272_vm13, %v14459_v32  ;;  %11116 = vmatpush1.bf16.msra.mxu1 %v11115_v57 }
 0x66b   : > { %11117 = vmatprep.subr.bf16.mxu1 %v15297_v7 }
 0x66d   : > { %5246 = vmatmul.mubr.f32.gmra.mrb[70].mxu1 %v14466_v28 }
 0x66e   : > { %11119 = vmatpush1.bf16.msra.mxu1 %v11118_v58  ;;  %9641 = vmatprep.mubr.msk.f32.mxu1 %vm3272_vm13, %v14431_v9  ;;  %v4599_v9 = vld [vmem:[#allocation11 + $0x1270] sm:$0xff]  ;;  %v5434_v58 = vld [vmem:[#allocation11 + $0x1818] sm:$0xff] }
 0x66f   : > { %11120 = vmatprep.subr.bf16.mxu1 %v15297_v7  ;;  %v11133_v35 = vpack.c.bf16 %v4602_v0, %v4599_v9  ;;  %v5453_v9 = vld [vmem:[#allocation11 + $0x18b0] sm:$0xff] }
 0x672   : > { %11122 = vmatpush1.bf16.msra.mxu1 %v11121_v60 }
 0x673   : > { %11123 = vmatprep.subr.bf16.mxu1 %v15297_v7 }
 0x676   : > { %11125 = vmatpush1.bf16.msra.mxu1 %v11124_v40  ;;  %v5440_v40 = vld [vmem:[#allocation11 + $0x1848] sm:$0xff] }
 0x677   : > { %11126 = vmatprep.subr.bf16.mxu1 %v15297_v7 }
 0x67a   : > { %11128 = vmatpush1.bf16.msra.mxu1 %v11127_v43  ;;  %v11156_v43 = vpack.c.bf16 %v5440_v40, %v5437_v2 }
 0x67b   : > { %11129 = vmatprep.subr.bf16.mxu1 %v15297_v7 }
 0x67e   : > { %11131 = vmatpush1.bf16.msra.mxu1 %v11130_v63  ;;  %v5450_v63 = vld [vmem:[#allocation11 + $0x1898] sm:$0xff] }
 0x67f   : > { %11132 = vmatprep.subr.bf16.mxu1 %v15297_v7 }
 0x682   : > { %11134 = vmatpush1.bf16.msra.mxu1 %v11133_v35  ;;  %v5449_v35 = vld [vmem:[#allocation11 + $0x1890] sm:$0xff] }
 0x683   : > { %11135 = vmatprep.subr.bf16.mxu1 %v15297_v7  ;;  %v11164_v14 = vpack.c.bf16 %v5452_v8, %v5449_v35  ;;  %v5485_v35 = vld [vmem:[#allocation11 + $0x19b0] sm:$0xff]  ;;  %v5488_v8 = vld [vmem:[#allocation11 + $0x19c8] sm:$0xff] }
 0x686   : > { %11137 = vmatpush1.bf16.msra.mxu1 %v11136_v27  ;;  %v11166_v27 = vpack.c.bf16 %v5459_v22, %v5456_v50  ;;  %v5492_v22 = vld [vmem:[#allocation11 + $0x19e8] sm:$0xff] }
 0x687   : > { %11139 = vmatprep.subr.bf16.mxu1 %v11138_v26  ;;  %v5455_v26 = vld [vmem:[#allocation11 + $0x18c0] sm:$0xff] }
 0x688   : > { %v11168_v29 = vpack.c.bf16 %v5458_v54, %v5455_v26  ;;  %v11188_v26 = vpack.c.bf16 %v5488_v8, %v5485_v35  ;;  %v5528_v35 = vld [vmem:[#allocation11 + $0x1b08] sm:$0xff]  ;;  %v5531_v8 = vld [vmem:[#allocation11 + $0x1b20] sm:$0xff] }
 0x689   : > { %5397 = vmatmul.mubr.f32.vlgmr.msra.gmra.mrb[72].mxu1 %v14461_v36  ;;  %v14748_v61 = vpop.f32.mrb[30].mxu0 }
 0x68a   : > { %9642 = vmatprep.mubr.msk.f32.mxu1 %vm3272_vm13, %v14437_v48  ;;  %11141 = vmatpush1.bf16.msra.mxu1 %v11140_v46  ;;  %v14752_v38 = vpop.f32.mrb[31].mxu0  ;;  %v11148_v48 = vpack.c.bf16 %v5428_v5, %v5425_v16  ;;  %v11170_v46 = vpack.c.bf16 %v5465_v24, %v5462_v52  ;;  %v5470_v16 = vld [vmem:[#allocation11 + $0x1938] sm:$0xff]  ;;  %v5491_v52 = vld [vmem:[#allocation11 + $0x19e0] sm:$0xff] }
 0x68b   : > { %11143 = vmatprep.subr.bf16.mxu1 %v11142_v18  ;;  %v5461_v18 = vld [vmem:[#allocation11 + $0x18f0] sm:$0xff]  ;;  %v5474_v5 = vld [vmem:[#allocation11 + $0x1958] sm:$0xff] }
 0x68c   : > { %v11172_v1 = vpack.c.bf16 %v5464_v42, %v5461_v18  ;;  %v5494_v24 = vld [vmem:[#allocation11 + $0x19f8] sm:$0xff] }
 0x68d   : > { %5402 = vmatmul.mubr.f32.gmra.mrb[74].mxu1 %v14457_v31  ;;  %v14755_v57 = vpop.f32.mrb[32].mxu0  ;;  %v11192_v18 = vpack.c.bf16 %v5494_v24, %v5491_v52  ;;  %v5534_v24 = vld [vmem:[#allocation11 + $0x1b38] sm:$0xff] }
 0x68e   : > { %9643 = vmatprep.mubr.msk.f32.mxu1 %vm3272_vm13, %v14459_v32  ;;  %11145 = vmatpush1.bf16.msra.mxu1 %v11144_v10  ;;  %v14759_v36 = vpop.f32.mrb[33].mxu0  ;;  %v11152_v32 = vpack.c.bf16 %v5434_v58, %v5431_v13  ;;  %v11174_v10 = vpack.c.bf16 %v5471_v59, %v5468_v4  ;;  %v5473_v13 = vld [vmem:[#allocation11 + $0x1950] sm:$0xff]  ;;  %v5476_v58 = vld [vmem:[#allocation11 + $0x1968] sm:$0xff] }
 0x68f   : > { %11147 = vmatprep.subr.bf16.mxu1 %v11146_v56  ;;  %v5467_v56 = vld [vmem:[#allocation11 + $0x1920] sm:$0xff]  ;;  %v11180_v2 = vpack.c.bf16 %v5476_v58, %v5473_v13  ;;  %v5497_v4 = vld [vmem:[#allocation11 + $0x1a10] sm:$0xff]  ;;  %v5500_v59 = vld [vmem:[#allocation11 + $0x1a28] sm:$0xff] }
 0x690   : > { %v11176_v30 = vpack.c.bf16 %v5470_v16, %v5467_v56  ;;  %v11196_v56 = vpack.c.bf16 %v5500_v59, %v5497_v4  ;;  %v5509_v58 = vld [vmem:[#allocation11 + $0x1a70] sm:$0xff]  ;;  %v5536_v59 = vld [vmem:[#allocation11 + $0x1b48] sm:$0xff] }
 0x691   : > { %5407 = vmatmul.mubr.f32.gmra.mrb[76].mxu1 %v14466_v28  ;;  %v14762_v60 = vpop.f32.mrb[34].mxu0  ;;  %v5446_v28 = vld [vmem:[#allocation11 + $0x1878] sm:$0xff]  ;;  %v5533_v4 = vld [vmem:[#allocation11 + $0x1b30] sm:$0xff] }
 0x692   : > { %11149 = vmatpush1.bf16.msra.mxu1 %v11148_v48  ;;  %5627 = vmatprep.mubr.f32.mxu1 %v14539_v25  ;;  %v14765_v31 = vpop.f32.mrb[35].mxu0  ;;  %v11160_v0 = vpack.c.bf16 %v5446_v28, %v5443_v20  ;;  %v11162_v25 = vpack.c.bf16 %v5453_v9, %v5450_v63  ;;  %v5486_v20 = vld [vmem:[#allocation11 + $0x19b8] sm:$0xff]  ;;  %v5489_v28 = vld [vmem:[#allocation11 + $0x19d0] sm:$0xff] }
 0x693   : > { %11151 = vmatprep.subr.bf16.mxu1 %v11150_v41  ;;  %v11178_v41 = vpack.c.bf16 %v5477_v33, %v5474_v5  ;;  %v5503_v5 = vld [vmem:[#allocation11 + $0x1a40] sm:$0xff]  ;;  %v5506_v33 = vld [vmem:[#allocation11 + $0x1a58] sm:$0xff] }
 0x696   : > { %11153 = vmatpush1.bf16.msra.mxu1 %v11152_v32  ;;  %v5483_v32 = vld [vmem:[#allocation11 + $0x19a0] sm:$0xff] }
 0x697   : > { %11155 = vmatprep.subr.bf16.mxu1 %v11154_v17  ;;  %v11182_v53 = vpack.c.bf16 %v5483_v32, %v5480_v44  ;;  %v5516_v44 = vld [vmem:[#allocation11 + $0x1aa8] sm:$0xff]  ;;  %v5519_v32 = vld [vmem:[#allocation11 + $0x1ac0] sm:$0xff] }
 0x69a   : > { %11157 = vmatpush1.bf16.msra.mxu1 %v11156_v43  ;;  %v5482_v43 = vld [vmem:[#allocation11 + $0x1998] sm:$0xff] }
 0x69b   : > { %11159 = vmatprep.subr.bf16.mxu1 %v11158_v19  ;;  %v11184_v9 = vpack.c.bf16 %v5482_v43, %v5479_v6  ;;  %v5518_v6 = vld [vmem:[#allocation11 + $0x1ab8] sm:$0xff] }
 0x69c   : > { %v5522_v43 = vld [vmem:[#allocation11 + $0x1ad8] sm:$0xff] }
 0x69e   : > { %11161 = vmatpush1.bf16.msra.mxu1 %v11160_v0 }
 0x69f   : > { %11163 = vmatprep.subr.bf16.mxu1 %v11162_v25  ;;  %v11186_v25 = vpack.c.bf16 %v5489_v28, %v5486_v20 }
 0x6a2   : > { %11165 = vmatpush1.bf16.msra.mxu1 %v11164_v14  ;;  %v5495_v14 = vld [vmem:[#allocation11 + $0x1a00] sm:$0xff] }
 0x6a3   : > { %11167 = vmatprep.subr.bf16.mxu1 %v11166_v27  ;;  %v11190_v54 = vpack.c.bf16 %v5495_v14, %v5492_v22 }
 0x6a6   : > { %11169 = vmatpush1.bf16.msra.mxu1 %v11168_v29  ;;  %v5498_v29 = vld [vmem:[#allocation11 + $0x1a18] sm:$0xff] }
 0x6a7   : > { %11171 = vmatprep.subr.bf16.mxu1 %v11170_v46  ;;  %v5501_v46 = vld [vmem:[#allocation11 + $0x1a30] sm:$0xff] }
 0x6a8   : > { %v11194_v42 = vpack.c.bf16 %v5501_v46, %v5498_v29  ;;  %v5537_v29 = vld [vmem:[#allocation11 + $0x1b50] sm:$0xff] }
 0x6aa   : > { %11173 = vmatpush1.bf16.msra.mxu1 %v11172_v1  ;;  %v5504_v1 = vld [vmem:[#allocation11 + $0x1a48] sm:$0xff] }
 0x6ab   : > { %v9862_v48 = vpop.f32.mrb[36].mxu0  ;;  %11175 = vmatprep.subr.bf16.mxu1 %v11174_v10  ;;  %v5507_v10 = vld [vmem:[#allocation11 + $0x1a60] sm:$0xff] }
 0x6ac   : > { %v9863_v12 = vpop.f32.mrb[37].mxu0  ;;  %v11198_v16 = vpack.c.bf16 %v5507_v10, %v5504_v1  ;;  %v5540_v10 = vld [vmem:[#allocation11 + $0x1b68] sm:$0xff] }
 0x6ad   : > { %v14767_v17 = vadd.f32 %v9863_v12, %v9862_v48  ;;  %v5513_v48 = vld [vmem:[#allocation11 + $0x1a90] sm:$0xff]  ;;  %v5512_v12 = vld [vmem:[#allocation11 + $0x1a88] sm:$0xff] }
 0x6ae   : > { %11177 = vmatpush1.bf16.msra.mxu1 %v11176_v30  ;;  %v5510_v30 = vld [vmem:[#allocation11 + $0x1a78] sm:$0xff] }
 0x6af   : > { %v9865_v40 = vpop.f32.mrb[38].mxu0  ;;  %11179 = vmatprep.subr.bf16.mxu1 %v11178_v41  ;;  %v11200_v41 = vpack.c.bf16 %v5506_v33, %v5503_v5  ;;  %v11202_v13 = vpack.c.bf16 %v5513_v48, %v5510_v30  ;;  %v5539_v30 = vld [vmem:[#allocation11 + $0x1b60] sm:$0xff]  ;;  %v5542_v48 = vld [vmem:[#allocation11 + $0x1b78] sm:$0xff] }
 0x6b0   : > { %v9866_v19 = vpop.f32.mrb[39].mxu0 }
 0x6b1   : > { %v14769_v63 = vadd.f32 %v9866_v19, %v9865_v40  ;;  %v11206_v40 = vpack.c.bf16 %v5519_v32, %v5516_v44  ;;  %v5525_v19 = vld [vmem:[#allocation11 + $0x1af0] sm:$0xff]  ;;  %v5548_v32 = vld [vmem:[#allocation11 + $0x1ba8] sm:$0xff] }
 0x6b2   : > { %11181 = vmatpush1.bf16.msra.mxu1 %v11180_v2  ;;  %v11204_v2 = vpack.c.bf16 %v5512_v12, %v5509_v58  ;;  %v11210_v28 = vpack.c.bf16 %v5525_v19, %v5522_v43  ;;  %v5549_v58 = vld [vmem:[#allocation11 + $0x1bb0] sm:$0xff]  ;;  %v11224_v12 = vpack.c.bf16 %v5542_v48, %v5539_v30  ;;  %v5551_v43 = vld [vmem:[#allocation11 + $0x1bc0] sm:$0xff]  ;;  %v5554_v19 = vld [vmem:[#allocation11 + $0x1bd8] sm:$0xff] }
 0x6b3   : > { %v9868_v0 = vpop.f32.mrb[40].mxu0  ;;  %11183 = vmatprep.subr.bf16.mxu1 %v11182_v53  ;;  %v5515_v53 = vld [vmem:[#allocation11 + $0x1aa0] sm:$0xff]  ;;  %v5545_v44 = vld [vmem:[#allocation11 + $0x1b90] sm:$0xff]  ;;  %v5538_v30 = vld [vmem:[#allocation11 + $0x1b58] sm:$0xff] }
 0x6b4   : > { %v9869_v50 = vpop.f32.mrb[41].mxu0  ;;  %v11208_v20 = vpack.c.bf16 %v5518_v6, %v5515_v53  ;;  %v11228_v53 = vpack.c.bf16 %v5548_v32, %v5545_v44  ;;  %v5553_v32 = vld [vmem:[#allocation11 + $0x1bd0] sm:$0xff] }
 0x6b5   : > { %v14771_v27 = vadd.f32 %v9869_v50, %v9868_v0  ;;  %v5524_v0 = vld [vmem:[#allocation11 + $0x1ae8] sm:$0xff] }
 0x6b6   : > { %11185 = vmatpush1.bf16.msra.mxu1 %v11184_v9  ;;  %v5521_v9 = vld [vmem:[#allocation11 + $0x1ad0] sm:$0xff] }
 0x6b7   : > { %11187 = vmatprep.subr.bf16.mxu1 %v11186_v25  ;;  %v11212_v14 = vpack.c.bf16 %v5524_v0, %v5521_v9  ;;  %v5557_v0 = vld [vmem:[#allocation11 + $0x1bf0] sm:$0xff] }
 0x6ba   : > { %11189 = vmatpush1.bf16.msra.mxu1 %v11188_v26  ;;  %v5530_v26 = vld [vmem:[#allocation11 + $0x1b18] sm:$0xff] }
 0x6bb   : > { %11191 = vmatprep.subr.bf16.mxu1 %v11190_v54 }
 0x6be   : > { %11193 = vmatpush1.bf16.msra.mxu1 %v11192_v18 }
 0x6bf   : > { %11195 = vmatprep.subr.bf16.mxu1 %v11194_v42  ;;  %v11218_v42 = vpack.c.bf16 %v5537_v29, %v5534_v24  ;;  %v5523_v29 = vld [vmem:[#allocation11 + $0x1ae0] sm:$0xff] }
 0x6c2   : > { %11197 = vmatpush1.bf16.msra.mxu1 %v11196_v56  ;;  %v5543_v56 = vld [vmem:[#allocation11 + $0x1b80] sm:$0xff] }
 0x6c3   : > { %11199 = vmatprep.subr.bf16.mxu1 %v11198_v16  ;;  %v11222_v33 = vpack.c.bf16 %v5543_v56, %v5540_v10  ;;  %v5532_v10 = vld [vmem:[#allocation11 + $0x1b28] sm:$0xff] }
 0x6c6   : > { %11201 = vmatpush1.bf16.msra.mxu1 %v11200_v41 }
 0x6c7   : > { %11203 = vmatprep.subr.bf16.mxu1 %v11202_v13  ;;  %v5546_v13 = vld [vmem:[#allocation11 + $0x1b98] sm:$0xff] }
 0x6c9   : > { %5628 = vmatmul.mubr.f32.vlgmr.msra.gmra.mrb[66].mxu1 %v14550_v34  ;;  %v11214_v34 = vpack.c.bf16 %v5531_v8, %v5528_v35  ;;  %v5511_v8 = vld [vmem:[#allocation11 + $0x1a80] sm:$0xff] }
 0x6ca   : > { %5633 = vmatprep.mubr.f32.mxu1 %v14562_v49  ;;  %11205 = vmatpush1.bf16.msra.mxu1 %v11204_v2  ;;  %v5527_v49 = vld [vmem:[#allocation11 + $0x1b00] sm:$0xff]  ;;  %v5552_v2 = vld [vmem:[#allocation11 + $0x1bc8] sm:$0xff] }
 0x6cb   : > { %11207 = vmatprep.subr.bf16.mxu1 %v11206_v40  ;;  %v5555_v40 = vld [vmem:[#allocation11 + $0x1be0] sm:$0xff] }
 0x6cc   : > { %v9903_v25 = vpop.f32.mrb[42].mxu0  ;;  %v11230_v6 = vpack.c.bf16 %v5555_v40, %v5552_v2  ;;  %v5556_v2 = vld [vmem:[#allocation11 + $0x1be8] sm:$0xff]  ;;  %v5559_v40 = vld [vmem:[#allocation11 + $0x1c00] sm:$0xff] }
 0x6cd   : > { %v9904_v50 = vpop.f32.mrb[43].mxu0  ;;  %5634 = vmatmul.mubr.f32.gmra.mrb[68].mxu1 %v14568_v51  ;;  %v15299_v51 = vld [vmem:[#allocation55_spill] sm:$0xff] }
 0x6ce   : > { %v9905_v22 = vadd.f32 %v9904_v50, %v9903_v25  ;;  %5639 = vmatprep.mubr.f32.mxu1 %v14544_v55  ;;  %11209 = vmatpush1.bf16.msra.mxu1 %v11208_v20  ;;  %v11216_v55 = vpack.c.bf16 %v5530_v26, %v5527_v49  ;;  %v5558_v20 = vld [vmem:[#allocation11 + $0x1bf8] sm:$0xff]  ;;  %v5560_v25 = vld [vmem:[#allocation11 + $0x1c08] sm:$0xff] }
 0x6cf   : > { %11211 = vmatprep.subr.bf16.mxu1 %v11210_v28  ;;  %v5561_v28 = vld [vmem:[#allocation11 + $0x1c10] sm:$0xff]  ;;  %v11236_v35 = vpack.c.bf16 %v5560_v25, %v5557_v0  ;;  %v5514_v50 = vld [vmem:[#allocation11 + $0x1a98] sm:$0xff] }
 0x6d0   : > { %v14778_v54 = vadd.f32 %v9905_v22, %v14767_v17  ;;  %v9906_v52 = vpop.f32.mrb[44].mxu0  ;;  %v11234_v9 = vpack.c.bf16 %v5561_v28, %v5558_v20  ;;  %v11271_v22 = vpack.c.bf16 %v5514_v50, %v5511_v8  ;;  %v7160_v28 = vld [vmem:[#allocation15 + $0xb40] sm:$0xff]  ;;  %v7165_v0 = vld [vmem:[#allocation15 + $0xb68] sm:$0xff]  ;;  %v7167_v25 = vld [vmem:[#allocation15 + $0xb78] sm:$0xff] }
 0x6d1   : > { %v9907_v46 = vpop.f32.mrb[45].mxu0  ;;  %5640 = vmatmul.mubr.f32.gmra.mrb[70].mxu1 %v14553_v39  ;;  %v11220_v39 = vpack.c.bf16 %v5536_v59, %v5533_v4  ;;  %v7169_v8 = vld [vmem:[#allocation15 + $0xb88] sm:$0xff]  ;;  %v7171_v50 = vld [vmem:[#allocation15 + $0xb98] sm:$0xff] }
 0x6d2   : > { %v9908_v18 = vadd.f32 %v9907_v46, %v9906_v52  ;;  %11213 = vmatpush1.bf16.msra.mxu1 %v11212_v14  ;;  %9644 = vmatprep.mubr.msk.f32.mxu1 %vm3272_vm13, %v15299_v51  ;;  %v5517_v14 = vld [vmem:[#allocation11 + $0x1ab0] sm:$0xff]  ;;  %v5526_v46 = vld [vmem:[#allocation11 + $0x1af8] sm:$0xff] }
 0x6d3   : > { %11215 = vmatprep.subr.bf16.mxu1 %v11214_v34  ;;  %v5520_v34 = vld [vmem:[#allocation11 + $0x1ac8] sm:$0xff]  ;;  %v11277_v59 = vpack.c.bf16 %v5526_v46, %v5523_v29 }
 0x6d4   : > { %v14784_v1 = vadd.f32 %v9908_v18, %v14769_v63  ;;  %v9909_v17 = vpop.f32.mrb[46].mxu0  ;;  %v11226_v63 = vpack.c.bf16 %v5549_v58, %v5546_v13  ;;  %v11274_v24 = vpack.c.bf16 %v5520_v34, %v5517_v14  ;;  %v5544_v58 = vld [vmem:[#allocation11 + $0x1b88] sm:$0xff] }
 0x6d5   : > { %v9910_v16 = vpop.f32.mrb[47].mxu0  ;;  %v7173_v34 = vld [vmem:[#allocation15 + $0xba8] sm:$0xff] }
 0x6d6   : > { %v9911_v5 = vadd.f32 %v9910_v16, %v9909_v17  ;;  %11217 = vmatpush1.bf16.msra.mxu1 %v11216_v55  ;;  %v5529_v17 = vld [vmem:[#allocation11 + $0x1b10] sm:$0xff] }
 0x6d7   : > { %11219 = vmatprep.subr.bf16.mxu1 %v11218_v42  ;;  %v7177_v46 = vld [vmem:[#allocation15 + $0xbc8] sm:$0xff] }
 0x6d8   : > { %v14787_v41 = vadd.f32 %v9911_v5, %v14771_v27  ;;  %v11232_v27 = vpack.c.bf16 %v5554_v19, %v5551_v43  ;;  %v7161_v43 = vld [vmem:[#allocation15 + $0xb48] sm:$0xff]  ;;  %v7163_v19 = vld [vmem:[#allocation15 + $0xb58] sm:$0xff] }
 0x6d9   : > { %v11577_v20 = vpack.c.bf16 %v7163_v19, %v7161_v43  ;;  %v7192_v19 = vld [vmem:[#allocation15 + $0xc40] sm:$0xff] }
 0x6da   : > { %11221 = vmatpush1.bf16.msra.mxu1 %v11220_v39  ;;  %v11280_v39 = vpack.c.bf16 %v5532_v10, %v5529_v17  ;;  %v7181_v10 = vld [vmem:[#allocation15 + $0xbe8] sm:$0xff] }
 0x6db   : > { %11223 = vmatprep.subr.bf16.mxu1 %v11222_v33  ;;  %v5535_v33 = vld [vmem:[#allocation11 + $0x1b40] sm:$0xff] }
 0x6dc   : > { %v11283_v13 = vpack.c.bf16 %v5538_v30, %v5535_v33  ;;  %v7185_v30 = vld [vmem:[#allocation15 + $0xc08] sm:$0xff] }
 0x6de   : > { %11225 = vmatpush1.bf16.msra.mxu1 %v11224_v12 }
 0x6df   : > { %11227 = vmatprep.subr.bf16.mxu1 %v11226_v63  ;;  %v5547_v63 = vld [vmem:[#allocation11 + $0x1ba0] sm:$0xff] }
 0x6e2   : > { %11229 = vmatpush1.bf16.msra.mxu1 %v11228_v53  ;;  %v5562_v53 = vld [vmem:[#allocation11 + $0x1c18] sm:$0xff] }
 0x6e3   : > { %11231 = vmatprep.subr.bf16.mxu1 %v11230_v6  ;;  %v11295_v6 = vpack.c.bf16 %v5562_v53, %v5559_v40  ;;  %v7193_v53 = vld [vmem:[#allocation15 + $0xc48] sm:$0xff] }
 0x6e6   : > { %11233 = vmatpush1.bf16.msra.mxu1 %v11232_v27  ;;  %v7162_v27 = vld [vmem:[#allocation15 + $0xb50] sm:$0xff] }
 0x6e7   : > { %11235 = vmatprep.subr.bf16.mxu1 %v11234_v9  ;;  %v11579_v9 = vpack.c.bf16 %v7162_v27, %v7160_v28 }
 0x6ea   : > { %11237 = vmatpush1.bf16.msra.mxu1 %v11236_v35  ;;  %v7164_v35 = vld [vmem:[#allocation15 + $0xb60] sm:$0xff] }
 0x6eb   : > { %11270 = vmatprep.subr.bf16.mxu1 %v15297_v7 }
 0x6ec   : > { %v9944_v49 = vpop.f32.mrb[48].mxu0 }
 0x6ed   : > { %5711 = vmatmul.mubr.f32.vlgmr.msra.gmra.mrb[66].mxu1 %v14600_v45  ;;  %v9945_v26 = vpop.f32.mrb[49].mxu0 }
 0x6ee   : > { %v9946_v52 = vadd.f32 %v9945_v26, %v9944_v49  ;;  %9645 = vmatprep.mubr.msk.f32.mxu1 %vm3272_vm13, %v14610_v23  ;;  %11272 = vmatpush1.bf16.msra.mxu1 %v11271_v22  ;;  %v7170_v22 = vld [vmem:[#allocation15 + $0xb90] sm:$0xff]  ;;  %v7175_v49 = vld [vmem:[#allocation15 + $0xbb8] sm:$0xff] }
 0x6ef   : > { %11273 = vmatprep.subr.bf16.mxu1 %v15297_v7  ;;  %v11589_v26 = vpack.c.bf16 %v7175_v49, %v7173_v34 }
 0x6f0   : > { %v9947_v18 = vpop.f32.mrb[50].mxu0  ;;  %v14795_v55 = vadd.f32 %v14778_v54, %v9946_v52  ;;  %v7172_v52 = vld [vmem:[#allocation15 + $0xba0] sm:$0xff] }
 0x6f1   : > { %5717 = vmatmul.mubr.f32.gmra.mrb[68].mxu1 %v14616_v21  ;;  %v9948_v42 = vpop.f32.mrb[51].mxu0 }
 0x6f2   : > { %v9949_v4 = vadd.f32 %v9948_v42, %v9947_v18  ;;  %9646 = vmatprep.mubr.msk.f32.mxu1 %vm3272_vm13, %v14596_v62  ;;  %11275 = vmatpush1.bf16.msra.mxu1 %v11274_v24  ;;  %v7174_v24 = vld [vmem:[#allocation15 + $0xbb0] sm:$0xff]  ;;  %v7179_v18 = vld [vmem:[#allocation15 + $0xbd8] sm:$0xff] }
 0x6f3   : > { %11276 = vmatprep.subr.bf16.mxu1 %v15297_v7  ;;  %v11591_v29 = vpack.c.bf16 %v7174_v24, %v7172_v52  ;;  %v11593_v42 = vpack.c.bf16 %v7179_v18, %v7177_v46 }
 0x6f4   : > { %v9950_v56 = vpop.f32.mrb[52].mxu0  ;;  %v14802_v16 = vadd.f32 %v14784_v1, %v9949_v4  ;;  %v5541_v1 = vld [vmem:[#allocation11 + $0x1b70] sm:$0xff]  ;;  %v7176_v4 = vld [vmem:[#allocation15 + $0xbc0] sm:$0xff] }
 0x6f5   : > { %5723 = vmatmul.mubr.f32.gmra.mrb[70].mxu1 %v14603_v15  ;;  %v9951_v54 = vpop.f32.mrb[53].mxu0  ;;  %v11286_v12 = vpack.c.bf16 %v5544_v58, %v5541_v1  ;;  %v7184_v58 = vld [vmem:[#allocation15 + $0xc00] sm:$0xff] }
 0x6f6   : > { %v9952_v5 = vadd.f32 %v9951_v54, %v9950_v56  ;;  %11278 = vmatpush1.bf16.msra.mxu1 %v11277_v59  ;;  %9647 = vmatprep.mubr.msk.f32.mxu1 %vm3272_vm13, %v15299_v51  ;;  %v5550_v51 = vld [vmem:[#allocation11 + $0x1bb8] sm:$0xff] }
 0x6f7   : > { %11279 = vmatprep.subr.bf16.mxu1 %v15297_v7  ;;  %v11289_v44 = vpack.c.bf16 %v5550_v51, %v5547_v63  ;;  %v7178_v59 = vld [vmem:[#allocation15 + $0xbd0] sm:$0xff]  ;;  %v7183_v56 = vld [vmem:[#allocation15 + $0xbf8] sm:$0xff]  ;;  %v7189_v51 = vld [vmem:[#allocation15 + $0xc28] sm:$0xff] }
 0x6f8   : > { %v14809_v48 = vadd.f32 %v14787_v41, %v9952_v5  ;;  %v11292_v41 = vpack.c.bf16 %v5556_v2, %v5553_v32  ;;  %v11595_v17 = vpack.c.bf16 %v7178_v59, %v7176_v4  ;;  %v11597_v54 = vpack.c.bf16 %v7183_v56, %v7181_v10  ;;  %v7180_v5 = vld [vmem:[#allocation15 + $0xbe0] sm:$0xff]  ;;  %v6381_v59 = vld [vmem:[#allocation15 + $0x2f8] sm:$0xff] }
 0x6f9   : > { %v7188_v2 = vld [vmem:[#allocation15 + $0xc20] sm:$0xff] }
 0x6fa   : > { %11281 = vmatpush1.bf16.msra.mxu1 %v11280_v39  ;;  %v7182_v39 = vld [vmem:[#allocation15 + $0xbf0] sm:$0xff]  ;;  %v6378_v4 = vld [vmem:[#allocation15 + $0x2e0] sm:$0xff] }
 0x6fb   : > { %11282 = vmatprep.subr.bf16.mxu1 %v15297_v7  ;;  %v11599_v33 = vpack.c.bf16 %v7182_v39, %v7180_v5  ;;  %v6382_v5 = vld [vmem:[#allocation15 + $0x300] sm:$0xff]  ;;  %v6385_v39 = vld [vmem:[#allocation15 + $0x318] sm:$0xff] }
 0x6fe   : > { %11284 = vmatpush1.bf16.msra.mxu1 %v11283_v13  ;;  %v7187_v13 = vld [vmem:[#allocation15 + $0xc18] sm:$0xff] }
 0x6ff   : > { %11285 = vmatprep.subr.bf16.mxu1 %v15297_v7  ;;  %v11601_v1 = vpack.c.bf16 %v7187_v13, %v7185_v30 }
 0x702   : > { %11287 = vmatpush1.bf16.msra.mxu1 %v11286_v12  ;;  %v7186_v12 = vld [vmem:[#allocation15 + $0xc10] sm:$0xff] }
 0x703   : > { %11288 = vmatprep.subr.bf16.mxu1 %v15297_v7  ;;  %v11603_v63 = vpack.c.bf16 %v7186_v12, %v7184_v58  ;;  %v6386_v58 = vld [vmem:[#allocation15 + $0x320] sm:$0xff]  ;;  %v6389_v12 = vld [vmem:[#allocation15 + $0x338] sm:$0xff] }
 0x706   : > { %11290 = vmatpush1.bf16.msra.mxu1 %v11289_v44  ;;  %v7191_v44 = vld [vmem:[#allocation15 + $0xc38] sm:$0xff] }
 0x707   : > { %11291 = vmatprep.subr.bf16.mxu1 %v15297_v7  ;;  %v11605_v32 = vpack.c.bf16 %v7191_v44, %v7189_v51 }
 0x70a   : > { %11293 = vmatpush1.bf16.msra.mxu1 %v11292_v41  ;;  %v7190_v41 = vld [vmem:[#allocation15 + $0xc30] sm:$0xff] }
 0x70b   : > { %11294 = vmatprep.subr.bf16.mxu1 %v15297_v7  ;;  %v11607_v40 = vpack.c.bf16 %v7190_v41, %v7188_v2  ;;  %v6390_v2 = vld [vmem:[#allocation15 + $0x340] sm:$0xff]  ;;  %v6393_v41 = vld [vmem:[#allocation15 + $0x358] sm:$0xff] }
 0x70e   : > { %11296 = vmatpush1.bf16.msra.mxu1 %v11295_v6  ;;  %v7195_v6 = vld [vmem:[#allocation15 + $0xc58] sm:$0xff] }
 0x70f   : > { %11578 = vmatprep.subr.bf16.mxu1 %v11577_v20  ;;  %v11609_v43 = vpack.c.bf16 %v7195_v6, %v7193_v53  ;;  %v7194_v20 = vld [vmem:[#allocation15 + $0xc50] sm:$0xff] }
 0x710   : > { %v11611_v28 = vpack.c.bf16 %v7194_v20, %v7192_v19  ;;  %v6394_v19 = vld [vmem:[#allocation15 + $0x360] sm:$0xff]  ;;  %v6397_v20 = vld [vmem:[#allocation15 + $0x378] sm:$0xff] }
 0x711   : > { %5874 = vmatmul.mubr.f32.vlgmr.msra.gmra.mrb[72].mxu1 %v14600_v45  ;;  %v11581_v45 = vpack.c.bf16 %v7167_v25, %v7165_v0 }
 0x712   : > { %9648 = vmatprep.mubr.msk.f32.mxu1 %vm3272_vm13, %v14610_v23  ;;  %11580 = vmatpush1.bf16.msra.mxu1 %v11579_v9  ;;  %v7166_v23 = vld [vmem:[#allocation15 + $0xb70] sm:$0xff] }
 0x713   : > { %11582 = vmatprep.subr.bf16.mxu1 %v11581_v45 }
 0x715   : > { %5879 = vmatmul.mubr.f32.gmra.mrb[74].mxu1 %v14616_v21  ;;  %v11583_v21 = vpack.c.bf16 %v7166_v23, %v7164_v35 }
 0x716   : > { %9649 = vmatprep.mubr.msk.f32.mxu1 %vm3272_vm13, %v14596_v62  ;;  %v11585_v62 = vpack.c.bf16 %v7171_v50, %v7169_v8  ;;  %vm7812_vm13 = vcmask 72704  }
 0x717   : > { %11584 = vmatpush1.bf16.msra.mxu1 %v11583_v21 }
 0x718   : > { %11586 = vmatprep.subr.bf16.mxu1 %v11585_v62 }
 0x719   : > { %5884 = vmatmul.mubr.f32.gmra.mrb[76].mxu1 %v14603_v15  ;;  %v7168_v15 = vld [vmem:[#allocation15 + $0xb80] sm:$0xff] }
 0x71a   : > { %v11587_v14 = vpack.c.bf16 %v7170_v22, %v7168_v15 }
 0x71c   : > { %11588 = vmatpush1.bf16.msra.mxu1 %v11587_v14 }
 0x71d   : > { %11590 = vmatprep.subr.bf16.mxu1 %v11589_v26 }
 0x720   : > { %11592 = vmatpush1.bf16.msra.mxu1 %v11591_v29 }
 0x721   : > { %11594 = vmatprep.subr.bf16.mxu1 %v11593_v42 }
 0x724   : > { %11596 = vmatpush1.bf16.msra.mxu1 %v11595_v17  ;;  %v6383_v17 = vld [vmem:[#allocation15 + $0x308] sm:$0xff] }
 0x725   : > { %11598 = vmatprep.subr.bf16.mxu1 %v11597_v54  ;;  %v11317_v56 = vpack.c.bf16 %v6383_v17, %v6381_v59  ;;  %v6380_v54 = vld [vmem:[#allocation15 + $0x2f0] sm:$0xff]  ;;  %v6419_v59 = vld [vmem:[#allocation15 + $0x428] sm:$0xff] }
 0x726   : > { %v11319_v30 = vpack.c.bf16 %v6382_v5, %v6380_v54  ;;  %v7201_v17 = vld [vmem:[#allocation15 + $0xc88] sm:$0xff]  ;;  %v6416_v54 = vld [vmem:[#allocation15 + $0x410] sm:$0xff]  ;;  %v6418_v5 = vld [vmem:[#allocation15 + $0x420] sm:$0xff] }
 0x728   : > { %11600 = vmatpush1.bf16.msra.mxu1 %v11599_v33  ;;  %v6387_v33 = vld [vmem:[#allocation15 + $0x328] sm:$0xff] }
 0x729   : > { %11602 = vmatprep.subr.bf16.mxu1 %v11601_v1  ;;  %v11321_v13 = vpack.c.bf16 %v6387_v33, %v6385_v39  ;;  %v6384_v1 = vld [vmem:[#allocation15 + $0x310] sm:$0xff]  ;;  %v11355_v33 = vpack.c.bf16 %v6418_v5, %v6416_v54 }
 0x72a   : > { %v11323_v51 = vpack.c.bf16 %v6386_v58, %v6384_v1  ;;  %v6421_v58 = vld [vmem:[#allocation15 + $0x438] sm:$0xff] }
 0x72c   : > { %11604 = vmatpush1.bf16.msra.mxu1 %v11603_v63  ;;  %v6391_v63 = vld [vmem:[#allocation15 + $0x348] sm:$0xff] }
 0x72d   : > { %11606 = vmatprep.subr.bf16.mxu1 %v11605_v32  ;;  %v11325_v44 = vpack.c.bf16 %v6391_v63, %v6389_v12  ;;  %v6388_v32 = vld [vmem:[#allocation15 + $0x330] sm:$0xff]  ;;  %v6423_v12 = vld [vmem:[#allocation15 + $0x448] sm:$0xff] }
 0x72e   : > { %v11327_v53 = vpack.c.bf16 %v6390_v2, %v6388_v32  ;;  %v7205_v63 = vld [vmem:[#allocation15 + $0xca8] sm:$0xff]  ;;  %v6420_v32 = vld [vmem:[#allocation15 + $0x430] sm:$0xff]  ;;  %v6422_v2 = vld [vmem:[#allocation15 + $0x440] sm:$0xff] }
 0x730   : > { %11608 = vmatpush1.bf16.msra.mxu1 %v11607_v40  ;;  %v6395_v40 = vld [vmem:[#allocation15 + $0x368] sm:$0xff] }
 0x731   : > { %11610 = vmatprep.subr.bf16.mxu1 %v11609_v43  ;;  %v11329_v6 = vpack.c.bf16 %v6395_v40, %v6393_v41  ;;  %v6392_v43 = vld [vmem:[#allocation15 + $0x350] sm:$0xff]  ;;  %v11359_v40 = vpack.c.bf16 %v6422_v2, %v6420_v32 }
 0x734   : > { %11612 = vmatpush1.bf16.msra.mxu1 %v11611_v28  ;;  %v6399_v28 = vld [vmem:[#allocation15 + $0x388] sm:$0xff] }
 0x7c0   : > { %v5712_v27 = vpop.f32.mrb[66].mxu1 }
 0x7c1   : > { %v5898_v9 = vmax.f32 %v14748_v61, %v5712_v27  ;;  %v5714_v0 = vpop.f32.mrb[67].mxu1  ;;  %v5907_v61 = vld [vmem:[#allocation12] sm:$0xff]  ;;  %v11331_v27 = vpack.c.bf16 %v6394_v19, %v6392_v43 }
 0x7c2   : > { %v5899_v25 = vmax.f32 %v14752_v38, %v5714_v0  ;;  %v5908_v38 = vld [vmem:[#allocation12 + $0x8] sm:$0x7]  ;;  %v6396_v0 = vld [vmem:[#allocation15 + $0x370] sm:$0xff]  ;;  %v6425_v19 = vld [vmem:[#allocation15 + $0x458] sm:$0xff] }
 0x7c4   : > { %v5718_v45 = vpop.f32.mrb[68].mxu1 }
 0x7c5   : > { %v5901_v35 = vmax.f32 %v14755_v57, %v5718_v45  ;;  %v5720_v23 = vpop.f32.mrb[69].mxu1  ;;  %v6401_v45 = vld [vmem:[#allocation15 + $0x398] sm:$0xff] }
 0x7c6   : > { %v5902_v21 = vmax.f32 %v14759_v36, %v5720_v23 }
 0x7c7   : > { %v11299_v8 = vpack.c.bf16 %v5901_v35, %v5898_v9  ;;  %v11333_v9 = vpack.c.bf16 %v6399_v28, %v6397_v20  ;;  %v6403_v35 = vld [vmem:[#allocation15 + $0x3a8] sm:$0xff] }
 0x7c8   : > { %v11297_v50 = vpack.c.bf16 %v5902_v21, %v5899_v25  ;;  %v5724_v62 = vpop.f32.mrb[70].mxu1  ;;  %v6398_v25 = vld [vmem:[#allocation15 + $0x380] sm:$0xff]  ;;  %v11337_v21 = vpack.c.bf16 %v6403_v35, %v6401_v45  ;;  %v6427_v20 = vld [vmem:[#allocation15 + $0x468] sm:$0xff] }
 0x7c9   : > { %v5904_v15 = vmax.f32 %v14762_v60, %v5724_v62  ;;  %v5726_v22 = vpop.f32.mrb[71].mxu1  ;;  %v11335_v23 = vpack.c.bf16 %v6398_v25, %v6396_v0  ;;  %v6405_v62 = vld [vmem:[#allocation15 + $0x3b8] sm:$0xff]  ;;  %v7209_v28 = vld [vmem:[#allocation15 + $0xcc8] sm:$0xff]  ;;  %v6424_v0 = vld [vmem:[#allocation15 + $0x450] sm:$0xff] }
 0x7ca   : > { %v5905_v14 = vmax.f32 %v14765_v31, %v5726_v22  ;;  %11298 = vmatprep.subr.bf16.mxu0 %v11297_v50  ;;  %v6426_v25 = vld [vmem:[#allocation15 + $0x460] sm:$0xff] }
 0x7cb   : > { %11300 = vmatpush1.bf16.msra.mxu0 %v11299_v8  ;;  %v11363_v35 = vpack.c.bf16 %v6426_v25, %v6424_v0 }
 0x7cc   : > { %9650 = vmatprep.subr.msk.mxu0 %vm1461_vm3, %v5905_v14 }
 0x7cf   : > { %9651 = vmatpush1.msk.msra.mxu0 %vm1461_vm3, %v5904_v15 }
 0x7d0   : > { %9652 = vmatmul.mubr.msk.f32.vlgmr.msra.gmra.mrb[54].mxu0 %vm5909_vm4, %v5907_v61 }
 0x7d1   : > { %5995 = vmatprep.mubr.f32.mxu0 %v15298_v37 }
 0x7d4   : > { %9653 = vmatmul.mubr.msk.f32.gmra.mrb[56].mxu0 %vm5909_vm4, %v5908_v38 }
 0x7d5   : > { %10016 = vmatprep.mubr.msk.f32.mxu0 %vm5909_vm4, %v5907_v61  ;;  %v6404_v61 = vld [vmem:[#allocation15 + $0x3b0] sm:$0xff] }
 0x7e4   : > { %v5875_v57 = vpop.f32.mrb[72].mxu1 }
 0x7e5   : > { %v12134_v36 = vadd.f32 %v14795_v55, %v5875_v57  ;;  %v5877_v60 = vpop.f32.mrb[73].mxu1  ;;  %v6379_v55 = vld [vmem:[#allocation15 + $0x2e8] sm:$0xff]  ;;  %v6409_v57 = vld [vmem:[#allocation15 + $0x3d8] sm:$0xff] }
 0x7e7   : > { %v5900_v31 = vmax.f32 %v14721_v47, %v12134_v36  ;;  %v6078_v47 = vld [vmem:[#allocation12 + $0x10] sm:$0xff] }
 0x7e8   : > { %v5880_v34 = vpop.f32.mrb[74].mxu1  ;;  %v6411_v36 = vld [vmem:[#allocation15 + $0x3e8] sm:$0xff] }
 0x7e9   : > { %v12137_v49 = vadd.f32 %v14802_v16, %v5880_v34  ;;  %v5882_v26 = vpop.f32.mrb[75].mxu1  ;;  %v6408_v34 = vld [vmem:[#allocation15 + $0x3d0] sm:$0xff] }
 0x7eb   : > { %v5903_v52 = vmax.f32 %v14724_v3, %v12137_v49  ;;  %v6377_v3 = vld [vmem:[#allocation15 + $0x2d8] sm:$0xff]  ;;  %v6410_v49 = vld [vmem:[#allocation15 + $0x3e0] sm:$0xff] }
 0x7ec   : > { %v5885_v24 = vpop.f32.mrb[76].mxu1  ;;  %v11313_v16 = vpack.c.bf16 %v6379_v55, %v6377_v3  ;;  %v11347_v26 = vpack.c.bf16 %v6410_v49, %v6408_v34  ;;  %v6433_v49 = vld [vmem:[#allocation15 + $0x498] sm:$0xff] }
 0x7ed   : > { %v11301_v29 = vpack.c.bf16 %v5903_v52, %v5900_v31  ;;  %v12140_v46 = vadd.f32 %v14809_v48, %v5885_v24  ;;  %v5887_v18 = vpop.f32.mrb[77].mxu1  ;;  %v6376_v48 = vld [vmem:[#allocation15 + $0x2d0] sm:$0xff]  ;;  %v11345_v31 = vpack.c.bf16 %v6411_v36, %v6409_v57  ;;  %v6413_v52 = vld [vmem:[#allocation15 + $0x3f8] sm:$0xff]  ;;  %v6415_v24 = vld [vmem:[#allocation15 + $0x408] sm:$0xff] }
 0x7ee   : > { %v11315_v10 = vpack.c.bf16 %v6378_v4, %v6376_v48  ;;  %v7199_v18 = vld [vmem:[#allocation15 + $0xc78] sm:$0xff] }
 0x7ef   : > { %v5906_v42 = vmax.f32 %v14727_v11, %v12140_v46  ;;  %11302 = vmatprep.subr.bf16.mxu0 %v11301_v29  ;;  %v6079_v11 = vld [vmem:[#allocation12 + $0x18] sm:$0x7]  ;;  %v11349_v46 = vpack.c.bf16 %v6415_v24, %v6413_v52  ;;  %v6417_v4 = vld [vmem:[#allocation15 + $0x418] sm:$0xff]  ;;  %v7217_v52 = vld [vmem:[#allocation15 + $0xd08] sm:$0xff] }
 0x7f0   : > { %11304 = vmatpush3.bf16.msra.mxu0 %v11301_v29 }
 0x7f1   : > { %10014 = vmatprep.subr.msk.mxu0 %vm1461_vm3, %v5906_v42 }
 0x7f4   : > { %10015 = vmatpush3.msk.msra.mxu0 %vm1461_vm3, %v5906_v42 }
 0x7f5   : > { %10017 = vmatmul.mubr.msk.f32.vlgmr.msra.gmra.mrb[58].mxu0 %vm5909_vm4, %v5908_v38  ;;  %11306 = vmatprep.subr.bf16.mxu0 %v11297_v50  ;;  %v6402_v50 = vld [vmem:[#allocation15 + $0x3a0] sm:$0xff] }
 0x7f6   : > { %11308 = vmatpush1.bf16.msra.mxu0 %v11299_v8  ;;  %6150 = vmatprep.mubr.f32.mxu0 %v15298_v37  ;;  %v6400_v8 = vld [vmem:[#allocation15 + $0x390] sm:$0xff]  ;;  %v6406_v38 = vld [vmem:[#allocation15 + $0x3c0] sm:$0xff] }
 0x7f7   : > { %9657 = vmatprep.subr.msk.mxu0 %vm1461_vm3, %v5905_v14  ;;  %v11339_v22 = vpack.c.bf16 %v6402_v50, %v6400_v8  ;;  %v11343_v60 = vpack.c.bf16 %v6406_v38, %v6404_v61  ;;  %v6429_v50 = vld [vmem:[#allocation15 + $0x478] sm:$0xff]  ;;  %v6428_v61 = vld [vmem:[#allocation15 + $0x470] sm:$0xff]  ;;  %v6430_v38 = vld [vmem:[#allocation15 + $0x480] sm:$0xff] }
 0x7f8   : > { %v11367_v36 = vpack.c.bf16 %v6430_v38, %v6428_v61 }
 0x7fa   : > { %9658 = vmatpush1.msk.msra.mxu0 %vm1461_vm3, %v5904_v15  ;;  %v6407_v15 = vld [vmem:[#allocation15 + $0x3c8] sm:$0xff] }
 0x7fb   : > { %9659 = vmatmul.mubr.msk.f32.vlgmr.msra.gmra.mrb[60].mxu0 %vm5909_vm4, %v6078_v47  ;;  %11310 = vmatprep.subr.bf16.mxu0 %v11301_v29  ;;  %v11341_v14 = vpack.c.bf16 %v6407_v15, %v6405_v62  ;;  %v6431_v62 = vld [vmem:[#allocation15 + $0x488] sm:$0xff] }
 0x7fc   : > { %11312 = vmatpush3.bf16.msra.mxu0 %v11301_v29  ;;  %6156 = vmatprep.mubr.f32.mxu0 %v15298_v37  ;;  %v7197_v29 = vld [vmem:[#allocation15 + $0xc68] sm:$0xff] }
 0x7fd   : > { %10023 = vmatprep.subr.msk.mxu0 %vm1461_vm3, %v5906_v42  ;;  %v11613_v3 = vpack.c.bf16 %v7199_v18, %v7197_v29  ;;  %v7213_v15 = vld [vmem:[#allocation15 + $0xce8] sm:$0xff]  ;;  %v7219_v29 = vld [vmem:[#allocation15 + $0xd18] sm:$0xff]  ;;  %v6434_v18 = vld [vmem:[#allocation15 + $0x4a0] sm:$0xff] }
 0x7ff   : > { %9660 = vmatmul.mubr.msk.f32.gmra.mrb[62].mxu0 %vm5909_vm4, %v6079_v11  ;;  %11614 = vmatprep.subr.bf16.mxu1 %v11613_v3  ;;  %v7216_v3 = vld [vmem:[#allocation15 + $0xd00] sm:$0xff] }
 0x800   : > { %10024 = vmatpush3.msk.msra.mxu0 %vm1461_vm3, %v5906_v42  ;;  %10025 = vmatprep.mubr.msk.f32.mxu0 %vm5909_vm4, %v6078_v47  ;;  %v6412_v42 = vld [vmem:[#allocation15 + $0x3f0] sm:$0xff]  ;;  %v6414_v47 = vld [vmem:[#allocation15 + $0x400] sm:$0xff] }
 0x801   : > { %11314 = vmatprep.subr.bf16.mxu0 %v11313_v16  ;;  %v11351_v55 = vpack.c.bf16 %v6414_v47, %v6412_v42  ;;  %v7198_v16 = vld [vmem:[#allocation15 + $0xc70] sm:$0xff]  ;;  %v11633_v42 = vpack.c.bf16 %v7219_v29, %v7217_v52  ;;  %v7224_v29 = vld [vmem:[#allocation15 + $0xd40] sm:$0xff] }
 0x803   : > { %10026 = vmatmul.mubr.msk.f32.vlgmr.msra.gmra.mrb[64].mxu0 %vm5909_vm4, %v6079_v11  ;;  %v7196_v11 = vld [vmem:[#allocation15 + $0xc60] sm:$0xff]  ;;  %vm8034_vm4 = vcmask 97280  }
 0x804   : > { %11316 = vmatpush1.bf16.msra.mxu0 %v11315_v10  ;;  %v11615_v48 = vpack.c.bf16 %v7198_v16, %v7196_v11  ;;  %v11353_v10 = vpack.c.bf16 %v6419_v59, %v6417_v4  ;;  %v6437_v16 = vld [vmem:[#allocation15 + $0x4b8] sm:$0xff]  ;;  %v7221_v4 = vld [vmem:[#allocation15 + $0xd28] sm:$0xff] }
 0x805   : > { %11318 = vmatprep.subr.bf16.mxu0 %v11317_v56  ;;  %v7203_v56 = vld [vmem:[#allocation15 + $0xc98] sm:$0xff] }
 0x806   : > { %11616 = vmatpush1.bf16.msra.mxu1 %v11615_v48  ;;  %v11617_v39 = vpack.c.bf16 %v7203_v56, %v7201_v17  ;;  %v6439_v48 = vld [vmem:[#allocation15 + $0x4c8] sm:$0xff]  ;;  %v7223_v17 = vld [vmem:[#allocation15 + $0xd38] sm:$0xff]  ;;  %v6438_v56 = vld [vmem:[#allocation15 + $0x4c0] sm:$0xff] }
 0x807   : > { %v11373_v59 = vpack.c.bf16 %v6439_v48, %v6437_v16  ;;  %v11637_v54 = vpack.c.bf16 %v7223_v17, %v7221_v4  ;;  %v7229_v16 = vld [vmem:[#allocation15 + $0xd68] sm:$0xff]  ;;  %v7231_v48 = vld [vmem:[#allocation15 + $0xd78] sm:$0xff] }
 0x808   : > { %11320 = vmatpush1.bf16.msra.mxu0 %v11319_v30  ;;  %v7200_v30 = vld [vmem:[#allocation15 + $0xc80] sm:$0xff]  ;;  %11618 = vmatprep.subr.bf16.mxu1 %v11617_v39 }
 0x809   : > { %11322 = vmatprep.subr.bf16.mxu0 %v11321_v13  ;;  %v7202_v13 = vld [vmem:[#allocation15 + $0xc90] sm:$0xff]  ;;  %v7220_v39 = vld [vmem:[#allocation15 + $0xd20] sm:$0xff] }
 0x80a   : > { %v11619_v1 = vpack.c.bf16 %v7202_v13, %v7200_v30  ;;  %v6441_v13 = vld [vmem:[#allocation15 + $0x4d8] sm:$0xff] }
 0x80c   : > { %11324 = vmatpush1.bf16.msra.mxu0 %v11323_v51  ;;  %11620 = vmatpush1.bf16.msra.mxu1 %v11619_v1  ;;  %v11357_v51 = vpack.c.bf16 %v6423_v12, %v6421_v58  ;;  %v6443_v1 = vld [vmem:[#allocation15 + $0x4e8] sm:$0xff] }
 0x80d   : > { %11326 = vmatprep.subr.bf16.mxu0 %v11325_v44  ;;  %v7207_v44 = vld [vmem:[#allocation15 + $0xcb8] sm:$0xff]  ;;  %v7225_v58 = vld [vmem:[#allocation15 + $0xd48] sm:$0xff]  ;;  %v11377_v12 = vpack.c.bf16 %v6443_v1, %v6441_v13  ;;  %v11645_v1 = vpack.c.bf16 %v7231_v48, %v7229_v16  ;;  %v7240_v48 = vld [vmem:[#allocation15 + $0xdc0] sm:$0xff] }
 0x80e   : > { %v11621_v41 = vpack.c.bf16 %v7207_v44, %v7205_v63  ;;  %v7227_v63 = vld [vmem:[#allocation15 + $0xd58] sm:$0xff] }
 0x810   : > { %11328 = vmatpush1.bf16.msra.mxu0 %v11327_v53  ;;  %v7204_v53 = vld [vmem:[#allocation15 + $0xca0] sm:$0xff]  ;;  %11622 = vmatprep.subr.bf16.mxu1 %v11621_v41 }
 0x811   : > { %11330 = vmatprep.subr.bf16.mxu0 %v11329_v6  ;;  %v7206_v6 = vld [vmem:[#allocation15 + $0xcb0] sm:$0xff] }
 0x812   : > { %v11623_v43 = vpack.c.bf16 %v7206_v6, %v7204_v53  ;;  %v14858_v6 = vld [vmem:[#allocation14] sm:$0x7] }
 0x814   : > { %11332 = vmatpush1.bf16.msra.mxu0 %v11331_v27  ;;  %11624 = vmatpush1.bf16.msra.mxu1 %v11623_v43  ;;  %v11361_v27 = vpack.c.bf16 %v6427_v20, %v6425_v19  ;;  %v15300_v43 = vld [vmem:[#allocation52_spill] sm:$0xff] }
 0x815   : > { %11334 = vmatprep.subr.bf16.mxu0 %v11333_v9  ;;  %v7211_v9 = vld [vmem:[#allocation15 + $0xcd8] sm:$0xff]  ;;  %v6249_v19 = vrot.slane %v14858_v6, %v15300_v43 }
 0x816   : > { %v11625_v45 = vpack.c.bf16 %v7211_v9, %v7209_v28  ;;  %v15301_v28 = vld [vmem:[#allocation53_spill] sm:$0xff] }
 0x818   : > { %11336 = vmatpush1.bf16.msra.mxu0 %v11335_v23  ;;  %v7208_v23 = vld [vmem:[#allocation15 + $0xcc0] sm:$0xff]  ;;  %11626 = vmatprep.subr.bf16.mxu1 %v11625_v45 }
 0x819   : > { %11338 = vmatprep.subr.bf16.mxu0 %v11337_v21  ;;  %v7210_v21 = vld [vmem:[#allocation15 + $0xcd0] sm:$0xff] }
 0x81a   : > { %v11627_v8 = vpack.c.bf16 %v7210_v21, %v7208_v23 }
 0x81c   : > { %11340 = vmatpush1.bf16.msra.mxu0 %v11339_v22  ;;  %11628 = vmatpush1.bf16.msra.mxu1 %v11627_v8  ;;  %v11365_v22 = vpack.c.bf16 %v6431_v62, %v6429_v50 }
 0x81d   : > { %11342 = vmatprep.subr.bf16.mxu0 %v11341_v14  ;;  %v7215_v14 = vld [vmem:[#allocation15 + $0xcf8] sm:$0xff] }
 0x81e   : > { %v11629_v57 = vpack.c.bf16 %v7215_v14, %v7213_v15 }
 0x820   : > { %11344 = vmatpush1.bf16.msra.mxu0 %v11343_v60  ;;  %v7212_v60 = vld [vmem:[#allocation15 + $0xce0] sm:$0xff]  ;;  %11630 = vmatprep.subr.bf16.mxu1 %v11629_v57 }
 0x821   : > { %11346 = vmatprep.subr.bf16.mxu0 %v11345_v31  ;;  %v7214_v31 = vld [vmem:[#allocation15 + $0xcf0] sm:$0xff] }
 0x822   : > { %v11631_v34 = vpack.c.bf16 %v7214_v31, %v7212_v60 }
 0x824   : > { %11348 = vmatpush1.bf16.msra.mxu0 %v11347_v26  ;;  %v6435_v26 = vld [vmem:[#allocation15 + $0x4a8] sm:$0xff]  ;;  %11632 = vmatpush1.bf16.msra.mxu1 %v11631_v34 }
 0x825   : > { %11350 = vmatprep.subr.bf16.mxu0 %v11349_v46  ;;  %v11369_v24 = vpack.c.bf16 %v6435_v26, %v6433_v49  ;;  %v6432_v46 = vld [vmem:[#allocation15 + $0x490] sm:$0xff]  ;;  %11634 = vmatprep.subr.bf16.mxu1 %v11633_v42 }
 0x826   : > { %v11371_v47 = vpack.c.bf16 %v6434_v18, %v6432_v46  ;;  %v6440_v49 = vld [vmem:[#allocation15 + $0x4d0] sm:$0xff] }
 0x827   : > { %v7226_v46 = vld [vmem:[#allocation15 + $0xd50] sm:$0xff] }
 0x828   : > { %11352 = vmatpush1.bf16.msra.mxu0 %v11351_v55  ;;  %v7218_v55 = vld [vmem:[#allocation15 + $0xd10] sm:$0xff]  ;;  %v11643_v17 = vpack.c.bf16 %v7226_v46, %v7224_v29  ;;  %v7243_v29 = vld [vmem:[#allocation15 + $0xdd8] sm:$0xff] }
 0x829   : > { %11354 = vmatprep.subr.bf16.mxu0 %v11353_v10  ;;  %v11635_v11 = vpack.c.bf16 %v7218_v55, %v7216_v3  ;;  %v6436_v10 = vld [vmem:[#allocation15 + $0x4b0] sm:$0xff] }
 0x82a   : > { %v11375_v5 = vpack.c.bf16 %v6438_v56, %v6436_v10  ;;  %v6444_v10 = vld [vmem:[#allocation15 + $0x4f0] sm:$0xff]  ;;  %v6446_v56 = vld [vmem:[#allocation15 + $0x500] sm:$0xff] }
 0x82b   : > { %11636 = vmatpush1.bf16.msra.mxu1 %v11635_v11  ;;  %v6447_v11 = vld [vmem:[#allocation15 + $0x508] sm:$0xff] }
 0x82c   : > { %11356 = vmatpush1.bf16.msra.mxu0 %v11355_v33  ;;  %v7222_v33 = vld [vmem:[#allocation15 + $0xd30] sm:$0xff]  ;;  %11638 = vmatprep.subr.bf16.mxu1 %v11637_v54 }
 0x82d   : > { %11358 = vmatprep.subr.bf16.mxu0 %v11357_v51  ;;  %v11639_v30 = vpack.c.bf16 %v7222_v33, %v7220_v39  ;;  %v11641_v51 = vpack.c.bf16 %v7227_v63, %v7225_v58  ;;  %v7230_v39 = vld [vmem:[#allocation15 + $0xd70] sm:$0xff]  ;;  %v6449_v33 = vld [vmem:[#allocation15 + $0x518] sm:$0xff]  ;;  %v6451_v58 = vld [vmem:[#allocation15 + $0x528] sm:$0xff] }
 0x82e   : > { %v7235_v63 = vld [vmem:[#allocation15 + $0xd98] sm:$0xff] }
 0x82f   : > { %11640 = vmatpush1.bf16.msra.mxu1 %v11639_v30 }
 0x830   : > { %11360 = vmatpush1.bf16.msra.mxu0 %v11359_v40  ;;  %11642 = vmatprep.subr.bf16.mxu1 %v11641_v51  ;;  %v11383_v51 = vpack.c.bf16 %v6446_v56, %v6444_v10  ;;  %v7245_v10 = vld [vmem:[#allocation15 + $0xde8] sm:$0xff]  ;;  %v7247_v56 = vld [vmem:[#allocation15 + $0xdf8] sm:$0xff] }
 0x831   : > { %11362 = vmatprep.subr.bf16.mxu0 %v11361_v27  ;;  %v6253_v27 = vrot.slane %v14858_v6, %v15301_v28 }
 0x834   : > { %11364 = vmatpush1.bf16.msra.mxu0 %v11363_v35 }
 0x835   : > { %11366 = vmatprep.subr.bf16.mxu0 %v11365_v22 }
 0x838   : > { %11368 = vmatpush1.bf16.msra.mxu0 %v11367_v36 }
 0x839   : > { %11370 = vmatprep.subr.bf16.mxu0 %v11369_v24  ;;  %v6442_v24 = vld [vmem:[#allocation15 + $0x4e0] sm:$0xff] }
 0x83c   : > { %11372 = vmatpush1.bf16.msra.mxu0 %v11371_v47  ;;  %v6445_v47 = vld [vmem:[#allocation15 + $0x4f8] sm:$0xff] }
 0x83d   : > { %11374 = vmatprep.subr.bf16.mxu0 %v11373_v59  ;;  %v11379_v59 = vpack.c.bf16 %v6442_v24, %v6440_v49  ;;  %v11381_v13 = vpack.c.bf16 %v6447_v11, %v6445_v47  ;;  %v6459_v49 = vld [vmem:[#allocation15 + $0x568] sm:$0xff] }
 0x83e   : > { %v7241_v24 = vld [vmem:[#allocation15 + $0xdc8] sm:$0xff] }
 0x83f   : > { %v11657_v16 = vpack.c.bf16 %v7243_v29, %v7241_v24  ;;  %v7073_v29 = vld [vmem:[#allocation15 + $0x890] sm:$0xff] }
 0x840   : > { %11376 = vmatpush1.bf16.msra.mxu0 %v11375_v5  ;;  %v7228_v5 = vld [vmem:[#allocation15 + $0xd60] sm:$0xff] }
 0x841   : > { %11378 = vmatprep.subr.bf16.mxu0 %v11377_v12  ;;  %v7233_v12 = vld [vmem:[#allocation15 + $0xd88] sm:$0xff] }
 0x8a3   : > { %v5991_v44 = vpop.f32.mrb[54].mxu0 }
 0x8a4   : > { %v5993_v32 = vpop.f32.mrb[55].mxu0 }
 0x8a7   : > { %v5997_v2 = vpop.f32.mrb[56].mxu0 }
 0x8a8   : > { %v5999_v41 = vpop.f32.mrb[57].mxu0 }
 0x8c8   : > { %v14854_v40 = vpop.f32.mrb[58].mxu0 }
 0x8c9   : > { %v14856_v53 = vpop.f32.mrb[59].mxu0 }
 0x8ce   : > { %v6152_v20 = vpop.f32.mrb[60].mxu0 }
 0x8cf   : > { %v6238_v9 = vmax.f32 %v5991_v44, %v6152_v20  ;;  %v6154_v0 = vpop.f32.mrb[61].mxu0  ;;  %v11647_v44 = vpack.c.bf16 %v7230_v39, %v7228_v5  ;;  %v7232_v20 = vld [vmem:[#allocation15 + $0xd80] sm:$0xff]  ;;  %v6460_v39 = vld [vmem:[#allocation15 + $0x570] sm:$0xff] }
 0x8d0   : > { %v6239_v25 = vmax.f32 %v5993_v32, %v6154_v0  ;;  %v6448_v32 = vld [vmem:[#allocation15 + $0x510] sm:$0xff]  ;;  %v6455_v0 = vld [vmem:[#allocation15 + $0x548] sm:$0xff] }
 0x8d1   : > { %v6261_v45 = vadd.f32 %v6249_v19, %v6238_v9  ;;  %v6453_v9 = vld [vmem:[#allocation15 + $0x538] sm:$0xff] }
 0x8d2   : > { %v6262_v35 = vadd.f32 %v6253_v27, %v6239_v25  ;;  %v6158_v23 = vpop.f32.mrb[62].mxu0  ;;  %v7237_v25 = vld [vmem:[#allocation15 + $0xda8] sm:$0xff] }
 0x8d3   : > { %v6241_v21 = vmax.f32 %v5997_v2, %v6158_v23  ;;  %v6160_v8 = vpop.f32.mrb[63].mxu0  ;;  %v6273_v15 = vmul.f32 0.01, %v6261_v45  ;;  %vm6267_vm6 = vcmp.ge.f32.partialorder %v6261_v45, 0.0  ;;  %v6450_v2 = vld [vmem:[#allocation15 + $0x520] sm:$0xff] }
 0x8d4   : > { %v6274_v50 = vmul.f32 0.01, %v6262_v35  ;;  %v6242_v62 = vmax.f32 %v5999_v41, %v6160_v8  ;;  %vm6268_vm5 = vcmp.ge.f32.partialorder %v6262_v35, 0.0  ;;  %v11385_v41 = vpack.c.bf16 %v6451_v58, %v6449_v33  ;;  %v6454_v8 = vld [vmem:[#allocation15 + $0x540] sm:$0xff]  ;;  %v7246_v33 = vld [vmem:[#allocation15 + $0xdf0] sm:$0xff] }
 0x8d5   : > { %v6264_v22 = vadd.f32 %v6249_v19, %v6241_v21  ;;  %v14874_v26 = vsel %vm6267_vm6, %v6261_v45, %v6273_v15  ;;  %v11649_v19 = vpack.c.bf16 %v7235_v63, %v7233_v12  ;;  %v7239_v45 = vld [vmem:[#allocation15 + $0xdb8] sm:$0xff]  ;;  %v6452_v21 = vld [vmem:[#allocation15 + $0x530] sm:$0xff]  ;;  %v7249_v63 = vld [vmem:[#allocation15 + $0xe08] sm:$0xff]  ;;  %vm8567_vm6 = vcmask 1041408  }
 0x8d6   : > { %v6265_v14 = vadd.f32 %v6253_v27, %v6242_v62  ;;  %v14864_v61 = vpop.f32.mrb[64].mxu0  ;;  %v14870_v60 = vsel %vm6268_vm5, %v6262_v35, %v6274_v50  ;;  %v6472_v4 = vrot.slane %v14874_v26, 1  ;;  %v7234_v27 = vld [vmem:[#allocation15 + $0xd90] sm:$0xff]  ;;  %v11387_v35 = vpack.c.bf16 %v6450_v2, %v6448_v32  ;;  %v7236_v50 = vld [vmem:[#allocation15 + $0xda0] sm:$0xff]  ;;  %v6465_v12 = vld [vmem:[#allocation15 + $0x598] sm:$0xff] }
 0x8d7   : > { %vm6270_vm7 = vcmp.ge.f32.partialorder %v6264_v22, 0.0  ;;  %v6276_v38 = vmul.f32 0.01, %v6264_v22  ;;  %v6243_v57 = vmax.f32 %v14854_v40, %v14864_v61  ;;  %v14868_v36 = vpop.f32.mrb[65].mxu0  ;;  %v6475_v3 = vrot.slane %v14870_v60, 1  ;;  %v15302_v62 = vld [vmem:[#allocation54_spill] sm:$0xff] }
 0x8d8   : > { %vm6271_vm8 = vcmp.ge.f32.partialorder %v6265_v14, 0.0  ;;  %v6277_v31 = vmul.f32 0.01, %v6265_v14  ;;  %v6240_v34 = vmax.f32 %v14856_v53, %v14868_v36  ;;  %v11651_v23 = vpack.c.bf16 %v7234_v27, %v7232_v20  ;;  %v6462_v40 = vld [vmem:[#allocation15 + $0x580] sm:$0xff]  ;;  %v7070_v32 = vld [vmem:[#allocation15 + $0x878] sm:$0xff]  ;;  %v7072_v2 = vld [vmem:[#allocation15 + $0x888] sm:$0xff] }
 0x8d9   : > { %v14876_v52 = vsel %vm6270_vm7, %v6264_v22, %v6276_v38  ;;  %v6257_v15 = vrot.slane %v14858_v6, %v15302_v62  ;;  %v11389_v22 = vpack.c.bf16 %v6455_v0, %v6453_v9  ;;  %v7238_v38 = vld [vmem:[#allocation15 + $0xdb0] sm:$0xff]  ;;  %v11391_v46 = vpack.c.bf16 %v6454_v8, %v6452_v21  ;;  %v6458_v6 = vld [vmem:[#allocation15 + $0x560] sm:$0xff]  ;;  %v6290_v21 = vld [vmem:[#allocation15 + $0x28] sm:$0xff] }
 0x8da   : > { %v14878_v18 = vsel %vm6271_vm8, %v6265_v14, %v6277_v31  ;;  %v6473_v42 = vrot.slane %v14876_v52, 1  ;;  %v11653_v14 = vpack.c.bf16 %v7239_v45, %v7237_v25  ;;  %v6457_v31 = vld [vmem:[#allocation15 + $0x558] sm:$0xff]  ;;  %v11661_v36 = vpack.c.bf16 %v7247_v56, %v7245_v10  ;;  %v6287_v27 = vld [vmem:[#allocation15 + $0x10] sm:$0xff]  ;;  %v7071_v0 = vld [vmem:[#allocation15 + $0x880] sm:$0xff] }
 0x8db   : > { %v6476_v55 = vrot.slane %v14878_v18, 1  ;;  %v11393_v47 = vpack.c.bf16 %v6459_v49, %v6457_v31  ;;  %v6263_v11 = vadd.f32 %v6257_v15, %v6240_v34  ;;  %v7244_v34 = vld [vmem:[#allocation15 + $0xde0] sm:$0xff]  ;;  %v7069_v9 = vld [vmem:[#allocation15 + $0x870] sm:$0xff]  ;;  %v6292_v8 = vld [vmem:[#allocation15 + $0x38] sm:$0xff]  ;;  %vm13289_vm5 = vmmov 0  }
 0x8dc   : > { %v6474_v30 = vsel %vm978_vm2, %v6472_v4, %v6473_v42  ;;  %v7242_v4 = vld [vmem:[#allocation15 + $0xdd0] sm:$0xff]  ;;  %v7248_v45 = vld [vmem:[#allocation15 + $0xe00] sm:$0xff]  ;;  %v11405_v24 = vpack.c.bf16 %v6292_v8, %v6290_v21  ;;  %vm8563_vm7 = vcmask 15360  }
 0x8dd   : > { %v6477_v54 = vsel %vm978_vm2, %v6475_v3, %v6476_v55  ;;  %v6456_v3 = vld [vmem:[#allocation15 + $0x550] sm:$0xff]  ;;  %v11659_v5 = vpack.c.bf16 %v7242_v4, %v7240_v48  ;;  %vm6269_vm10 = vcmp.ge.f32.partialorder %v6263_v11, 0.0  ;;  %v6289_v31 = vld [vmem:[#allocation15 + $0x20] sm:$0xff] }
 0x8de   : > { %6554 = vmatprep.mubr.f32.mxu0 %v6477_v54  ;;  %7314 = vmatprep.mubr.f32.mxu1 %v6477_v54  ;;  %v11395_v54 = vpack.c.bf16 %v6458_v6, %v6456_v3  ;;  %v6464_v25 = vld [vmem:[#allocation15 + $0x590] sm:$0xff]  ;;  %v6296_v3 = vld [vmem:[#allocation15 + $0x58] sm:$0xff]  ;;  %v6293_v48 = vld [vmem:[#allocation15 + $0x40] sm:$0xff] }
 0x8df   : > { %6555 = vmatmul.mubr.f32.vlgmr.msra.gmra.mrb[66].mxu0 %v6474_v30  ;;  %7315 = vmatmul.mubr.f32.vlgmr.msra.gmra.mrb[78].mxu1 %v6474_v30  ;;  %v11399_v30 = vpack.c.bf16 %v6462_v40, %v6460_v39  ;;  %v6291_v49 = vld [vmem:[#allocation15 + $0x30] sm:$0xff]  ;;  %v7078_v6 = vld [vmem:[#allocation15 + $0x8b8] sm:$0xff]  ;;  %v7079_v56 = vld [vmem:[#allocation15 + $0x8c0] sm:$0xff] }
 0x8e0   : > { %11380 = vmatpush1.bf16.msra.mxu0 %v11379_v59  ;;  %11644 = vmatpush1.bf16.msra.mxu1 %v11643_v17  ;;  %v6461_v59 = vld [vmem:[#allocation15 + $0x578] sm:$0xff]  ;;  %v6463_v17 = vld [vmem:[#allocation15 + $0x588] sm:$0xff]  ;;  %v6295_v4 = vld [vmem:[#allocation15 + $0x50] sm:$0xff] }
 0x8e1   : > { %6560 = vmatprep.mubr.f32.mxu0 %v6476_v55  ;;  %7320 = vmatprep.mubr.f32.mxu1 %v6476_v55  ;;  %v6266_v55 = vadd.f32 %v6257_v15, %v6243_v57  ;;  %v6275_v57 = vmul.f32 0.01, %v6263_v11  ;;  %v11397_v53 = vpack.c.bf16 %v6463_v17, %v6461_v59  ;;  %v11667_v15 = vpack.c.bf16 %v7071_v0, %v7069_v9  ;;  %v7077_v59 = vld [vmem:[#allocation15 + $0x8b0] sm:$0xff]  ;;  %v7082_v39 = vld [vmem:[#allocation15 + $0x8d8] sm:$0xff]  ;;  %v7084_v40 = vld [vmem:[#allocation15 + $0x8e8] sm:$0xff] }
 0x8e2   : > { %11382 = vmatprep.subr.bf16.mxu0 %v11381_v13  ;;  %11646 = vmatprep.subr.bf16.mxu1 %v11645_v1  ;;  %v11663_v13 = vpack.c.bf16 %v7246_v33, %v7244_v34  ;;  %v6299_v34 = vld [vmem:[#allocation15 + $0x70] sm:$0xff]  ;;  %v7087_v0 = vld [vmem:[#allocation15 + $0x900] sm:$0xff] }
 0x8e3   : > { %6561 = vmatmul.mubr.f32.gmra.mrb[68].mxu0 %v6473_v42  ;;  %7321 = vmatmul.mubr.f32.gmra.mrb[80].mxu1 %v6473_v42  ;;  %v11655_v42 = vpack.c.bf16 %v7238_v38, %v7236_v50  ;;  %v6278_v61 = vmul.f32 0.01, %v6266_v55  ;;  %vm6272_vm9 = vcmp.ge.f32.partialorder %v6266_v55, 0.0  ;;  %v14898_v58 = vsel %vm6269_vm10, %v6263_v11, %v6275_v57  ;;  %v7081_v33 = vld [vmem:[#allocation15 + $0x8d0] sm:$0xff] }
 0x8e4   : > { %11384 = vmatpush1.bf16.msra.mxu0 %v11383_v51  ;;  %11648 = vmatpush1.bf16.msra.mxu1 %v11647_v44  ;;  %v6286_v51 = vld [vmem:[#allocation15 + $0x8] sm:$0xff]  ;;  %v6288_v44 = vld [vmem:[#allocation15 + $0x18] sm:$0xff]  ;;  %v6478_v20 = vrot.slane %v14898_v58, 1  ;;  %v11407_v11 = vpack.c.bf16 %v6291_v49, %v6289_v31  ;;  %v11675_v57 = vpack.c.bf16 %v7079_v56, %v7077_v59  ;;  %v7091_v31 = vld [vmem:[#allocation15 + $0x920] sm:$0xff] }
 0x8e5   : > { %11386 = vmatprep.subr.bf16.mxu0 %v11385_v41  ;;  %11650 = vmatprep.subr.bf16.mxu1 %v11649_v19  ;;  %v14896_v1 = vsel %vm6272_vm9, %v6266_v55, %v6278_v61  ;;  %v6285_v41 = vld [vmem:[#allocation15] sm:$0xff]  ;;  %v7080_v55 = vld [vmem:[#allocation15 + $0x8c8] sm:$0xff]  ;;  %v11411_v61 = vpack.c.bf16 %v6295_v4, %v6293_v48  ;;  %v6316_v59 = vld [vmem:[#allocation15 + $0xf8] sm:$0xff]  ;;  %vm8764_vm9 = vcmask 326656  }
 0x8e6   : > { %6631 = vmatprep.mubr.f32.mxu0 %v15298_v37  ;;  %7391 = vmatprep.mubr.f32.mxu1 %v15298_v37  ;;  %v6479_v19 = vrot.slane %v14896_v1, 1  ;;  %v11403_v50 = vpack.c.bf16 %v6287_v27, %v6285_v41  ;;  %v11673_v10 = vpack.c.bf16 %v7080_v55, %v7078_v6  ;;  %v7085_v27 = vld [vmem:[#allocation15 + $0x8f0] sm:$0xff]  ;;  %v6310_v49 = vld [vmem:[#allocation15 + $0xc8] sm:$0xff]  ;;  %v6309_v6 = vld [vmem:[#allocation15 + $0xc0] sm:$0xff] }
 0x8e7   : > { %v11683_v8 = vpack.c.bf16 %v7087_v0, %v7085_v27  ;;  %v6311_v55 = vld [vmem:[#allocation15 + $0xd0] sm:$0xff]  ;;  %v7095_v48 = vld [vmem:[#allocation15 + $0x940] sm:$0xff]  ;;  %v6314_v4 = vld [vmem:[#allocation15 + $0xe8] sm:$0xff] }
 0x8e8   : > { %11388 = vmatpush1.bf16.msra.mxu0 %v11387_v35  ;;  %11652 = vmatpush1.bf16.msra.mxu1 %v11651_v23  ;;  %v11401_v35 = vpack.c.bf16 %v6288_v44, %v6286_v51  ;;  %v11665_v23 = vpack.c.bf16 %v7072_v2, %v7070_v32  ;;  %v6480_v38 = vsel %vm978_vm2, %v6478_v20, %v6479_v19  ;;  %v7086_v51 = vld [vmem:[#allocation15 + $0x8f8] sm:$0xff]  ;;  %v7088_v44 = vld [vmem:[#allocation15 + $0x908] sm:$0xff]  ;;  %v6303_v20 = vld [vmem:[#allocation15 + $0x90] sm:$0xff]  ;;  %vm7816_vm2 = vcmask 1040384  }
 0x8e9   : > { %11390 = vmatprep.subr.bf16.mxu0 %v11389_v22  ;;  %11654 = vmatprep.subr.bf16.mxu1 %v11653_v14  ;;  %v7074_v22 = vld [vmem:[#allocation15 + $0x898] sm:$0xff]  ;;  %v7076_v14 = vld [vmem:[#allocation15 + $0x8a8] sm:$0xff]  ;;  %v11681_v9 = vpack.c.bf16 %v7088_v44, %v7086_v51  ;;  %v11427_v56 = vpack.c.bf16 %v6311_v55, %v6309_v6  ;;  %v6317_v51 = vld [vmem:[#allocation15 + $0x100] sm:$0xff] }
 0x8ea   : > { %v6319_v44 = vld [vmem:[#allocation15 + $0x110] sm:$0xff]  ;;  %v7106_v27 = vld [vmem:[#allocation15 + $0x998] sm:$0xff]  ;;  %v6330_v6 = vld [vmem:[#allocation15 + $0x168] sm:$0xff] }
 0x8eb   : > { %v11435_v0 = vpack.c.bf16 %v6319_v44, %v6317_v51  ;;  %v6332_v55 = vld [vmem:[#allocation15 + $0x178] sm:$0xff]  ;;  %v6338_v51 = vld [vmem:[#allocation15 + $0x1a8] sm:$0xff] }
 0x8ec   : > { %11392 = vmatpush1.bf16.msra.mxu0 %v11391_v46  ;;  %11656 = vmatpush1.bf16.msra.mxu1 %v11655_v42  ;;  %v7075_v46 = vld [vmem:[#allocation15 + $0x8a0] sm:$0xff]  ;;  %v6294_v42 = vld [vmem:[#allocation15 + $0x48] sm:$0xff]  ;;  %v6340_v44 = vld [vmem:[#allocation15 + $0x1b8] sm:$0xff] }
 0x8ed   : > { %11394 = vmatprep.subr.bf16.mxu0 %v11393_v47  ;;  %11658 = vmatprep.subr.bf16.mxu1 %v11657_v16  ;;  %v11669_v47 = vpack.c.bf16 %v7076_v14, %v7074_v22  ;;  %v11671_v16 = vpack.c.bf16 %v7075_v46, %v7073_v29  ;;  %v11409_v17 = vpack.c.bf16 %v6296_v3, %v6294_v42  ;;  %v6307_v22 = vld [vmem:[#allocation15 + $0xb0] sm:$0xff]  ;;  %v7094_v29 = vld [vmem:[#allocation15 + $0x938] sm:$0xff]  ;;  %v7096_v46 = vld [vmem:[#allocation15 + $0x948] sm:$0xff] }
 0x8ee   : > { %v7089_v14 = vld [vmem:[#allocation15 + $0x910] sm:$0xff] }
 0x8f0   : > { %11396 = vmatpush1.bf16.msra.mxu0 %v11395_v54  ;;  %11660 = vmatpush1.bf16.msra.mxu1 %v11659_v5  ;;  %v6298_v54 = vld [vmem:[#allocation15 + $0x68] sm:$0xff]  ;;  %v6300_v5 = vld [vmem:[#allocation15 + $0x78] sm:$0xff] }
 0x8f1   : > { %11398 = vmatprep.subr.bf16.mxu0 %v11397_v53  ;;  %11662 = vmatprep.subr.bf16.mxu1 %v11661_v36  ;;  %v11413_v53 = vpack.c.bf16 %v6300_v5, %v6298_v54  ;;  %v6297_v36 = vld [vmem:[#allocation15 + $0x60] sm:$0xff]  ;;  %v11429_v5 = vpack.c.bf16 %v6316_v59, %v6314_v4  ;;  %v11445_v59 = vpack.c.bf16 %v6332_v55, %v6330_v6 }
 0x8f2   : > { %v11415_v32 = vpack.c.bf16 %v6299_v34, %v6297_v36  ;;  %v6318_v36 = vld [vmem:[#allocation15 + $0x108] sm:$0xff]  ;;  %v6320_v34 = vld [vmem:[#allocation15 + $0x118] sm:$0xff] }
 0x8f4   : > { %11400 = vmatpush1.bf16.msra.mxu0 %v11399_v30  ;;  %11664 = vmatpush1.bf16.msra.mxu1 %v11663_v13  ;;  %v11677_v30 = vpack.c.bf16 %v7084_v40, %v7082_v39  ;;  %v7083_v13 = vld [vmem:[#allocation15 + $0x8e0] sm:$0xff]  ;;  %v6315_v40 = vld [vmem:[#allocation15 + $0xf0] sm:$0xff] }
 0x8f5   : > { %6591 = vmatprep.subr.mxu0 %v6465_v12  ;;  %7351 = vmatprep.subr.mxu1 %v7249_v63  ;;  %v6302_v12 = vld [vmem:[#allocation15 + $0x88] sm:$0xff]  ;;  %v6304_v63 = vld [vmem:[#allocation15 + $0x98] sm:$0xff]  ;;  %v11679_v2 = vpack.c.bf16 %v7083_v13, %v7081_v33  ;;  %v6313_v39 = vld [vmem:[#allocation15 + $0xe0] sm:$0xff] }
 0x8f6   : > { %v11417_v41 = vpack.c.bf16 %v6304_v63, %v6302_v12  ;;  %v7102_v33 = vld [vmem:[#allocation15 + $0x978] sm:$0xff]  ;;  %v11431_v13 = vpack.c.bf16 %v6315_v40, %v6313_v39  ;;  %v11433_v63 = vpack.c.bf16 %v6320_v34, %v6318_v36  ;;  %v6334_v39 = vld [vmem:[#allocation15 + $0x188] sm:$0xff] }
 0x8f7   : > { %v6336_v40 = vld [vmem:[#allocation15 + $0x198] sm:$0xff] }
 0x8f8   : > { %6592 = vmatpush1.msra.mxu0 %v6464_v25  ;;  %7352 = vmatpush1.msra.mxu1 %v7248_v45  ;;  %v6306_v25 = vld [vmem:[#allocation15 + $0xa8] sm:$0xff]  ;;  %v6308_v45 = vld [vmem:[#allocation15 + $0xb8] sm:$0xff]  ;;  %v11449_v34 = vpack.c.bf16 %v6336_v40, %v6334_v39 }
 0x8f9   : > { %9664 = vmatmul.mubr.msk.f32.vlgmr.msra.gmra.mrb[66].mxu0 %vm6485_vm11, %v6480_v38  ;;  %11402 = vmatprep.subr.bf16.mxu0 %v11401_v35  ;;  %v7090_v35 = vld [vmem:[#allocation15 + $0x918] sm:$0xff] }
 0x8fa   : > { %9670 = vmatmul.mubr.msk.f32.vlgmr.msra.gmra.mrb[78].mxu1 %vm6485_vm11, %v6480_v38  ;;  %11666 = vmatprep.subr.bf16.mxu1 %v11665_v23  ;;  %v7092_v23 = vld [vmem:[#allocation15 + $0x928] sm:$0xff] }
 0x8fb   : > { %11404 = vmatpush1.bf16.msra.mxu0 %v11403_v50  ;;  %11668 = vmatpush1.bf16.msra.mxu1 %v11667_v15  ;;  %v11421_v50 = vpack.c.bf16 %v6308_v45, %v6306_v25  ;;  %v6305_v15 = vld [vmem:[#allocation15 + $0xa0] sm:$0xff]  ;;  %v11685_v38 = vpack.c.bf16 %v7092_v23, %v7090_v35  ;;  %v6323_v23 = vld [vmem:[#allocation15 + $0x130] sm:$0xff] }
 0x8fc   : > { %6637 = vmatprep.mubr.f32.mxu0 %v15298_v37  ;;  %7397 = vmatprep.mubr.f32.mxu1 %v15298_v37  ;;  %v11423_v42 = vpack.c.bf16 %v6307_v22, %v6305_v15  ;;  %v6321_v35 = vld [vmem:[#allocation15 + $0x120] sm:$0xff]  ;;  %v6326_v15 = vld [vmem:[#allocation15 + $0x148] sm:$0xff]  ;;  %v6328_v22 = vld [vmem:[#allocation15 + $0x158] sm:$0xff] }
 0x8fd   : > { %9665 = vmatmul.mubr.msk.f32.gmra.mrb[68].mxu0 %vm6485_vm11, %v6479_v19  ;;  %11406 = vmatprep.subr.bf16.mxu0 %v11405_v24  ;;  %v6312_v24 = vld [vmem:[#allocation15 + $0xd8] sm:$0xff] }
 0x8fe   : > { %9671 = vmatmul.mubr.msk.f32.gmra.mrb[80].mxu1 %vm6485_vm11, %v6479_v19  ;;  %11670 = vmatprep.subr.bf16.mxu1 %v11669_v47  ;;  %v6301_v19 = vld [vmem:[#allocation15 + $0x80] sm:$0xff]  ;;  %v11687_v47 = vpack.c.bf16 %v7091_v31, %v7089_v14  ;;  %v11425_v3 = vpack.c.bf16 %v6312_v24, %v6310_v49  ;;  %v7110_v14 = vld [vmem:[#allocation15 + $0x9b8] sm:$0xff]  ;;  %v11439_v31 = vpack.c.bf16 %v6323_v23, %v6321_v35  ;;  %v6342_v35 = vld [vmem:[#allocation15 + $0x1c8] sm:$0xff] }
 0x8ff   : > { %11408 = vmatpush1.bf16.msra.mxu0 %v11407_v11  ;;  %6712 = vmatprep.mubr.f32.mxu0 %v14870_v60  ;;  %v11419_v21 = vpack.c.bf16 %v6303_v20, %v6301_v19  ;;  %v7093_v11 = vld [vmem:[#allocation15 + $0x930] sm:$0xff]  ;;  %v6322_v19 = vld [vmem:[#allocation15 + $0x128] sm:$0xff]  ;;  %v6324_v20 = vld [vmem:[#allocation15 + $0x138] sm:$0xff]  ;;  %v11441_v24 = vpack.c.bf16 %v6328_v22, %v6326_v15 }
 0x900   : > { %11672 = vmatpush1.bf16.msra.mxu1 %v11671_v16  ;;  %7468 = vmatprep.mubr.f32.mxu1 %v14870_v60  ;;  %v11689_v16 = vpack.c.bf16 %v7096_v46, %v7094_v29  ;;  %v11691_v54 = vpack.c.bf16 %v7095_v48, %v7093_v11  ;;  %v11437_v45 = vpack.c.bf16 %v6324_v20, %v6322_v19  ;;  %v6325_v29 = vld [vmem:[#allocation15 + $0x140] sm:$0xff]  ;;  %v6327_v46 = vld [vmem:[#allocation15 + $0x150] sm:$0xff]  ;;  %v7114_v11 = vld [vmem:[#allocation15 + $0x9d8] sm:$0xff] }
 0x901   : > { %11410 = vmatprep.subr.bf16.mxu0 %v11409_v17  ;;  %11674 = vmatprep.subr.bf16.mxu1 %v11673_v10  ;;  %v7098_v17 = vld [vmem:[#allocation15 + $0x958] sm:$0xff]  ;;  %v7100_v10 = vld [vmem:[#allocation15 + $0x968] sm:$0xff]  ;;  %v11443_v48 = vpack.c.bf16 %v6327_v46, %v6325_v29  ;;  %v11453_v20 = vpack.c.bf16 %v6340_v44, %v6338_v51 }
 0x902   : > { %v6344_v23 = vld [vmem:[#allocation15 + $0x1d8] sm:$0xff]  ;;  %v6346_v29 = vld [vmem:[#allocation15 + $0x1e8] sm:$0xff] }
 0x903   : > { %11412 = vmatpush1.bf16.msra.mxu0 %v11411_v61  ;;  %v7097_v61 = vld [vmem:[#allocation15 + $0x950] sm:$0xff]  ;;  %v11457_v22 = vpack.c.bf16 %v6344_v23, %v6342_v35  ;;  %v6348_v46 = vld [vmem:[#allocation15 + $0x1f8] sm:$0xff] }
 0x904   : > { %11676 = vmatpush1.bf16.msra.mxu1 %v11675_v57  ;;  %11414 = vmatprep.subr.bf16.mxu0 %v11413_v53  ;;  %v11693_v57 = vpack.c.bf16 %v7100_v10, %v7098_v17  ;;  %v7099_v53 = vld [vmem:[#allocation15 + $0x960] sm:$0xff]  ;;  %v6331_v10 = vld [vmem:[#allocation15 + $0x170] sm:$0xff]  ;;  %v11461_v55 = vpack.c.bf16 %v6348_v46, %v6346_v29 }
 0x905   : > { %11678 = vmatprep.subr.bf16.mxu1 %v11677_v30  ;;  %v7104_v30 = vld [vmem:[#allocation15 + $0x988] sm:$0xff]  ;;  %v11695_v12 = vpack.c.bf16 %v7099_v53, %v7097_v61  ;;  %v6329_v17 = vld [vmem:[#allocation15 + $0x160] sm:$0xff]  ;;  %v7118_v61 = vld [vmem:[#allocation15 + $0x9f8] sm:$0xff] }
 0x906   : > { %v11447_v53 = vpack.c.bf16 %v6331_v10, %v6329_v17  ;;  %v6350_v17 = vld [vmem:[#allocation15 + $0x208] sm:$0xff]  ;;  %v6352_v10 = vld [vmem:[#allocation15 + $0x218] sm:$0xff] }
 0x907   : > { %11416 = vmatpush1.bf16.msra.mxu0 %v11415_v32  ;;  %v7101_v32 = vld [vmem:[#allocation15 + $0x970] sm:$0xff]  ;;  %v11465_v40 = vpack.c.bf16 %v6352_v10, %v6350_v17 }
 0x908   : > { %11680 = vmatpush1.bf16.msra.mxu1 %v11679_v2  ;;  %11418 = vmatprep.subr.bf16.mxu0 %v11417_v41  ;;  %v11697_v2 = vpack.c.bf16 %v7104_v30, %v7102_v33  ;;  %v7103_v41 = vld [vmem:[#allocation15 + $0x980] sm:$0xff]  ;;  %v6335_v30 = vld [vmem:[#allocation15 + $0x190] sm:$0xff] }
 0x909   : > { %11682 = vmatprep.subr.bf16.mxu1 %v11681_v9  ;;  %v7108_v9 = vld [vmem:[#allocation15 + $0x9a8] sm:$0xff]  ;;  %v11699_v25 = vpack.c.bf16 %v7103_v41, %v7101_v32  ;;  %v6333_v33 = vld [vmem:[#allocation15 + $0x180] sm:$0xff]  ;;  %v7122_v32 = vld [vmem:[#allocation15 + $0xa18] sm:$0xff] }
 0x90a   : > { %v11451_v41 = vpack.c.bf16 %v6335_v30, %v6333_v33  ;;  %v6354_v33 = vld [vmem:[#allocation15 + $0x228] sm:$0xff]  ;;  %v6356_v30 = vld [vmem:[#allocation15 + $0x238] sm:$0xff] }
 0x90b   : > { %11420 = vmatpush1.bf16.msra.mxu0 %v11419_v21  ;;  %v7105_v21 = vld [vmem:[#allocation15 + $0x990] sm:$0xff]  ;;  %v11469_v44 = vpack.c.bf16 %v6356_v30, %v6354_v33 }
 0x90c   : > { %11684 = vmatpush1.bf16.msra.mxu1 %v11683_v8  ;;  %11422 = vmatprep.subr.bf16.mxu0 %v11421_v50  ;;  %v11701_v8 = vpack.c.bf16 %v7108_v9, %v7106_v27  ;;  %v7107_v50 = vld [vmem:[#allocation15 + $0x9a0] sm:$0xff]  ;;  %v6339_v9 = vld [vmem:[#allocation15 + $0x1b0] sm:$0xff] }
 0x90d   : > { %11686 = vmatprep.subr.bf16.mxu1 %v11685_v38  ;;  %v7112_v38 = vld [vmem:[#allocation15 + $0x9c8] sm:$0xff]  ;;  %v11703_v49 = vpack.c.bf16 %v7107_v50, %v7105_v21  ;;  %v6337_v27 = vld [vmem:[#allocation15 + $0x1a0] sm:$0xff]  ;;  %v7126_v21 = vld [vmem:[#allocation15 + $0xa38] sm:$0xff] }
 0x90e   : > { %v11455_v50 = vpack.c.bf16 %v6339_v9, %v6337_v27  ;;  %v6358_v27 = vld [vmem:[#allocation15 + $0x248] sm:$0xff]  ;;  %v6360_v9 = vld [vmem:[#allocation15 + $0x258] sm:$0xff] }
 0x90f   : > { %11424 = vmatpush1.bf16.msra.mxu0 %v11423_v42  ;;  %v7109_v42 = vld [vmem:[#allocation15 + $0x9b0] sm:$0xff]  ;;  %v11473_v23 = vpack.c.bf16 %v6360_v9, %v6358_v27  ;;  %v6806_v27 = vld [vmem:[#allocation15 + $0x5b8] sm:$0xff] }
 0x910   : > { %11688 = vmatpush1.bf16.msra.mxu1 %v11687_v47  ;;  %11426 = vmatprep.subr.bf16.mxu0 %v11425_v3  ;;  %v11705_v47 = vpack.c.bf16 %v7112_v38, %v7110_v14  ;;  %v7111_v3 = vld [vmem:[#allocation15 + $0x9c0] sm:$0xff]  ;;  %v6343_v38 = vld [vmem:[#allocation15 + $0x1d0] sm:$0xff]  ;;  %v7560_v9 = vld [vmem:[#allocation15 + $0xe18] sm:$0xff] }
 0x911   : > { %11690 = vmatprep.subr.bf16.mxu1 %v11689_v16  ;;  %v7116_v16 = vld [vmem:[#allocation15 + $0x9e8] sm:$0xff]  ;;  %v11707_v4 = vpack.c.bf16 %v7111_v3, %v7109_v42  ;;  %v6341_v14 = vld [vmem:[#allocation15 + $0x1c0] sm:$0xff]  ;;  %v7130_v42 = vld [vmem:[#allocation15 + $0xa58] sm:$0xff] }
 0x912   : > { %v11459_v3 = vpack.c.bf16 %v6343_v38, %v6341_v14  ;;  %v6362_v14 = vld [vmem:[#allocation15 + $0x268] sm:$0xff]  ;;  %v6364_v38 = vld [vmem:[#allocation15 + $0x278] sm:$0xff] }
 0x913   : > { %11428 = vmatpush1.bf16.msra.mxu0 %v11427_v56  ;;  %v7113_v56 = vld [vmem:[#allocation15 + $0x9d0] sm:$0xff]  ;;  %v11477_v46 = vpack.c.bf16 %v6364_v38, %v6362_v14  ;;  %v6808_v14 = vld [vmem:[#allocation15 + $0x5c8] sm:$0xff]  ;;  %v6810_v38 = vld [vmem:[#allocation15 + $0x5d8] sm:$0xff] }
 0x914   : > { %11692 = vmatpush1.bf16.msra.mxu1 %v11691_v54  ;;  %11430 = vmatprep.subr.bf16.mxu0 %v11429_v5  ;;  %v11709_v54 = vpack.c.bf16 %v7116_v16, %v7114_v11  ;;  %v7115_v5 = vld [vmem:[#allocation15 + $0x9e0] sm:$0xff]  ;;  %v6347_v16 = vld [vmem:[#allocation15 + $0x1f0] sm:$0xff] }
 0x915   : > { %11694 = vmatprep.subr.bf16.mxu1 %v11693_v57  ;;  %v7120_v57 = vld [vmem:[#allocation15 + $0xa08] sm:$0xff]  ;;  %v11711_v36 = vpack.c.bf16 %v7115_v5, %v7113_v56  ;;  %v6345_v11 = vld [vmem:[#allocation15 + $0x1e0] sm:$0xff]  ;;  %v7134_v56 = vld [vmem:[#allocation15 + $0xa78] sm:$0xff] }
 0x916   : > { %v11463_v5 = vpack.c.bf16 %v6347_v16, %v6345_v11  ;;  %v6366_v11 = vld [vmem:[#allocation15 + $0x288] sm:$0xff]  ;;  %v6368_v16 = vld [vmem:[#allocation15 + $0x298] sm:$0xff] }
 0x917   : > { %11432 = vmatpush1.bf16.msra.mxu0 %v11431_v13  ;;  %v7117_v13 = vld [vmem:[#allocation15 + $0x9f0] sm:$0xff]  ;;  %v11481_v10 = vpack.c.bf16 %v6368_v16, %v6366_v11 }
 0x918   : > { %11696 = vmatpush1.bf16.msra.mxu1 %v11695_v12  ;;  %11434 = vmatprep.subr.bf16.mxu0 %v11433_v63  ;;  %v11713_v12 = vpack.c.bf16 %v7120_v57, %v7118_v61  ;;  %v7119_v63 = vld [vmem:[#allocation15 + $0xa00] sm:$0xff] }
 0x919   : > { %11698 = vmatprep.subr.bf16.mxu1 %v11697_v2  ;;  %v7124_v2 = vld [vmem:[#allocation15 + $0xa28] sm:$0xff]  ;;  %v11715_v19 = vpack.c.bf16 %v7119_v63, %v7117_v13  ;;  %v6349_v57 = vld [vmem:[#allocation15 + $0x200] sm:$0xff]  ;;  %v7138_v13 = vld [vmem:[#allocation15 + $0xa98] sm:$0xff] }
 0x91b   : > { %11436 = vmatpush1.bf16.msra.mxu0 %v11435_v0  ;;  %v7121_v0 = vld [vmem:[#allocation15 + $0xa10] sm:$0xff] }
 0x91c   : > { %11700 = vmatpush1.bf16.msra.mxu1 %v11699_v25  ;;  %11438 = vmatprep.subr.bf16.mxu0 %v11437_v45  ;;  %v11717_v25 = vpack.c.bf16 %v7124_v2, %v7122_v32  ;;  %v7123_v45 = vld [vmem:[#allocation15 + $0xa20] sm:$0xff]  ;;  %v6355_v2 = vld [vmem:[#allocation15 + $0x230] sm:$0xff] }
 0x91d   : > { %11702 = vmatprep.subr.bf16.mxu1 %v11701_v8  ;;  %v7128_v8 = vld [vmem:[#allocation15 + $0xa48] sm:$0xff]  ;;  %v11719_v15 = vpack.c.bf16 %v7123_v45, %v7121_v0  ;;  %v6353_v32 = vld [vmem:[#allocation15 + $0x220] sm:$0xff]  ;;  %v7142_v0 = vld [vmem:[#allocation15 + $0xab8] sm:$0xff] }
 0x91e   : > { %v11471_v45 = vpack.c.bf16 %v6355_v2, %v6353_v32 }
 0x91f   : > { %11440 = vmatpush1.bf16.msra.mxu0 %v11439_v31  ;;  %v7125_v31 = vld [vmem:[#allocation15 + $0xa30] sm:$0xff] }
 0x920   : > { %11704 = vmatpush1.bf16.msra.mxu1 %v11703_v49  ;;  %11442 = vmatprep.subr.bf16.mxu0 %v11441_v24  ;;  %v11721_v49 = vpack.c.bf16 %v7128_v8, %v7126_v21  ;;  %v7127_v24 = vld [vmem:[#allocation15 + $0xa40] sm:$0xff]  ;;  %v6359_v8 = vld [vmem:[#allocation15 + $0x250] sm:$0xff] }
 0x921   : > { %11706 = vmatprep.subr.bf16.mxu1 %v11705_v47  ;;  %v7132_v47 = vld [vmem:[#allocation15 + $0xa68] sm:$0xff]  ;;  %v11723_v6 = vpack.c.bf16 %v7127_v24, %v7125_v31  ;;  %v6357_v21 = vld [vmem:[#allocation15 + $0x240] sm:$0xff]  ;;  %v7146_v31 = vld [vmem:[#allocation15 + $0xad8] sm:$0xff] }
 0x922   : > { %v11475_v24 = vpack.c.bf16 %v6359_v8, %v6357_v21  ;;  %v7561_v21 = vld [vmem:[#allocation15 + $0xe20] sm:$0xff]  ;;  %v7157_v8 = vld [vmem:[#allocation15 + $0xb30] sm:$0xff] }
 0x923   : > { %11444 = vmatpush1.bf16.msra.mxu0 %v11443_v48  ;;  %v7129_v48 = vld [vmem:[#allocation15 + $0xa50] sm:$0xff] }
 0x924   : > { %11708 = vmatpush1.bf16.msra.mxu1 %v11707_v4  ;;  %11446 = vmatprep.subr.bf16.mxu0 %v11445_v59  ;;  %v11725_v4 = vpack.c.bf16 %v7132_v47, %v7130_v42  ;;  %v7131_v59 = vld [vmem:[#allocation15 + $0xa60] sm:$0xff]  ;;  %v6363_v47 = vld [vmem:[#allocation15 + $0x270] sm:$0xff] }
 0x925   : > { %11710 = vmatprep.subr.bf16.mxu1 %v11709_v54  ;;  %v7136_v54 = vld [vmem:[#allocation15 + $0xa88] sm:$0xff]  ;;  %v11727_v39 = vpack.c.bf16 %v7131_v59, %v7129_v48  ;;  %v6361_v42 = vld [vmem:[#allocation15 + $0x260] sm:$0xff]  ;;  %v7150_v48 = vld [vmem:[#allocation15 + $0xaf8] sm:$0xff] }
 0x926   : > { %v11729_v61 = vpack.c.bf16 %v7136_v54, %v7134_v56  ;;  %v11479_v59 = vpack.c.bf16 %v6363_v47, %v6361_v42  ;;  %v6365_v56 = vld [vmem:[#allocation15 + $0x280] sm:$0xff]  ;;  %v6367_v54 = vld [vmem:[#allocation15 + $0x290] sm:$0xff] }
 0x927   : > { %11448 = vmatpush1.bf16.msra.mxu0 %v11447_v53  ;;  %v6351_v53 = vld [vmem:[#allocation15 + $0x210] sm:$0xff]  ;;  %v7565_v47 = vld [vmem:[#allocation15 + $0xe40] sm:$0xff] }
 0x928   : > { %11712 = vmatpush1.bf16.msra.mxu1 %v11711_v36  ;;  %11450 = vmatprep.subr.bf16.mxu0 %v11449_v34  ;;  %v7133_v36 = vld [vmem:[#allocation15 + $0xa70] sm:$0xff]  ;;  %v7135_v34 = vld [vmem:[#allocation15 + $0xa80] sm:$0xff]  ;;  %v11467_v63 = vpack.c.bf16 %v6351_v53, %v6349_v57  ;;  %v6372_v57 = vld [vmem:[#allocation15 + $0x2b8] sm:$0xff] }
 0x929   : > { %11714 = vmatprep.subr.bf16.mxu1 %v11713_v12  ;;  %v7140_v12 = vld [vmem:[#allocation15 + $0xaa8] sm:$0xff]  ;;  %v11731_v51 = vpack.c.bf16 %v7135_v34, %v7133_v36  ;;  %v7154_v53 = vld [vmem:[#allocation15 + $0xb18] sm:$0xff]  ;;  %v11483_v34 = vpack.c.bf16 %v6367_v54, %v6365_v56  ;;  %v7563_v42 = vld [vmem:[#allocation15 + $0xe30] sm:$0xff] }
 0x92a   : > { %v7156_v36 = vld [vmem:[#allocation15 + $0xb28] sm:$0xff]  ;;  %v6813_v56 = vld [vmem:[#allocation15 + $0x5f0] sm:$0xff] }
 0x92b   : > { %11452 = vmatpush1.bf16.msra.mxu0 %v11451_v41  ;;  %v7137_v41 = vld [vmem:[#allocation15 + $0xa90] sm:$0xff] }
 0x92c   : > { %11716 = vmatpush1.bf16.msra.mxu1 %v11715_v19  ;;  %11454 = vmatprep.subr.bf16.mxu0 %v11453_v20  ;;  %v11733_v19 = vpack.c.bf16 %v7140_v12, %v7138_v13  ;;  %v7139_v20 = vld [vmem:[#allocation15 + $0xaa0] sm:$0xff]  ;;  %v6371_v12 = vld [vmem:[#allocation15 + $0x2b0] sm:$0xff] }
 0x92d   : > { %11718 = vmatprep.subr.bf16.mxu1 %v11717_v25  ;;  %v7144_v25 = vld [vmem:[#allocation15 + $0xac8] sm:$0xff]  ;;  %v11735_v35 = vpack.c.bf16 %v7139_v20, %v7137_v41  ;;  %v6369_v13 = vld [vmem:[#allocation15 + $0x2a0] sm:$0xff]  ;;  %v7567_v54 = vld [vmem:[#allocation15 + $0xe50] sm:$0xff] }
 0x92e   : > { %v11487_v32 = vpack.c.bf16 %v6371_v12, %v6369_v13  ;;  %v6374_v41 = vld [vmem:[#allocation15 + $0x2c8] sm:$0xff]  ;;  %v6815_v13 = vld [vmem:[#allocation15 + $0x600] sm:$0xff]  ;;  %v6817_v12 = vld [vmem:[#allocation15 + $0x610] sm:$0xff] }
 0x92f   : > { %11456 = vmatpush1.bf16.msra.mxu0 %v11455_v50  ;;  %v7141_v50 = vld [vmem:[#allocation15 + $0xab0] sm:$0xff]  ;;  %v6804_v20 = vld [vmem:[#allocation15 + $0x5a8] sm:$0xff] }
 0x930   : > { %11720 = vmatpush1.bf16.msra.mxu1 %v11719_v15  ;;  %11458 = vmatprep.subr.bf16.mxu0 %v11457_v22  ;;  %v11737_v15 = vpack.c.bf16 %v7144_v25, %v7142_v0  ;;  %v7143_v22 = vld [vmem:[#allocation15 + $0xac0] sm:$0xff]  ;;  %v7562_v0 = vld [vmem:[#allocation15 + $0xe28] sm:$0xff] }
 0x931   : > { %11722 = vmatprep.subr.bf16.mxu1 %v11721_v49  ;;  %v7148_v49 = vld [vmem:[#allocation15 + $0xae8] sm:$0xff]  ;;  %v11739_v29 = vpack.c.bf16 %v7143_v22, %v7141_v50  ;;  %v6803_v25 = vld [vmem:[#allocation15 + $0x5a0] sm:$0xff]  ;;  %v11489_v50 = vpack.c.bf16 %v6806_v27, %v6804_v20  ;;  %v11503_v20 = vpack.c.bf16 %v6817_v12, %v6815_v13  ;;  %v6838_v13 = vld [vmem:[#allocation15 + $0x6b8] sm:$0xff] }
 0x932   : > { %v7592_v12 = vld [vmem:[#allocation15 + $0xf18] sm:$0xff] }
 0x933   : > { %11460 = vmatpush1.bf16.msra.mxu0 %v11459_v3  ;;  %v7145_v3 = vld [vmem:[#allocation15 + $0xad0] sm:$0xff] }
 0x934   : > { %11724 = vmatpush1.bf16.msra.mxu1 %v11723_v6  ;;  %11462 = vmatprep.subr.bf16.mxu0 %v11461_v55  ;;  %v11741_v6 = vpack.c.bf16 %v7148_v49, %v7146_v31  ;;  %v7147_v55 = vld [vmem:[#allocation15 + $0xae0] sm:$0xff]  ;;  %v7564_v31 = vld [vmem:[#allocation15 + $0xe38] sm:$0xff] }
 0x935   : > { %11726 = vmatprep.subr.bf16.mxu1 %v11725_v4  ;;  %v7152_v4 = vld [vmem:[#allocation15 + $0xb08] sm:$0xff]  ;;  %v11743_v17 = vpack.c.bf16 %v7147_v55, %v7145_v3  ;;  %v11493_v3 = vpack.c.bf16 %v6810_v38, %v6808_v14  ;;  %v6814_v55 = vld [vmem:[#allocation15 + $0x5f8] sm:$0xff] }
 0x937   : > { %11464 = vmatpush1.bf16.msra.mxu0 %v11463_v5  ;;  %v7149_v5 = vld [vmem:[#allocation15 + $0xaf0] sm:$0xff] }
 0x938   : > { %11728 = vmatpush1.bf16.msra.mxu1 %v11727_v39  ;;  %11466 = vmatprep.subr.bf16.mxu0 %v11465_v40  ;;  %v11745_v39 = vpack.c.bf16 %v7152_v4, %v7150_v48  ;;  %v7151_v40 = vld [vmem:[#allocation15 + $0xb00] sm:$0xff]  ;;  %v14924_v48 = vrot.slane %v14878_v18, 2  ;;  %v7568_v4 = vld [vmem:[#allocation15 + $0xe58] sm:$0xff] }
 0x939   : > { %11730 = vmatprep.subr.bf16.mxu1 %v11729_v61  ;;  %v6370_v61 = vld [vmem:[#allocation15 + $0x2a8] sm:$0xff]  ;;  %v11747_v33 = vpack.c.bf16 %v7151_v40, %v7149_v5  ;;  %v6896_v5 = vrot.slane %v14870_v60, 2  ;;  %v7569_v40 = vld [vmem:[#allocation15 + $0xe60] sm:$0xff] }
 0x93a   : > { %6713 = vmatmul.mubr.f32.vlgmr.msra.gmra.mrb[66].mxu0 %v14874_v26  ;;  %v11485_v30 = vpack.c.bf16 %v6372_v57, %v6370_v61  ;;  %v6818_v61 = vld [vmem:[#allocation15 + $0x618] sm:$0xff]  ;;  %v11763_v60 = vpack.c.bf16 %v7569_v40, %v7567_v54  ;;  %v6832_v54 = vld [vmem:[#allocation15 + $0x688] sm:$0xff] }
 0x93b   : > { %7469 = vmatmul.mubr.f32.vlgmr.msra.gmra.mrb[78].mxu1 %v14874_v26  ;;  %6718 = vmatprep.mubr.f32.mxu0 %v14878_v18  ;;  %v7590_v40 = vld [vmem:[#allocation15 + $0xf08] sm:$0xff] }
 0x93c   : > { %11468 = vmatpush1.bf16.msra.mxu0 %v11467_v63  ;;  %7474 = vmatprep.mubr.f32.mxu1 %v14878_v18  ;;  %v11749_v63 = vpack.c.bf16 %v7156_v36, %v7154_v53  ;;  %v6816_v18 = vld [vmem:[#allocation15 + $0x608] sm:$0xff]  ;;  %v7572_v53 = vld [vmem:[#allocation15 + $0xe78] sm:$0xff] }
 0x93d   : > { %11732 = vmatpush1.bf16.msra.mxu1 %v11731_v51  ;;  %11470 = vmatprep.subr.bf16.mxu0 %v11469_v44  ;;  %v7153_v51 = vld [vmem:[#allocation15 + $0xb10] sm:$0xff]  ;;  %v7155_v44 = vld [vmem:[#allocation15 + $0xb20] sm:$0xff]  ;;  %v7574_v36 = vld [vmem:[#allocation15 + $0xe88] sm:$0xff] }
 0x93e   : > { %6719 = vmatmul.mubr.f32.gmra.mrb[68].mxu0 %v14876_v52  ;;  %11734 = vmatprep.subr.bf16.mxu1 %v11733_v19  ;;  %v11751_v2 = vpack.c.bf16 %v7155_v44, %v7153_v51  ;;  %v7158_v19 = vld [vmem:[#allocation15 + $0xb38] sm:$0xff]  ;;  %v11765_v51 = vpack.c.bf16 %v7574_v36, %v7572_v53  ;;  %v7573_v44 = vld [vmem:[#allocation15 + $0xe80] sm:$0xff]  ;;  %v6833_v36 = vld [vmem:[#allocation15 + $0x690] sm:$0xff] }
 0x93f   : > { %7475 = vmatmul.mubr.f32.gmra.mrb[80].mxu1 %v14876_v52  ;;  %6789 = vmatprep.mubr.f32.mxu0 %v15298_v37  ;;  %v6831_v53 = vld [vmem:[#allocation15 + $0x680] sm:$0xff] }
 0x940   : > { %11472 = vmatpush1.bf16.msra.mxu0 %v11471_v45  ;;  %7545 = vmatprep.mubr.f32.mxu1 %v15298_v37  ;;  %v6805_v45 = vld [vmem:[#allocation15 + $0x5b0] sm:$0xff] }
 0x941   : > { %11736 = vmatpush1.bf16.msra.mxu1 %v11735_v35  ;;  %11474 = vmatprep.subr.bf16.mxu0 %v11473_v23  ;;  %v6373_v35 = vld [vmem:[#allocation15 + $0x2c0] sm:$0xff]  ;;  %v7559_v23 = vld [vmem:[#allocation15 + $0xe10] sm:$0xff]  ;;  %v11491_v22 = vpack.c.bf16 %v6805_v45, %v6803_v25 }
 0x942   : > { %11738 = vmatprep.subr.bf16.mxu1 %v11737_v15  ;;  %v11753_v15 = vpack.c.bf16 %v7562_v0, %v7560_v9  ;;  %v11755_v49 = vpack.c.bf16 %v7561_v21, %v7559_v23  ;;  %v6819_v0 = vld [vmem:[#allocation15 + $0x620] sm:$0xff]  ;;  %v6821_v25 = vld [vmem:[#allocation15 + $0x630] sm:$0xff]  ;;  %v6824_v21 = vld [vmem:[#allocation15 + $0x648] sm:$0xff] }
 0x943   : > { %v7575_v45 = vld [vmem:[#allocation15 + $0xe90] sm:$0xff]  ;;  %v7577_v23 = vld [vmem:[#allocation15 + $0xea0] sm:$0xff] }
 0x944   : > { %11476 = vmatpush1.bf16.msra.mxu0 %v11475_v24  ;;  %v7566_v24 = vld [vmem:[#allocation15 + $0xe48] sm:$0xff]  ;;  %v11771_v14 = vpack.c.bf16 %v7577_v23, %v7575_v45 }
 0x945   : > { %11740 = vmatpush1.bf16.msra.mxu1 %v11739_v29  ;;  %11478 = vmatprep.subr.bf16.mxu0 %v11477_v46  ;;  %v6807_v29 = vld [vmem:[#allocation15 + $0x5c0] sm:$0xff]  ;;  %v6809_v46 = vld [vmem:[#allocation15 + $0x5d0] sm:$0xff]  ;;  %v11757_v11 = vpack.c.bf16 %v7566_v24, %v7564_v31  ;;  %v7598_v45 = vld [vmem:[#allocation15 + $0xf48] sm:$0xff] }
 0x946   : > { %11742 = vmatprep.subr.bf16.mxu1 %v11741_v6  ;;  %v6812_v6 = vld [vmem:[#allocation15 + $0x5e8] sm:$0xff]  ;;  %v11495_v16 = vpack.c.bf16 %v6809_v46, %v6807_v29  ;;  %v6823_v31 = vld [vmem:[#allocation15 + $0x640] sm:$0xff]  ;;  %v7579_v24 = vld [vmem:[#allocation15 + $0xeb0] sm:$0xff] }
 0x947   : > { %v7581_v46 = vld [vmem:[#allocation15 + $0xec0] sm:$0xff] }
 0x948   : > { %11480 = vmatpush1.bf16.msra.mxu0 %v11479_v59  ;;  %v7570_v59 = vld [vmem:[#allocation15 + $0xe68] sm:$0xff] }
 0x949   : > { %11744 = vmatpush1.bf16.msra.mxu1 %v11743_v17  ;;  %11482 = vmatprep.subr.bf16.mxu0 %v11481_v10  ;;  %v11759_v17 = vpack.c.bf16 %v7565_v47, %v7563_v42  ;;  %v6811_v10 = vld [vmem:[#allocation15 + $0x5e0] sm:$0xff]  ;;  %v11761_v57 = vpack.c.bf16 %v7570_v59, %v7568_v4  ;;  %v6828_v42 = vld [vmem:[#allocation15 + $0x668] sm:$0xff]  ;;  %v6830_v47 = vld [vmem:[#allocation15 + $0x678] sm:$0xff] }
 0x94a   : > { %11746 = vmatprep.subr.bf16.mxu1 %v11745_v39  ;;  %v11497_v39 = vpack.c.bf16 %v6814_v55, %v6812_v6  ;;  %v7586_v6 = vld [vmem:[#allocation15 + $0xee8] sm:$0xff]  ;;  %v6827_v4 = vld [vmem:[#allocation15 + $0x660] sm:$0xff]  ;;  %v6829_v59 = vld [vmem:[#allocation15 + $0x670] sm:$0xff] }
 0x94c   : > { %11484 = vmatpush1.bf16.msra.mxu0 %v11483_v34  ;;  %v6898_v34 = vsel %vm1461_vm3, %v6896_v5, %v14924_v48  ;;  %v6834_v5 = vld [vmem:[#allocation15 + $0x698] sm:$0xff] }
 0x94d   : > { %11748 = vmatpush1.bf16.msra.mxu1 %v11747_v33  ;;  %11486 = vmatprep.subr.bf16.mxu0 %v11485_v30  ;;  %v11499_v33 = vpack.c.bf16 %v6813_v56, %v6811_v10  ;;  %v11501_v30 = vpack.c.bf16 %v6818_v61, %v6816_v18  ;;  %v7585_v56 = vld [vmem:[#allocation15 + $0xee0] sm:$0xff]  ;;  %v11515_v18 = vpack.c.bf16 %v6829_v59, %v6827_v4  ;;  %v6850_v4 = vld [vmem:[#allocation15 + $0x718] sm:$0xff] }
 0x94e   : > { %11750 = vmatprep.subr.bf16.mxu1 %v11749_v63  ;;  %v7571_v63 = vld [vmem:[#allocation15 + $0xe70] sm:$0xff]  ;;  %v7604_v59 = vld [vmem:[#allocation15 + $0xf78] sm:$0xff] }
 0x94f   : > { %v11767_v27 = vpack.c.bf16 %v7573_v44, %v7571_v63  ;;  %v7594_v63 = vld [vmem:[#allocation15 + $0xf28] sm:$0xff] }
 0x950   : > { %11488 = vmatpush1.bf16.msra.mxu0 %v11487_v32  ;;  %v6820_v32 = vld [vmem:[#allocation15 + $0x628] sm:$0xff] }
 0x951   : > { %11752 = vmatpush1.bf16.msra.mxu1 %v11751_v2  ;;  %6749 = vmatprep.subr.mxu0 %v6374_v41  ;;  %v6822_v2 = vld [vmem:[#allocation15 + $0x638] sm:$0xff] }
 0x952   : > { %7505 = vmatprep.subr.mxu1 %v7158_v19  ;;  %v7576_v41 = vld [vmem:[#allocation15 + $0xe98] sm:$0xff]  ;;  %v7578_v19 = vld [vmem:[#allocation15 + $0xea8] sm:$0xff]  ;;  %v11505_v9 = vpack.c.bf16 %v6822_v2, %v6820_v32  ;;  %v6835_v2 = vld [vmem:[#allocation15 + $0x6a0] sm:$0xff] }
 0x954   : > { %6750 = vmatpush1.msra.mxu0 %v6373_v35  ;;  %v11769_v35 = vpack.c.bf16 %v7578_v19, %v7576_v41  ;;  %v6837_v41 = vld [vmem:[#allocation15 + $0x6b0] sm:$0xff] }
 0x955   : > { %7506 = vmatpush1.msra.mxu1 %v7157_v8  ;;  %9666 = vmatmul.mubr.msk.f32.vlgmr.msra.gmra.mrb[66].mxu0 %vm6485_vm11, %v14898_v58  ;;  %v6826_v8 = vld [vmem:[#allocation15 + $0x658] sm:$0xff]  ;;  %v7591_v19 = vld [vmem:[#allocation15 + $0xf10] sm:$0xff] }
 0x956   : > { %11490 = vmatprep.subr.bf16.mxu0 %v11489_v50  ;;  %9672 = vmatmul.mubr.msk.f32.vlgmr.msra.gmra.mrb[78].mxu1 %vm6485_vm11, %v14898_v58  ;;  %v7580_v50 = vld [vmem:[#allocation15 + $0xeb8] sm:$0xff]  ;;  %v11509_v38 = vpack.c.bf16 %v6826_v8, %v6824_v21  ;;  %v6839_v8 = vld [vmem:[#allocation15 + $0x6c0] sm:$0xff] }
 0x957   : > { %11754 = vmatprep.subr.bf16.mxu1 %v11753_v15  ;;  %11492 = vmatpush1.bf16.msra.mxu0 %v11491_v22  ;;  %v7582_v15 = vld [vmem:[#allocation15 + $0xec8] sm:$0xff]  ;;  %v11507_v22 = vpack.c.bf16 %v6821_v25, %v6819_v0  ;;  %v6842_v0 = vld [vmem:[#allocation15 + $0x6d8] sm:$0xff] }
 0x958   : > { %11756 = vmatpush1.bf16.msra.mxu1 %v11755_v49  ;;  %6795 = vmatprep.mubr.f32.mxu0 %v15298_v37  ;;  %v6825_v49 = vld [vmem:[#allocation15 + $0x650] sm:$0xff]  ;;  %v11773_v29 = vpack.c.bf16 %v7582_v15, %v7580_v50  ;;  %v7596_v25 = vld [vmem:[#allocation15 + $0xf38] sm:$0xff] }
 0x959   : > { %7551 = vmatprep.mubr.f32.mxu1 %v15298_v37  ;;  %9667 = vmatmul.mubr.msk.f32.gmra.mrb[68].mxu0 %vm6485_vm11, %v14896_v1  ;;  %v11511_v55 = vpack.c.bf16 %v6825_v49, %v6823_v31  ;;  %v6841_v50 = vld [vmem:[#allocation15 + $0x6d0] sm:$0xff]  ;;  %v6846_v31 = vld [vmem:[#allocation15 + $0x6f8] sm:$0xff] }
 0x95a   : > { %11494 = vmatprep.subr.bf16.mxu0 %v11493_v3  ;;  %9673 = vmatmul.mubr.msk.f32.gmra.mrb[80].mxu1 %vm6485_vm11, %v14896_v1  ;;  %v7584_v3 = vld [vmem:[#allocation15 + $0xed8] sm:$0xff]  ;;  %v7595_v15 = vld [vmem:[#allocation15 + $0xf30] sm:$0xff] }
 0x95b   : > { %11758 = vmatprep.subr.bf16.mxu1 %v11757_v11  ;;  %11496 = vmatpush1.bf16.msra.mxu0 %v11495_v16  ;;  %v11775_v11 = vpack.c.bf16 %v7581_v46, %v7579_v24  ;;  %v11513_v16 = vpack.c.bf16 %v6830_v47, %v6828_v42  ;;  %v11777_v10 = vpack.c.bf16 %v7586_v6, %v7584_v3  ;;  %v7600_v49 = vld [vmem:[#allocation15 + $0xf58] sm:$0xff]  ;;  %v7602_v24 = vld [vmem:[#allocation15 + $0xf68] sm:$0xff]  ;;  %v6843_v47 = vld [vmem:[#allocation15 + $0x6e0] sm:$0xff] }
 0x95c   : > { %6974 = vmatprep.mubr.f32.mxu0 %v6898_v34  ;;  %11760 = vmatpush1.bf16.msra.mxu1 %v11759_v17  ;;  %v7583_v17 = vld [vmem:[#allocation15 + $0xed0] sm:$0xff] }
 0x95d   : > { %7713 = vmatprep.mubr.f32.mxu1 %v6898_v34  ;;  %11498 = vmatprep.subr.bf16.mxu0 %v11497_v39  ;;  %v7588_v39 = vld [vmem:[#allocation15 + $0xef8] sm:$0xff]  ;;  %v11779_v61 = vpack.c.bf16 %v7585_v56, %v7583_v17  ;;  %v7587_v34 = vld [vmem:[#allocation15 + $0xef0] sm:$0xff]  ;;  %v7606_v17 = vld [vmem:[#allocation15 + $0xf88] sm:$0xff] }
 0x95e   : > { %11762 = vmatprep.subr.bf16.mxu1 %v11761_v57  ;;  %v11517_v57 = vpack.c.bf16 %v6834_v5, %v6832_v54  ;;  %v6845_v3 = vld [vmem:[#allocation15 + $0x6f0] sm:$0xff]  ;;  %v6847_v5 = vld [vmem:[#allocation15 + $0x700] sm:$0xff] }
 0x95f   : > { %11500 = vmatpush1.bf16.msra.mxu0 %v11499_v33  ;;  %v11781_v33 = vpack.c.bf16 %v7590_v40, %v7588_v39  ;;  %v7599_v6 = vld [vmem:[#allocation15 + $0xf50] sm:$0xff] }
 0x960   : > { %11764 = vmatpush1.bf16.msra.mxu1 %v11763_v60  ;;  %11502 = vmatprep.subr.bf16.mxu0 %v11501_v30  ;;  %v7589_v60 = vld [vmem:[#allocation15 + $0xf00] sm:$0xff]  ;;  %v6836_v30 = vld [vmem:[#allocation15 + $0x6a8] sm:$0xff]  ;;  %v6849_v39 = vld [vmem:[#allocation15 + $0x710] sm:$0xff] }
 0x961   : > { %11766 = vmatprep.subr.bf16.mxu1 %v11765_v51  ;;  %v11519_v51 = vpack.c.bf16 %v6833_v36, %v6831_v53  ;;  %v11783_v44 = vpack.c.bf16 %v7589_v60, %v7587_v34  ;;  %v11521_v32 = vpack.c.bf16 %v6838_v13, %v6836_v30  ;;  %v7603_v40 = vld [vmem:[#allocation15 + $0xf70] sm:$0xff]  ;;  %v6854_v53 = vld [vmem:[#allocation15 + $0x738] sm:$0xff]  ;;  %v7610_v34 = vld [vmem:[#allocation15 + $0xfa8] sm:$0xff] }
 0x962   : > { %v7608_v36 = vld [vmem:[#allocation15 + $0xf98] sm:$0xff]  ;;  %v6851_v13 = vld [vmem:[#allocation15 + $0x720] sm:$0xff] }
 0x963   : > { %11504 = vmatpush1.bf16.msra.mxu0 %v11503_v20  ;;  %v11785_v20 = vpack.c.bf16 %v7594_v63, %v7592_v12  ;;  %v6853_v12 = vld [vmem:[#allocation15 + $0x730] sm:$0xff] }
 0x964   : > { %11768 = vmatpush1.bf16.msra.mxu1 %v11767_v27  ;;  %11506 = vmatprep.subr.bf16.mxu0 %v11505_v9  ;;  %v7593_v27 = vld [vmem:[#allocation15 + $0xf20] sm:$0xff]  ;;  %v6840_v9 = vld [vmem:[#allocation15 + $0x6c8] sm:$0xff]  ;;  %v7607_v63 = vld [vmem:[#allocation15 + $0xf90] sm:$0xff] }
 0x965   : > { %11770 = vmatprep.subr.bf16.mxu1 %v11769_v35  ;;  %v11523_v35 = vpack.c.bf16 %v6837_v41, %v6835_v2  ;;  %v11787_v23 = vpack.c.bf16 %v7593_v27, %v7591_v19  ;;  %v11525_v21 = vpack.c.bf16 %v6842_v0, %v6840_v9  ;;  %v6858_v2 = vld [vmem:[#allocation15 + $0x758] sm:$0xff]  ;;  %v7614_v19 = vld [vmem:[#allocation15 + $0xfc8] sm:$0xff]  ;;  %v6855_v0 = vld [vmem:[#allocation15 + $0x740] sm:$0xff] }
 0x966   : > { %v7612_v41 = vld [vmem:[#allocation15 + $0xfb8] sm:$0xff] }
 0x967   : > { %11508 = vmatpush1.bf16.msra.mxu0 %v11507_v22  ;;  %v11789_v22 = vpack.c.bf16 %v7598_v45, %v7596_v25  ;;  %v6857_v25 = vld [vmem:[#allocation15 + $0x750] sm:$0xff] }
 0x968   : > { %11772 = vmatpush1.bf16.msra.mxu1 %v11771_v14  ;;  %11510 = vmatprep.subr.bf16.mxu0 %v11509_v38  ;;  %v7597_v14 = vld [vmem:[#allocation15 + $0xf40] sm:$0xff]  ;;  %v6844_v38 = vld [vmem:[#allocation15 + $0x6e8] sm:$0xff]  ;;  %v7611_v45 = vld [vmem:[#allocation15 + $0xfb0] sm:$0xff] }
 0x969   : > { %11774 = vmatprep.subr.bf16.mxu1 %v11773_v29  ;;  %v11527_v29 = vpack.c.bf16 %v6841_v50, %v6839_v8  ;;  %v11791_v46 = vpack.c.bf16 %v7597_v14, %v7595_v15  ;;  %v11529_v42 = vpack.c.bf16 %v6846_v31, %v6844_v38  ;;  %v6862_v8 = vld [vmem:[#allocation15 + $0x778] sm:$0xff]  ;;  %v7618_v15 = vld [vmem:[#allocation15 + $0xfe8] sm:$0xff]  ;;  %v6859_v31 = vld [vmem:[#allocation15 + $0x760] sm:$0xff] }
 0x96a   : > { %v7616_v50 = vld [vmem:[#allocation15 + $0xfd8] sm:$0xff] }
 0x96b   : > { %11512 = vmatpush1.bf16.msra.mxu0 %v11511_v55  ;;  %v11793_v55 = vpack.c.bf16 %v7602_v24, %v7600_v49  ;;  %v6861_v49 = vld [vmem:[#allocation15 + $0x770] sm:$0xff] }
 0x96c   : > { %11776 = vmatpush1.bf16.msra.mxu1 %v11775_v11  ;;  %11514 = vmatprep.subr.bf16.mxu0 %v11513_v16  ;;  %v7601_v11 = vld [vmem:[#allocation15 + $0xf60] sm:$0xff]  ;;  %v6848_v16 = vld [vmem:[#allocation15 + $0x708] sm:$0xff]  ;;  %v7615_v24 = vld [vmem:[#allocation15 + $0xfd0] sm:$0xff] }
 0x96d   : > { %11778 = vmatprep.subr.bf16.mxu1 %v11777_v10  ;;  %v11531_v10 = vpack.c.bf16 %v6845_v3, %v6843_v47  ;;  %v11795_v56 = vpack.c.bf16 %v7601_v11, %v7599_v6  ;;  %v11533_v54 = vpack.c.bf16 %v6850_v4, %v6848_v16  ;;  %v6866_v47 = vld [vmem:[#allocation15 + $0x798] sm:$0xff]  ;;  %v7622_v6 = vld [vmem:[#allocation15 + $0x1008] sm:$0xff]  ;;  %v6863_v4 = vld [vmem:[#allocation15 + $0x780] sm:$0xff] }
 0x96e   : > { %v7620_v3 = vld [vmem:[#allocation15 + $0xff8] sm:$0xff] }
 0x96f   : > { %11516 = vmatpush1.bf16.msra.mxu0 %v11515_v18  ;;  %v11797_v18 = vpack.c.bf16 %v7606_v17, %v7604_v59  ;;  %v6865_v59 = vld [vmem:[#allocation15 + $0x790] sm:$0xff] }
 0x970   : > { %11780 = vmatpush1.bf16.msra.mxu1 %v11779_v61  ;;  %11518 = vmatprep.subr.bf16.mxu0 %v11517_v57  ;;  %v7605_v61 = vld [vmem:[#allocation15 + $0xf80] sm:$0xff]  ;;  %v6852_v57 = vld [vmem:[#allocation15 + $0x728] sm:$0xff]  ;;  %v7619_v17 = vld [vmem:[#allocation15 + $0xff0] sm:$0xff] }
 0x971   : > { %11782 = vmatprep.subr.bf16.mxu1 %v11781_v33  ;;  %v11535_v33 = vpack.c.bf16 %v6849_v39, %v6847_v5  ;;  %v11799_v60 = vpack.c.bf16 %v7605_v61, %v7603_v40  ;;  %v11537_v30 = vpack.c.bf16 %v6854_v53, %v6852_v57  ;;  %v6870_v5 = vld [vmem:[#allocation15 + $0x7b8] sm:$0xff]  ;;  %v7626_v40 = vld [vmem:[#allocation15 + $0x1028] sm:$0xff]  ;;  %v6894_v53 = vrot.slane %v14876_v52, 2 }
 0x972   : > { %v7624_v39 = vld [vmem:[#allocation15 + $0x1018] sm:$0xff] }
 0x973   : > { %11520 = vmatpush1.bf16.msra.mxu0 %v11519_v51  ;;  %v11801_v51 = vpack.c.bf16 %v7610_v34, %v7608_v36  ;;  %v11817_v36 = vpack.c.bf16 %v7626_v40, %v7624_v39  ;;  %v6867_v34 = vld [vmem:[#allocation15 + $0x7a0] sm:$0xff]  ;;  %v6885_v39 = vld [vmem:[#allocation15 + $0x830] sm:$0xff] }
 0x974   : > { %11784 = vmatpush1.bf16.msra.mxu1 %v11783_v44  ;;  %11522 = vmatprep.subr.bf16.mxu0 %v11521_v32  ;;  %v7609_v44 = vld [vmem:[#allocation15 + $0xfa0] sm:$0xff]  ;;  %v6856_v32 = vld [vmem:[#allocation15 + $0x748] sm:$0xff]  ;;  %v7639_v40 = vld [vmem:[#allocation15 + $0x1090] sm:$0xff] }
 0x975   : > { %11786 = vmatprep.subr.bf16.mxu1 %v11785_v20  ;;  %v11539_v20 = vpack.c.bf16 %v6853_v12, %v6851_v13  ;;  %v11803_v27 = vpack.c.bf16 %v7609_v44, %v7607_v63  ;;  %v11541_v9 = vpack.c.bf16 %v6858_v2, %v6856_v32  ;;  %v6872_v13 = vld [vmem:[#allocation15 + $0x7c8] sm:$0xff]  ;;  %v6874_v12 = vld [vmem:[#allocation15 + $0x7d8] sm:$0xff]  ;;  %v6893_v63 = vrot.slane %v14874_v26, 2 }
 0x976   : > { %v7630_v44 = vld [vmem:[#allocation15 + $0x1048] sm:$0xff]  ;;  %v11557_v52 = vpack.c.bf16 %v6874_v12, %v6872_v13  ;;  %v7632_v26 = vld [vmem:[#allocation15 + $0x1058] sm:$0xff]  ;;  %v6887_v13 = vld [vmem:[#allocation15 + $0x840] sm:$0xff] }
 0x977   : > { %11524 = vmatpush1.bf16.msra.mxu0 %v11523_v35  ;;  %v11805_v35 = vpack.c.bf16 %v7614_v19, %v7612_v41  ;;  %v6895_v2 = vsel %vm1461_vm3, %v6893_v63, %v6894_v53  ;;  %v6871_v19 = vld [vmem:[#allocation15 + $0x7c0] sm:$0xff]  ;;  %v6889_v12 = vld [vmem:[#allocation15 + $0x850] sm:$0xff] }
 0x978   : > { %11788 = vmatpush1.bf16.msra.mxu1 %v11787_v23  ;;  %11526 = vmatprep.subr.bf16.mxu0 %v11525_v21  ;;  %v7613_v23 = vld [vmem:[#allocation15 + $0xfc0] sm:$0xff]  ;;  %v6860_v21 = vld [vmem:[#allocation15 + $0x768] sm:$0xff] }
 0x979   : > { %11790 = vmatprep.subr.bf16.mxu1 %v11789_v22  ;;  %v11543_v22 = vpack.c.bf16 %v6857_v25, %v6855_v0  ;;  %v11807_v14 = vpack.c.bf16 %v7613_v23, %v7611_v45  ;;  %v11545_v38 = vpack.c.bf16 %v6862_v8, %v6860_v21  ;;  %v7629_v0 = vld [vmem:[#allocation15 + $0x1040] sm:$0xff]  ;;  %v6876_v25 = vld [vmem:[#allocation15 + $0x7e8] sm:$0xff]  ;;  %v6878_v45 = vld [vmem:[#allocation15 + $0x7f8] sm:$0xff] }
 0x97a   : > { %v11561_v8 = vpack.c.bf16 %v6878_v45, %v6876_v25 }
 0x97b   : > { %11528 = vmatpush1.bf16.msra.mxu0 %v11527_v29  ;;  %v11809_v29 = vpack.c.bf16 %v7618_v15, %v7616_v50  ;;  %v6875_v50 = vld [vmem:[#allocation15 + $0x7e0] sm:$0xff]  ;;  %v6877_v15 = vld [vmem:[#allocation15 + $0x7f0] sm:$0xff] }
 0x97c   : > { %11792 = vmatpush1.bf16.msra.mxu1 %v11791_v46  ;;  %11530 = vmatprep.subr.bf16.mxu0 %v11529_v42  ;;  %v7617_v46 = vld [vmem:[#allocation15 + $0xfe0] sm:$0xff]  ;;  %v6864_v42 = vld [vmem:[#allocation15 + $0x788] sm:$0xff] }
 0x97d   : > { %11794 = vmatprep.subr.bf16.mxu1 %v11793_v55  ;;  %v11547_v55 = vpack.c.bf16 %v6861_v49, %v6859_v31  ;;  %v11811_v11 = vpack.c.bf16 %v7617_v46, %v7615_v24  ;;  %v11549_v16 = vpack.c.bf16 %v6866_v47, %v6864_v42  ;;  %v6880_v31 = vld [vmem:[#allocation15 + $0x808] sm:$0xff]  ;;  %v6882_v49 = vld [vmem:[#allocation15 + $0x818] sm:$0xff]  ;;  %v6879_v47 = vld [vmem:[#allocation15 + $0x800] sm:$0xff] }
 0x97e   : > { %v7636_v24 = vld [vmem:[#allocation15 + $0x1078] sm:$0xff]  ;;  %v11565_v42 = vpack.c.bf16 %v6882_v49, %v6880_v31  ;;  %v8012_v49 = vld [vmem:[#allocation20 + $0x98] sm:$0xff] }
 0x97f   : > { %11532 = vmatpush1.bf16.msra.mxu0 %v11531_v10  ;;  %v11813_v10 = vpack.c.bf16 %v7622_v6, %v7620_v3  ;;  %v6881_v3 = vld [vmem:[#allocation15 + $0x810] sm:$0xff]  ;;  %v8011_v31 = vld [vmem:[#allocation20 + $0x90] sm:$0xff] }
 0x980   : > { %11796 = vmatpush1.bf16.msra.mxu1 %v11795_v56  ;;  %11534 = vmatprep.subr.bf16.mxu0 %v11533_v54  ;;  %v7621_v56 = vld [vmem:[#allocation15 + $0x1000] sm:$0xff]  ;;  %v6868_v54 = vld [vmem:[#allocation15 + $0x7a8] sm:$0xff]  ;;  %v7635_v6 = vld [vmem:[#allocation15 + $0x1070] sm:$0xff] }
 0x981   : > { %11798 = vmatprep.subr.bf16.mxu1 %v11797_v18  ;;  %v11551_v18 = vpack.c.bf16 %v6865_v59, %v6863_v4  ;;  %v11815_v61 = vpack.c.bf16 %v7621_v56, %v7619_v17  ;;  %v11553_v57 = vpack.c.bf16 %v6870_v5, %v6868_v54  ;;  %v6886_v4 = vld [vmem:[#allocation15 + $0x838] sm:$0xff]  ;;  %v7642_v17 = vld [vmem:[#allocation15 + $0x10a8] sm:$0xff]  ;;  %v6883_v5 = vld [vmem:[#allocation15 + $0x820] sm:$0xff] }
 0x982   : > { %v7640_v59 = vld [vmem:[#allocation15 + $0x1098] sm:$0xff] }
 0x983   : > { %11536 = vmatpush1.bf16.msra.mxu0 %v11535_v33  ;;  %v6869_v33 = vld [vmem:[#allocation15 + $0x7b0] sm:$0xff] }
 0x984   : > { %11800 = vmatpush1.bf16.msra.mxu1 %v11799_v60  ;;  %11538 = vmatprep.subr.bf16.mxu0 %v11537_v30  ;;  %v7623_v60 = vld [vmem:[#allocation15 + $0x1010] sm:$0xff]  ;;  %v7625_v30 = vld [vmem:[#allocation15 + $0x1020] sm:$0xff]  ;;  %v11555_v32 = vpack.c.bf16 %v6869_v33, %v6867_v34  ;;  %v7646_v34 = vld [vmem:[#allocation15 + $0x10c8] sm:$0xff]  ;;  %v11571_v33 = vpack.c.bf16 %v6885_v39, %v6883_v5 }
 0x985   : > { %11802 = vmatprep.subr.bf16.mxu1 %v11801_v51  ;;  %v7628_v51 = vld [vmem:[#allocation15 + $0x1038] sm:$0xff]  ;;  %v11819_v41 = vpack.c.bf16 %v7625_v30, %v7623_v60 }
 0x986   : > { %v8023_v39 = vld [vmem:[#allocation20 + $0xf0] sm:$0xff] }
 0x987   : > { %11540 = vmatpush1.bf16.msra.mxu0 %v11539_v20  ;;  %v6873_v20 = vld [vmem:[#allocation15 + $0x7d0] sm:$0xff] }
 0x988   : > { %11804 = vmatpush1.bf16.msra.mxu1 %v11803_v27  ;;  %11542 = vmatprep.subr.bf16.mxu0 %v11541_v9  ;;  %v7627_v27 = vld [vmem:[#allocation15 + $0x1030] sm:$0xff]  ;;  %v11821_v9 = vpack.c.bf16 %v7630_v44, %v7628_v51  ;;  %v11559_v23 = vpack.c.bf16 %v6873_v20, %v6871_v19  ;;  %v7645_v44 = vld [vmem:[#allocation15 + $0x10c0] sm:$0xff]  ;;  %v6900_v19 = vrot.slane %v14896_v1, 2  ;;  %v6899_v20 = vrot.slane %v14898_v58, 2 }
 0x989   : > { %11806 = vmatprep.subr.bf16.mxu1 %v11805_v35  ;;  %v7634_v35 = vld [vmem:[#allocation15 + $0x1068] sm:$0xff]  ;;  %v11823_v21 = vpack.c.bf16 %v7629_v0, %v7627_v27  ;;  %v7643_v51 = vld [vmem:[#allocation15 + $0x10b0] sm:$0xff]  ;;  %v6891_v27 = vld [vmem:[#allocation15 + $0x860] sm:$0xff] }
 0x98a   : > { %v6901_v0 = vsel %vm1461_vm3, %v6899_v20, %v6900_v19  ;;  %vm13288_vm3 = vmmov 1  }
 0x98b   : > { %11544 = vmatpush1.bf16.msra.mxu0 %v11543_v22  ;;  %v7631_v22 = vld [vmem:[#allocation15 + $0x1050] sm:$0xff]  ;;  %vm11842_vm12 = vmpackc.low %vm7816_vm2, %vm13288_vm3 }
 0x98c   : > { %11808 = vmatpush1.bf16.msra.mxu1 %v11807_v14  ;;  %11546 = vmatprep.subr.bf16.mxu0 %v11545_v38  ;;  %v11825_v14 = vpack.c.bf16 %v7634_v35, %v7632_v26  ;;  %v7633_v38 = vld [vmem:[#allocation15 + $0x1060] sm:$0xff]  ;;  %vm14965_vm15 = vmpackc.low %vm8037_vm14, %vm13288_vm3 }
 0x98d   : > { %11810 = vmatprep.subr.bf16.mxu1 %v11809_v29  ;;  %v7638_v29 = vld [vmem:[#allocation15 + $0x1088] sm:$0xff]  ;;  %v11827_v46 = vpack.c.bf16 %v7633_v38, %v7631_v22 }
 0x98f   : > { %11548 = vmatpush1.bf16.msra.mxu0 %v11547_v55  ;;  %v11829_v55 = vpack.c.bf16 %v7638_v29, %v7636_v24  ;;  %v7811_v24 = vld [vmem:[#allocation17] sm:$0xf]  ;;  %v7895_v29 = vld [vmem:[#allocation17 + $0x4] sm:$0xf] }
 0x990   : > { %11812 = vmatpush1.bf16.msra.mxu1 %v11811_v11  ;;  %11550 = vmatprep.subr.bf16.mxu0 %v11549_v16  ;;  %v7637_v11 = vld [vmem:[#allocation15 + $0x1080] sm:$0xff]  ;;  %v6884_v16 = vld [vmem:[#allocation15 + $0x828] sm:$0xff] }
 0x991   : > { %11814 = vmatprep.subr.bf16.mxu1 %v11813_v10  ;;  %v11567_v10 = vpack.c.bf16 %v6881_v3, %v6879_v47  ;;  %v11831_v56 = vpack.c.bf16 %v7637_v11, %v7635_v6  ;;  %v11569_v54 = vpack.c.bf16 %v6886_v4, %v6884_v16  ;;  %v8015_v3 = vld [vmem:[#allocation20 + $0xb0] sm:$0xff]  ;;  %v8016_v6 = vld [vmem:[#allocation20 + $0xb8] sm:$0xff]  ;;  %v8017_v11 = vld [vmem:[#allocation20 + $0xc0] sm:$0xff] }
 0x992   : > { %v8018_v16 = vld [vmem:[#allocation20 + $0xc8] sm:$0xff] }
 0x993   : > { %11552 = vmatpush1.bf16.msra.mxu0 %v11551_v18  ;;  %v11833_v18 = vpack.c.bf16 %v7642_v17, %v7640_v59  ;;  %v11863_v4 = vpack.c.bf16 %v8018_v16, %v8017_v11  ;;  %v8019_v59 = vld [vmem:[#allocation20 + $0xd0] sm:$0xff]  ;;  %v8020_v17 = vld [vmem:[#allocation20 + $0xd8] sm:$0xff]  ;;  %v8008_v16 = vld [vmem:[#allocation20 + $0x80] sm:$0xff] }
 0x994   : > { %11816 = vmatpush1.bf16.msra.mxu1 %v11815_v61  ;;  %11554 = vmatprep.subr.bf16.mxu0 %v11553_v57  ;;  %v7641_v61 = vld [vmem:[#allocation15 + $0x10a0] sm:$0xff]  ;;  %v6888_v57 = vld [vmem:[#allocation15 + $0x848] sm:$0xff] }
 0x995   : > { %11818 = vmatprep.subr.bf16.mxu1 %v11817_v36  ;;  %v7644_v36 = vld [vmem:[#allocation15 + $0x10b8] sm:$0xff]  ;;  %v11835_v60 = vpack.c.bf16 %v7641_v61, %v7639_v40  ;;  %v8024_v40 = vld [vmem:[#allocation20 + $0xf8] sm:$0xff]  ;;  %v8025_v61 = vld [vmem:[#allocation20 + $0x100] sm:$0xff] }
 0x996   : > { %6975 = vmatmul.mubr.f32.vlgmr.msra.gmra.mrb[66].mxu0 %v6895_v2  ;;  %v11837_v63 = vpack.c.bf16 %v7646_v34, %v7644_v36  ;;  %v8027_v34 = vld [vmem:[#allocation20 + $0x110] sm:$0xff] }
 0x997   : > { %7714 = vmatmul.mubr.f32.vlgmr.msra.gmra.mrb[78].mxu1 %v6895_v2  ;;  %6980 = vmatprep.mubr.f32.mxu0 %v14924_v48  ;;  %v11839_v2 = vpack.c.bf16 %v7645_v44, %v7643_v51 }
 0x998   : > { %11556 = vmatpush1.bf16.msra.mxu0 %v11555_v32  ;;  %7719 = vmatprep.mubr.f32.mxu1 %v14924_v48  ;;  %v11563_v48 = vpack.c.bf16 %v6877_v15, %v6875_v50  ;;  %v11575_v32 = vpack.c.bf16 %v6889_v12, %v6887_v13 }
 0x999   : > { %11820 = vmatpush1.bf16.msra.mxu1 %v11819_v41  ;;  %11558 = vmatprep.subr.bf16.mxu0 %v11557_v52  ;;  %v6892_v41 = vld [vmem:[#allocation15 + $0x868] sm:$0xff]  ;;  %v7648_v52 = vld [vmem:[#allocation15 + $0x10d8] sm:$0xff] }
 0x99a   : > { %6981 = vmatmul.mubr.f32.gmra.mrb[68].mxu0 %v6894_v53  ;;  %11822 = vmatprep.subr.bf16.mxu1 %v11821_v9  ;;  %v7647_v9 = vld [vmem:[#allocation15 + $0x10d0] sm:$0xff] }
 0x99b   : > { %7720 = vmatmul.mubr.f32.gmra.mrb[80].mxu1 %v6894_v53  ;;  %7051 = vmatprep.mubr.f32.mxu0 %v15298_v37  ;;  %v6890_v53 = vld [vmem:[#allocation15 + $0x858] sm:$0xff] }
 0x99c   : > { %11560 = vmatpush1.bf16.msra.mxu0 %v11559_v23  ;;  %7790 = vmatprep.mubr.f32.mxu1 %v15298_v37  ;;  %v11573_v30 = vpack.c.bf16 %v6890_v53, %v6888_v57  ;;  %v8026_v57 = vld [vmem:[#allocation20 + $0x108] sm:$0xff] }
 0x99d   : > { %11824 = vmatpush1.bf16.msra.mxu1 %v11823_v21  ;;  %11562 = vmatprep.subr.bf16.mxu0 %v11561_v8  ;;  %v11875_v53 = vpack.c.bf16 %v8026_v57, %v8025_v61  ;;  %v8192_v61 = vld [vmem:[#allocation20 + $0x148] sm:$0xff] }
 0x99e   : > { %11826 = vmatprep.subr.bf16.mxu1 %v11825_v14 }
 0x9a0   : > { %11564 = vmatpush1.bf16.msra.mxu0 %v11563_v48  ;;  %v11854_v48 = vpack.c.bf16 %v8012_v49, %v8011_v31  ;;  %v8000_v31 = vld [vmem:[#allocation20 + $0x40] sm:$0xff]  ;;  %v8001_v49 = vld [vmem:[#allocation20 + $0x48] sm:$0xff] }
 0x9a1   : > { %11828 = vmatpush1.bf16.msra.mxu1 %v11827_v46  ;;  %11566 = vmatprep.subr.bf16.mxu0 %v11565_v42  ;;  %v8013_v46 = vld [vmem:[#allocation20 + $0xa0] sm:$0xff]  ;;  %v8014_v42 = vld [vmem:[#allocation20 + $0xa8] sm:$0xff] }
 0x9a2   : > { %11830 = vmatprep.subr.bf16.mxu1 %v11829_v55  ;;  %v11857_v47 = vpack.c.bf16 %v8014_v42, %v8013_v46  ;;  %v11860_v55 = vpack.c.bf16 %v8016_v6, %v8015_v3  ;;  %v8004_v42 = vld [vmem:[#allocation20 + $0x60] sm:$0xff]  ;;  %v8006_v6 = vld [vmem:[#allocation20 + $0x70] sm:$0xff] }
 0x9a4   : > { %11568 = vmatpush1.bf16.msra.mxu0 %v11567_v10  ;;  %v11866_v10 = vpack.c.bf16 %v8020_v17, %v8019_v59  ;;  %v8187_v17 = vld [vmem:[#allocation20 + $0x120] sm:$0xff] }
 0x9a5   : > { %11832 = vmatpush1.bf16.msra.mxu1 %v11831_v56  ;;  %11570 = vmatprep.subr.bf16.mxu0 %v11569_v54  ;;  %v8021_v56 = vld [vmem:[#allocation20 + $0xe0] sm:$0xff]  ;;  %v8022_v54 = vld [vmem:[#allocation20 + $0xe8] sm:$0xff] }
 0x9a6   : > { %11834 = vmatprep.subr.bf16.mxu1 %v11833_v18  ;;  %v11869_v5 = vpack.c.bf16 %v8022_v54, %v8021_v56  ;;  %v11872_v18 = vpack.c.bf16 %v8024_v40, %v8023_v39  ;;  %v8189_v54 = vld [vmem:[#allocation20 + $0x130] sm:$0xff] }
 0x9a8   : > { %11572 = vmatpush1.bf16.msra.mxu0 %v11571_v33  ;;  %v8028_v33 = vld [vmem:[#allocation20 + $0x118] sm:$0xf] }
 0x9a9   : > { %11836 = vmatpush1.bf16.msra.mxu1 %v11835_v60  ;;  %11574 = vmatprep.subr.bf16.mxu0 %v11573_v30  ;;  %v11878_v60 = vpack.c.bf16 %v8028_v33, %v8027_v34  ;;  %v7972_v30 = vld [vmem:[#allocation18] sm:$0x3] }
 0x9aa   : > { %11838 = vmatprep.subr.bf16.mxu1 %v11837_v63  ;;  %v7977_v13 = vrot.slane %v7972_v30, %v15300_v43  ;;  %v7981_v51 = vrot.slane %v7972_v30, %v15301_v28  ;;  %v8194_v34 = vld [vmem:[#allocation20 + $0x158] sm:$0xff]  ;;  %v8196_v30 = vld [vmem:[#allocation20 + $0x168] sm:$0xff] }
 0x9ac   : > { %11576 = vmatpush1.bf16.msra.mxu0 %v11575_v32 }
 0x9ad   : > { %11840 = vmatpush1.bf16.msra.mxu1 %v11839_v2  ;;  %7011 = vmatprep.subr.mxu0 %v6892_v41 }
 0x9ae   : > { %7750 = vmatprep.subr.mxu1 %v7648_v52 }
 0x9b0   : > { %7012 = vmatpush1.msra.mxu0 %v6891_v27 }
 0x9b1   : > { %7751 = vmatpush1.msra.mxu1 %v7647_v9  ;;  %9668 = vmatmul.mubr.msk.f32.vlgmr.msra.gmra.mrb[66].mxu0 %vm6485_vm11, %v6901_v0  ;;  %v7992_v9 = vld [vmem:[#allocation20] sm:$0xff] }
 0x9b2   : > { %9674 = vmatmul.mubr.msk.f32.vlgmr.msra.gmra.mrb[78].mxu1 %vm6485_vm11, %v6901_v0  ;;  %7057 = vmatprep.mubr.f32.mxu0 %v15298_v37  ;;  %v7993_v0 = vld [vmem:[#allocation20 + $0x8] sm:$0xff] }
 0x9b3   : > { %7796 = vmatprep.mubr.f32.mxu1 %v15298_v37 }
 0x9b5   : > { %9669 = vmatmul.mubr.msk.f32.gmra.mrb[68].mxu0 %vm6485_vm11, %v6900_v19 }
 0x9b6   : > { %9675 = vmatmul.mubr.msk.f32.gmra.mrb[80].mxu1 %vm6485_vm11, %v6900_v19  ;;  %7963 = vmatprep.mubr.f32.mxu0 %v15298_v37 }
 0x9b7   : > { %7887 = vmatprep.mubr.f32.mxu1 %v15298_v37 }
 0xa84   : > { %v7053_v1 = vpop.f32.mrb[66].mxu0 }
 0xa85   : > { %v7792_v58 = vpop.f32.mrb[78].mxu1  ;;  %v7055_v25 = vpop.f32.mrb[67].mxu0 }
 0xa86   : > { %v7807_v45 = vmax.f32 %v7053_v1, %v7792_v58  ;;  %v7794_v26 = vpop.f32.mrb[79].mxu1 }
 0xa87   : > { %v7808_v35 = vmax.f32 %v7055_v25, %v7794_v26 }
 0xa88   : > { %v7059_v23 = vpop.f32.mrb[68].mxu0 }
 0xa89   : > { %v7798_v21 = vpop.f32.mrb[80].mxu1  ;;  %v7061_v8 = vpop.f32.mrb[69].mxu0 }
 0xa8a   : > { %v7809_v50 = vmax.f32 %v7059_v23, %v7798_v21  ;;  %v7800_v15 = vpop.f32.mrb[81].mxu1  ;;  %v7995_v23 = vld [vmem:[#allocation20 + $0x18] sm:$0xff] }
 0xa8b   : > { %v7810_v22 = vmax.f32 %v7061_v8, %v7800_v15  ;;  %v7996_v8 = vld [vmem:[#allocation20 + $0x20] sm:$0xff] }
 0xa8c   : > { %v11844_v14 = vpack.c.bf16 %v7809_v50, %v7807_v45  ;;  %v11882_v45 = vpack.c.bf16 %v7993_v0, %v7992_v9  ;;  %v7997_v50 = vld [vmem:[#allocation20 + $0x28] sm:$0xff]  ;;  %v8304_v0 = vld [vmem:[#allocation20 + $0x240] sm:$0xff] }
 0xa8d   : > { %v11841_v38 = vpack.c.bf16 %v7810_v22, %v7808_v35  ;;  %v7994_v35 = vld [vmem:[#allocation20 + $0x10] sm:$0xff]  ;;  %v11888_v15 = vpack.c.bf16 %v7997_v50, %v7996_v8  ;;  %v8307_v8 = vld [vmem:[#allocation20 + $0x258] sm:$0xff] }
 0xa8e   : > { %v11885_v21 = vpack.c.bf16 %v7995_v23, %v7994_v35  ;;  %v7998_v22 = vld [vmem:[#allocation20 + $0x30] sm:$0xff] }
 0xa8f   : > { %11843 = vmatprep.subr.msk.bf16.mxu1 %vm11842_vm12, %v11841_v38  ;;  %11849 = vmatprep.subr.msk.bf16.mxu0 %vm11842_vm12, %v11841_v38 }
 0xa90   : > { %11846 = vmatpush1.bf16.msk.msra.mxu1 %vm11842_vm12, %v11844_v14  ;;  %11852 = vmatpush1.bf16.msk.msra.mxu0 %vm11842_vm12, %v11844_v14  ;;  %v7999_v14 = vld [vmem:[#allocation20 + $0x38] sm:$0xff]  ;;  %vm8986_vm12 = vcmask 949248  }
 0xa91   : > { %11853 = vmatprep.subr.bf16.mxu0 %v15297_v7  ;;  %10028 = vmatprep.subr.mxu1 %v15298_v37  ;;  %v11891_v38 = vpack.c.bf16 %v7999_v14, %v7998_v22  ;;  %v8309_v22 = vld [vmem:[#allocation20 + $0x268] sm:$0xff] }
 0xa93   : > { %9678 = vmatmul.mubr.msk.f32.vlgmr.msra.gmra.mrb[82].mxu1 %vm7812_vm13, %v7811_v24  ;;  %9681 = vmatmul.mubr.msk.f32.vlgmr.msra.gmra.mrb[70].mxu0 %vm7812_vm13, %v7895_v29  ;;  %v11894_v24 = vpack.c.bf16 %v8001_v49, %v8000_v31  ;;  %v8002_v29 = vld [vmem:[#allocation20 + $0x50] sm:$0xff]  ;;  %v8311_v31 = vld [vmem:[#allocation20 + $0x278] sm:$0xff] }
 0xa94   : > { %11855 = vmatpush1.bf16.msra.mxu0 %v11854_v48  ;;  %v8003_v48 = vld [vmem:[#allocation20 + $0x58] sm:$0xff]  ;;  %10030 = vmatprep.mubr.msk.f32.mxu1 %vm13289_vm5, %v15298_v37 }
 0xa95   : > { %11856 = vmatprep.subr.bf16.mxu0 %v15297_v7  ;;  %v11897_v46 = vpack.c.bf16 %v8003_v48, %v8002_v29  ;;  %v8313_v29 = vld [vmem:[#allocation20 + $0x288] sm:$0xff] }
 0xa98   : > { %11858 = vmatpush1.bf16.msra.mxu0 %v11857_v47  ;;  %v8005_v47 = vld [vmem:[#allocation20 + $0x68] sm:$0xff] }
 0xa99   : > { %11859 = vmatprep.subr.bf16.mxu0 %v15297_v7  ;;  %v11900_v3 = vpack.c.bf16 %v8005_v47, %v8004_v42  ;;  %v8316_v47 = vld [vmem:[#allocation20 + $0x2a0] sm:$0xff] }
 0xa9c   : > { %11861 = vmatpush1.bf16.msra.mxu0 %v11860_v55  ;;  %v8007_v55 = vld [vmem:[#allocation20 + $0x78] sm:$0xff] }
 0xa9d   : > { %11862 = vmatprep.subr.bf16.mxu0 %v15297_v7  ;;  %v11903_v11 = vpack.c.bf16 %v8007_v55, %v8006_v6  ;;  %v8318_v55 = vld [vmem:[#allocation20 + $0x2b0] sm:$0xff] }
 0xaa0   : > { %11864 = vmatpush1.bf16.msra.mxu0 %v11863_v4  ;;  %v8009_v4 = vld [vmem:[#allocation20 + $0x88] sm:$0xf] }
 0xaa1   : > { %11865 = vmatprep.subr.bf16.mxu0 %v15297_v7  ;;  %v11906_v59 = vpack.c.bf16 %v8009_v4, %v8008_v16  ;;  %v8320_v4 = vld [vmem:[#allocation20 + $0x2c0] sm:$0xff] }
 0xaa4   : > { %11867 = vmatpush1.bf16.msra.mxu0 %v11866_v10  ;;  %v8188_v10 = vld [vmem:[#allocation20 + $0x128] sm:$0xff] }
 0xaa5   : > { %11868 = vmatprep.subr.bf16.mxu0 %v15297_v7  ;;  %v11910_v56 = vpack.c.bf16 %v8188_v10, %v8187_v17  ;;  %v8285_v10 = vld [vmem:[#allocation20 + $0x1b0] sm:$0xff] }
 0xaa8   : > { %11870 = vmatpush1.bf16.msra.mxu0 %v11869_v5  ;;  %v8190_v5 = vld [vmem:[#allocation20 + $0x138] sm:$0xff] }
 0xaa9   : > { %11871 = vmatprep.subr.bf16.mxu0 %v15297_v7  ;;  %v11913_v40 = vpack.c.bf16 %v8190_v5, %v8189_v54  ;;  %v8287_v5 = vld [vmem:[#allocation20 + $0x1c0] sm:$0xff] }
 0xaac   : > { %11873 = vmatpush1.bf16.msra.mxu0 %v11872_v18  ;;  %v8191_v18 = vld [vmem:[#allocation20 + $0x140] sm:$0xff] }
 0xaad   : > { %11874 = vmatprep.subr.bf16.mxu0 %v15297_v7  ;;  %v11916_v57 = vpack.c.bf16 %v8192_v61, %v8191_v18  ;;  %v8289_v61 = vld [vmem:[#allocation20 + $0x1d0] sm:$0xff] }
 0xab0   : > { %11876 = vmatpush1.bf16.msra.mxu0 %v11875_v53  ;;  %v8193_v53 = vld [vmem:[#allocation20 + $0x150] sm:$0xff] }
 0xab1   : > { %11877 = vmatprep.subr.bf16.mxu0 %v15297_v7  ;;  %v11919_v33 = vpack.c.bf16 %v8194_v34, %v8193_v53  ;;  %v8291_v34 = vld [vmem:[#allocation20 + $0x1e0] sm:$0xff] }
 0xab4   : > { %11880 = vmatpush1.bf16.msk.msra.mxu0 %vm14965_vm15, %v11878_v60  ;;  %v8195_v60 = vld [vmem:[#allocation20 + $0x160] sm:$0xff] }
 0xab5   : > { %11881 = vmatprep.subr.bf16.mxu0 %v15297_v7 }
 0xb66   : > { %v7889_v12 = vpop.f32.mrb[82].mxu1  ;;  %v7965_v63 = vpop.f32.mrb[70].mxu0 }
 0xb67   : > { %v7970_v44 = vmax.f32 %v7889_v12, %v7965_v63  ;;  %v7891_v32 = vpop.f32.mrb[83].mxu1  ;;  %v7967_v2 = vpop.f32.mrb[71].mxu0  ;;  %v8197_v12 = vld [vmem:[#allocation20 + $0x170] sm:$0xff]  ;;  %v8198_v63 = vld [vmem:[#allocation20 + $0x178] sm:$0xff] }
 0xb68   : > { %v7971_v41 = vmax.f32 %v7891_v32, %v7967_v2  ;;  %v8200_v32 = vld [vmem:[#allocation20 + $0x188] sm:$0xff] }
 0xb69   : > { %v7984_v52 = vadd.f32 %v7977_v13, %v7970_v44  ;;  %v11922_v13 = vpack.c.bf16 %v8196_v30, %v8195_v60  ;;  %v8199_v44 = vld [vmem:[#allocation20 + $0x180] sm:$0xff]  ;;  %v8294_v30 = vld [vmem:[#allocation20 + $0x1f8] sm:$0xff] }
 0xb6a   : > { %v7985_v19 = vadd.f32 %v7981_v51, %v7971_v41  ;;  %v11925_v51 = vpack.c.bf16 %v8198_v63, %v8197_v12  ;;  %v11928_v2 = vpack.c.bf16 %v8200_v32, %v8199_v44  ;;  %v8201_v41 = vld [vmem:[#allocation20 + $0x190] sm:$0xff]  ;;  %v8295_v12 = vld [vmem:[#allocation20 + $0x200] sm:$0xff]  ;;  %v8296_v63 = vld [vmem:[#allocation20 + $0x208] sm:$0xff] }
 0xb6b   : > { %vm7986_vm0 = vcmp.ge.f32.partialorder %v7984_v52, 0.0  ;;  %v7988_v20 = vmul.f32 0.01, %v7984_v52  ;;  %v8297_v44 = vld [vmem:[#allocation20 + $0x210] sm:$0xff]  ;;  %v8298_v32 = vld [vmem:[#allocation20 + $0x218] sm:$0xff] }
 0xb6c   : > { %vm7987_vm1 = vcmp.ge.f32.partialorder %v7985_v19, 0.0  ;;  %v7989_v27 = vmul.f32 0.01, %v7985_v19 }
 0xb6d   : > { %v14975_v1 = vsel %vm7986_vm0, %v7984_v52, %v7988_v20  ;;  %v8202_v52 = vld [vmem:[#allocation20 + $0x198] sm:$0xff]  ;;  %v8203_v20 = vld [vmem:[#allocation20 + $0x1a0] sm:$0xff]  ;;  %vm9224_vm0 = vcmask 32768  }
 0xb6e   : > { %v14977_v58 = vsel %vm7987_vm1, %v7985_v19, %v7989_v27  ;;  %v8031_v26 = vrot.slane %v14975_v1, 1  ;;  %v11931_v19 = vpack.c.bf16 %v8202_v52, %v8201_v41  ;;  %v8204_v27 = vld [vmem:[#allocation20 + $0x1a8] sm:$0xf]  ;;  %v8205_v23 = vrot.slane %v14975_v1, 2  ;;  %v8299_v41 = vld [vmem:[#allocation20 + $0x220] sm:$0xff] }
 0xb6f   : > { %v8032_v25 = vrot.slane %v14977_v58, 1  ;;  %v8206_v39 = vrot.slane %v14977_v58, 2  ;;  %v11934_v9 = vpack.c.bf16 %v8204_v27, %v8203_v20  ;;  %v8300_v52 = vld [vmem:[#allocation20 + $0x228] sm:$0xff]  ;;  %v8301_v20 = vld [vmem:[#allocation20 + $0x230] sm:$0xff]  ;;  %v8302_v27 = vld [vmem:[#allocation20 + $0x238] sm:$0xf] }
 0xb71   : > { %9683 = vmatprep.mubr.msk.f32.mxu0 %vm8034_vm4, %v8032_v25 }
 0xb72   : > { %8106 = vmatmul.mubr.f32.vlgmr.msra.gmra.mrb[72].mxu0 %v8031_v26 }
 0xb73   : > { %11883 = vmatpush1.bf16.msra.mxu0 %v11882_v45  ;;  %9685 = vmatprep.mubr.msk.f32.mxu0 %vm8034_vm4, %v14977_v58  ;;  %v8305_v45 = vld [vmem:[#allocation20 + $0x248] sm:$0xff] }
 0xb74   : > { %11884 = vmatprep.subr.bf16.mxu0 %v15297_v7  ;;  %v11938_v35 = vpack.c.bf16 %v8305_v45, %v8304_v0  ;;  %v8469_v0 = vld [vmem:[#allocation20 + $0x2d0] sm:$0xff]  ;;  %v8470_v45 = vld [vmem:[#allocation20 + $0x2d8] sm:$0xff] }
 0xb77   : > { %11886 = vmatpush1.bf16.msra.mxu0 %v11885_v21  ;;  %v8306_v21 = vld [vmem:[#allocation20 + $0x250] sm:$0xff] }
 0xb78   : > { %11887 = vmatprep.subr.bf16.mxu0 %v15297_v7  ;;  %v11941_v50 = vpack.c.bf16 %v8307_v8, %v8306_v21  ;;  %v8471_v21 = vld [vmem:[#allocation20 + $0x2e0] sm:$0xff]  ;;  %v8472_v8 = vld [vmem:[#allocation20 + $0x2e8] sm:$0xff] }
 0xb7b   : > { %11889 = vmatpush1.bf16.msra.mxu0 %v11888_v15  ;;  %v8308_v15 = vld [vmem:[#allocation20 + $0x260] sm:$0xff] }
 0xb7c   : > { %11890 = vmatprep.subr.bf16.mxu0 %v15297_v7  ;;  %v11944_v14 = vpack.c.bf16 %v8309_v22, %v8308_v15  ;;  %v8473_v15 = vld [vmem:[#allocation20 + $0x2f0] sm:$0xff]  ;;  %v8474_v22 = vld [vmem:[#allocation20 + $0x2f8] sm:$0xff] }
 0xb7f   : > { %11892 = vmatpush1.bf16.msra.mxu0 %v11891_v38  ;;  %v8310_v38 = vld [vmem:[#allocation20 + $0x270] sm:$0xff] }
 0xb80   : > { %11893 = vmatprep.subr.bf16.mxu0 %v15297_v7  ;;  %v11947_v49 = vpack.c.bf16 %v8311_v31, %v8310_v38  ;;  %v8475_v38 = vld [vmem:[#allocation20 + $0x300] sm:$0xff]  ;;  %v8476_v31 = vld [vmem:[#allocation20 + $0x308] sm:$0xff] }
 0xb83   : > { %11895 = vmatpush1.bf16.msra.mxu0 %v11894_v24  ;;  %v8312_v24 = vld [vmem:[#allocation20 + $0x280] sm:$0xff] }
 0xb84   : > { %11896 = vmatprep.subr.bf16.mxu0 %v15297_v7  ;;  %v11950_v48 = vpack.c.bf16 %v8313_v29, %v8312_v24  ;;  %v8477_v24 = vld [vmem:[#allocation20 + $0x310] sm:$0xff]  ;;  %v8478_v29 = vld [vmem:[#allocation20 + $0x318] sm:$0xff] }
 0xb87   : > { %11898 = vmatpush1.bf16.msra.mxu0 %v11897_v46  ;;  %v8315_v46 = vld [vmem:[#allocation20 + $0x298] sm:$0xff] }
 0xb88   : > { %11899 = vmatprep.subr.bf16.mxu0 %v15297_v7 }
 0xb8b   : > { %11901 = vmatpush1.bf16.msra.mxu0 %v11900_v3  ;;  %v8317_v3 = vld [vmem:[#allocation20 + $0x2a8] sm:$0xff] }
 0xb8c   : > { %11902 = vmatprep.subr.bf16.mxu0 %v15297_v7  ;;  %v11956_v6 = vpack.c.bf16 %v8317_v3, %v8316_v47  ;;  %v8483_v3 = vld [vmem:[#allocation20 + $0x340] sm:$0xff] }
 0xb8f   : > { %11904 = vmatpush1.bf16.msra.mxu0 %v11903_v11  ;;  %v8319_v11 = vld [vmem:[#allocation20 + $0x2b8] sm:$0xff] }
 0xb90   : > { %11905 = vmatprep.subr.bf16.mxu0 %v15297_v7  ;;  %v11959_v16 = vpack.c.bf16 %v8319_v11, %v8318_v55  ;;  %v8485_v11 = vld [vmem:[#allocation20 + $0x350] sm:$0xff] }
 0xb93   : > { %11908 = vmatpush1.bf16.msk.msra.mxu0 %vm14965_vm15, %v11906_v59  ;;  %v8321_v59 = vld [vmem:[#allocation20 + $0x2c8] sm:$0xf] }
 0xb94   : > { %11909 = vmatprep.subr.bf16.mxu0 %v15297_v7  ;;  %v11962_v17 = vpack.c.bf16 %v8321_v59, %v8320_v4 }
 0xb96   : > { %8181 = vmatmul.mubr.f32.vlgmr.msra.gmra.mrb[72].mxu0 %v14975_v1 }
 0xb97   : > { %11911 = vmatpush1.bf16.msra.mxu0 %v11910_v56  ;;  %9687 = vmatprep.mubr.msk.f32.mxu0 %vm8034_vm4, %v8206_v39  ;;  %v8286_v56 = vld [vmem:[#allocation20 + $0x1b8] sm:$0xff] }
 0xb98   : > { %11912 = vmatprep.subr.bf16.mxu0 %v15297_v7  ;;  %v11966_v54 = vpack.c.bf16 %v8286_v56, %v8285_v10  ;;  %v8723_v10 = vld [vmem:[#allocation24 + $0x8] sm:$0xff] }
 0xb99   : > { %v8727_v56 = vld [vmem:[#allocation24 + $0x28] sm:$0xff] }
 0xb9a   : > { %v12021_v36 = vpack.c.bf16 %v8727_v56, %v8723_v10 }
 0xb9b   : > { %11914 = vmatpush1.bf16.msra.mxu0 %v11913_v40  ;;  %v8288_v40 = vld [vmem:[#allocation20 + $0x1c8] sm:$0xff] }
 0xb9c   : > { %11915 = vmatprep.subr.bf16.mxu0 %v15297_v7  ;;  %v11969_v18 = vpack.c.bf16 %v8288_v40, %v8287_v5 }
 0xb9f   : > { %11917 = vmatpush1.bf16.msra.mxu0 %v11916_v57  ;;  %v8290_v57 = vld [vmem:[#allocation20 + $0x1d8] sm:$0xff] }
 0xba0   : > { %11918 = vmatprep.subr.bf16.mxu0 %v15297_v7  ;;  %v11972_v53 = vpack.c.bf16 %v8290_v57, %v8289_v61  ;;  %v8726_v61 = vld [vmem:[#allocation24 + $0x20] sm:$0xff] }
 0xba3   : > { %11920 = vmatpush1.bf16.msra.mxu0 %v11919_v33  ;;  %v8292_v33 = vld [vmem:[#allocation20 + $0x1e8] sm:$0xff] }
 0xba4   : > { %11921 = vmatprep.subr.bf16.mxu0 %v15297_v7  ;;  %v11975_v60 = vpack.c.bf16 %v8292_v33, %v8291_v34  ;;  %v8735_v34 = vld [vmem:[#allocation24 + $0x68] sm:$0xff] }
 0xba7   : > { %11923 = vmatpush1.bf16.msra.mxu0 %v11922_v13 }
 0xba8   : > { %11924 = vmatprep.subr.bf16.mxu0 %v15297_v7 }
 0xbab   : > { %11926 = vmatpush1.bf16.msra.mxu0 %v11925_v51  ;;  %v11981_v51 = vpack.c.bf16 %v8296_v63, %v8295_v12  ;;  %v8725_v12 = vld [vmem:[#allocation24 + $0x18] sm:$0xff] }
 0xbac   : > { %11927 = vmatprep.subr.bf16.mxu0 %v15297_v7  ;;  %v8729_v63 = vld [vmem:[#allocation24 + $0x38] sm:$0xff] }
 0xbaf   : > { %11929 = vmatpush1.bf16.msra.mxu0 %v11928_v2  ;;  %v11984_v2 = vpack.c.bf16 %v8298_v32, %v8297_v44  ;;  %v12029_v44 = vpack.c.bf16 %v8729_v63, %v8725_v12  ;;  %v8954_v32 = vld [vmem:[#allocation27 + $0x100] sm:$0xff]  ;;  %v8923_v12 = vld [vmem:[#allocation27 + $0x8] sm:$0xff]  ;;  %v8940_v63 = vld [vmem:[#allocation27 + $0x90] sm:$0xff] }
 0xbb0   : > { %11930 = vmatprep.subr.bf16.mxu0 %v15297_v7 }
 0xbb3   : > { %11932 = vmatpush1.bf16.msra.mxu0 %v11931_v19  ;;  %v11987_v19 = vpack.c.bf16 %v8300_v52, %v8299_v41  ;;  %v8956_v41 = vld [vmem:[#allocation27 + $0x110] sm:$0xff] }
 0xbb4   : > { %11933 = vmatprep.subr.bf16.mxu0 %v15297_v7 }
 0xbb7   : > { %11936 = vmatpush1.bf16.msk.msra.mxu0 %vm14965_vm15, %v11934_v9  ;;  %v11990_v9 = vpack.c.bf16 %v8302_v27, %v8301_v20  ;;  %v8958_v27 = vld [vmem:[#allocation27 + $0x120] sm:$0xff] }
 0xbb8   : > { %11937 = vmatprep.subr.bf16.mxu0 %v15297_v7 }
 0xbba   : > { %8278 = vmatmul.mubr.f32.vlgmr.msra.gmra.mrb[72].mxu0 %v8205_v23 }
 0xbbb   : > { %11939 = vmatpush1.bf16.msra.mxu0 %v11938_v35  ;;  %9689 = vmatprep.mubr.msk.f32.mxu0 %vm8034_vm4, %v8032_v25  ;;  %v8314_v25 = vld [vmem:[#allocation20 + $0x290] sm:$0xff]  ;;  %v11994_v35 = vpack.c.bf16 %v8470_v45, %v8469_v0  ;;  %v8960_v45 = vld [vmem:[#allocation27 + $0x130] sm:$0xff] }
 0xbbc   : > { %11940 = vmatprep.subr.bf16.mxu0 %v15297_v7  ;;  %v11953_v42 = vpack.c.bf16 %v8315_v46, %v8314_v25  ;;  %v8481_v46 = vld [vmem:[#allocation20 + $0x330] sm:$0xff] }
 0xbbf   : > { %11942 = vmatpush1.bf16.msra.mxu0 %v11941_v50  ;;  %v11997_v50 = vpack.c.bf16 %v8472_v8, %v8471_v21  ;;  %v8962_v8 = vld [vmem:[#allocation27 + $0x140] sm:$0xff] }
 0xbc0   : > { %11943 = vmatprep.subr.bf16.mxu0 %v15297_v7 }
 0xbc3   : > { %11945 = vmatpush1.bf16.msra.mxu0 %v11944_v14  ;;  %v12000_v14 = vpack.c.bf16 %v8474_v22, %v8473_v15  ;;  %v8964_v22 = vld [vmem:[#allocation27 + $0x150] sm:$0xff] }
 0xbc4   : > { %11946 = vmatprep.subr.bf16.mxu0 %v15297_v7 }
 0xbc7   : > { %11948 = vmatpush1.bf16.msra.mxu0 %v11947_v49  ;;  %v12003_v49 = vpack.c.bf16 %v8476_v31, %v8475_v38  ;;  %v8966_v31 = vld [vmem:[#allocation27 + $0x160] sm:$0xff] }
 0xbc8   : > { %11949 = vmatprep.subr.bf16.mxu0 %v15297_v7 }
 0xbcb   : > { %11951 = vmatpush1.bf16.msra.mxu0 %v11950_v48  ;;  %v8480_v48 = vld [vmem:[#allocation20 + $0x328] sm:$0xff] }
 0xbcc   : > { %11952 = vmatprep.subr.bf16.mxu0 %v15297_v7 }
 0xbcf   : > { %11954 = vmatpush1.bf16.msra.mxu0 %v11953_v42  ;;  %v8482_v42 = vld [vmem:[#allocation20 + $0x338] sm:$0xff] }
 0xbd0   : > { %11955 = vmatprep.subr.bf16.mxu0 %v15297_v7  ;;  %v12012_v47 = vpack.c.bf16 %v8482_v42, %v8481_v46  ;;  %v8972_v42 = vld [vmem:[#allocation27 + $0x190] sm:$0xff] }
 0xbd3   : > { %11957 = vmatpush1.bf16.msra.mxu0 %v11956_v6  ;;  %v8484_v6 = vld [vmem:[#allocation20 + $0x348] sm:$0xff] }
 0xbd4   : > { %11958 = vmatprep.subr.bf16.mxu0 %v15297_v7  ;;  %v12015_v55 = vpack.c.bf16 %v8484_v6, %v8483_v3  ;;  %v8974_v6 = vld [vmem:[#allocation27 + $0x1a0] sm:$0xff] }
 0xbd7   : > { %11960 = vmatpush1.bf16.msra.mxu0 %v11959_v16  ;;  %v8486_v16 = vld [vmem:[#allocation20 + $0x358] sm:$0xf] }
 0xbd8   : > { %11961 = vmatprep.subr.bf16.mxu0 %v15297_v7  ;;  %v12018_v4 = vpack.c.bf16 %v8486_v16, %v8485_v11 }
 0xbdb   : > { %11964 = vmatpush1.bf16.msk.msra.mxu0 %vm14965_vm15, %v11962_v17 }
 0xbdc   : > { %11965 = vmatprep.subr.bf16.mxu0 %v15297_v7 }
 0xbde   : > { %8390 = vmatmul.mubr.f32.vlgmr.msra.gmra.mrb[74].mxu0 %v8031_v26  ;;  %v8293_v26 = vld [vmem:[#allocation20 + $0x1f0] sm:$0xff] }
 0xbdf   : > { %11967 = vmatpush1.bf16.msra.mxu0 %v11966_v54  ;;  %9691 = vmatprep.mubr.msk.f32.mxu0 %vm8034_vm4, %v14977_v58  ;;  %v11978_v13 = vpack.c.bf16 %v8294_v30, %v8293_v26  ;;  %v12006_v58 = vpack.c.bf16 %v8478_v29, %v8477_v24  ;;  %v8734_v26 = vld [vmem:[#allocation24 + $0x60] sm:$0xff]  ;;  %v8968_v29 = vld [vmem:[#allocation27 + $0x170] sm:$0xff] }
 0xbe0   : > { %11968 = vmatprep.subr.bf16.mxu0 %v15297_v7 }
 0xbe3   : > { %11970 = vmatpush1.bf16.msra.mxu0 %v11969_v18  ;;  %v8562_v18 = vld [vmem:[#allocation21] sm:$0x1] }
 0xbe4   : > { %11971 = vmatprep.subr.bf16.mxu0 %v15297_v7 }
 0xbe7   : > { %11973 = vmatpush1.bf16.msra.mxu0 %v11972_v53  ;;  %v8731_v53 = vld [vmem:[#allocation24 + $0x48] sm:$0xff] }
 0xbe8   : > { %11974 = vmatprep.subr.bf16.mxu0 %v15297_v7  ;;  %v12025_v33 = vpack.c.bf16 %v8735_v34, %v8731_v53  ;;  %v8736_v53 = vld [vmem:[#allocation24 + $0x70] sm:$0xff] }
 0xbeb   : > { %11976 = vmatpush1.bf16.msra.mxu0 %v11975_v60  ;;  %v8730_v60 = vld [vmem:[#allocation24 + $0x40] sm:$0xff] }
 0xbec   : > { %11977 = vmatprep.subr.bf16.mxu0 %v15297_v7  ;;  %v12027_v30 = vpack.c.bf16 %v8734_v26, %v8730_v60  ;;  %v8741_v60 = vld [vmem:[#allocation24 + $0x98] sm:$0xff]  ;;  %v8938_v26 = vld [vmem:[#allocation27 + $0x80] sm:$0xff] }
 0xbef   : > { %11979 = vmatpush1.bf16.msra.mxu0 %v11978_v13  ;;  %v8739_v13 = vld [vmem:[#allocation24 + $0x88] sm:$0xff] }
 0xbf0   : > { %11980 = vmatprep.subr.bf16.mxu0 %v15297_v7 }
 0xbf3   : > { %11982 = vmatpush1.bf16.msra.mxu0 %v11981_v51  ;;  %v8738_v51 = vld [vmem:[#allocation24 + $0x80] sm:$0xff] }
 0xbf4   : > { %11983 = vmatprep.subr.bf16.mxu0 %v15297_v7 }
 0xbf7   : > { %11985 = vmatpush1.bf16.msra.mxu0 %v11984_v2  ;;  %v8955_v2 = vld [vmem:[#allocation27 + $0x108] sm:$0xff] }
 0xbf8   : > { %11986 = vmatprep.subr.bf16.mxu0 %v15297_v7  ;;  %v12070_v52 = vpack.c.bf16 %v8955_v2, %v8954_v32 }
 0xbfb   : > { %11988 = vmatpush1.bf16.msra.mxu0 %v11987_v19  ;;  %v8957_v19 = vld [vmem:[#allocation27 + $0x118] sm:$0xff] }
 0xbfc   : > { %11989 = vmatprep.subr.bf16.mxu0 %v15297_v7  ;;  %v12073_v20 = vpack.c.bf16 %v8957_v19, %v8956_v41  ;;  %v8925_v19 = vld [vmem:[#allocation27 + $0x18] sm:$0xff] }
 0xbff   : > { %11992 = vmatpush1.bf16.msk.msra.mxu0 %vm14965_vm15, %v11990_v9  ;;  %v8959_v9 = vld [vmem:[#allocation27 + $0x128] sm:$0xff] }
 0xc00   : > { %11993 = vmatprep.subr.bf16.mxu0 %v15297_v7  ;;  %v12076_v0 = vpack.c.bf16 %v8959_v9, %v8958_v27  ;;  %v8943_v27 = vld [vmem:[#allocation27 + $0xa8] sm:$0xff] }
 0xc02   : > { %8463 = vmatmul.mubr.f32.vlgmr.msra.gmra.mrb[74].mxu0 %v14975_v1  ;;  %v8642_v1 = vld [vmem:[#allocation21 + $0x1] sm:$0x1] }
 0xc03   : > { %11995 = vmatpush1.bf16.msra.mxu0 %v11994_v35  ;;  %9693 = vmatprep.mubr.msk.f32.mxu0 %vm8034_vm4, %v8206_v39  ;;  %v8479_v39 = vld [vmem:[#allocation20 + $0x320] sm:$0xff] }
 0xc04   : > { %11996 = vmatprep.subr.bf16.mxu0 %v15297_v7  ;;  %v12009_v25 = vpack.c.bf16 %v8480_v48, %v8479_v39  ;;  %v8961_v35 = vld [vmem:[#allocation27 + $0x138] sm:$0xff]  ;;  %v8970_v48 = vld [vmem:[#allocation27 + $0x180] sm:$0xff] }
 0xc05   : > { %v12079_v21 = vpack.c.bf16 %v8961_v35, %v8960_v45  ;;  %v8926_v45 = vld [vmem:[#allocation27 + $0x20] sm:$0xff]  ;;  %v8927_v35 = vld [vmem:[#allocation27 + $0x28] sm:$0xff] }
 0xc07   : > { %11998 = vmatpush1.bf16.msra.mxu0 %v11997_v50  ;;  %v8963_v50 = vld [vmem:[#allocation27 + $0x148] sm:$0xff] }
 0xc08   : > { %11999 = vmatprep.subr.bf16.mxu0 %v15297_v7  ;;  %v12082_v15 = vpack.c.bf16 %v8963_v50, %v8962_v8  ;;  %v8945_v8 = vld [vmem:[#allocation27 + $0xb8] sm:$0xff]  ;;  %v12047_v50 = vpack.c.bf16 %v8927_v35, %v8926_v45 }
 0xc0b   : > { %12001 = vmatpush1.bf16.msra.mxu0 %v12000_v14  ;;  %v8965_v14 = vld [vmem:[#allocation27 + $0x158] sm:$0xff] }
 0xc0c   : > { %12002 = vmatprep.subr.bf16.mxu0 %v15297_v7  ;;  %v12085_v38 = vpack.c.bf16 %v8965_v14, %v8964_v22  ;;  %v8928_v22 = vld [vmem:[#allocation27 + $0x30] sm:$0xff]  ;;  %v8929_v14 = vld [vmem:[#allocation27 + $0x38] sm:$0xff] }
 0xc0f   : > { %12004 = vmatpush1.bf16.msra.mxu0 %v12003_v49  ;;  %v8967_v49 = vld [vmem:[#allocation27 + $0x168] sm:$0xff] }
 0xc10   : > { %12005 = vmatprep.subr.bf16.mxu0 %v15297_v7  ;;  %v12088_v24 = vpack.c.bf16 %v8967_v49, %v8966_v31  ;;  %v8947_v31 = vld [vmem:[#allocation27 + $0xc8] sm:$0xff]  ;;  %v12051_v49 = vpack.c.bf16 %v8929_v14, %v8928_v22 }
 0xc13   : > { %12007 = vmatpush1.bf16.msra.mxu0 %v12006_v58  ;;  %v8969_v58 = vld [vmem:[#allocation27 + $0x178] sm:$0xff] }
 0xc14   : > { %12008 = vmatprep.subr.bf16.mxu0 %v15297_v7  ;;  %v12091_v39 = vpack.c.bf16 %v8969_v58, %v8968_v29  ;;  %v8930_v29 = vld [vmem:[#allocation27 + $0x40] sm:$0xff]  ;;  %v8931_v58 = vld [vmem:[#allocation27 + $0x48] sm:$0xff] }
 0xc17   : > { %12010 = vmatpush1.bf16.msra.mxu0 %v12009_v25  ;;  %v8971_v25 = vld [vmem:[#allocation27 + $0x188] sm:$0xff] }
 0xc18   : > { %12011 = vmatprep.subr.bf16.mxu0 %v15297_v7  ;;  %v12094_v46 = vpack.c.bf16 %v8971_v25, %v8970_v48  ;;  %v8949_v48 = vld [vmem:[#allocation27 + $0xd8] sm:$0xff]  ;;  %v12055_v25 = vpack.c.bf16 %v8931_v58, %v8930_v29 }
 0xc19   : > { %v9140_v58 = vld [vmem:[#allocation30 + $0x20] sm:$0xff] }
 0xc1b   : > { %12013 = vmatpush1.bf16.msra.mxu0 %v12012_v47  ;;  %v8973_v47 = vld [vmem:[#allocation27 + $0x198] sm:$0xff] }
 0xc1c   : > { %12014 = vmatprep.subr.bf16.mxu0 %v15297_v7  ;;  %v12097_v3 = vpack.c.bf16 %v8973_v47, %v8972_v42  ;;  %v8932_v42 = vld [vmem:[#allocation27 + $0x50] sm:$0xff]  ;;  %v8933_v47 = vld [vmem:[#allocation27 + $0x58] sm:$0xff] }
 0xc1f   : > { %12016 = vmatpush1.bf16.msra.mxu0 %v12015_v55  ;;  %v8975_v55 = vld [vmem:[#allocation27 + $0x1a8] sm:$0xff] }
 0xc20   : > { %12017 = vmatprep.subr.bf16.mxu0 %v15297_v7  ;;  %v12100_v11 = vpack.c.bf16 %v8975_v55, %v8974_v6  ;;  %v8950_v6 = vld [vmem:[#allocation27 + $0xe0] sm:$0xff]  ;;  %v8951_v55 = vld [vmem:[#allocation27 + $0xe8] sm:$0xff] }
 0xc23   : > { %12020 = vmatpush1.bf16.msk.msra.mxu0 %vm14965_vm15, %v12018_v4 }
 0xc24   : > { %12069 = vmatprep.subr.bf16.mxu0 %v15297_v7 }
 0xc26   : > { %8555 = vmatmul.mubr.f32.vlgmr.msra.gmra.mrb[74].mxu0 %v8205_v23  ;;  %v8722_v23 = vld [vmem:[#allocation24] sm:$0xff] }
 0xc27   : > { %v12023_v57 = vpack.c.bf16 %v8726_v61, %v8722_v23  ;;  %12071 = vmatpush1.bf16.msra.mxu0 %v12070_v52  ;;  %v8924_v52 = vld [vmem:[#allocation27 + $0x10] sm:$0xff] }
 0xc28   : > { %12072 = vmatprep.subr.bf16.mxu0 %v15297_v7  ;;  %v12043_v9 = vpack.c.bf16 %v8925_v19, %v8924_v52 }
 0xc2b   : > { %12074 = vmatpush1.bf16.msra.mxu0 %v12073_v20  ;;  %v8942_v20 = vld [vmem:[#allocation27 + $0xa0] sm:$0xff] }
 0xc2c   : > { %12075 = vmatprep.subr.bf16.mxu0 %v15297_v7 }
 0xc2f   : > { %12077 = vmatpush1.bf16.msra.mxu0 %v12076_v0  ;;  %v12045_v0 = vpack.c.bf16 %v8943_v27, %v8942_v20 }
 0xc30   : > { %12078 = vmatprep.subr.bf16.mxu0 %v15297_v7 }
 0xc33   : > { %12080 = vmatpush1.bf16.msra.mxu0 %v12079_v21  ;;  %v8944_v21 = vld [vmem:[#allocation27 + $0xb0] sm:$0xff] }
 0xc34   : > { %12081 = vmatprep.subr.bf16.mxu0 %v15297_v7 }
 0xc37   : > { %12083 = vmatpush1.bf16.msra.mxu0 %v12082_v15  ;;  %v12049_v15 = vpack.c.bf16 %v8945_v8, %v8944_v21 }
 0xc38   : > { %12084 = vmatprep.subr.bf16.mxu0 %v15297_v7 }
 0xc3b   : > { %12086 = vmatpush1.bf16.msra.mxu0 %v12085_v38  ;;  %v8946_v38 = vld [vmem:[#allocation27 + $0xc0] sm:$0xff] }
 0xc3c   : > { %12087 = vmatprep.subr.bf16.mxu0 %v15297_v7 }
 0xc3f   : > { %12089 = vmatpush1.bf16.msra.mxu0 %v12088_v24  ;;  %v12053_v24 = vpack.c.bf16 %v8947_v31, %v8946_v38  ;;  %v9137_v38 = vld [vmem:[#allocation30 + $0x8] sm:$0xff] }
 0xc40   : > { %12090 = vmatprep.subr.bf16.mxu0 %v15297_v7 }
 0xc43   : > { %12092 = vmatpush1.bf16.msra.mxu0 %v12091_v39  ;;  %v8948_v39 = vld [vmem:[#allocation27 + $0xd0] sm:$0xff] }
 0xc44   : > { %12093 = vmatprep.subr.bf16.mxu0 %v15297_v7 }
 0xc47   : > { %12095 = vmatpush1.bf16.msra.mxu0 %v12094_v46  ;;  %v12057_v46 = vpack.c.bf16 %v8949_v48, %v8948_v39  ;;  %v9141_v39 = vld [vmem:[#allocation30 + $0x28] sm:$0xff] }
 0xc48   : > { %12096 = vmatprep.subr.bf16.mxu0 %v15297_v7  ;;  %v12121_v48 = vpack.c.bf16 %v9141_v39, %v9140_v58 }
 0xc4b   : > { %12098 = vmatpush1.bf16.msra.mxu0 %v12097_v3  ;;  %v12059_v3 = vpack.c.bf16 %v8933_v47, %v8932_v42 }
 0xc4c   : > { %12099 = vmatprep.subr.bf16.mxu0 %v15297_v7 }
 0xc4f   : > { %12101 = vmatpush1.bf16.msra.mxu0 %v12100_v11  ;;  %v8976_v11 = vld [vmem:[#allocation27 + $0x1b0] sm:$0xff] }
 0xc50   : > { %12102 = vmatprep.subr.bf16.mxu0 %v15297_v7 }
 0xc8d   : > { %v8279_v59 = vpop.f32.mrb[72].mxu0 }
 0xc8e   : > { %v8281_v17 = vpop.f32.mrb[73].mxu0 }
 0xc8f   : > { %v8717_v17 = vld [vmem:[#allocation23] sm:$0x1] }
 0xcf9   : > { %v8556_v54 = vpop.f32.mrb[74].mxu0 }
 0xcfa   : > { %v8561_v5 = vmax.f32 %v8279_v59, %v8556_v54  ;;  %v8558_v40 = vpop.f32.mrb[75].mxu0  ;;  %v8724_v54 = vld [vmem:[#allocation24 + $0x10] sm:$0xff] }
 0xcfc   : > { %10029 = vmatpush3.msk.msra.mxu1 %vm8567_vm6, %v8561_v5 }
 0xcfd   : > { %10031 = vmatmul.mubr.msk.f32.vlgmr.msra.gmra.mrb[84].mxu1 %vm8563_vm7, %v8562_v18  ;;  %10033 = vmatprep.subr.mxu1 %v15298_v37  ;;  %v8733_v18 = vld [vmem:[#allocation24 + $0x58] sm:$0xff] }
 0xcfe   : > { %10034 = vmatpush3.msk.msra.mxu1 %vm8567_vm6, %v8561_v5  ;;  %10035 = vmatprep.mubr.msk.f32.mxu1 %vm13289_vm5, %v15298_v37  ;;  %v8728_v5 = vld [vmem:[#allocation24 + $0x30] sm:$0xff] }
 0xcff   : > { %12022 = vmatprep.subr.bf16.mxu1 %v12021_v36  ;;  %v8737_v36 = vld [vmem:[#allocation24 + $0x78] sm:$0xff]  ;;  %v12031_v23 = vpack.c.bf16 %v8728_v5, %v8724_v54 }
 0xd00   : > { %v12033_v61 = vpack.c.bf16 %v8737_v36, %v8733_v18  ;;  %v8952_v54 = vld [vmem:[#allocation27 + $0xf0] sm:$0xff]  ;;  %v8953_v5 = vld [vmem:[#allocation27 + $0xf8] sm:$0xff]  ;;  %v8979_v36 = vld [vmem:[#allocation27 + $0x1c8] sm:$0xff] }
 0xd01   : > { %10036 = vmatmul.mubr.msk.f32.vlgmr.msra.gmra.mrb[86].mxu1 %vm8563_vm7, %v8642_v1  ;;  %v12065_v18 = vpack.c.bf16 %v8953_v5, %v8952_v54 }
 0xd02   : > { %8832 = vmatprep.mubr.f32.mxu1 %v15298_v37  ;;  %12024 = vmatpush1.bf16.msra.mxu1 %v12023_v57  ;;  %v8732_v57 = vld [vmem:[#allocation24 + $0x50] sm:$0xff] }
 0xd03   : > { %12026 = vmatprep.subr.bf16.mxu1 %v12025_v33  ;;  %v12035_v33 = vpack.c.bf16 %v8736_v53, %v8732_v57  ;;  %v8980_v53 = vld [vmem:[#allocation27 + $0x1d0] sm:$0xff] }
 0xd06   : > { %12028 = vmatpush1.bf16.msra.mxu1 %v12027_v30  ;;  %v8939_v30 = vld [vmem:[#allocation27 + $0x88] sm:$0xff] }
 0xd07   : > { %8776 = vmatprep.subr.mxu1 %v8739_v13  ;;  %v8922_v13 = vld [vmem:[#allocation27] sm:$0xff]  ;;  %v12037_v32 = vpack.c.bf16 %v8939_v30, %v8938_v26  ;;  %v8983_v26 = vld [vmem:[#allocation27 + $0x1e8] sm:$0xff] }
 0xd08   : > { %v12039_v2 = vpack.c.bf16 %v8923_v12, %v8922_v13  ;;  %v8984_v13 = vld [vmem:[#allocation27 + $0x1f0] sm:$0xf]  ;;  %v8742_v12 = vld [vmem:[#allocation26] sm:$0xf] }
 0xd0a   : > { %8777 = vmatpush1.msra.mxu1 %v8738_v51  ;;  %v8941_v51 = vld [vmem:[#allocation27 + $0x98] sm:$0xff] }
 0xd0b   : > { %12030 = vmatprep.subr.bf16.mxu1 %v12029_v44  ;;  %v8740_v44 = vld [vmem:[#allocation24 + $0x90] sm:$0xff]  ;;  %v12041_v41 = vpack.c.bf16 %v8941_v51, %v8940_v63  ;;  %v8747_v63 = vrot.slane %v8742_v12, %v15300_v43  ;;  %v8751_v51 = vrot.slane %v8742_v12, %v15301_v28 }
 0xdd0   : > { %v8637_v16 = vpop.f32.mrb[84].mxu1 }
 0xdd1   : > { %v10032_v4 = vpop.f32.mrb[85].mxu1 }
 0xdd2   : > { %v8977_v4 = vld [vmem:[#allocation27 + $0x1b8] sm:$0xff] }
 0xdd4   : > { %v8712_v59 = vpop.f32.mrb[86].mxu1 }
 0xdd5   : > { %v8716_v10 = vmax.f32 %v8637_v16, %v8712_v59  ;;  %v10037_v56 = vpop.f32.mrb[87].mxu1  ;;  %v12061_v16 = vpack.c.bf16 %v8951_v55, %v8950_v6  ;;  %v8934_v59 = vld [vmem:[#allocation27 + $0x60] sm:$0xff] }
 0xdd7   : > { %v8718_v40 = vadd.f32 %v8717_v17, %v8716_v10  ;;  %v8935_v17 = vld [vmem:[#allocation27 + $0x68] sm:$0xff]  ;;  %v12103_v10 = vpack.c.bf16 %v8977_v4, %v8976_v11 }
 0xdd8   : > { %v12063_v56 = vpack.c.bf16 %v8935_v17, %v8934_v59  ;;  %v9143_v59 = vld [vmem:[#allocation32] sm:$0x1] }
 0xdd9   : > { %vm8719_vm8 = vcmp.ge.f32.partialorder %v8718_v40, 0.0  ;;  %v8720_v1 = vmul.f32 0.01, %v8718_v40  ;;  %12104 = vmatpush1.bf16.msra.mxu0 %v12103_v10 }
 0xdda   : > { %12105 = vmatprep.subr.bf16.mxu0 %v15297_v7 }
 0xddb   : > { %v8721_v34 = vsel %vm8719_vm8, %v8718_v40, %v8720_v1  ;;  %v8978_v40 = vld [vmem:[#allocation27 + $0x1c0] sm:$0xff]  ;;  %v8936_v1 = vld [vmem:[#allocation27 + $0x70] sm:$0xff] }
 0xddc   : > { %9698 = vmatmul.mubr.msk.f32.vlgmr.msra.gmra.mrb[88].mxu1 %vm8764_vm9, %v8721_v34 }
 0xddd   : > { %12032 = vmatpush1.bf16.msra.mxu1 %v12031_v23  ;;  %8903 = vmatprep.mubr.f32.mxu1 %v15298_v37  ;;  %v8937_v23 = vld [vmem:[#allocation27 + $0x78] sm:$0xff] }
 0xdde   : > { %12034 = vmatprep.subr.bf16.mxu1 %v12033_v61  ;;  %v12106_v61 = vpack.c.bf16 %v8979_v36, %v8978_v40  ;;  %v12067_v57 = vpack.c.bf16 %v8937_v23, %v8936_v1 }
 0xde0   : > { %12107 = vmatpush1.bf16.msra.mxu0 %v12106_v61 }
 0xde1   : > { %12036 = vmatpush1.bf16.msra.mxu1 %v12035_v33  ;;  %12108 = vmatprep.subr.bf16.mxu0 %v15297_v7 }
 0xde2   : > { %8847 = vmatprep.subr.mxu1 %v8741_v60  ;;  %v8982_v60 = vld [vmem:[#allocation27 + $0x1e0] sm:$0xff] }
 0xde3   : > { %v12112_v30 = vpack.c.bf16 %v8983_v26, %v8982_v60 }
 0xde5   : > { %8848 = vmatpush1.msra.mxu1 %v8740_v44 }
 0xde6   : > { %9699 = vmatmul.mubr.msk.f32.vlgmr.msra.gmra.mrb[90].mxu1 %vm8764_vm9, %v8721_v34  ;;  %12038 = vmatprep.subr.bf16.mxu1 %v12037_v32  ;;  %v8981_v34 = vld [vmem:[#allocation27 + $0x1d8] sm:$0xff] }
 0xde7   : > { %12040 = vmatpush3.bf16.msra.mxu1 %v12039_v2  ;;  %v12109_v33 = vpack.c.bf16 %v8981_v34, %v8980_v53 }
 0xde8   : > { %12042 = vmatprep.subr.bf16.mxu1 %v12041_v41 }
 0xde9   : > { %12110 = vmatpush1.bf16.msra.mxu0 %v12109_v33 }
 0xdea   : > { %12111 = vmatprep.subr.bf16.mxu0 %v15297_v7 }
 0xdeb   : > { %12044 = vmatpush3.bf16.msra.mxu1 %v12043_v9  ;;  %v8755_v9 = vrot.slane %v8742_v12, %v15302_v62  ;;  %v9136_v62 = vld [vmem:[#allocation30] sm:$0xff] }
 0xdec   : > { %12046 = vmatprep.subr.bf16.mxu1 %v12045_v0  ;;  %v15305_v0 = vld [vmem:[#allocation51_spill] sm:$0xff]  ;;  %v12115_v31 = vpack.c.bf16 %v9137_v38, %v9136_v62 }
 0xded   : > { %12113 = vmatpush1.bf16.msra.mxu0 %v12112_v30  ;;  %v15306_v45 = vsub.s32 3, %v15305_v0 }
 0xdee   : > { %9123 = vmatprep.subr.mxu0 %v15298_v37 }
 0xdef   : > { %12048 = vmatpush3.bf16.msra.mxu1 %v12047_v50  ;;  %v8759_v35 = vrot.slane %v8742_v12, %v15306_v45 }
 0xdf0   : > { %12050 = vmatprep.subr.bf16.mxu1 %v12049_v15 }
 0xdf1   : > { %9700 = vmatpush1.msk.msra.mxu0 %vm8037_vm14, %v8984_v13  ;;  %vm9144_vm14 = vcmask 408576  }
 0xdf3   : > { %12052 = vmatpush3.bf16.msra.mxu1 %v12051_v49  ;;  %v9138_v49 = vld [vmem:[#allocation30 + $0x10] sm:$0xff] }
 0xdf4   : > { %12054 = vmatprep.subr.bf16.mxu1 %v12053_v24  ;;  %v9139_v24 = vld [vmem:[#allocation30 + $0x18] sm:$0xff] }
 0xdf5   : > { %v12118_v29 = vpack.c.bf16 %v9139_v24, %v9138_v49 }
 0xdf7   : > { %12056 = vmatpush3.bf16.msra.mxu1 %v12055_v25  ;;  %v9142_v25 = vld [vmem:[#allocation30 + $0x30] sm:$0x3] }
 0xdf8   : > { %12058 = vmatprep.subr.bf16.mxu1 %v12057_v46 }
 0xdfb   : > { %12060 = vmatpush3.bf16.msra.mxu1 %v12059_v3  ;;  %v8985_v3 = vld [vmem:[#allocation29] sm:$0x1] }
 0xdfc   : > { %12062 = vmatprep.subr.bf16.mxu1 %v12061_v16 }
 0xdff   : > { %12064 = vmatpush3.bf16.msra.mxu1 %v12063_v56 }
 0xe00   : > { %12066 = vmatprep.subr.bf16.mxu1 %v12065_v18 }
 0xe03   : > { %12068 = vmatpush3.bf16.msra.mxu1 %v12067_v57 }
 0xe04   : > { %12114 = vmatprep.subr.bf16.mxu1 %v15297_v7 }
 0xeaf   : > { %v8834_v44 = vpop.f32.mrb[88].mxu1 }
 0xeb0   : > { %v8835_v32 = vadd.f32 %v8834_v44, %v8747_v63  ;;  %v8836_v2 = vpop.f32.mrb[89].mxu1 }
 0xeb1   : > { %v8837_v41 = vadd.f32 %v8836_v2, %v8751_v51 }
 0xeb2   : > { %v8914_v52 = vmul.f32 0.01, %v8835_v32  ;;  %vm8910_vm10 = vcmp.ge.f32.partialorder %v8835_v32, 0.0 }
 0xeb3   : > { %v8915_v19 = vmul.f32 0.01, %v8837_v41  ;;  %vm8911_vm11 = vcmp.ge.f32.partialorder %v8837_v41, 0.0 }
 0xeb4   : > { %v8918_v27 = vsel %vm8910_vm10, %v8835_v32, %v8914_v52 }
 0xeb5   : > { %v8919_v20 = vsel %vm8911_vm11, %v8837_v41, %v8915_v19 }
 0xeb6   : > { %9057 = vmatprep.mubr.f32.mxu1 %v8919_v20 }
 0xeb7   : > { %9058 = vmatmul.mubr.f32.vlgmr.msra.gmra.mrb[92].mxu1 %v8918_v27 }
 0xeb8   : > { %10052 = vmatprep.mubr.msk.f32.mxu1 %vm13289_vm5, %v15298_v37  ;;  %12116 = vmatpush3.bf16.msra.mxu1 %v12115_v31 }
 0xeb9   : > { %v8905_v43 = vpop.f32.mrb[90].mxu1  ;;  %12117 = vmatprep.subr.bf16.mxu1 %v15297_v7 }
 0xeba   : > { %v8906_v28 = vadd.f32 %v8905_v43, %v8755_v9  ;;  %v8907_v21 = vpop.f32.mrb[91].mxu1 }
 0xebb   : > { %v8908_v8 = vadd.f32 %v8907_v21, %v8759_v35 }
 0xebc   : > { %v8916_v50 = vmul.f32 0.01, %v8906_v28  ;;  %vm8912_vm2 = vcmp.ge.f32.partialorder %v8906_v28, 0.0  ;;  %12119 = vmatpush3.bf16.msra.mxu1 %v12118_v29 }
 0xebd   : > { %vm8913_vm3 = vcmp.ge.f32.partialorder %v8908_v8, 0.0  ;;  %v8917_v15 = vmul.f32 0.01, %v8908_v8  ;;  %12120 = vmatprep.subr.bf16.mxu1 %v15297_v7 }
 0xebe   : > { %v8920_v14 = vsel %vm8912_vm2, %v8906_v28, %v8916_v50 }
 0xebf   : > { %v8921_v22 = vsel %vm8913_vm3, %v8908_v8, %v8917_v15 }
 0xec0   : > { %9701 = vmatprep.mubr.msk.f32.mxu0 %vm8986_vm12, %v8921_v22  ;;  %12122 = vmatpush3.bf16.msra.mxu1 %v12121_v48 }
 0xec1   : > { %9128 = vmatmul.mubr.f32.vlgmr.msra.gmra.mrb[76].mxu0 %v8920_v14  ;;  %10050 = vmatprep.subr.mxu1 %v15298_v37 }
 0xec4   : > { %10051 = vmatpush3.msk.msra.mxu1 %vm8567_vm6, %v9142_v25 }
 0xf8a   : > { %v9999_v46 = vpop.f32.mrb[92].mxu1 }
 0xf8b   : > { %v10000_v42 = vpop.f32.mrb[93].mxu1 }
 0xf8c   : > { %v10001_v47 = vadd.f32 %v10000_v42, %v9999_v46 }
 0xf8e   : > { %v9060_v6 = vadd.f32 %v10001_v47, %v8985_v3 }
 0xf94   : > { %v9129_v55 = vpop.f32.mrb[76].mxu0 }
 0xf95   : > { %v9130_v11 = vadd.f32 %v9129_v55, %v9060_v6  ;;  %v9131_v16 = vpop.f32.mrb[77].mxu0 }
 0xf97   : > { %vm9133_vm13 = vcmp.ge.f32.partialorder %v9130_v11, 0.0  ;;  %v9134_v4 = vmul.f32 0.01, %v9130_v11 }
 0xf99   : > { %v9135_v7 = vsel %vm9133_vm13, %v9130_v11, %v9134_v4 }
 0xf9a   : > { %10053 = vmatmul.mubr.msk.f32.vlgmr.msra.gmra.mrb[94].mxu1 %vm9144_vm14, %v9135_v7 }
0x106d   : > { %v9217_v17 = vpop.f32.mrb[94].mxu1 }
0x106e   : > { %v9218_v10 = vadd.f32 %v9217_v17, %v9143_v59  ;;  %v10054_v37 = vpop.f32.mrb[95].mxu1 }
0x1070   : > { %v9222_v56 = vmul.f32 0.01, %v9218_v10  ;;  %vm9221_vm15 = vcmp.ge.f32.partialorder %v9218_v10, 0.0 }
0x1072   : > { %v9223_v54 = vsel %vm9221_vm15, %v9218_v10, %v9222_v56 }
0x1073   : > { %v9225_v5 = vsel %vm9224_vm0, %v9223_v54, -inf }
0x1074   : > { %9226 = vmax.xlane.f32.xlu0 %v9225_v5 }
0x1101   : > { %v9227_v40 = vpop.xlane.xlu0 %9226 }
0x1102   : > { %v9228_v18 = vsub.f32 %v9223_v54, %v9227_v40 }
0x1104   : > { %v9229_v36 = vmul.f32 1.442695, %v9228_v18 }
0x1106   : > { %12614 = vpow2.f32 %v9229_v36 }
0x1110   : > { %v12615_v1 = vpop.eup %12614 }
0x1111   : > { %v9231_v23 = vsel %vm9224_vm0, %v12615_v1, 0.0 }
0x1112   : > { %9232 = vadd.xlane.f32.xlu0 %v9231_v23 }
0x119f   : > { %v9233_v61 = vpop.xlane.xlu0 %9232 }
0x11a0   : > { %12616 = vlog2.f32 %v9233_v61 }
0x11aa   : > { %v12617_v57 = vpop.eup %12616 }
0x11ab   : > { %v9235_v53 = vmul.f32 0.6931472, %v12617_v57 }
0x11ad   : > { %v9236_v34 = vadd.f32 %v9235_v53, %v9227_v40 }
0x11af   : > { %v9237_v33 = vsub.f32 %v9223_v54, %v9236_v34 }
0x11b1   : > { %9238 = vst.msk [vmem:[%s866_s7] sm:$0x1] %vm9224_vm0, %v9237_v33 }
0x11b2   : > { %13165 = shalt.err (!%p13162_p12)
}
0x11b3   : > { %s13166_s14 = scalar_lea.hbm %s15110_s19, 16  ;;  %s13170_s24 = scalar_lea.hbm %s15307_s26, 32 }
0x11b4   : > { %p13167_p13 = scmp.ne.s32.totalorder %s15110_s19, %s13166_s14  ;;  %p13171_p9 = scmp.lt.u32.totalorder %s15110_s19, %s15307_s26 }
0x11b5   : > { %p13172_p4 = scmp.lt.u32.totalorder %s13170_s24, %s13166_s14  ;;  %p13174_p0 = scmp.lt.u32.totalorder %s13166_s14, %s15110_s19 }
0x11b6   : > { %p13168_p8 = pnand %p13167_p13, %p15308_p5 }
0x11b7   : > { %p13173_p3 = por %p13172_p4, %p13171_p9 }
0x11b8   : > { %p13169_p6 = pneg %p13168_p8 }
0x11b9   : > { %p13175_p2 = por %p13174_p0, %p13173_p3 }
0x11bb   : > { %p13176_p7 = pnand %p13175_p2, %p13169_p6 }
0x11bd   : > { %13179 = shalt.err (!%p13176_p7)
}
0x11be   : > { %12446 = dma.vmem_to_hbm [thread:$0]  (%p15308_p5), %s15112_s30, 16, %s15110_s19, %s9240_s0  }
0x11bf PF: > { %s15309_s16 = sld [smem:[#allocation45_spill]]  ;;  %s15310_s23 = sld [smem:[#allocation48_spill]] }
0x11c0   : > { %p15311_p10 = scmp.ne.s32.totalorder %s15267_s20, 0 }
0x11c5   : > { %s9264_s9 = sand.u32 1, %s15309_s16   ;;  %p15312_p1 = scmp.ge.s32.totalorder %s15310_s23, 2 }
0x11c6   : > { %s9265_s8 = scalar_lea.sflag [#allocation5], %s9264_s9 }
0x11c7   : > { %p12508_p11 = pnand %p15312_p1, %p15311_p10 }
0x11c9   : > { %13237 = dma.done.wait (!%p12508_p11), %s9265_s8, 16  }
0x11ca   : > { %13239 = vsyncadd (!%p12508_p11), %s9265_s8, 4294967280  ;;  %s15313_s0 = sld [smem:[#allocation46_spill]]  ;;  %s15314_s30 = sld [smem:[#allocation47_spill]] }
0x11cb   : > { %p41_p12 = scmp.ge.s32.totalorder %s13833_s21, 4   ;;  %s15315_s20 = smov %s13845_s25 }
0x11cd   :  { %43 = sbr.rel (!%p41_p12) target bundleno = 29 (0x1d), region = 237 }
0x11d4   :  { %9269 = vsyncpa [#allocation4], 1 }
0x11d5   :  { %9271 = vsyncpa [#allocation4 + $0x1], 1 }
0x11d6   :  { %9272 = vsyncpa [#allocation7], 1 }
0x11d7   :  { %9273 = vsyncpa [#allocation10], 1 }
0x11d8   :  { %9274 = vsyncpa [#allocation13], 1 }
0x11d9   :  { %9275 = vsyncpa [#allocation16], 1 }
0x11da   :  { %9276 = vsyncpa [#allocation19], 1 }
0x11db   :  { %9277 = vsyncpa [#allocation22], 1 }
0x11dc   :  { %9278 = vsyncpa [#allocation25], 1 }
0x11dd   :  { %9279 = vsyncpa [#allocation28], 1 }
0x11de   :  { %9280 = vsyncpa [#allocation31], 1 }
0x11df   :  { %9281 = vsyncpa [#allocation5], 1 }
0x11e0   :  { %9283 = vsyncpa [#allocation5 + $0x1], 1 }

</bundles_post_ra>
